<compile_context>
chip_gen: v7x
topology: tpu7x:2x2x1
jax: 0.10.0
libtpu: 0.0.40
codegen_flags: <defaults>
</compile_context>

<pallas_src>
import functools
import math

import jax
import jax.numpy as jnp
from jax import lax
from jax.experimental import pallas as pl
from jax.experimental.pallas import tpu as pltpu

EPS = 1e-5
LANE = 128
SUBLANE = 8
# Explicit scoped-VMEM budget; tiles below are sized well under this so the same
# choice is safe on v5e (128 MiB), v6e (128 MiB) and v7x (64 MiB physical).
VMEM_LIMIT = 32 * 1024 * 1024


def _round_up(x, m):
    return ((x + m - 1) // m) * m


def bn_scale_shift(bn):
    gamma, beta, mean, var = bn
    scale = gamma / jnp.sqrt(var + EPS)
    shift = beta - mean * scale
    return scale, shift


# ---------------------------------------------------------------------------
# Kernel A: tiled fused  y = act((x @ w + b) * scale + shift)
#   grid = (M/tm, N/tn, K/tk); bf16 operands, f32 VMEM accumulator.
# Used for: LSTM input projection (both directions at once), attention
# in/out projections (bn4 folded into the in-projection), fc1 (+BN+ReLU), fc2.
# ---------------------------------------------------------------------------
def _linear_kernel(x_ref, w_ref, b_ref, s_ref, t_ref, o_ref, acc_ref, *, relu):
    @pl.when(pl.program_id(2) == 0)
    def _():
        acc_ref[...] = jnp.zeros_like(acc_ref)

    acc_ref[...] += jnp.dot(x_ref[...], w_ref[...],
                            preferred_element_type=jnp.float32)

    @pl.when(pl.program_id(2) == pl.num_programs(2) - 1)
    def _():
        y = (acc_ref[...] + b_ref[...]) * s_ref[...] + t_ref[...]
        if relu:
            y = jnp.maximum(y, 0.0)
        o_ref[...] = y.astype(o_ref.dtype)


def linear_affine(x, w, b, scale=None, shift=None, relu=False,
                  out_dtype=jnp.float32, tm=256, tn=256, tk=256):
    M, K = x.shape
    K2, N = w.shape
    assert K == K2
    if scale is None:
        scale = jnp.ones((N,), jnp.float32)
    if shift is None:
        shift = jnp.zeros((N,), jnp.float32)

    # Clamp tiles to the (padded) problem size; keep MXU/lane alignment.
    tm = tm if M >= tm else _round_up(M, SUBLANE)
    tn = tn if N >= tn else _round_up(N, LANE)
    tk = tk if K >= tk else _round_up(K, LANE)
    Mp, Np, Kp = _round_up(M, tm), _round_up(N, tn), _round_up(K, tk)

    xp = jnp.pad(x.astype(jnp.bfloat16), ((0, Mp - M), (0, Kp - K)))
    wp = jnp.pad(w.astype(jnp.bfloat16), ((0, Kp - K), (0, Np - N)))

    def pad_row(v):
        return jnp.pad(v.astype(jnp.float32).reshape(1, N),
                       ((0, 0), (0, Np - N)))

    grid = (Mp // tm, Np // tn, Kp // tk)
    out = pl.pallas_call(
        functools.partial(_linear_kernel, relu=relu),
        out_shape=jax.ShapeDtypeStruct((Mp, Np), out_dtype),
        grid_spec=pltpu.PrefetchScalarGridSpec(
            num_scalar_prefetch=0,
            grid=grid,
            in_specs=[
                pl.BlockSpec((tm, tk), lambda i, j, k: (i, k)),
                pl.BlockSpec((tk, tn), lambda i, j, k: (k, j)),
                pl.BlockSpec((1, tn), lambda i, j, k: (0, j)),
                pl.BlockSpec((1, tn), lambda i, j, k: (0, j)),
                pl.BlockSpec((1, tn), lambda i, j, k: (0, j)),
            ],
            out_specs=pl.BlockSpec((tm, tn), lambda i, j, k: (i, j)),
            scratch_shapes=[pltpu.VMEM((tm, tn), jnp.float32)],
        ),
        compiler_params=pltpu.CompilerParams(
            dimension_semantics=("parallel", "parallel", "arbitrary"),
            vmem_limit_bytes=VMEM_LIMIT),
        cost_estimate=pl.CostEstimate(
            flops=2 * Mp * Np * Kp,
            transcendentals=0,
            bytes_accessed=2 * (Mp * Kp + Kp * Np) + 4 * Mp * Np),
    )(xp, wp, pad_row(b), pad_row(scale), pad_row(shift))
    return out[:M, :N]


# ---------------------------------------------------------------------------
# Kernel B: fused Conv1d(valid) + eval-BatchNorm + ReLU, no HBM im2col.
#   One grid step per batch element; K shifted matmuls on the in-VMEM window.
# ---------------------------------------------------------------------------
def _conv_bn_relu_kernel(x_ref, w_ref, b_ref, s_ref, t_ref, o_ref, *, K):
    x = x_ref[0]                                  # (T, Cin)
    To, Cout = o_ref.shape[1], o_ref.shape[2]
    acc = jnp.zeros((To, Cout), jnp.float32)
    for j in range(K):                            # K shifted taps
        xj = x[j:j + To, :]
        wj = w_ref[j]                             # (Cin, Cout)
        if x.shape[1] == 1:                       # conv1: outer product on the VPU
            acc = acc + xj.astype(jnp.float32) * wj.astype(jnp.float32)
        else:
            acc = acc + jnp.dot(xj, wj, preferred_element_type=jnp.float32)
    y = (acc + b_ref[...]) * s_ref[...] + t_ref[...]
    o_ref[0] = jnp.maximum(y, 0.0).astype(o_ref.dtype)


def conv1d_bn_relu(x_btc, w, b, bn, out_dtype=jnp.bfloat16):
    B, T, Cin_x = x_btc.shape
    Cout, Cin_w, K = w.shape
    To = T - K + 1
    Cout_p = _round_up(Cout, LANE)                # lane-dense output channels

    wk = jnp.transpose(w, (2, 1, 0)).astype(jnp.float32)          # (K, Cin_w, Cout)
    wk = jnp.pad(wk, ((0, 0), (0, Cin_x - Cin_w), (0, Cout_p - Cout)))
    scale, shift = bn_scale_shift(bn)

    def pad_row(v):
        return jnp.pad(v.astype(jnp.float32).reshape(1, Cout),
                       ((0, 0), (0, Cout_p - Cout)))

    return pl.pallas_call(
        functools.partial(_conv_bn_relu_kernel, K=K),
        grid=(B,),
        in_specs=[
            pl.BlockSpec((1, T, Cin_x), lambda bI: (bI, 0, 0)),
            pl.BlockSpec((K, Cin_x, Cout_p), lambda bI: (0, 0, 0)),
            pl.BlockSpec((1, Cout_p), lambda bI: (0, 0)),
            pl.BlockSpec((1, Cout_p), lambda bI: (0, 0)),
            pl.BlockSpec((1, Cout_p), lambda bI: (0, 0)),
        ],
        out_specs=pl.BlockSpec((1, To, Cout_p), lambda bI: (bI, 0, 0)),
        out_shape=jax.ShapeDtypeStruct((B, To, Cout_p), out_dtype),
        compiler_params=pltpu.CompilerParams(
            dimension_semantics=("parallel",),
            vmem_limit_bytes=VMEM_LIMIT),
        cost_estimate=pl.CostEstimate(
            flops=2 * B * To * Cin_x * Cout_p * K,
            transcendentals=0,
            bytes_accessed=2 * B * T * Cin_x + 2 * K * Cin_x * Cout_p
            + 2 * B * To * Cout_p),
    )(x_btc.astype(jnp.bfloat16), wk.astype(jnp.bfloat16),
      pad_row(b), pad_row(scale), pad_row(shift))


# ---------------------------------------------------------------------------
# Kernel C: bidirectional LSTM recurrence, BOTH directions in one call.
#   xg_{f,b}: (T, B, 4*Hp)  precomputed x @ W_ih^T + b_ih + b_hh  (gate-padded)
#   whh_{f,b}: (Hp, 4*Hp)   gate-padded W_hh^T (bf16)
#   out_{f,b}: (T, B, Hp)   lane-dense per-step stores (Hp multiple of 128).
#   Backward direction indexes time as T-1-t (no host-side reversal).
#   PyTorch gate order i, f, g, o; Hp-aligned gate slices.
# ---------------------------------------------------------------------------
def _bilstm_kernel(xg_f_ref, xg_b_ref, whh_f_ref, whh_b_ref,
                   out_f_ref, out_b_ref, h_ref, c_ref):
    T = xg_f_ref.shape[0]
    Hp = out_f_ref.shape[2]
    h_ref[...] = jnp.zeros_like(h_ref)
    c_ref[...] = jnp.zeros_like(c_ref)

    dirs = ((0, xg_f_ref, whh_f_ref, out_f_ref, False),
            (1, xg_b_ref, whh_b_ref, out_b_ref, True))

    def step(t, carry):
        for d, xg_ref, whh_ref, out_ref, rev in dirs:
            t_eff = T - 1 - t if rev else t
            g = xg_ref[t_eff] + jnp.dot(
                h_ref[d].astype(jnp.bfloat16), whh_ref[...],
                preferred_element_type=jnp.float32)
            i = jax.nn.sigmoid(g[:, 0 * Hp:1 * Hp])
            f = jax.nn.sigmoid(g[:, 1 * Hp:2 * Hp])
            gg = jnp.tanh(g[:, 2 * Hp:3 * Hp])
            o = jax.nn.sigmoid(g[:, 3 * Hp:4 * Hp])
            c = f * c_ref[d] + i * gg
            h = o * jnp.tanh(c)
            c_ref[d] = c
            h_ref[d] = h
            out_ref[t_eff] = h
        return carry

    lax.fori_loop(0, T, step, 0, unroll=True if T <= 32 else 4)


def bilstm(x_btc, lstm_params):
    B, T, C = x_btc.shape
    H = lstm_params['fwd'][1].shape[1]            # W_hh: (4H, H)
    Hp = _round_up(H, LANE)

    def pad_gate_mat(wm):                         # (4H, X) -> (4Hp, X), per-gate pad
        X = wm.shape[1]
        w4 = wm.reshape(4, H, X)
        return jnp.pad(w4, ((0, 0), (0, Hp - H), (0, 0))).reshape(4 * Hp, X)

    def pad_gate_vec(v):                          # (4H,) -> (4Hp,)
        return jnp.pad(v.reshape(4, H), ((0, 0), (0, Hp - H))).reshape(4 * Hp)

    w_cols, b_cols, whh_t = [], [], []
    for d in ('fwd', 'bwd'):
        w_ih, w_hh, b_ih, b_hh = lstm_params[d]
        w_cols.append(pad_gate_mat(w_ih).T)                        # (C, 4Hp)
        b_cols.append(pad_gate_vec(b_ih + b_hh))                   # (4Hp,)
        whh = jnp.pad(pad_gate_mat(w_hh), ((0, 0), (0, Hp - H)))   # (4Hp, Hp)
        whh_t.append(whh.T.astype(jnp.bfloat16))                   # (Hp, 4Hp)

    # One fused, tiled input projection for BOTH directions.
    xg = linear_affine(x_btc.reshape(B * T, C),
                       jnp.concatenate(w_cols, axis=1),
                       jnp.concatenate(b_cols))                    # (B*T, 8Hp) f32
    xg = xg.reshape(B, T, 2, 4 * Hp).transpose(2, 1, 0, 3)         # (2, T, B, 4Hp)

    out_sds = jax.ShapeDtypeStruct((T, B, Hp), jnp.float32)
    out_f, out_b = pl.pallas_call(
        _bilstm_kernel,
        out_shape=(out_sds, out_sds),
        scratch_shapes=[pltpu.VMEM((2, B, Hp), jnp.float32),
                        pltpu.VMEM((2, B, Hp), jnp.float32)],
        compiler_params=pltpu.CompilerParams(vmem_limit_bytes=VMEM_LIMIT),
    )(xg[0], xg[1], whh_t[0], whh_t[1])

    h_f = out_f.transpose(1, 0, 2)[:, :, :H]                       # (B, T, H)
    h_b = out_b.transpose(1, 0, 2)[:, :, :H]
    return jnp.concatenate([h_f, h_b], axis=-1)                    # (B, T, 2H)


# ---------------------------------------------------------------------------
# Kernel D: scaled-dot-product attention core; many (time*head) slices per grid
# step (heads batched on the sublane axis), softmax over the key axis.
# ---------------------------------------------------------------------------
def _attn_kernel(q_ref, k_ref, v_ref, o_ref, *, scale):
    s = jnp.einsum('gld,gmd->glm', q_ref[...], k_ref[...],
                   preferred_element_type=jnp.float32) * scale
    s = s - s.max(axis=-1, keepdims=True)
    p = jnp.exp(s)
    p = p * pl.reciprocal(p.sum(axis=-1, keepdims=True), approx=True)
    o = jnp.einsum('glm,gmd->gld', p.astype(v_ref.dtype), v_ref[...],
                   preferred_element_type=jnp.float32)
    o_ref[...] = o.astype(o_ref.dtype)


def attention_core(qh, kh, vh, head_dim, heads_per_step=64):
    NH, L, D = qh.shape
    G = min(NH, heads_per_step)
    NHp = _round_up(NH, G)
    if NHp != NH:
        pad = ((0, NHp - NH), (0, 0), (0, 0))
        qh, kh, vh = jnp.pad(qh, pad), jnp.pad(kh, pad), jnp.pad(vh, pad)
    spec = pl.BlockSpec((G, L, D), lambda n: (n, 0, 0))
    out = pl.pallas_call(
        functools.partial(_attn_kernel, scale=1.0 / math.sqrt(head_dim)),
        grid=(NHp // G,),
        in_specs=[spec, spec, spec],
        out_specs=spec,
        out_shape=jax.ShapeDtypeStruct((NHp, L, D), jnp.bfloat16),
        compiler_params=pltpu.CompilerParams(
            dimension_semantics=("parallel",),
            vmem_limit_bytes=VMEM_LIMIT),
    )(qh, kh, vh)
    return out[:NH]


def multihead_attention(x, bn4, in_w, in_b, out_w, out_b, num_heads):
    # The PyTorch module feeds batch-first (B, T, E) data to a seq-first
    # nn.MultiheadAttention, so L == batch and N == time (reproduced as-is).
    L, N, E = x.shape
    hd = E // num_heads

    # Fold bn4 (per-feature affine) into the QKV in-projection: zero extra cost.
    scale, shift = bn_scale_shift(bn4)
    w_folded = (in_w * scale[None, :]).T          # (E, 3E)
    b_folded = in_w @ shift + in_b                # (3E,)

    qkv = linear_affine(x.reshape(L * N, E), w_folded, b_folded,
                        out_dtype=jnp.bfloat16)   # (L*N, 3E)
    q, k, v = jnp.split(qkv, 3, axis=-1)

    def to_heads(t):
        return t.reshape(L, N * num_heads, hd).transpose(1, 0, 2)  # (N*nh, L, hd)

    # TODO(synk): QKV/out projections stay as separate tiled matmul calls; a full
    # single-kernel attention fusion is possible but not done here.
    attn = attention_core(to_heads(q), to_heads(k), to_heads(v), hd)
    attn = attn.transpose(1, 0, 2).reshape(L * N, E)
    out = linear_affine(attn, out_w.T, out_b)
    return out.reshape(L, N, E)


# ---------------------------------------------------------------------------
# Full forward
# ---------------------------------------------------------------------------
def carnet_forward(params, x_ncl):
    # x_ncl: (B, 1, L) -- same layout the PyTorch Conv1d receives.
    x = x_ncl.transpose(0, 2, 1).astype(jnp.float32)            # (B, L, 1)
    x = conv1d_bn_relu(x, params['conv1_w'], params['conv1_b'], params['bn1'])
    x = conv1d_bn_relu(x, params['conv2_w'], params['conv2_b'], params['bn2'])
    x = conv1d_bn_relu(x, params['conv3_w'], params['conv3_b'], params['bn3'])
    # TODO(synk): dropout layers are identity (eval mode); no RNG masking applied.
    # channels-last x already equals PyTorch's x.permute(0, 2, 1): (B, T, 256)
    x = bilstm(x, params['lstm'])                                # (B, T, 2H)
    # bn4 is folded into the attention in-projection inside multihead_attention.
    x = multihead_attention(x, params['bn4'],
                            params['attn_in_w'], params['attn_in_b'],
                            params['attn_out_w'], params['attn_out_b'],
                            num_heads=4)                         # (B, T, 2H)
    B, T, E = x.shape
    x = x.reshape(B, T * E)                                      # flatten(start_dim=1)
    scale, shift = bn_scale_shift(params['bn5'])
    x = linear_affine(x, params['fc1_w'].T, params['fc1_b'], scale, shift, relu=True)
    x = linear_affine(x, params['fc2_w'].T, params['fc2_b'])
    return x


# ---------------------------------------------------------------------------
# Deterministic parameter initialization (shapes from CarNet.__init__).
# BatchNorms use eval-mode running stats (initialized non-trivially).
# ---------------------------------------------------------------------------
def init_params(key, input_len, output_shape, hidden_size):
    H = hidden_size
    E = 2 * H
    T_out = input_len - 6
    ks = iter(jax.random.split(key, 64))

    def w(shape, s=0.1):
        return jax.random.normal(next(ks), shape, jnp.float32) * s

    def bn(c):
        gamma = jax.random.uniform(next(ks), (c,), jnp.float32, 0.5, 1.5)
        beta = w((c,))
        mean = w((c,))
        var = jax.random.uniform(next(ks), (c,), jnp.float32, 0.5, 1.5)
        return (gamma, beta, mean, var)

    p = {
        'conv1_w': w((64, 1, 3)),    'conv1_b': w((64,)),   'bn1': bn(64),
        'conv2_w': w((128, 64, 3)),  'conv2_b': w((128,)),  'bn2': bn(128),
        'conv3_w': w((256, 128, 3)), 'conv3_b': w((256,)),  'bn3': bn(256),
        'lstm': {
            'fwd': (w((4 * H, 256)), w((4 * H, H)), w((4 * H,)), w((4 * H,))),
            'bwd': (w((4 * H, 256)), w((4 * H, H)), w((4 * H,)), w((4 * H,))),
        },
        'bn4': bn(E),
        'attn_in_w': w((3 * E, E)), 'attn_in_b': w((3 * E,)),
        'attn_out_w': w((E, E)),    'attn_out_b': w((E,)),
        'fc1_w': w((128, T_out * E)), 'fc1_b': w((128,)), 'bn5': bn(128),
        'fc2_w': w((output_shape, 128)), 'fc2_b': w((output_shape,)),
    }
    return p


if __name__ == "__main__":
    B, L, OUT, H = 4, 16, 8, 16   # small shapes: batch=4, seq len=16, hidden=16
    key = jax.random.PRNGKey(0)
    pkey, xkey = jax.random.split(key)
    params = init_params(pkey, L, OUT, H)
    x = jax.random.normal(xkey, (B, 1, L), jnp.float32)

    y = jax.jit(carnet_forward)(params, x)
    y = jax.block_until_ready(y)

    assert y.shape == (B, OUT), y.shape
    assert bool(jnp.all(jnp.isfinite(y)))
    print("KERNEL_OK")
</pallas_src>

<mosaic_0001>
module attributes {stable_mosaic.version = 11 : i64} {
  func.func @_conv_bn_relu_kernel(%arg0: i32, %arg1: memref<1x16x1xbf16, #tpu.memory_space<vmem>>, %arg2: memref<3x1x128xbf16, #tpu.memory_space<vmem>>, %arg3: memref<1x128xf32, #tpu.memory_space<vmem>>, %arg4: memref<1x128xf32, #tpu.memory_space<vmem>>, %arg5: memref<1x128xf32, #tpu.memory_space<vmem>>, %arg6: memref<1x14x128xbf16, #tpu.memory_space<vmem>>) attributes {dimension_semantics = [#tpu.dimension_semantics<parallel>], iteration_bounds = array<i64: 4>, scalar_prefetch = 0 : i64, scratch_operands = 0 : i64, tpu.core_type = #tpu.core_type<tc>, window_params = [{transform_indices = @transform_0, window_bounds = array<i64: 1, 16, 1>}, {pipeline_mode = #tpu.pipeline_mode<synchronous>, transform_indices = @transform_1, window_bounds = array<i64: 3, 1, 128>}, {pipeline_mode = #tpu.pipeline_mode<synchronous>, transform_indices = @transform_2, window_bounds = array<i64: 1, 128>}, {pipeline_mode = #tpu.pipeline_mode<synchronous>, transform_indices = @transform_3, window_bounds = array<i64: 1, 128>}, {pipeline_mode = #tpu.pipeline_mode<synchronous>, transform_indices = @transform_4, window_bounds = array<i64: 1, 128>}, {transform_indices = @transform_5, window_bounds = array<i64: 1, 14, 128>}]} {
    %c0 = arith.constant 0 : index
    %c0_0 = arith.constant 0 : index
    %c0_1 = arith.constant 0 : index
    %0 = vector.load %arg1[%c0, %c0_0, %c0_1] : memref<1x16x1xbf16, #tpu.memory_space<vmem>>, vector<1x16x1xbf16>
    %1 = vector.shape_cast %0 : vector<1x16x1xbf16> to vector<16x1xbf16>
    %cst = arith.constant 0.000000e+00 : f32
    %2 = vector.broadcast %cst : f32 to vector<14x128xf32>
    %3 = vector.extract_strided_slice %1 {offsets = [0, 0], sizes = [14, 1], strides = [1, 1]} : vector<16x1xbf16> to vector<14x1xbf16>
    %c0_2 = arith.constant 0 : index
    %c0_3 = arith.constant 0 : index
    %c0_4 = arith.constant 0 : index
    %4 = vector.load %arg2[%c0_2, %c0_3, %c0_4] : memref<3x1x128xbf16, #tpu.memory_space<vmem>>, vector<1x1x128xbf16>
    %5 = vector.shape_cast %4 : vector<1x1x128xbf16> to vector<1x128xbf16>
    %6 = arith.extf %3 : vector<14x1xbf16> to vector<14x1xf32>
    %7 = arith.extf %5 : vector<1x128xbf16> to vector<1x128xf32>
    %8 = vector.broadcast %6 : vector<14x1xf32> to vector<14x128xf32>
    %9 = vector.broadcast %7 : vector<1x128xf32> to vector<14x128xf32>
    %10 = arith.mulf %8, %9 : vector<14x128xf32>
    %11 = arith.addf %2, %10 : vector<14x128xf32>
    %12 = vector.extract_strided_slice %1 {offsets = [1, 0], sizes = [14, 1], strides = [1, 1]} : vector<16x1xbf16> to vector<14x1xbf16>
    %c1 = arith.constant 1 : index
    %c0_5 = arith.constant 0 : index
    %c0_6 = arith.constant 0 : index
    %13 = vector.load %arg2[%c1, %c0_5, %c0_6] : memref<3x1x128xbf16, #tpu.memory_space<vmem>>, vector<1x1x128xbf16>
    %14 = vector.shape_cast %13 : vector<1x1x128xbf16> to vector<1x128xbf16>
    %15 = arith.extf %12 : vector<14x1xbf16> to vector<14x1xf32>
    %16 = arith.extf %14 : vector<1x128xbf16> to vector<1x128xf32>
    %17 = vector.broadcast %15 : vector<14x1xf32> to vector<14x128xf32>
    %18 = vector.broadcast %16 : vector<1x128xf32> to vector<14x128xf32>
    %19 = arith.mulf %17, %18 : vector<14x128xf32>
    %20 = arith.addf %11, %19 : vector<14x128xf32>
    %21 = vector.extract_strided_slice %1 {offsets = [2, 0], sizes = [14, 1], strides = [1, 1]} : vector<16x1xbf16> to vector<14x1xbf16>
    %c2 = arith.constant 2 : index
    %c0_7 = arith.constant 0 : index
    %c0_8 = arith.constant 0 : index
    %22 = vector.load %arg2[%c2, %c0_7, %c0_8] : memref<3x1x128xbf16, #tpu.memory_space<vmem>>, vector<1x1x128xbf16>
    %23 = vector.shape_cast %22 : vector<1x1x128xbf16> to vector<1x128xbf16>
    %24 = arith.extf %21 : vector<14x1xbf16> to vector<14x1xf32>
    %25 = arith.extf %23 : vector<1x128xbf16> to vector<1x128xf32>
    %26 = vector.broadcast %24 : vector<14x1xf32> to vector<14x128xf32>
    %27 = vector.broadcast %25 : vector<1x128xf32> to vector<14x128xf32>
    %28 = arith.mulf %26, %27 : vector<14x128xf32>
    %29 = arith.addf %20, %28 : vector<14x128xf32>
    %c0_9 = arith.constant 0 : index
    %c0_10 = arith.constant 0 : index
    %30 = vector.load %arg3[%c0_9, %c0_10] : memref<1x128xf32, #tpu.memory_space<vmem>>, vector<1x128xf32>
    %31 = vector.broadcast %30 : vector<1x128xf32> to vector<14x128xf32>
    %32 = arith.addf %29, %31 : vector<14x128xf32>
    %c0_11 = arith.constant 0 : index
    %c0_12 = arith.constant 0 : index
    %33 = vector.load %arg4[%c0_11, %c0_12] : memref<1x128xf32, #tpu.memory_space<vmem>>, vector<1x128xf32>
    %34 = vector.broadcast %33 : vector<1x128xf32> to vector<14x128xf32>
    %35 = arith.mulf %32, %34 : vector<14x128xf32>
    %c0_13 = arith.constant 0 : index
    %c0_14 = arith.constant 0 : index
    %36 = vector.load %arg5[%c0_13, %c0_14] : memref<1x128xf32, #tpu.memory_space<vmem>>, vector<1x128xf32>
    %37 = vector.broadcast %36 : vector<1x128xf32> to vector<14x128xf32>
    %38 = arith.addf %35, %37 : vector<14x128xf32>
    %cst_15 = arith.constant 0.000000e+00 : f32
    %39 = vector.broadcast %cst_15 : f32 to vector<14x128xf32>
    %40 = arith.maximumf %38, %39 : vector<14x128xf32>
    %41 = arith.truncf %40 : vector<14x128xf32> to vector<14x128xbf16>
    %c0_16 = arith.constant 0 : index
    %c0_17 = arith.constant 0 : index
    %c0_18 = arith.constant 0 : index
    %42 = vector.load %arg6[%c0_16, %c0_17, %c0_18] : memref<1x14x128xbf16, #tpu.memory_space<vmem>>, vector<1x14x128xbf16>
    %43 = vector.shape_cast %42 : vector<1x14x128xbf16> to vector<14x128xbf16>
    %44 = vector.shape_cast %41 : vector<14x128xbf16> to vector<1x14x128xbf16>
    tpu.vector_store %arg6[%c0_16, %c0_17, %c0_18], %44 {strides = array<i32>} : memref<1x14x128xbf16, #tpu.memory_space<vmem>>, vector<1x14x128xbf16>,
    return
  }
  func.func @transform_0(%arg0: i32) -> (i32, i32, i32) {
    %c0_i32 = arith.constant 0 : i32
    %c0_i32_0 = arith.constant 0 : i32
    %c0_i32_1 = arith.constant 0 : i32
    return %arg0, %c0_i32, %c0_i32_0 : i32, i32, i32
  }
  func.func @transform_1(%arg0: i32) -> (i32, i32, i32) {
    %c0_i32 = arith.constant 0 : i32
    %c0_i32_0 = arith.constant 0 : i32
    %c0_i32_1 = arith.constant 0 : i32
    %c0_i32_2 = arith.constant 0 : i32
    return %c0_i32, %c0_i32_0, %c0_i32_1 : i32, i32, i32
  }
  func.func @transform_2(%arg0: i32) -> (i32, i32) {
    %c0_i32 = arith.constant 0 : i32
    %c0_i32_0 = arith.constant 0 : i32
    %c0_i32_1 = arith.constant 0 : i32
    return %c0_i32, %c0_i32_0 : i32, i32
  }
  func.func @transform_3(%arg0: i32) -> (i32, i32) {
    %c0_i32 = arith.constant 0 : i32
    %c0_i32_0 = arith.constant 0 : i32
    %c0_i32_1 = arith.constant 0 : i32
    return %c0_i32, %c0_i32_0 : i32, i32
  }
  func.func @transform_4(%arg0: i32) -> (i32, i32) {
    %c0_i32 = arith.constant 0 : i32
    %c0_i32_0 = arith.constant 0 : i32
    %c0_i32_1 = arith.constant 0 : i32
    return %c0_i32, %c0_i32_0 : i32, i32
  }
  func.func @transform_5(%arg0: i32) -> (i32, i32, i32) {
    %c0_i32 = arith.constant 0 : i32
    %c0_i32_0 = arith.constant 0 : i32
    %c0_i32_1 = arith.constant 0 : i32
    return %arg0, %c0_i32, %c0_i32_0 : i32, i32, i32
  }
}

module attributes {stable_mosaic.version = 11 : i64} {
  func.func @_conv_bn_relu_kernel(%arg0: i32, %arg1: memref<1x14x128xbf16, #tpu.memory_space<vmem>>, %arg2: memref<3x128x128xbf16, #tpu.memory_space<vmem>>, %arg3: memref<1x128xf32, #tpu.memory_space<vmem>>, %arg4: memref<1x128xf32, #tpu.memory_space<vmem>>, %arg5: memref<1x128xf32, #tpu.memory_space<vmem>>, %arg6: memref<1x12x128xbf16, #tpu.memory_space<vmem>>) attributes {dimension_semantics = [#tpu.dimension_semantics<parallel>], iteration_bounds = array<i64: 4>, scalar_prefetch = 0 : i64, scratch_operands = 0 : i64, tpu.core_type = #tpu.core_type<tc>, window_params = [{transform_indices = @transform_0, window_bounds = array<i64: 1, 14, 128>}, {pipeline_mode = #tpu.pipeline_mode<synchronous>, transform_indices = @transform_1, window_bounds = array<i64: 3, 128, 128>}, {pipeline_mode = #tpu.pipeline_mode<synchronous>, transform_indices = @transform_2, window_bounds = array<i64: 1, 128>}, {pipeline_mode = #tpu.pipeline_mode<synchronous>, transform_indices = @transform_3, window_bounds = array<i64: 1, 128>}, {pipeline_mode = #tpu.pipeline_mode<synchronous>, transform_indices = @transform_4, window_bounds = array<i64: 1, 128>}, {transform_indices = @transform_5, window_bounds = array<i64: 1, 12, 128>}]} {
    %c0 = arith.constant 0 : index
    %c0_0 = arith.constant 0 : index
    %c0_1 = arith.constant 0 : index
    %0 = vector.load %arg1[%c0, %c0_0, %c0_1] : memref<1x14x128xbf16, #tpu.memory_space<vmem>>, vector<1x14x128xbf16>
    %1 = vector.shape_cast %0 : vector<1x14x128xbf16> to vector<14x128xbf16>
    %cst = arith.constant 0.000000e+00 : f32
    %2 = vector.broadcast %cst : f32 to vector<12x128xf32>
    %3 = vector.extract_strided_slice %1 {offsets = [0, 0], sizes = [12, 128], strides = [1, 1]} : vector<14x128xbf16> to vector<12x128xbf16>
    %c0_2 = arith.constant 0 : index
    %c0_3 = arith.constant 0 : index
    %c0_4 = arith.constant 0 : index
    %4 = vector.load %arg2[%c0_2, %c0_3, %c0_4] : memref<3x128x128xbf16, #tpu.memory_space<vmem>>, vector<1x128x128xbf16>
    %5 = vector.shape_cast %4 : vector<1x128x128xbf16> to vector<128x128xbf16>
    %cst_5 = arith.constant dense<0.000000e+00> : vector<12x128xf32>
    %6 = tpu.matmul %3, %5, %cst_5 {dimension_numbers = #tpu.dot_dimension_numbers<[1], [0], [0], [1], [0, 0, 1, 1], [], []>} : vector<12x128xbf16>, vector<128x128xbf16>, vector<12x128xf32> -> vector<12x128xf32>
    %7 = arith.addf %2, %6 : vector<12x128xf32>
    %8 = vector.extract_strided_slice %1 {offsets = [1, 0], sizes = [12, 128], strides = [1, 1]} : vector<14x128xbf16> to vector<12x128xbf16>
    %c1 = arith.constant 1 : index
    %c0_6 = arith.constant 0 : index
    %c0_7 = arith.constant 0 : index
    %9 = vector.load %arg2[%c1, %c0_6, %c0_7] : memref<3x128x128xbf16, #tpu.memory_space<vmem>>, vector<1x128x128xbf16>
    %10 = vector.shape_cast %9 : vector<1x128x128xbf16> to vector<128x128xbf16>
    %cst_8 = arith.constant dense<0.000000e+00> : vector<12x128xf32>
    %11 = tpu.matmul %8, %10, %cst_8 {dimension_numbers = #tpu.dot_dimension_numbers<[1], [0], [0], [1], [0, 0, 1, 1], [], []>} : vector<12x128xbf16>, vector<128x128xbf16>, vector<12x128xf32> -> vector<12x128xf32>
    %12 = arith.addf %7, %11 : vector<12x128xf32>
    %13 = vector.extract_strided_slice %1 {offsets = [2, 0], sizes = [12, 128], strides = [1, 1]} : vector<14x128xbf16> to vector<12x128xbf16>
    %c2 = arith.constant 2 : index
    %c0_9 = arith.constant 0 : index
    %c0_10 = arith.constant 0 : index
    %14 = vector.load %arg2[%c2, %c0_9, %c0_10] : memref<3x128x128xbf16, #tpu.memory_space<vmem>>, vector<1x128x128xbf16>
    %15 = vector.shape_cast %14 : vector<1x128x128xbf16> to vector<128x128xbf16>
    %cst_11 = arith.constant dense<0.000000e+00> : vector<12x128xf32>
    %16 = tpu.matmul %13, %15, %cst_11 {dimension_numbers = #tpu.dot_dimension_numbers<[1], [0], [0], [1], [0, 0, 1, 1], [], []>} : vector<12x128xbf16>, vector<128x128xbf16>, vector<12x128xf32> -> vector<12x128xf32>
    %17 = arith.addf %12, %16 : vector<12x128xf32>
    %c0_12 = arith.constant 0 : index
    %c0_13 = arith.constant 0 : index
    %18 = vector.load %arg3[%c0_12, %c0_13] : memref<1x128xf32, #tpu.memory_space<vmem>>, vector<1x128xf32>
    %19 = vector.broadcast %18 : vector<1x128xf32> to vector<12x128xf32>
    %20 = arith.addf %17, %19 : vector<12x128xf32>
    %c0_14 = arith.constant 0 : index
    %c0_15 = arith.constant 0 : index
    %21 = vector.load %arg4[%c0_14, %c0_15] : memref<1x128xf32, #tpu.memory_space<vmem>>, vector<1x128xf32>
    %22 = vector.broadcast %21 : vector<1x128xf32> to vector<12x128xf32>
    %23 = arith.mulf %20, %22 : vector<12x128xf32>
    %c0_16 = arith.constant 0 : index
    %c0_17 = arith.constant 0 : index
    %24 = vector.load %arg5[%c0_16, %c0_17] : memref<1x128xf32, #tpu.memory_space<vmem>>, vector<1x128xf32>
    %25 = vector.broadcast %24 : vector<1x128xf32> to vector<12x128xf32>
    %26 = arith.addf %23, %25 : vector<12x128xf32>
    %cst_18 = arith.constant 0.000000e+00 : f32
    %27 = vector.broadcast %cst_18 : f32 to vector<12x128xf32>
    %28 = arith.maximumf %26, %27 : vector<12x128xf32>
    %29 = arith.truncf %28 : vector<12x128xf32> to vector<12x128xbf16>
    %c0_19 = arith.constant 0 : index
    %c0_20 = arith.constant 0 : index
    %c0_21 = arith.constant 0 : index
    %30 = vector.load %arg6[%c0_19, %c0_20, %c0_21] : memref<1x12x128xbf16, #tpu.memory_space<vmem>>, vector<1x12x128xbf16>
    %31 = vector.shape_cast %30 : vector<1x12x128xbf16> to vector<12x128xbf16>
    %32 = vector.shape_cast %29 : vector<12x128xbf16> to vector<1x12x128xbf16>
    tpu.vector_store %arg6[%c0_19, %c0_20, %c0_21], %32 {strides = array<i32>} : memref<1x12x128xbf16, #tpu.memory_space<vmem>>, vector<1x12x128xbf16>,
    return
  }
  func.func @transform_0(%arg0: i32) -> (i32, i32, i32) {
    %c0_i32 = arith.constant 0 : i32
    %c0_i32_0 = arith.constant 0 : i32
    %c0_i32_1 = arith.constant 0 : i32
    return %arg0, %c0_i32, %c0_i32_0 : i32, i32, i32
  }
  func.func @transform_1(%arg0: i32) -> (i32, i32, i32) {
    %c0_i32 = arith.constant 0 : i32
    %c0_i32_0 = arith.constant 0 : i32
    %c0_i32_1 = arith.constant 0 : i32
    %c0_i32_2 = arith.constant 0 : i32
    return %c0_i32, %c0_i32_0, %c0_i32_1 : i32, i32, i32
  }
  func.func @transform_2(%arg0: i32) -> (i32, i32) {
    %c0_i32 = arith.constant 0 : i32
    %c0_i32_0 = arith.constant 0 : i32
    %c0_i32_1 = arith.constant 0 : i32
    return %c0_i32, %c0_i32_0 : i32, i32
  }
  func.func @transform_3(%arg0: i32) -> (i32, i32) {
    %c0_i32 = arith.constant 0 : i32
    %c0_i32_0 = arith.constant 0 : i32
    %c0_i32_1 = arith.constant 0 : i32
    return %c0_i32, %c0_i32_0 : i32, i32
  }
  func.func @transform_4(%arg0: i32) -> (i32, i32) {
    %c0_i32 = arith.constant 0 : i32
    %c0_i32_0 = arith.constant 0 : i32
    %c0_i32_1 = arith.constant 0 : i32
    return %c0_i32, %c0_i32_0 : i32, i32
  }
  func.func @transform_5(%arg0: i32) -> (i32, i32, i32) {
    %c0_i32 = arith.constant 0 : i32
    %c0_i32_0 = arith.constant 0 : i32
    %c0_i32_1 = arith.constant 0 : i32
    return %arg0, %c0_i32, %c0_i32_0 : i32, i32, i32
  }
}

module attributes {stable_mosaic.version = 11 : i64} {
  func.func @_conv_bn_relu_kernel(%arg0: i32, %arg1: memref<1x12x128xbf16, #tpu.memory_space<vmem>>, %arg2: memref<3x128x256xbf16, #tpu.memory_space<vmem>>, %arg3: memref<1x256xf32, #tpu.memory_space<vmem>>, %arg4: memref<1x256xf32, #tpu.memory_space<vmem>>, %arg5: memref<1x256xf32, #tpu.memory_space<vmem>>, %arg6: memref<1x10x256xbf16, #tpu.memory_space<vmem>>) attributes {dimension_semantics = [#tpu.dimension_semantics<parallel>], iteration_bounds = array<i64: 4>, scalar_prefetch = 0 : i64, scratch_operands = 0 : i64, tpu.core_type = #tpu.core_type<tc>, window_params = [{transform_indices = @transform_0, window_bounds = array<i64: 1, 12, 128>}, {pipeline_mode = #tpu.pipeline_mode<synchronous>, transform_indices = @transform_1, window_bounds = array<i64: 3, 128, 256>}, {pipeline_mode = #tpu.pipeline_mode<synchronous>, transform_indices = @transform_2, window_bounds = array<i64: 1, 256>}, {pipeline_mode = #tpu.pipeline_mode<synchronous>, transform_indices = @transform_3, window_bounds = array<i64: 1, 256>}, {pipeline_mode = #tpu.pipeline_mode<synchronous>, transform_indices = @transform_4, window_bounds = array<i64: 1, 256>}, {transform_indices = @transform_5, window_bounds = array<i64: 1, 10, 256>}]} {
    %c0 = arith.constant 0 : index
    %c0_0 = arith.constant 0 : index
    %c0_1 = arith.constant 0 : index
    %0 = vector.load %arg1[%c0, %c0_0, %c0_1] : memref<1x12x128xbf16, #tpu.memory_space<vmem>>, vector<1x12x128xbf16>
    %1 = vector.shape_cast %0 : vector<1x12x128xbf16> to vector<12x128xbf16>
    %cst = arith.constant 0.000000e+00 : f32
    %2 = vector.broadcast %cst : f32 to vector<10x256xf32>
    %3 = vector.extract_strided_slice %1 {offsets = [0, 0], sizes = [10, 128], strides = [1, 1]} : vector<12x128xbf16> to vector<10x128xbf16>
    %c0_2 = arith.constant 0 : index
    %c0_3 = arith.constant 0 : index
    %c0_4 = arith.constant 0 : index
    %4 = vector.load %arg2[%c0_2, %c0_3, %c0_4] : memref<3x128x256xbf16, #tpu.memory_space<vmem>>, vector<1x128x256xbf16>
    %5 = vector.shape_cast %4 : vector<1x128x256xbf16> to vector<128x256xbf16>
    %cst_5 = arith.constant dense<0.000000e+00> : vector<10x256xf32>
    %6 = tpu.matmul %3, %5, %cst_5 {dimension_numbers = #tpu.dot_dimension_numbers<[1], [0], [0], [1], [0, 0, 1, 1], [], []>} : vector<10x128xbf16>, vector<128x256xbf16>, vector<10x256xf32> -> vector<10x256xf32>
    %7 = arith.addf %2, %6 : vector<10x256xf32>
    %8 = vector.extract_strided_slice %1 {offsets = [1, 0], sizes = [10, 128], strides = [1, 1]} : vector<12x128xbf16> to vector<10x128xbf16>
    %c1 = arith.constant 1 : index
    %c0_6 = arith.constant 0 : index
    %c0_7 = arith.constant 0 : index
    %9 = vector.load %arg2[%c1, %c0_6, %c0_7] : memref<3x128x256xbf16, #tpu.memory_space<vmem>>, vector<1x128x256xbf16>
    %10 = vector.shape_cast %9 : vector<1x128x256xbf16> to vector<128x256xbf16>
    %cst_8 = arith.constant dense<0.000000e+00> : vector<10x256xf32>
    %11 = tpu.matmul %8, %10, %cst_8 {dimension_numbers = #tpu.dot_dimension_numbers<[1], [0], [0], [1], [0, 0, 1, 1], [], []>} : vector<10x128xbf16>, vector<128x256xbf16>, vector<10x256xf32> -> vector<10x256xf32>
    %12 = arith.addf %7, %11 : vector<10x256xf32>
    %13 = vector.extract_strided_slice %1 {offsets = [2, 0], sizes = [10, 128], strides = [1, 1]} : vector<12x128xbf16> to vector<10x128xbf16>
    %c2 = arith.constant 2 : index
    %c0_9 = arith.constant 0 : index
    %c0_10 = arith.constant 0 : index
    %14 = vector.load %arg2[%c2, %c0_9, %c0_10] : memref<3x128x256xbf16, #tpu.memory_space<vmem>>, vector<1x128x256xbf16>
    %15 = vector.shape_cast %14 : vector<1x128x256xbf16> to vector<128x256xbf16>
    %cst_11 = arith.constant dense<0.000000e+00> : vector<10x256xf32>
    %16 = tpu.matmul %13, %15, %cst_11 {dimension_numbers = #tpu.dot_dimension_numbers<[1], [0], [0], [1], [0, 0, 1, 1], [], []>} : vector<10x128xbf16>, vector<128x256xbf16>, vector<10x256xf32> -> vector<10x256xf32>
    %17 = arith.addf %12, %16 : vector<10x256xf32>
    %c0_12 = arith.constant 0 : index
    %c0_13 = arith.constant 0 : index
    %18 = vector.load %arg3[%c0_12, %c0_13] : memref<1x256xf32, #tpu.memory_space<vmem>>, vector<1x256xf32>
    %19 = vector.broadcast %18 : vector<1x256xf32> to vector<10x256xf32>
    %20 = arith.addf %17, %19 : vector<10x256xf32>
    %c0_14 = arith.constant 0 : index
    %c0_15 = arith.constant 0 : index
    %21 = vector.load %arg4[%c0_14, %c0_15] : memref<1x256xf32, #tpu.memory_space<vmem>>, vector<1x256xf32>
    %22 = vector.broadcast %21 : vector<1x256xf32> to vector<10x256xf32>
    %23 = arith.mulf %20, %22 : vector<10x256xf32>
    %c0_16 = arith.constant 0 : index
    %c0_17 = arith.constant 0 : index
    %24 = vector.load %arg5[%c0_16, %c0_17] : memref<1x256xf32, #tpu.memory_space<vmem>>, vector<1x256xf32>
    %25 = vector.broadcast %24 : vector<1x256xf32> to vector<10x256xf32>
    %26 = arith.addf %23, %25 : vector<10x256xf32>
    %cst_18 = arith.constant 0.000000e+00 : f32
    %27 = vector.broadcast %cst_18 : f32 to vector<10x256xf32>
    %28 = arith.maximumf %26, %27 : vector<10x256xf32>
    %29 = arith.truncf %28 : vector<10x256xf32> to vector<10x256xbf16>
    %c0_19 = arith.constant 0 : index
    %c0_20 = arith.constant 0 : index
    %c0_21 = arith.constant 0 : index
    %30 = vector.load %arg6[%c0_19, %c0_20, %c0_21] : memref<1x10x256xbf16, #tpu.memory_space<vmem>>, vector<1x10x256xbf16>
    %31 = vector.shape_cast %30 : vector<1x10x256xbf16> to vector<10x256xbf16>
    %32 = vector.shape_cast %29 : vector<10x256xbf16> to vector<1x10x256xbf16>
    tpu.vector_store %arg6[%c0_19, %c0_20, %c0_21], %32 {strides = array<i32>} : memref<1x10x256xbf16, #tpu.memory_space<vmem>>, vector<1x10x256xbf16>,
    return
  }
  func.func @transform_0(%arg0: i32) -> (i32, i32, i32) {
    %c0_i32 = arith.constant 0 : i32
    %c0_i32_0 = arith.constant 0 : i32
    %c0_i32_1 = arith.constant 0 : i32
    return %arg0, %c0_i32, %c0_i32_0 : i32, i32, i32
  }
  func.func @transform_1(%arg0: i32) -> (i32, i32, i32) {
    %c0_i32 = arith.constant 0 : i32
    %c0_i32_0 = arith.constant 0 : i32
    %c0_i32_1 = arith.constant 0 : i32
    %c0_i32_2 = arith.constant 0 : i32
    return %c0_i32, %c0_i32_0, %c0_i32_1 : i32, i32, i32
  }
  func.func @transform_2(%arg0: i32) -> (i32, i32) {
    %c0_i32 = arith.constant 0 : i32
    %c0_i32_0 = arith.constant 0 : i32
    %c0_i32_1 = arith.constant 0 : i32
    return %c0_i32, %c0_i32_0 : i32, i32
  }
  func.func @transform_3(%arg0: i32) -> (i32, i32) {
    %c0_i32 = arith.constant 0 : i32
    %c0_i32_0 = arith.constant 0 : i32
    %c0_i32_1 = arith.constant 0 : i32
    return %c0_i32, %c0_i32_0 : i32, i32
  }
  func.func @transform_4(%arg0: i32) -> (i32, i32) {
    %c0_i32 = arith.constant 0 : i32
    %c0_i32_0 = arith.constant 0 : i32
    %c0_i32_1 = arith.constant 0 : i32
    return %c0_i32, %c0_i32_0 : i32, i32
  }
  func.func @transform_5(%arg0: i32) -> (i32, i32, i32) {
    %c0_i32 = arith.constant 0 : i32
    %c0_i32_0 = arith.constant 0 : i32
    %c0_i32_1 = arith.constant 0 : i32
    return %arg0, %c0_i32, %c0_i32_0 : i32, i32, i32
  }
}

module attributes {stable_mosaic.version = 11 : i64} {
  func.func @_linear_kernel(%arg0: i32, %arg1: i32, %arg2: i32, %arg3: memref<40x256xbf16, #tpu.memory_space<vmem>>, %arg4: memref<256x256xbf16, #tpu.memory_space<vmem>>, %arg5: memref<1x256xf32, #tpu.memory_space<vmem>>, %arg6: memref<1x256xf32, #tpu.memory_space<vmem>>, %arg7: memref<1x256xf32, #tpu.memory_space<vmem>>, %arg8: memref<40x256xf32, #tpu.memory_space<vmem>>, %arg9: memref<40x256xf32, #tpu.memory_space<vmem>>) attributes {dimension_semantics = [#tpu.dimension_semantics<parallel>, #tpu.dimension_semantics<parallel>, #tpu.dimension_semantics<arbitrary>], iteration_bounds = array<i64: 1, 4, 1>, scalar_prefetch = 0 : i64, scratch_operands = 1 : i64, tpu.core_type = #tpu.core_type<tc>, window_params = [{transform_indices = @transform_0, window_bounds = array<i64: 40, 256>}, {transform_indices = @transform_1, window_bounds = array<i64: 256, 256>}, {transform_indices = @transform_2, window_bounds = array<i64: 1, 256>}, {transform_indices = @transform_3, window_bounds = array<i64: 1, 256>}, {transform_indices = @transform_4, window_bounds = array<i64: 1, 256>}, {transform_indices = @transform_5, window_bounds = array<i64: 40, 256>}]} {
    %c0_i32 = arith.constant 0 : i32
    %0 = arith.cmpi eq, %arg2, %c0_i32 : i32
    %1 = arith.extui %0 : i1 to i32
    %c0_i32_0 = arith.constant 0 : i32
    %2 = arith.cmpi ne, %1, %c0_i32_0 : i32
    scf.if %2 {
      %cst_10 = arith.constant 0.000000e+00 : f32
      %12 = vector.broadcast %cst_10 : f32 to vector<40x256xf32>
      %c0_11 = arith.constant 0 : index
      %c0_12 = arith.constant 0 : index
      %13 = vector.load %arg9[%c0_11, %c0_12] : memref<40x256xf32, #tpu.memory_space<vmem>>, vector<40x256xf32>
      tpu.vector_store %arg9[%c0_11, %c0_12], %12 {strides = array<i32>} : memref<40x256xf32, #tpu.memory_space<vmem>>, vector<40x256xf32>,
    } else {
    }
    %c0 = arith.constant 0 : index
    %c0_1 = arith.constant 0 : index
    %3 = vector.load %arg9[%c0, %c0_1] : memref<40x256xf32, #tpu.memory_space<vmem>>, vector<40x256xf32>
    %c0_2 = arith.constant 0 : index
    %c0_3 = arith.constant 0 : index
    %4 = vector.load %arg3[%c0_2, %c0_3] : memref<40x256xbf16, #tpu.memory_space<vmem>>, vector<40x256xbf16>
    %c0_4 = arith.constant 0 : index
    %c0_5 = arith.constant 0 : index
    %5 = vector.load %arg4[%c0_4, %c0_5] : memref<256x256xbf16, #tpu.memory_space<vmem>>, vector<256x256xbf16>
    %cst = arith.constant dense<0.000000e+00> : vector<40x256xf32>
    %6 = tpu.matmul %4, %5, %cst {dimension_numbers = #tpu.dot_dimension_numbers<[1], [0], [0], [1], [0, 0, 1, 1], [], []>} : vector<40x256xbf16>, vector<256x256xbf16>, vector<40x256xf32> -> vector<40x256xf32>
    %7 = arith.addf %3, %6 : vector<40x256xf32>
    %c0_6 = arith.constant 0 : index
    %c0_7 = arith.constant 0 : index
    %8 = vector.load %arg9[%c0_6, %c0_7] : memref<40x256xf32, #tpu.memory_space<vmem>>, vector<40x256xf32>
    tpu.vector_store %arg9[%c0_6, %c0_7], %7 {strides = array<i32>} : memref<40x256xf32, #tpu.memory_space<vmem>>, vector<40x256xf32>,
    %c0_i32_8 = arith.constant 0 : i32
    %9 = arith.cmpi eq, %arg2, %c0_i32_8 : i32
    %10 = arith.extui %9 : i1 to i32
    %c0_i32_9 = arith.constant 0 : i32
    %11 = arith.cmpi ne, %10, %c0_i32_9 : i32
    scf.if %11 {
      %c0_10 = arith.constant 0 : index
      %c0_11 = arith.constant 0 : index
      %12 = vector.load %arg9[%c0_10, %c0_11] : memref<40x256xf32, #tpu.memory_space<vmem>>, vector<40x256xf32>
      %c0_12 = arith.constant 0 : index
      %c0_13 = arith.constant 0 : index
      %13 = vector.load %arg5[%c0_12, %c0_13] : memref<1x256xf32, #tpu.memory_space<vmem>>, vector<1x256xf32>
      %14 = vector.broadcast %13 : vector<1x256xf32> to vector<40x256xf32>
      %15 = arith.addf %12, %14 : vector<40x256xf32>
      %c0_14 = arith.constant 0 : index
      %c0_15 = arith.constant 0 : index
      %16 = vector.load %arg6[%c0_14, %c0_15] : memref<1x256xf32, #tpu.memory_space<vmem>>, vector<1x256xf32>
      %17 = vector.broadcast %16 : vector<1x256xf32> to vector<40x256xf32>
      %18 = arith.mulf %15, %17 : vector<40x256xf32>
      %c0_16 = arith.constant 0 : index
      %c0_17 = arith.constant 0 : index
      %19 = vector.load %arg7[%c0_16, %c0_17] : memref<1x256xf32, #tpu.memory_space<vmem>>, vector<1x256xf32>
      %20 = vector.broadcast %19 : vector<1x256xf32> to vector<40x256xf32>
      %21 = arith.addf %18, %20 : vector<40x256xf32>
      %c0_18 = arith.constant 0 : index
      %c0_19 = arith.constant 0 : index
      %22 = vector.load %arg8[%c0_18, %c0_19] : memref<40x256xf32, #tpu.memory_space<vmem>>, vector<40x256xf32>
      tpu.vector_store %arg8[%c0_18, %c0_19], %21 {strides = array<i32>} : memref<40x256xf32, #tpu.memory_space<vmem>>, vector<40x256xf32>,
    } else {
    }
    return
  }
  func.func @transform_0(%arg0: i32, %arg1: i32, %arg2: i32) -> (i32, i32) {
    %c0_i32 = arith.constant 0 : i32
    return %arg0, %arg2 : i32, i32
  }
  func.func @transform_1(%arg0: i32, %arg1: i32, %arg2: i32) -> (i32, i32) {
    %c0_i32 = arith.constant 0 : i32
    return %arg2, %arg1 : i32, i32
  }
  func.func @transform_2(%arg0: i32, %arg1: i32, %arg2: i32) -> (i32, i32) {
    %c0_i32 = arith.constant 0 : i32
    %c0_i32_0 = arith.constant 0 : i32
    return %c0_i32, %arg1 : i32, i32
  }
  func.func @transform_3(%arg0: i32, %arg1: i32, %arg2: i32) -> (i32, i32) {
    %c0_i32 = arith.constant 0 : i32
    %c0_i32_0 = arith.constant 0 : i32
    return %c0_i32, %arg1 : i32, i32
  }
  func.func @transform_4(%arg0: i32, %arg1: i32, %arg2: i32) -> (i32, i32) {
    %c0_i32 = arith.constant 0 : i32
    %c0_i32_0 = arith.constant 0 : i32
    return %c0_i32, %arg1 : i32, i32
  }
  func.func @transform_5(%arg0: i32, %arg1: i32, %arg2: i32) -> (i32, i32) {
    %c0_i32 = arith.constant 0 : i32
    return %arg0, %arg1 : i32, i32
  }
}

module attributes {stable_mosaic.version = 11 : i64} {
  func.func @_bilstm_kernel(%arg0: memref<10x4x512xf32, #tpu.memory_space<vmem>>, %arg1: memref<10x4x512xf32, #tpu.memory_space<vmem>>, %arg2: memref<128x512xbf16, #tpu.memory_space<vmem>>, %arg3: memref<128x512xbf16, #tpu.memory_space<vmem>>, %arg4: memref<10x4x128xf32, #tpu.memory_space<vmem>>, %arg5: memref<10x4x128xf32, #tpu.memory_space<vmem>>, %arg6: memref<2x4x128xf32, #tpu.memory_space<vmem>>, %arg7: memref<2x4x128xf32, #tpu.memory_space<vmem>>) attributes {dimension_semantics = [], scalar_prefetch = 0 : i64, scratch_operands = 2 : i64, tpu.core_type = #tpu.core_type<tc>} {
    %cst = arith.constant 0.000000e+00 : f32
    %0 = vector.broadcast %cst : f32 to vector<2x4x128xf32>
    %c0 = arith.constant 0 : index
    %c0_0 = arith.constant 0 : index
    %c0_1 = arith.constant 0 : index
    %1 = vector.load %arg6[%c0, %c0_0, %c0_1] : memref<2x4x128xf32, #tpu.memory_space<vmem>>, vector<2x4x128xf32>
    tpu.vector_store %arg6[%c0, %c0_0, %c0_1], %0 {strides = array<i32>} : memref<2x4x128xf32, #tpu.memory_space<vmem>>, vector<2x4x128xf32>,
    %cst_2 = arith.constant 0.000000e+00 : f32
    %2 = vector.broadcast %cst_2 : f32 to vector<2x4x128xf32>
    %c0_3 = arith.constant 0 : index
    %c0_4 = arith.constant 0 : index
    %c0_5 = arith.constant 0 : index
    %3 = vector.load %arg7[%c0_3, %c0_4, %c0_5] : memref<2x4x128xf32, #tpu.memory_space<vmem>>, vector<2x4x128xf32>
    tpu.vector_store %arg7[%c0_3, %c0_4, %c0_5], %2 {strides = array<i32>} : memref<2x4x128xf32, #tpu.memory_space<vmem>>, vector<2x4x128xf32>,
    %c0_i32 = arith.constant 0 : i32
    %4 = arith.index_cast %c0_i32 : i32 to index
    %c0_6 = arith.constant 0 : index
    %c0_7 = arith.constant 0 : index
    %5 = vector.load %arg0[%4, %c0_6, %c0_7] : memref<10x4x512xf32, #tpu.memory_space<vmem>>, vector<1x4x512xf32>
    %6 = vector.shape_cast %5 : vector<1x4x512xf32> to vector<4x512xf32>
    %c0_8 = arith.constant 0 : index
    %c0_9 = arith.constant 0 : index
    %c0_10 = arith.constant 0 : index
    %7 = vector.load %arg6[%c0_8, %c0_9, %c0_10] : memref<2x4x128xf32, #tpu.memory_space<vmem>>, vector<1x4x128xf32>
    %8 = vector.shape_cast %7 : vector<1x4x128xf32> to vector<4x128xf32>
    %9 = arith.truncf %8 : vector<4x128xf32> to vector<4x128xbf16>
    %c0_11 = arith.constant 0 : index
    %c0_12 = arith.constant 0 : index
    %10 = vector.load %arg2[%c0_11, %c0_12] : memref<128x512xbf16, #tpu.memory_space<vmem>>, vector<128x512xbf16>
    %cst_13 = arith.constant dense<0.000000e+00> : vector<4x512xf32>
    %11 = tpu.matmul %9, %10, %cst_13 {dimension_numbers = #tpu.dot_dimension_numbers<[1], [0], [0], [1], [0, 0, 1, 1], [], []>} : vector<4x128xbf16>, vector<128x512xbf16>, vector<4x512xf32> -> vector<4x512xf32>
    %12 = arith.addf %6, %11 : vector<4x512xf32>
    %13 = vector.extract_strided_slice %12 {offsets = [0, 0], sizes = [4, 128], strides = [1, 1]} : vector<4x512xf32> to vector<4x128xf32>
    %14 = arith.negf %13 : vector<4x128xf32>
    %15 = math.exp %14 : vector<4x128xf32>
    %cst_14 = arith.constant 1.000000e+00 : f32
    %16 = vector.broadcast %cst_14 : f32 to vector<4x128xf32>
    %17 = arith.addf %16, %15 : vector<4x128xf32>
    %18 = arith.divf %16, %17 : vector<4x128xf32>
    %19 = vector.extract_strided_slice %12 {offsets = [0, 128], sizes = [4, 128], strides = [1, 1]} : vector<4x512xf32> to vector<4x128xf32>
    %20 = arith.negf %19 : vector<4x128xf32>
    %21 = math.exp %20 : vector<4x128xf32>
    %cst_15 = arith.constant 1.000000e+00 : f32
    %22 = vector.broadcast %cst_15 : f32 to vector<4x128xf32>
    %23 = arith.addf %22, %21 : vector<4x128xf32>
    %24 = arith.divf %22, %23 : vector<4x128xf32>
    %25 = vector.extract_strided_slice %12 {offsets = [0, 256], sizes = [4, 128], strides = [1, 1]} : vector<4x512xf32> to vector<4x128xf32>
    %26 = math.tanh %25 : vector<4x128xf32>
    %27 = vector.extract_strided_slice %12 {offsets = [0, 384], sizes = [4, 128], strides = [1, 1]} : vector<4x512xf32> to vector<4x128xf32>
    %28 = arith.negf %27 : vector<4x128xf32>
    %29 = math.exp %28 : vector<4x128xf32>
    %cst_16 = arith.constant 1.000000e+00 : f32
    %30 = vector.broadcast %cst_16 : f32 to vector<4x128xf32>
    %31 = arith.addf %30, %29 : vector<4x128xf32>
    %32 = arith.divf %30, %31 : vector<4x128xf32>
    %c0_17 = arith.constant 0 : index
    %c0_18 = arith.constant 0 : index
    %c0_19 = arith.constant 0 : index
    %33 = vector.load %arg7[%c0_17, %c0_18, %c0_19] : memref<2x4x128xf32, #tpu.memory_space<vmem>>, vector<1x4x128xf32>
    %34 = vector.shape_cast %33 : vector<1x4x128xf32> to vector<4x128xf32>
    %35 = arith.mulf %24, %34 : vector<4x128xf32>
    %36 = arith.mulf %18, %26 : vector<4x128xf32>
    %37 = arith.addf %35, %36 : vector<4x128xf32>
    %38 = math.tanh %37 : vector<4x128xf32>
    %39 = arith.mulf %32, %38 : vector<4x128xf32>
    %c0_20 = arith.constant 0 : index
    %c0_21 = arith.constant 0 : index
    %c0_22 = arith.constant 0 : index
    %40 = vector.load %arg7[%c0_20, %c0_21, %c0_22] : memref<2x4x128xf32, #tpu.memory_space<vmem>>, vector<1x4x128xf32>
    %41 = vector.shape_cast %40 : vector<1x4x128xf32> to vector<4x128xf32>
    %42 = vector.shape_cast %37 : vector<4x128xf32> to vector<1x4x128xf32>
    tpu.vector_store %arg7[%c0_20, %c0_21, %c0_22], %42 {strides = array<i32>} : memref<2x4x128xf32, #tpu.memory_space<vmem>>, vector<1x4x128xf32>,
    %c0_23 = arith.constant 0 : index
    %c0_24 = arith.constant 0 : index
    %c0_25 = arith.constant 0 : index
    %43 = vector.load %arg6[%c0_23, %c0_24, %c0_25] : memref<2x4x128xf32, #tpu.memory_space<vmem>>, vector<1x4x128xf32>
    %44 = vector.shape_cast %43 : vector<1x4x128xf32> to vector<4x128xf32>
    %45 = vector.shape_cast %39 : vector<4x128xf32> to vector<1x4x128xf32>
    tpu.vector_store %arg6[%c0_23, %c0_24, %c0_25], %45 {strides = array<i32>} : memref<2x4x128xf32, #tpu.memory_space<vmem>>, vector<1x4x128xf32>,
    %46 = arith.index_cast %c0_i32 : i32 to index
    %c0_26 = arith.constant 0 : index
    %c0_27 = arith.constant 0 : index
    %47 = vector.load %arg4[%46, %c0_26, %c0_27] : memref<10x4x128xf32, #tpu.memory_space<vmem>>, vector<1x4x128xf32>
    %48 = vector.shape_cast %47 : vector<1x4x128xf32> to vector<4x128xf32>
    %49 = vector.shape_cast %39 : vector<4x128xf32> to vector<1x4x128xf32>
    tpu.vector_store %arg4[%46, %c0_26, %c0_27], %49 {strides = array<i32>} : memref<10x4x128xf32, #tpu.memory_space<vmem>>, vector<1x4x128xf32>,
    %c9_i32 = arith.constant 9 : i32
    %50 = arith.subi %c9_i32, %c0_i32 : i32
    %51 = arith.index_cast %50 : i32 to index
    %c0_28 = arith.constant 0 : index
    %c0_29 = arith.constant 0 : index
    %52 = vector.load %arg1[%51, %c0_28, %c0_29] : memref<10x4x512xf32, #tpu.memory_space<vmem>>, vector<1x4x512xf32>
    %53 = vector.shape_cast %52 : vector<1x4x512xf32> to vector<4x512xf32>
    %c1 = arith.constant 1 : index
    %c0_30 = arith.constant 0 : index
    %c0_31 = arith.constant 0 : index
    %54 = vector.load %arg6[%c1, %c0_30, %c0_31] : memref<2x4x128xf32, #tpu.memory_space<vmem>>, vector<1x4x128xf32>
    %55 = vector.shape_cast %54 : vector<1x4x128xf32> to vector<4x128xf32>
    %56 = arith.truncf %55 : vector<4x128xf32> to vector<4x128xbf16>
    %c0_32 = arith.constant 0 : index
    %c0_33 = arith.constant 0 : index
    %57 = vector.load %arg3[%c0_32, %c0_33] : memref<128x512xbf16, #tpu.memory_space<vmem>>, vector<128x512xbf16>
    %cst_34 = arith.constant dense<0.000000e+00> : vector<4x512xf32>
    %58 = tpu.matmul %56, %57, %cst_34 {dimension_numbers = #tpu.dot_dimension_numbers<[1], [0], [0], [1], [0, 0, 1, 1], [], []>} : vector<4x128xbf16>, vector<128x512xbf16>, vector<4x512xf32> -> vector<4x512xf32>
    %59 = arith.addf %53, %58 : vector<4x512xf32>
    %60 = vector.extract_strided_slice %59 {offsets = [0, 0], sizes = [4, 128], strides = [1, 1]} : vector<4x512xf32> to vector<4x128xf32>
    %61 = arith.negf %60 : vector<4x128xf32>
    %62 = math.exp %61 : vector<4x128xf32>
    %cst_35 = arith.constant 1.000000e+00 : f32
    %63 = vector.broadcast %cst_35 : f32 to vector<4x128xf32>
    %64 = arith.addf %63, %62 : vector<4x128xf32>
    %65 = arith.divf %63, %64 : vector<4x128xf32>
    %66 = vector.extract_strided_slice %59 {offsets = [0, 128], sizes = [4, 128], strides = [1, 1]} : vector<4x512xf32> to vector<4x128xf32>
    %67 = arith.negf %66 : vector<4x128xf32>
    %68 = math.exp %67 : vector<4x128xf32>
    %cst_36 = arith.constant 1.000000e+00 : f32
    %69 = vector.broadcast %cst_36 : f32 to vector<4x128xf32>
    %70 = arith.addf %69, %68 : vector<4x128xf32>
    %71 = arith.divf %69, %70 : vector<4x128xf32>
    %72 = vector.extract_strided_slice %59 {offsets = [0, 256], sizes = [4, 128], strides = [1, 1]} : vector<4x512xf32> to vector<4x128xf32>
    %73 = math.tanh %72 : vector<4x128xf32>
    %74 = vector.extract_strided_slice %59 {offsets = [0, 384], sizes = [4, 128], strides = [1, 1]} : vector<4x512xf32> to vector<4x128xf32>
    %75 = arith.negf %74 : vector<4x128xf32>
    %76 = math.exp %75 : vector<4x128xf32>
    %cst_37 = arith.constant 1.000000e+00 : f32
    %77 = vector.broadcast %cst_37 : f32 to vector<4x128xf32>
    %78 = arith.addf %77, %76 : vector<4x128xf32>
    %79 = arith.divf %77, %78 : vector<4x128xf32>
    %c1_38 = arith.constant 1 : index
    %c0_39 = arith.constant 0 : index
    %c0_40 = arith.constant 0 : index
    %80 = vector.load %arg7[%c1_38, %c0_39, %c0_40] : memref<2x4x128xf32, #tpu.memory_space<vmem>>, vector<1x4x128xf32>
    %81 = vector.shape_cast %80 : vector<1x4x128xf32> to vector<4x128xf32>
    %82 = arith.mulf %71, %81 : vector<4x128xf32>
    %83 = arith.mulf %65, %73 : vector<4x128xf32>
    %84 = arith.addf %82, %83 : vector<4x128xf32>
    %85 = math.tanh %84 : vector<4x128xf32>
    %86 = arith.mulf %79, %85 : vector<4x128xf32>
    %c1_41 = arith.constant 1 : index
    %c0_42 = arith.constant 0 : index
    %c0_43 = arith.constant 0 : index
    %87 = vector.load %arg7[%c1_41, %c0_42, %c0_43] : memref<2x4x128xf32, #tpu.memory_space<vmem>>, vector<1x4x128xf32>
    %88 = vector.shape_cast %87 : vector<1x4x128xf32> to vector<4x128xf32>
    %89 = vector.shape_cast %84 : vector<4x128xf32> to vector<1x4x128xf32>
    tpu.vector_store %arg7[%c1_41, %c0_42, %c0_43], %89 {strides = array<i32>} : memref<2x4x128xf32, #tpu.memory_space<vmem>>, vector<1x4x128xf32>,
    %c1_44 = arith.constant 1 : index
    %c0_45 = arith.constant 0 : index
    %c0_46 = arith.constant 0 : index
    %90 = vector.load %arg6[%c1_44, %c0_45, %c0_46] : memref<2x4x128xf32, #tpu.memory_space<vmem>>, vector<1x4x128xf32>
    %91 = vector.shape_cast %90 : vector<1x4x128xf32> to vector<4x128xf32>
    %92 = vector.shape_cast %86 : vector<4x128xf32> to vector<1x4x128xf32>
    tpu.vector_store %arg6[%c1_44, %c0_45, %c0_46], %92 {strides = array<i32>} : memref<2x4x128xf32, #tpu.memory_space<vmem>>, vector<1x4x128xf32>,
    %93 = arith.index_cast %50 : i32 to index
    %c0_47 = arith.constant 0 : index
    %c0_48 = arith.constant 0 : index
    %94 = vector.load %arg5[%93, %c0_47, %c0_48] : memref<10x4x128xf32, #tpu.memory_space<vmem>>, vector<1x4x128xf32>
    %95 = vector.shape_cast %94 : vector<1x4x128xf32> to vector<4x128xf32>
    %96 = vector.shape_cast %86 : vector<4x128xf32> to vector<1x4x128xf32>
    tpu.vector_store %arg5[%93, %c0_47, %c0_48], %96 {strides = array<i32>} : memref<10x4x128xf32, #tpu.memory_space<vmem>>, vector<1x4x128xf32>,
    %c1_i32 = arith.constant 1 : i32
    %97 = arith.index_cast %c1_i32 : i32 to index
    %c0_49 = arith.constant 0 : index
    %c0_50 = arith.constant 0 : index
    %98 = vector.load %arg0[%97, %c0_49, %c0_50] : memref<10x4x512xf32, #tpu.memory_space<vmem>>, vector<1x4x512xf32>
    %99 = vector.shape_cast %98 : vector<1x4x512xf32> to vector<4x512xf32>
    %c0_51 = arith.constant 0 : index
    %c0_52 = arith.constant 0 : index
    %c0_53 = arith.constant 0 : index
    %100 = vector.load %arg6[%c0_51, %c0_52, %c0_53] : memref<2x4x128xf32, #tpu.memory_space<vmem>>, vector<1x4x128xf32>
    %101 = vector.shape_cast %100 : vector<1x4x128xf32> to vector<4x128xf32>
    %102 = arith.truncf %101 : vector<4x128xf32> to vector<4x128xbf16>
    %c0_54 = arith.constant 0 : index
    %c0_55 = arith.constant 0 : index
    %103 = vector.load %arg2[%c0_54, %c0_55] : memref<128x512xbf16, #tpu.memory_space<vmem>>, vector<128x512xbf16>
    %cst_56 = arith.constant dense<0.000000e+00> : vector<4x512xf32>
    %104 = tpu.matmul %102, %103, %cst_56 {dimension_numbers = #tpu.dot_dimension_numbers<[1], [0], [0], [1], [0, 0, 1, 1], [], []>} : vector<4x128xbf16>, vector<128x512xbf16>, vector<4x512xf32> -> vector<4x512xf32>
    %105 = arith.addf %99, %104 : vector<4x512xf32>
    %106 = vector.extract_strided_slice %105 {offsets = [0, 0], sizes = [4, 128], strides = [1, 1]} : vector<4x512xf32> to vector<4x128xf32>
    %107 = arith.negf %106 : vector<4x128xf32>
    %108 = math.exp %107 : vector<4x128xf32>
    %cst_57 = arith.constant 1.000000e+00 : f32
    %109 = vector.broadcast %cst_57 : f32 to vector<4x128xf32>
    %110 = arith.addf %109, %108 : vector<4x128xf32>
    %111 = arith.divf %109, %110 : vector<4x128xf32>
    %112 = vector.extract_strided_slice %105 {offsets = [0, 128], sizes = [4, 128], strides = [1, 1]} : vector<4x512xf32> to vector<4x128xf32>
    %113 = arith.negf %112 : vector<4x128xf32>
    %114 = math.exp %113 : vector<4x128xf32>
    %cst_58 = arith.constant 1.000000e+00 : f32
    %115 = vector.broadcast %cst_58 : f32 to vector<4x128xf32>
    %116 = arith.addf %115, %114 : vector<4x128xf32>
    %117 = arith.divf %115, %116 : vector<4x128xf32>
    %118 = vector.extract_strided_slice %105 {offsets = [0, 256], sizes = [4, 128], strides = [1, 1]} : vector<4x512xf32> to vector<4x128xf32>
    %119 = math.tanh %118 : vector<4x128xf32>
    %120 = vector.extract_strided_slice %105 {offsets = [0, 384], sizes = [4, 128], strides = [1, 1]} : vector<4x512xf32> to vector<4x128xf32>
    %121 = arith.negf %120 : vector<4x128xf32>
    %122 = math.exp %121 : vector<4x128xf32>
    %cst_59 = arith.constant 1.000000e+00 : f32
    %123 = vector.broadcast %cst_59 : f32 to vector<4x128xf32>
    %124 = arith.addf %123, %122 : vector<4x128xf32>
    %125 = arith.divf %123, %124 : vector<4x128xf32>
    %c0_60 = arith.constant 0 : index
    %c0_61 = arith.constant 0 : index
    %c0_62 = arith.constant 0 : index
    %126 = vector.load %arg7[%c0_60, %c0_61, %c0_62] : memref<2x4x128xf32, #tpu.memory_space<vmem>>, vector<1x4x128xf32>
    %127 = vector.shape_cast %126 : vector<1x4x128xf32> to vector<4x128xf32>
    %128 = arith.mulf %117, %127 : vector<4x128xf32>
    %129 = arith.mulf %111, %119 : vector<4x128xf32>
    %130 = arith.addf %128, %129 : vector<4x128xf32>
    %131 = math.tanh %130 : vector<4x128xf32>
    %132 = arith.mulf %125, %131 : vector<4x128xf32>
    %c0_63 = arith.constant 0 : index
    %c0_64 = arith.constant 0 : index
    %c0_65 = arith.constant 0 : index
    %133 = vector.load %arg7[%c0_63, %c0_64, %c0_65] : memref<2x4x128xf32, #tpu.memory_space<vmem>>, vector<1x4x128xf32>
    %134 = vector.shape_cast %133 : vector<1x4x128xf32> to vector<4x128xf32>
    %135 = vector.shape_cast %130 : vector<4x128xf32> to vector<1x4x128xf32>
    tpu.vector_store %arg7[%c0_63, %c0_64, %c0_65], %135 {strides = array<i32>} : memref<2x4x128xf32, #tpu.memory_space<vmem>>, vector<1x4x128xf32>,
    %c0_66 = arith.constant 0 : index
    %c0_67 = arith.constant 0 : index
    %c0_68 = arith.constant 0 : index
    %136 = vector.load %arg6[%c0_66, %c0_67, %c0_68] : memref<2x4x128xf32, #tpu.memory_space<vmem>>, vector<1x4x128xf32>
    %137 = vector.shape_cast %136 : vector<1x4x128xf32> to vector<4x128xf32>
    %138 = vector.shape_cast %132 : vector<4x128xf32> to vector<1x4x128xf32>
    tpu.vector_store %arg6[%c0_66, %c0_67, %c0_68], %138 {strides = array<i32>} : memref<2x4x128xf32, #tpu.memory_space<vmem>>, vector<1x4x128xf32>,
    %139 = arith.index_cast %c1_i32 : i32 to index
    %c0_69 = arith.constant 0 : index
    %c0_70 = arith.constant 0 : index
    %140 = vector.load %arg4[%139, %c0_69, %c0_70] : memref<10x4x128xf32, #tpu.memory_space<vmem>>, vector<1x4x128xf32>
    %141 = vector.shape_cast %140 : vector<1x4x128xf32> to vector<4x128xf32>
    %142 = vector.shape_cast %132 : vector<4x128xf32> to vector<1x4x128xf32>
    tpu.vector_store %arg4[%139, %c0_69, %c0_70], %142 {strides = array<i32>} : memref<10x4x128xf32, #tpu.memory_space<vmem>>, vector<1x4x128xf32>,
    %c9_i32_71 = arith.constant 9 : i32
    %143 = arith.subi %c9_i32_71, %c1_i32 : i32
    %144 = arith.index_cast %143 : i32 to index
    %c0_72 = arith.constant 0 : index
    %c0_73 = arith.constant 0 : index
    %145 = vector.load %arg1[%144, %c0_72, %c0_73] : memref<10x4x512xf32, #tpu.memory_space<vmem>>, vector<1x4x512xf32>
    %146 = vector.shape_cast %145 : vector<1x4x512xf32> to vector<4x512xf32>
    %c1_74 = arith.constant 1 : index
    %c0_75 = arith.constant 0 : index
    %c0_76 = arith.constant 0 : index
    %147 = vector.load %arg6[%c1_74, %c0_75, %c0_76] : memref<2x4x128xf32, #tpu.memory_space<vmem>>, vector<1x4x128xf32>
    %148 = vector.shape_cast %147 : vector<1x4x128xf32> to vector<4x128xf32>
    %149 = arith.truncf %148 : vector<4x128xf32> to vector<4x128xbf16>
    %c0_77 = arith.constant 0 : index
    %c0_78 = arith.constant 0 : index
    %150 = vector.load %arg3[%c0_77, %c0_78] : memref<128x512xbf16, #tpu.memory_space<vmem>>, vector<128x512xbf16>
    %cst_79 = arith.constant dense<0.000000e+00> : vector<4x512xf32>
    %151 = tpu.matmul %149, %150, %cst_79 {dimension_numbers = #tpu.dot_dimension_numbers<[1], [0], [0], [1], [0, 0, 1, 1], [], []>} : vector<4x128xbf16>, vector<128x512xbf16>, vector<4x512xf32> -> vector<4x512xf32>
    %152 = arith.addf %146, %151 : vector<4x512xf32>
    %153 = vector.extract_strided_slice %152 {offsets = [0, 0], sizes = [4, 128], strides = [1, 1]} : vector<4x512xf32> to vector<4x128xf32>
    %154 = arith.negf %153 : vector<4x128xf32>
    %155 = math.exp %154 : vector<4x128xf32>
    %cst_80 = arith.constant 1.000000e+00 : f32
    %156 = vector.broadcast %cst_80 : f32 to vector<4x128xf32>
    %157 = arith.addf %156, %155 : vector<4x128xf32>
    %158 = arith.divf %156, %157 : vector<4x128xf32>
    %159 = vector.extract_strided_slice %152 {offsets = [0, 128], sizes = [4, 128], strides = [1, 1]} : vector<4x512xf32> to vector<4x128xf32>
    %160 = arith.negf %159 : vector<4x128xf32>
    %161 = math.exp %160 : vector<4x128xf32>
    %cst_81 = arith.constant 1.000000e+00 : f32
    %162 = vector.broadcast %cst_81 : f32 to vector<4x128xf32>
    %163 = arith.addf %162, %161 : vector<4x128xf32>
    %164 = arith.divf %162, %163 : vector<4x128xf32>
    %165 = vector.extract_strided_slice %152 {offsets = [0, 256], sizes = [4, 128], strides = [1, 1]} : vector<4x512xf32> to vector<4x128xf32>
    %166 = math.tanh %165 : vector<4x128xf32>
    %167 = vector.extract_strided_slice %152 {offsets = [0, 384], sizes = [4, 128], strides = [1, 1]} : vector<4x512xf32> to vector<4x128xf32>
    %168 = arith.negf %167 : vector<4x128xf32>
    %169 = math.exp %168 : vector<4x128xf32>
    %cst_82 = arith.constant 1.000000e+00 : f32
    %170 = vector.broadcast %cst_82 : f32 to vector<4x128xf32>
    %171 = arith.addf %170, %169 : vector<4x128xf32>
    %172 = arith.divf %170, %171 : vector<4x128xf32>
    %c1_83 = arith.constant 1 : index
    %c0_84 = arith.constant 0 : index
    %c0_85 = arith.constant 0 : index
    %173 = vector.load %arg7[%c1_83, %c0_84, %c0_85] : memref<2x4x128xf32, #tpu.memory_space<vmem>>, vector<1x4x128xf32>
    %174 = vector.shape_cast %173 : vector<1x4x128xf32> to vector<4x128xf32>
    %175 = arith.mulf %164, %174 : vector<4x128xf32>
    %176 = arith.mulf %158, %166 : vector<4x128xf32>
    %177 = arith.addf %175, %176 : vector<4x128xf32>
    %178 = math.tanh %177 : vector<4x128xf32>
    %179 = arith.mulf %172, %178 : vector<4x128xf32>
    %c1_86 = arith.constant 1 : index
    %c0_87 = arith.constant 0 : index
    %c0_88 = arith.constant 0 : index
    %180 = vector.load %arg7[%c1_86, %c0_87, %c0_88] : memref<2x4x128xf32, #tpu.memory_space<vmem>>, vector<1x4x128xf32>
    %181 = vector.shape_cast %180 : vector<1x4x128xf32> to vector<4x128xf32>
    %182 = vector.shape_cast %177 : vector<4x128xf32> to vector<1x4x128xf32>
    tpu.vector_store %arg7[%c1_86, %c0_87, %c0_88], %182 {strides = array<i32>} : memref<2x4x128xf32, #tpu.memory_space<vmem>>, vector<1x4x128xf32>,
    %c1_89 = arith.constant 1 : index
    %c0_90 = arith.constant 0 : index
    %c0_91 = arith.constant 0 : index
    %183 = vector.load %arg6[%c1_89, %c0_90, %c0_91] : memref<2x4x128xf32, #tpu.memory_space<vmem>>, vector<1x4x128xf32>
    %184 = vector.shape_cast %183 : vector<1x4x128xf32> to vector<4x128xf32>
    %185 = vector.shape_cast %179 : vector<4x128xf32> to vector<1x4x128xf32>
    tpu.vector_store %arg6[%c1_89, %c0_90, %c0_91], %185 {strides = array<i32>} : memref<2x4x128xf32, #tpu.memory_space<vmem>>, vector<1x4x128xf32>,
    %186 = arith.index_cast %143 : i32 to index
    %c0_92 = arith.constant 0 : index
    %c0_93 = arith.constant 0 : index
    %187 = vector.load %arg5[%186, %c0_92, %c0_93] : memref<10x4x128xf32, #tpu.memory_space<vmem>>, vector<1x4x128xf32>
    %188 = vector.shape_cast %187 : vector<1x4x128xf32> to vector<4x128xf32>
    %189 = vector.shape_cast %179 : vector<4x128xf32> to vector<1x4x128xf32>
    tpu.vector_store %arg5[%186, %c0_92, %c0_93], %189 {strides = array<i32>} : memref<10x4x128xf32, #tpu.memory_space<vmem>>, vector<1x4x128xf32>,
    %c2_i32 = arith.constant 2 : i32
    %190 = arith.index_cast %c2_i32 : i32 to index
    %c0_94 = arith.constant 0 : index
    %c0_95 = arith.constant 0 : index
    %191 = vector.load %arg0[%190, %c0_94, %c0_95] : memref<10x4x512xf32, #tpu.memory_space<vmem>>, vector<1x4x512xf32>
    %192 = vector.shape_cast %191 : vector<1x4x512xf32> to vector<4x512xf32>
    %c0_96 = arith.constant 0 : index
    %c0_97 = arith.constant 0 : index
    %c0_98 = arith.constant 0 : index
    %193 = vector.load %arg6[%c0_96, %c0_97, %c0_98] : memref<2x4x128xf32, #tpu.memory_space<vmem>>, vector<1x4x128xf32>
    %194 = vector.shape_cast %193 : vector<1x4x128xf32> to vector<4x128xf32>
    %195 = arith.truncf %194 : vector<4x128xf32> to vector<4x128xbf16>
    %c0_99 = arith.constant 0 : index
    %c0_100 = arith.constant 0 : index
    %196 = vector.load %arg2[%c0_99, %c0_100] : memref<128x512xbf16, #tpu.memory_space<vmem>>, vector<128x512xbf16>
    %cst_101 = arith.constant dense<0.000000e+00> : vector<4x512xf32>
    %197 = tpu.matmul %195, %196, %cst_101 {dimension_numbers = #tpu.dot_dimension_numbers<[1], [0], [0], [1], [0, 0, 1, 1], [], []>} : vector<4x128xbf16>, vector<128x512xbf16>, vector<4x512xf32> -> vector<4x512xf32>
    %198 = arith.addf %192, %197 : vector<4x512xf32>
    %199 = vector.extract_strided_slice %198 {offsets = [0, 0], sizes = [4, 128], strides = [1, 1]} : vector<4x512xf32> to vector<4x128xf32>
    %200 = arith.negf %199 : vector<4x128xf32>
    %201 = math.exp %200 : vector<4x128xf32>
    %cst_102 = arith.constant 1.000000e+00 : f32
    %202 = vector.broadcast %cst_102 : f32 to vector<4x128xf32>
    %203 = arith.addf %202, %201 : vector<4x128xf32>
    %204 = arith.divf %202, %203 : vector<4x128xf32>
    %205 = vector.extract_strided_slice %198 {offsets = [0, 128], sizes = [4, 128], strides = [1, 1]} : vector<4x512xf32> to vector<4x128xf32>
    %206 = arith.negf %205 : vector<4x128xf32>
    %207 = math.exp %206 : vector<4x128xf32>
    %cst_103 = arith.constant 1.000000e+00 : f32
    %208 = vector.broadcast %cst_103 : f32 to vector<4x128xf32>
    %209 = arith.addf %208, %207 : vector<4x128xf32>
    %210 = arith.divf %208, %209 : vector<4x128xf32>
    %211 = vector.extract_strided_slice %198 {offsets = [0, 256], sizes = [4, 128], strides = [1, 1]} : vector<4x512xf32> to vector<4x128xf32>
    %212 = math.tanh %211 : vector<4x128xf32>
    %213 = vector.extract_strided_slice %198 {offsets = [0, 384], sizes = [4, 128], strides = [1, 1]} : vector<4x512xf32> to vector<4x128xf32>
    %214 = arith.negf %213 : vector<4x128xf32>
    %215 = math.exp %214 : vector<4x128xf32>
    %cst_104 = arith.constant 1.000000e+00 : f32
    %216 = vector.broadcast %cst_104 : f32 to vector<4x128xf32>
    %217 = arith.addf %216, %215 : vector<4x128xf32>
    %218 = arith.divf %216, %217 : vector<4x128xf32>
    %c0_105 = arith.constant 0 : index
    %c0_106 = arith.constant 0 : index
    %c0_107 = arith.constant 0 : index
    %219 = vector.load %arg7[%c0_105, %c0_106, %c0_107] : memref<2x4x128xf32, #tpu.memory_space<vmem>>, vector<1x4x128xf32>
    %220 = vector.shape_cast %219 : vector<1x4x128xf32> to vector<4x128xf32>
    %221 = arith.mulf %210, %220 : vector<4x128xf32>
    %222 = arith.mulf %204, %212 : vector<4x128xf32>
    %223 = arith.addf %221, %222 : vector<4x128xf32>
    %224 = math.tanh %223 : vector<4x128xf32>
    %225 = arith.mulf %218, %224 : vector<4x128xf32>
    %c0_108 = arith.constant 0 : index
    %c0_109 = arith.constant 0 : index
    %c0_110 = arith.constant 0 : index
    %226 = vector.load %arg7[%c0_108, %c0_109, %c0_110] : memref<2x4x128xf32, #tpu.memory_space<vmem>>, vector<1x4x128xf32>
    %227 = vector.shape_cast %226 : vector<1x4x128xf32> to vector<4x128xf32>
    %228 = vector.shape_cast %223 : vector<4x128xf32> to vector<1x4x128xf32>
    tpu.vector_store %arg7[%c0_108, %c0_109, %c0_110], %228 {strides = array<i32>} : memref<2x4x128xf32, #tpu.memory_space<vmem>>, vector<1x4x128xf32>,
    %c0_111 = arith.constant 0 : index
    %c0_112 = arith.constant 0 : index
    %c0_113 = arith.constant 0 : index
    %229 = vector.load %arg6[%c0_111, %c0_112, %c0_113] : memref<2x4x128xf32, #tpu.memory_space<vmem>>, vector<1x4x128xf32>
    %230 = vector.shape_cast %229 : vector<1x4x128xf32> to vector<4x128xf32>
    %231 = vector.shape_cast %225 : vector<4x128xf32> to vector<1x4x128xf32>
    tpu.vector_store %arg6[%c0_111, %c0_112, %c0_113], %231 {strides = array<i32>} : memref<2x4x128xf32, #tpu.memory_space<vmem>>, vector<1x4x128xf32>,
    %232 = arith.index_cast %c2_i32 : i32 to index
    %c0_114 = arith.constant 0 : index
    %c0_115 = arith.constant 0 : index
    %233 = vector.load %arg4[%232, %c0_114, %c0_115] : memref<10x4x128xf32, #tpu.memory_space<vmem>>, vector<1x4x128xf32>
    %234 = vector.shape_cast %233 : vector<1x4x128xf32> to vector<4x128xf32>
    %235 = vector.shape_cast %225 : vector<4x128xf32> to vector<1x4x128xf32>
    tpu.vector_store %arg4[%232, %c0_114, %c0_115], %235 {strides = array<i32>} : memref<10x4x128xf32, #tpu.memory_space<vmem>>, vector<1x4x128xf32>,
    %c9_i32_116 = arith.constant 9 : i32
    %236 = arith.subi %c9_i32_116, %c2_i32 : i32
    %237 = arith.index_cast %236 : i32 to index
    %c0_117 = arith.constant 0 : index
    %c0_118 = arith.constant 0 : index
    %238 = vector.load %arg1[%237, %c0_117, %c0_118] : memref<10x4x512xf32, #tpu.memory_space<vmem>>, vector<1x4x512xf32>
    %239 = vector.shape_cast %238 : vector<1x4x512xf32> to vector<4x512xf32>
    %c1_119 = arith.constant 1 : index
    %c0_120 = arith.constant 0 : index
    %c0_121 = arith.constant 0 : index
    %240 = vector.load %arg6[%c1_119, %c0_120, %c0_121] : memref<2x4x128xf32, #tpu.memory_space<vmem>>, vector<1x4x128xf32>
    %241 = vector.shape_cast %240 : vector<1x4x128xf32> to vector<4x128xf32>
    %242 = arith.truncf %241 : vector<4x128xf32> to vector<4x128xbf16>
    %c0_122 = arith.constant 0 : index
    %c0_123 = arith.constant 0 : index
    %243 = vector.load %arg3[%c0_122, %c0_123] : memref<128x512xbf16, #tpu.memory_space<vmem>>, vector<128x512xbf16>
    %cst_124 = arith.constant dense<0.000000e+00> : vector<4x512xf32>
    %244 = tpu.matmul %242, %243, %cst_124 {dimension_numbers = #tpu.dot_dimension_numbers<[1], [0], [0], [1], [0, 0, 1, 1], [], []>} : vector<4x128xbf16>, vector<128x512xbf16>, vector<4x512xf32> -> vector<4x512xf32>
    %245 = arith.addf %239, %244 : vector<4x512xf32>
    %246 = vector.extract_strided_slice %245 {offsets = [0, 0], sizes = [4, 128], strides = [1, 1]} : vector<4x512xf32> to vector<4x128xf32>
    %247 = arith.negf %246 : vector<4x128xf32>
    %248 = math.exp %247 : vector<4x128xf32>
    %cst_125 = arith.constant 1.000000e+00 : f32
    %249 = vector.broadcast %cst_125 : f32 to vector<4x128xf32>
    %250 = arith.addf %249, %248 : vector<4x128xf32>
    %251 = arith.divf %249, %250 : vector<4x128xf32>
    %252 = vector.extract_strided_slice %245 {offsets = [0, 128], sizes = [4, 128], strides = [1, 1]} : vector<4x512xf32> to vector<4x128xf32>
    %253 = arith.negf %252 : vector<4x128xf32>
    %254 = math.exp %253 : vector<4x128xf32>
    %cst_126 = arith.constant 1.000000e+00 : f32
    %255 = vector.broadcast %cst_126 : f32 to vector<4x128xf32>
    %256 = arith.addf %255, %254 : vector<4x128xf32>
    %257 = arith.divf %255, %256 : vector<4x128xf32>
    %258 = vector.extract_strided_slice %245 {offsets = [0, 256], sizes = [4, 128], strides = [1, 1]} : vector<4x512xf32> to vector<4x128xf32>
    %259 = math.tanh %258 : vector<4x128xf32>
    %260 = vector.extract_strided_slice %245 {offsets = [0, 384], sizes = [4, 128], strides = [1, 1]} : vector<4x512xf32> to vector<4x128xf32>
    %261 = arith.negf %260 : vector<4x128xf32>
    %262 = math.exp %261 : vector<4x128xf32>
    %cst_127 = arith.constant 1.000000e+00 : f32
    %263 = vector.broadcast %cst_127 : f32 to vector<4x128xf32>
    %264 = arith.addf %263, %262 : vector<4x128xf32>
    %265 = arith.divf %263, %264 : vector<4x128xf32>
    %c1_128 = arith.constant 1 : index
    %c0_129 = arith.constant 0 : index
    %c0_130 = arith.constant 0 : index
    %266 = vector.load %arg7[%c1_128, %c0_129, %c0_130] : memref<2x4x128xf32, #tpu.memory_space<vmem>>, vector<1x4x128xf32>
    %267 = vector.shape_cast %266 : vector<1x4x128xf32> to vector<4x128xf32>
    %268 = arith.mulf %257, %267 : vector<4x128xf32>
    %269 = arith.mulf %251, %259 : vector<4x128xf32>
    %270 = arith.addf %268, %269 : vector<4x128xf32>
    %271 = math.tanh %270 : vector<4x128xf32>
    %272 = arith.mulf %265, %271 : vector<4x128xf32>
    %c1_131 = arith.constant 1 : index
    %c0_132 = arith.constant 0 : index
    %c0_133 = arith.constant 0 : index
    %273 = vector.load %arg7[%c1_131, %c0_132, %c0_133] : memref<2x4x128xf32, #tpu.memory_space<vmem>>, vector<1x4x128xf32>
    %274 = vector.shape_cast %273 : vector<1x4x128xf32> to vector<4x128xf32>
    %275 = vector.shape_cast %270 : vector<4x128xf32> to vector<1x4x128xf32>
    tpu.vector_store %arg7[%c1_131, %c0_132, %c0_133], %275 {strides = array<i32>} : memref<2x4x128xf32, #tpu.memory_space<vmem>>, vector<1x4x128xf32>,
    %c1_134 = arith.constant 1 : index
    %c0_135 = arith.constant 0 : index
    %c0_136 = arith.constant 0 : index
    %276 = vector.load %arg6[%c1_134, %c0_135, %c0_136] : memref<2x4x128xf32, #tpu.memory_space<vmem>>, vector<1x4x128xf32>
    %277 = vector.shape_cast %276 : vector<1x4x128xf32> to vector<4x128xf32>
    %278 = vector.shape_cast %272 : vector<4x128xf32> to vector<1x4x128xf32>
    tpu.vector_store %arg6[%c1_134, %c0_135, %c0_136], %278 {strides = array<i32>} : memref<2x4x128xf32, #tpu.memory_space<vmem>>, vector<1x4x128xf32>,
    %279 = arith.index_cast %236 : i32 to index
    %c0_137 = arith.constant 0 : index
    %c0_138 = arith.constant 0 : index
    %280 = vector.load %arg5[%279, %c0_137, %c0_138] : memref<10x4x128xf32, #tpu.memory_space<vmem>>, vector<1x4x128xf32>
    %281 = vector.shape_cast %280 : vector<1x4x128xf32> to vector<4x128xf32>
    %282 = vector.shape_cast %272 : vector<4x128xf32> to vector<1x4x128xf32>
    tpu.vector_store %arg5[%279, %c0_137, %c0_138], %282 {strides = array<i32>} : memref<10x4x128xf32, #tpu.memory_space<vmem>>, vector<1x4x128xf32>,
    %c3_i32 = arith.constant 3 : i32
    %283 = arith.index_cast %c3_i32 : i32 to index
    %c0_139 = arith.constant 0 : index
    %c0_140 = arith.constant 0 : index
    %284 = vector.load %arg0[%283, %c0_139, %c0_140] : memref<10x4x512xf32, #tpu.memory_space<vmem>>, vector<1x4x512xf32>
    %285 = vector.shape_cast %284 : vector<1x4x512xf32> to vector<4x512xf32>
    %c0_141 = arith.constant 0 : index
    %c0_142 = arith.constant 0 : index
    %c0_143 = arith.constant 0 : index
    %286 = vector.load %arg6[%c0_141, %c0_142, %c0_143] : memref<2x4x128xf32, #tpu.memory_space<vmem>>, vector<1x4x128xf32>
    %287 = vector.shape_cast %286 : vector<1x4x128xf32> to vector<4x128xf32>
    %288 = arith.truncf %287 : vector<4x128xf32> to vector<4x128xbf16>
    %c0_144 = arith.constant 0 : index
    %c0_145 = arith.constant 0 : index
    %289 = vector.load %arg2[%c0_144, %c0_145] : memref<128x512xbf16, #tpu.memory_space<vmem>>, vector<128x512xbf16>
    %cst_146 = arith.constant dense<0.000000e+00> : vector<4x512xf32>
    %290 = tpu.matmul %288, %289, %cst_146 {dimension_numbers = #tpu.dot_dimension_numbers<[1], [0], [0], [1], [0, 0, 1, 1], [], []>} : vector<4x128xbf16>, vector<128x512xbf16>, vector<4x512xf32> -> vector<4x512xf32>
    %291 = arith.addf %285, %290 : vector<4x512xf32>
    %292 = vector.extract_strided_slice %291 {offsets = [0, 0], sizes = [4, 128], strides = [1, 1]} : vector<4x512xf32> to vector<4x128xf32>
    %293 = arith.negf %292 : vector<4x128xf32>
    %294 = math.exp %293 : vector<4x128xf32>
    %cst_147 = arith.constant 1.000000e+00 : f32
    %295 = vector.broadcast %cst_147 : f32 to vector<4x128xf32>
    %296 = arith.addf %295, %294 : vector<4x128xf32>
    %297 = arith.divf %295, %296 : vector<4x128xf32>
    %298 = vector.extract_strided_slice %291 {offsets = [0, 128], sizes = [4, 128], strides = [1, 1]} : vector<4x512xf32> to vector<4x128xf32>
    %299 = arith.negf %298 : vector<4x128xf32>
    %300 = math.exp %299 : vector<4x128xf32>
    %cst_148 = arith.constant 1.000000e+00 : f32
    %301 = vector.broadcast %cst_148 : f32 to vector<4x128xf32>
    %302 = arith.addf %301, %300 : vector<4x128xf32>
    %303 = arith.divf %301, %302 : vector<4x128xf32>
    %304 = vector.extract_strided_slice %291 {offsets = [0, 256], sizes = [4, 128], strides = [1, 1]} : vector<4x512xf32> to vector<4x128xf32>
    %305 = math.tanh %304 : vector<4x128xf32>
    %306 = vector.extract_strided_slice %291 {offsets = [0, 384], sizes = [4, 128], strides = [1, 1]} : vector<4x512xf32> to vector<4x128xf32>
    %307 = arith.negf %306 : vector<4x128xf32>
    %308 = math.exp %307 : vector<4x128xf32>
    %cst_149 = arith.constant 1.000000e+00 : f32
    %309 = vector.broadcast %cst_149 : f32 to vector<4x128xf32>
    %310 = arith.addf %309, %308 : vector<4x128xf32>
    %311 = arith.divf %309, %310 : vector<4x128xf32>
    %c0_150 = arith.constant 0 : index
    %c0_151 = arith.constant 0 : index
    %c0_152 = arith.constant 0 : index
    %312 = vector.load %arg7[%c0_150, %c0_151, %c0_152] : memref<2x4x128xf32, #tpu.memory_space<vmem>>, vector<1x4x128xf32>
    %313 = vector.shape_cast %312 : vector<1x4x128xf32> to vector<4x128xf32>
    %314 = arith.mulf %303, %313 : vector<4x128xf32>
    %315 = arith.mulf %297, %305 : vector<4x128xf32>
    %316 = arith.addf %314, %315 : vector<4x128xf32>
    %317 = math.tanh %316 : vector<4x128xf32>
    %318 = arith.mulf %311, %317 : vector<4x128xf32>
    %c0_153 = arith.constant 0 : index
    %c0_154 = arith.constant 0 : index
    %c0_155 = arith.constant 0 : index
    %319 = vector.load %arg7[%c0_153, %c0_154, %c0_155] : memref<2x4x128xf32, #tpu.memory_space<vmem>>, vector<1x4x128xf32>
    %320 = vector.shape_cast %319 : vector<1x4x128xf32> to vector<4x128xf32>
    %321 = vector.shape_cast %316 : vector<4x128xf32> to vector<1x4x128xf32>
    tpu.vector_store %arg7[%c0_153, %c0_154, %c0_155], %321 {strides = array<i32>} : memref<2x4x128xf32, #tpu.memory_space<vmem>>, vector<1x4x128xf32>,
    %c0_156 = arith.constant 0 : index
    %c0_157 = arith.constant 0 : index
    %c0_158 = arith.constant 0 : index
    %322 = vector.load %arg6[%c0_156, %c0_157, %c0_158] : memref<2x4x128xf32, #tpu.memory_space<vmem>>, vector<1x4x128xf32>
    %323 = vector.shape_cast %322 : vector<1x4x128xf32> to vector<4x128xf32>
    %324 = vector.shape_cast %318 : vector<4x128xf32> to vector<1x4x128xf32>
    tpu.vector_store %arg6[%c0_156, %c0_157, %c0_158], %324 {strides = array<i32>} : memref<2x4x128xf32, #tpu.memory_space<vmem>>, vector<1x4x128xf32>,
    %325 = arith.index_cast %c3_i32 : i32 to index
    %c0_159 = arith.constant 0 : index
    %c0_160 = arith.constant 0 : index
    %326 = vector.load %arg4[%325, %c0_159, %c0_160] : memref<10x4x128xf32, #tpu.memory_space<vmem>>, vector<1x4x128xf32>
    %327 = vector.shape_cast %326 : vector<1x4x128xf32> to vector<4x128xf32>
    %328 = vector.shape_cast %318 : vector<4x128xf32> to vector<1x4x128xf32>
    tpu.vector_store %arg4[%325, %c0_159, %c0_160], %328 {strides = array<i32>} : memref<10x4x128xf32, #tpu.memory_space<vmem>>, vector<1x4x128xf32>,
    %c9_i32_161 = arith.constant 9 : i32
    %329 = arith.subi %c9_i32_161, %c3_i32 : i32
    %330 = arith.index_cast %329 : i32 to index
    %c0_162 = arith.constant 0 : index
    %c0_163 = arith.constant 0 : index
    %331 = vector.load %arg1[%330, %c0_162, %c0_163] : memref<10x4x512xf32, #tpu.memory_space<vmem>>, vector<1x4x512xf32>
    %332 = vector.shape_cast %331 : vector<1x4x512xf32> to vector<4x512xf32>
    %c1_164 = arith.constant 1 : index
    %c0_165 = arith.constant 0 : index
    %c0_166 = arith.constant 0 : index
    %333 = vector.load %arg6[%c1_164, %c0_165, %c0_166] : memref<2x4x128xf32, #tpu.memory_space<vmem>>, vector<1x4x128xf32>
    %334 = vector.shape_cast %333 : vector<1x4x128xf32> to vector<4x128xf32>
    %335 = arith.truncf %334 : vector<4x128xf32> to vector<4x128xbf16>
    %c0_167 = arith.constant 0 : index
    %c0_168 = arith.constant 0 : index
    %336 = vector.load %arg3[%c0_167, %c0_168] : memref<128x512xbf16, #tpu.memory_space<vmem>>, vector<128x512xbf16>
    %cst_169 = arith.constant dense<0.000000e+00> : vector<4x512xf32>
    %337 = tpu.matmul %335, %336, %cst_169 {dimension_numbers = #tpu.dot_dimension_numbers<[1], [0], [0], [1], [0, 0, 1, 1], [], []>} : vector<4x128xbf16>, vector<128x512xbf16>, vector<4x512xf32> -> vector<4x512xf32>
    %338 = arith.addf %332, %337 : vector<4x512xf32>
    %339 = vector.extract_strided_slice %338 {offsets = [0, 0], sizes = [4, 128], strides = [1, 1]} : vector<4x512xf32> to vector<4x128xf32>
    %340 = arith.negf %339 : vector<4x128xf32>
    %341 = math.exp %340 : vector<4x128xf32>
    %cst_170 = arith.constant 1.000000e+00 : f32
    %342 = vector.broadcast %cst_170 : f32 to vector<4x128xf32>
    %343 = arith.addf %342, %341 : vector<4x128xf32>
    %344 = arith.divf %342, %343 : vector<4x128xf32>
    %345 = vector.extract_strided_slice %338 {offsets = [0, 128], sizes = [4, 128], strides = [1, 1]} : vector<4x512xf32> to vector<4x128xf32>
    %346 = arith.negf %345 : vector<4x128xf32>
    %347 = math.exp %346 : vector<4x128xf32>
    %cst_171 = arith.constant 1.000000e+00 : f32
    %348 = vector.broadcast %cst_171 : f32 to vector<4x128xf32>
    %349 = arith.addf %348, %347 : vector<4x128xf32>
    %350 = arith.divf %348, %349 : vector<4x128xf32>
    %351 = vector.extract_strided_slice %338 {offsets = [0, 256], sizes = [4, 128], strides = [1, 1]} : vector<4x512xf32> to vector<4x128xf32>
    %352 = math.tanh %351 : vector<4x128xf32>
    %353 = vector.extract_strided_slice %338 {offsets = [0, 384], sizes = [4, 128], strides = [1, 1]} : vector<4x512xf32> to vector<4x128xf32>
    %354 = arith.negf %353 : vector<4x128xf32>
    %355 = math.exp %354 : vector<4x128xf32>
    %cst_172 = arith.constant 1.000000e+00 : f32
    %356 = vector.broadcast %cst_172 : f32 to vector<4x128xf32>
    %357 = arith.addf %356, %355 : vector<4x128xf32>
    %358 = arith.divf %356, %357 : vector<4x128xf32>
    %c1_173 = arith.constant 1 : index
    %c0_174 = arith.constant 0 : index
    %c0_175 = arith.constant 0 : index
    %359 = vector.load %arg7[%c1_173, %c0_174, %c0_175] : memref<2x4x128xf32, #tpu.memory_space<vmem>>, vector<1x4x128xf32>
    %360 = vector.shape_cast %359 : vector<1x4x128xf32> to vector<4x128xf32>
    %361 = arith.mulf %350, %360 : vector<4x128xf32>
    %362 = arith.mulf %344, %352 : vector<4x128xf32>
    %363 = arith.addf %361, %362 : vector<4x128xf32>
    %364 = math.tanh %363 : vector<4x128xf32>
    %365 = arith.mulf %358, %364 : vector<4x128xf32>
    %c1_176 = arith.constant 1 : index
    %c0_177 = arith.constant 0 : index
    %c0_178 = arith.constant 0 : index
    %366 = vector.load %arg7[%c1_176, %c0_177, %c0_178] : memref<2x4x128xf32, #tpu.memory_space<vmem>>, vector<1x4x128xf32>
    %367 = vector.shape_cast %366 : vector<1x4x128xf32> to vector<4x128xf32>
    %368 = vector.shape_cast %363 : vector<4x128xf32> to vector<1x4x128xf32>
    tpu.vector_store %arg7[%c1_176, %c0_177, %c0_178], %368 {strides = array<i32>} : memref<2x4x128xf32, #tpu.memory_space<vmem>>, vector<1x4x128xf32>,
    %c1_179 = arith.constant 1 : index
    %c0_180 = arith.constant 0 : index
    %c0_181 = arith.constant 0 : index
    %369 = vector.load %arg6[%c1_179, %c0_180, %c0_181] : memref<2x4x128xf32, #tpu.memory_space<vmem>>, vector<1x4x128xf32>
    %370 = vector.shape_cast %369 : vector<1x4x128xf32> to vector<4x128xf32>
    %371 = vector.shape_cast %365 : vector<4x128xf32> to vector<1x4x128xf32>
    tpu.vector_store %arg6[%c1_179, %c0_180, %c0_181], %371 {strides = array<i32>} : memref<2x4x128xf32, #tpu.memory_space<vmem>>, vector<1x4x128xf32>,
    %372 = arith.index_cast %329 : i32 to index
    %c0_182 = arith.constant 0 : index
    %c0_183 = arith.constant 0 : index
    %373 = vector.load %arg5[%372, %c0_182, %c0_183] : memref<10x4x128xf32, #tpu.memory_space<vmem>>, vector<1x4x128xf32>
    %374 = vector.shape_cast %373 : vector<1x4x128xf32> to vector<4x128xf32>
    %375 = vector.shape_cast %365 : vector<4x128xf32> to vector<1x4x128xf32>
    tpu.vector_store %arg5[%372, %c0_182, %c0_183], %375 {strides = array<i32>} : memref<10x4x128xf32, #tpu.memory_space<vmem>>, vector<1x4x128xf32>,
    %c4_i32 = arith.constant 4 : i32
    %376 = arith.index_cast %c4_i32 : i32 to index
    %c0_184 = arith.constant 0 : index
    %c0_185 = arith.constant 0 : index
    %377 = vector.load %arg0[%376, %c0_184, %c0_185] : memref<10x4x512xf32, #tpu.memory_space<vmem>>, vector<1x4x512xf32>
    %378 = vector.shape_cast %377 : vector<1x4x512xf32> to vector<4x512xf32>
    %c0_186 = arith.constant 0 : index
    %c0_187 = arith.constant 0 : index
    %c0_188 = arith.constant 0 : index
    %379 = vector.load %arg6[%c0_186, %c0_187, %c0_188] : memref<2x4x128xf32, #tpu.memory_space<vmem>>, vector<1x4x128xf32>
    %380 = vector.shape_cast %379 : vector<1x4x128xf32> to vector<4x128xf32>
    %381 = arith.truncf %380 : vector<4x128xf32> to vector<4x128xbf16>
    %c0_189 = arith.constant 0 : index
    %c0_190 = arith.constant 0 : index
    %382 = vector.load %arg2[%c0_189, %c0_190] : memref<128x512xbf16, #tpu.memory_space<vmem>>, vector<128x512xbf16>
    %cst_191 = arith.constant dense<0.000000e+00> : vector<4x512xf32>
    %383 = tpu.matmul %381, %382, %cst_191 {dimension_numbers = #tpu.dot_dimension_numbers<[1], [0], [0], [1], [0, 0, 1, 1], [], []>} : vector<4x128xbf16>, vector<128x512xbf16>, vector<4x512xf32> -> vector<4x512xf32>
    %384 = arith.addf %378, %383 : vector<4x512xf32>
    %385 = vector.extract_strided_slice %384 {offsets = [0, 0], sizes = [4, 128], strides = [1, 1]} : vector<4x512xf32> to vector<4x128xf32>
    %386 = arith.negf %385 : vector<4x128xf32>
    %387 = math.exp %386 : vector<4x128xf32>
    %cst_192 = arith.constant 1.000000e+00 : f32
    %388 = vector.broadcast %cst_192 : f32 to vector<4x128xf32>
    %389 = arith.addf %388, %387 : vector<4x128xf32>
    %390 = arith.divf %388, %389 : vector<4x128xf32>
    %391 = vector.extract_strided_slice %384 {offsets = [0, 128], sizes = [4, 128], strides = [1, 1]} : vector<4x512xf32> to vector<4x128xf32>
    %392 = arith.negf %391 : vector<4x128xf32>
    %393 = math.exp %392 : vector<4x128xf32>
    %cst_193 = arith.constant 1.000000e+00 : f32
    %394 = vector.broadcast %cst_193 : f32 to vector<4x128xf32>
    %395 = arith.addf %394, %393 : vector<4x128xf32>
    %396 = arith.divf %394, %395 : vector<4x128xf32>
    %397 = vector.extract_strided_slice %384 {offsets = [0, 256], sizes = [4, 128], strides = [1, 1]} : vector<4x512xf32> to vector<4x128xf32>
    %398 = math.tanh %397 : vector<4x128xf32>
    %399 = vector.extract_strided_slice %384 {offsets = [0, 384], sizes = [4, 128], strides = [1, 1]} : vector<4x512xf32> to vector<4x128xf32>
    %400 = arith.negf %399 : vector<4x128xf32>
    %401 = math.exp %400 : vector<4x128xf32>
    %cst_194 = arith.constant 1.000000e+00 : f32
    %402 = vector.broadcast %cst_194 : f32 to vector<4x128xf32>
    %403 = arith.addf %402, %401 : vector<4x128xf32>
    %404 = arith.divf %402, %403 : vector<4x128xf32>
    %c0_195 = arith.constant 0 : index
    %c0_196 = arith.constant 0 : index
    %c0_197 = arith.constant 0 : index
    %405 = vector.load %arg7[%c0_195, %c0_196, %c0_197] : memref<2x4x128xf32, #tpu.memory_space<vmem>>, vector<1x4x128xf32>
    %406 = vector.shape_cast %405 : vector<1x4x128xf32> to vector<4x128xf32>
    %407 = arith.mulf %396, %406 : vector<4x128xf32>
    %408 = arith.mulf %390, %398 : vector<4x128xf32>
    %409 = arith.addf %407, %408 : vector<4x128xf32>
    %410 = math.tanh %409 : vector<4x128xf32>
    %411 = arith.mulf %404, %410 : vector<4x128xf32>
    %c0_198 = arith.constant 0 : index
    %c0_199 = arith.constant 0 : index
    %c0_200 = arith.constant 0 : index
    %412 = vector.load %arg7[%c0_198, %c0_199, %c0_200] : memref<2x4x128xf32, #tpu.memory_space<vmem>>, vector<1x4x128xf32>
    %413 = vector.shape_cast %412 : vector<1x4x128xf32> to vector<4x128xf32>
    %414 = vector.shape_cast %409 : vector<4x128xf32> to vector<1x4x128xf32>
    tpu.vector_store %arg7[%c0_198, %c0_199, %c0_200], %414 {strides = array<i32>} : memref<2x4x128xf32, #tpu.memory_space<vmem>>, vector<1x4x128xf32>,
    %c0_201 = arith.constant 0 : index
    %c0_202 = arith.constant 0 : index
    %c0_203 = arith.constant 0 : index
    %415 = vector.load %arg6[%c0_201, %c0_202, %c0_203] : memref<2x4x128xf32, #tpu.memory_space<vmem>>, vector<1x4x128xf32>
    %416 = vector.shape_cast %415 : vector<1x4x128xf32> to vector<4x128xf32>
    %417 = vector.shape_cast %411 : vector<4x128xf32> to vector<1x4x128xf32>
    tpu.vector_store %arg6[%c0_201, %c0_202, %c0_203], %417 {strides = array<i32>} : memref<2x4x128xf32, #tpu.memory_space<vmem>>, vector<1x4x128xf32>,
    %418 = arith.index_cast %c4_i32 : i32 to index
    %c0_204 = arith.constant 0 : index
    %c0_205 = arith.constant 0 : index
    %419 = vector.load %arg4[%418, %c0_204, %c0_205] : memref<10x4x128xf32, #tpu.memory_space<vmem>>, vector<1x4x128xf32>
    %420 = vector.shape_cast %419 : vector<1x4x128xf32> to vector<4x128xf32>
    %421 = vector.shape_cast %411 : vector<4x128xf32> to vector<1x4x128xf32>
    tpu.vector_store %arg4[%418, %c0_204, %c0_205], %421 {strides = array<i32>} : memref<10x4x128xf32, #tpu.memory_space<vmem>>, vector<1x4x128xf32>,
    %c9_i32_206 = arith.constant 9 : i32
    %422 = arith.subi %c9_i32_206, %c4_i32 : i32
    %423 = arith.index_cast %422 : i32 to index
    %c0_207 = arith.constant 0 : index
    %c0_208 = arith.constant 0 : index
    %424 = vector.load %arg1[%423, %c0_207, %c0_208] : memref<10x4x512xf32, #tpu.memory_space<vmem>>, vector<1x4x512xf32>
    %425 = vector.shape_cast %424 : vector<1x4x512xf32> to vector<4x512xf32>
    %c1_209 = arith.constant 1 : index
    %c0_210 = arith.constant 0 : index
    %c0_211 = arith.constant 0 : index
    %426 = vector.load %arg6[%c1_209, %c0_210, %c0_211] : memref<2x4x128xf32, #tpu.memory_space<vmem>>, vector<1x4x128xf32>
    %427 = vector.shape_cast %426 : vector<1x4x128xf32> to vector<4x128xf32>
    %428 = arith.truncf %427 : vector<4x128xf32> to vector<4x128xbf16>
    %c0_212 = arith.constant 0 : index
    %c0_213 = arith.constant 0 : index
    %429 = vector.load %arg3[%c0_212, %c0_213] : memref<128x512xbf16, #tpu.memory_space<vmem>>, vector<128x512xbf16>
    %cst_214 = arith.constant dense<0.000000e+00> : vector<4x512xf32>
    %430 = tpu.matmul %428, %429, %cst_214 {dimension_numbers = #tpu.dot_dimension_numbers<[1], [0], [0], [1], [0, 0, 1, 1], [], []>} : vector<4x128xbf16>, vector<128x512xbf16>, vector<4x512xf32> -> vector<4x512xf32>
    %431 = arith.addf %425, %430 : vector<4x512xf32>
    %432 = vector.extract_strided_slice %431 {offsets = [0, 0], sizes = [4, 128], strides = [1, 1]} : vector<4x512xf32> to vector<4x128xf32>
    %433 = arith.negf %432 : vector<4x128xf32>
    %434 = math.exp %433 : vector<4x128xf32>
    %cst_215 = arith.constant 1.000000e+00 : f32
    %435 = vector.broadcast %cst_215 : f32 to vector<4x128xf32>
    %436 = arith.addf %435, %434 : vector<4x128xf32>
    %437 = arith.divf %435, %436 : vector<4x128xf32>
    %438 = vector.extract_strided_slice %431 {offsets = [0, 128], sizes = [4, 128], strides = [1, 1]} : vector<4x512xf32> to vector<4x128xf32>
    %439 = arith.negf %438 : vector<4x128xf32>
    %440 = math.exp %439 : vector<4x128xf32>
    %cst_216 = arith.constant 1.000000e+00 : f32
    %441 = vector.broadcast %cst_216 : f32 to vector<4x128xf32>
    %442 = arith.addf %441, %440 : vector<4x128xf32>
    %443 = arith.divf %441, %442 : vector<4x128xf32>
    %444 = vector.extract_strided_slice %431 {offsets = [0, 256], sizes = [4, 128], strides = [1, 1]} : vector<4x512xf32> to vector<4x128xf32>
    %445 = math.tanh %444 : vector<4x128xf32>
    %446 = vector.extract_strided_slice %431 {offsets = [0, 384], sizes = [4, 128], strides = [1, 1]} : vector<4x512xf32> to vector<4x128xf32>
    %447 = arith.negf %446 : vector<4x128xf32>
    %448 = math.exp %447 : vector<4x128xf32>
    %cst_217 = arith.constant 1.000000e+00 : f32
    %449 = vector.broadcast %cst_217 : f32 to vector<4x128xf32>
    %450 = arith.addf %449, %448 : vector<4x128xf32>
    %451 = arith.divf %449, %450 : vector<4x128xf32>
    %c1_218 = arith.constant 1 : index
    %c0_219 = arith.constant 0 : index
    %c0_220 = arith.constant 0 : index
    %452 = vector.load %arg7[%c1_218, %c0_219, %c0_220] : memref<2x4x128xf32, #tpu.memory_space<vmem>>, vector<1x4x128xf32>
    %453 = vector.shape_cast %452 : vector<1x4x128xf32> to vector<4x128xf32>
    %454 = arith.mulf %443, %453 : vector<4x128xf32>
    %455 = arith.mulf %437, %445 : vector<4x128xf32>
    %456 = arith.addf %454, %455 : vector<4x128xf32>
    %457 = math.tanh %456 : vector<4x128xf32>
    %458 = arith.mulf %451, %457 : vector<4x128xf32>
    %c1_221 = arith.constant 1 : index
    %c0_222 = arith.constant 0 : index
    %c0_223 = arith.constant 0 : index
    %459 = vector.load %arg7[%c1_221, %c0_222, %c0_223] : memref<2x4x128xf32, #tpu.memory_space<vmem>>, vector<1x4x128xf32>
    %460 = vector.shape_cast %459 : vector<1x4x128xf32> to vector<4x128xf32>
    %461 = vector.shape_cast %456 : vector<4x128xf32> to vector<1x4x128xf32>
    tpu.vector_store %arg7[%c1_221, %c0_222, %c0_223], %461 {strides = array<i32>} : memref<2x4x128xf32, #tpu.memory_space<vmem>>, vector<1x4x128xf32>,
    %c1_224 = arith.constant 1 : index
    %c0_225 = arith.constant 0 : index
    %c0_226 = arith.constant 0 : index
    %462 = vector.load %arg6[%c1_224, %c0_225, %c0_226] : memref<2x4x128xf32, #tpu.memory_space<vmem>>, vector<1x4x128xf32>
    %463 = vector.shape_cast %462 : vector<1x4x128xf32> to vector<4x128xf32>
    %464 = vector.shape_cast %458 : vector<4x128xf32> to vector<1x4x128xf32>
    tpu.vector_store %arg6[%c1_224, %c0_225, %c0_226], %464 {strides = array<i32>} : memref<2x4x128xf32, #tpu.memory_space<vmem>>, vector<1x4x128xf32>,
    %465 = arith.index_cast %422 : i32 to index
    %c0_227 = arith.constant 0 : index
    %c0_228 = arith.constant 0 : index
    %466 = vector.load %arg5[%465, %c0_227, %c0_228] : memref<10x4x128xf32, #tpu.memory_space<vmem>>, vector<1x4x128xf32>
    %467 = vector.shape_cast %466 : vector<1x4x128xf32> to vector<4x128xf32>
    %468 = vector.shape_cast %458 : vector<4x128xf32> to vector<1x4x128xf32>
    tpu.vector_store %arg5[%465, %c0_227, %c0_228], %468 {strides = array<i32>} : memref<10x4x128xf32, #tpu.memory_space<vmem>>, vector<1x4x128xf32>,
    %c5_i32 = arith.constant 5 : i32
    %469 = arith.index_cast %c5_i32 : i32 to index
    %c0_229 = arith.constant 0 : index
    %c0_230 = arith.constant 0 : index
    %470 = vector.load %arg0[%469, %c0_229, %c0_230] : memref<10x4x512xf32, #tpu.memory_space<vmem>>, vector<1x4x512xf32>
    %471 = vector.shape_cast %470 : vector<1x4x512xf32> to vector<4x512xf32>
    %c0_231 = arith.constant 0 : index
    %c0_232 = arith.constant 0 : index
    %c0_233 = arith.constant 0 : index
    %472 = vector.load %arg6[%c0_231, %c0_232, %c0_233] : memref<2x4x128xf32, #tpu.memory_space<vmem>>, vector<1x4x128xf32>
    %473 = vector.shape_cast %472 : vector<1x4x128xf32> to vector<4x128xf32>
    %474 = arith.truncf %473 : vector<4x128xf32> to vector<4x128xbf16>
    %c0_234 = arith.constant 0 : index
    %c0_235 = arith.constant 0 : index
    %475 = vector.load %arg2[%c0_234, %c0_235] : memref<128x512xbf16, #tpu.memory_space<vmem>>, vector<128x512xbf16>
    %cst_236 = arith.constant dense<0.000000e+00> : vector<4x512xf32>
    %476 = tpu.matmul %474, %475, %cst_236 {dimension_numbers = #tpu.dot_dimension_numbers<[1], [0], [0], [1], [0, 0, 1, 1], [], []>} : vector<4x128xbf16>, vector<128x512xbf16>, vector<4x512xf32> -> vector<4x512xf32>
    %477 = arith.addf %471, %476 : vector<4x512xf32>
    %478 = vector.extract_strided_slice %477 {offsets = [0, 0], sizes = [4, 128], strides = [1, 1]} : vector<4x512xf32> to vector<4x128xf32>
    %479 = arith.negf %478 : vector<4x128xf32>
    %480 = math.exp %479 : vector<4x128xf32>
    %cst_237 = arith.constant 1.000000e+00 : f32
    %481 = vector.broadcast %cst_237 : f32 to vector<4x128xf32>
    %482 = arith.addf %481, %480 : vector<4x128xf32>
    %483 = arith.divf %481, %482 : vector<4x128xf32>
    %484 = vector.extract_strided_slice %477 {offsets = [0, 128], sizes = [4, 128], strides = [1, 1]} : vector<4x512xf32> to vector<4x128xf32>
    %485 = arith.negf %484 : vector<4x128xf32>
    %486 = math.exp %485 : vector<4x128xf32>
    %cst_238 = arith.constant 1.000000e+00 : f32
    %487 = vector.broadcast %cst_238 : f32 to vector<4x128xf32>
    %488 = arith.addf %487, %486 : vector<4x128xf32>
    %489 = arith.divf %487, %488 : vector<4x128xf32>
    %490 = vector.extract_strided_slice %477 {offsets = [0, 256], sizes = [4, 128], strides = [1, 1]} : vector<4x512xf32> to vector<4x128xf32>
    %491 = math.tanh %490 : vector<4x128xf32>
    %492 = vector.extract_strided_slice %477 {offsets = [0, 384], sizes = [4, 128], strides = [1, 1]} : vector<4x512xf32> to vector<4x128xf32>
    %493 = arith.negf %492 : vector<4x128xf32>
    %494 = math.exp %493 : vector<4x128xf32>
    %cst_239 = arith.constant 1.000000e+00 : f32
    %495 = vector.broadcast %cst_239 : f32 to vector<4x128xf32>
    %496 = arith.addf %495, %494 : vector<4x128xf32>
    %497 = arith.divf %495, %496 : vector<4x128xf32>
    %c0_240 = arith.constant 0 : index
    %c0_241 = arith.constant 0 : index
    %c0_242 = arith.constant 0 : index
    %498 = vector.load %arg7[%c0_240, %c0_241, %c0_242] : memref<2x4x128xf32, #tpu.memory_space<vmem>>, vector<1x4x128xf32>
    %499 = vector.shape_cast %498 : vector<1x4x128xf32> to vector<4x128xf32>
    %500 = arith.mulf %489, %499 : vector<4x128xf32>
    %501 = arith.mulf %483, %491 : vector<4x128xf32>
    %502 = arith.addf %500, %501 : vector<4x128xf32>
    %503 = math.tanh %502 : vector<4x128xf32>
    %504 = arith.mulf %497, %503 : vector<4x128xf32>
    %c0_243 = arith.constant 0 : index
    %c0_244 = arith.constant 0 : index
    %c0_245 = arith.constant 0 : index
    %505 = vector.load %arg7[%c0_243, %c0_244, %c0_245] : memref<2x4x128xf32, #tpu.memory_space<vmem>>, vector<1x4x128xf32>
    %506 = vector.shape_cast %505 : vector<1x4x128xf32> to vector<4x128xf32>
    %507 = vector.shape_cast %502 : vector<4x128xf32> to vector<1x4x128xf32>
    tpu.vector_store %arg7[%c0_243, %c0_244, %c0_245], %507 {strides = array<i32>} : memref<2x4x128xf32, #tpu.memory_space<vmem>>, vector<1x4x128xf32>,
    %c0_246 = arith.constant 0 : index
    %c0_247 = arith.constant 0 : index
    %c0_248 = arith.constant 0 : index
    %508 = vector.load %arg6[%c0_246, %c0_247, %c0_248] : memref<2x4x128xf32, #tpu.memory_space<vmem>>, vector<1x4x128xf32>
    %509 = vector.shape_cast %508 : vector<1x4x128xf32> to vector<4x128xf32>
    %510 = vector.shape_cast %504 : vector<4x128xf32> to vector<1x4x128xf32>
    tpu.vector_store %arg6[%c0_246, %c0_247, %c0_248], %510 {strides = array<i32>} : memref<2x4x128xf32, #tpu.memory_space<vmem>>, vector<1x4x128xf32>,
    %511 = arith.index_cast %c5_i32 : i32 to index
    %c0_249 = arith.constant 0 : index
    %c0_250 = arith.constant 0 : index
    %512 = vector.load %arg4[%511, %c0_249, %c0_250] : memref<10x4x128xf32, #tpu.memory_space<vmem>>, vector<1x4x128xf32>
    %513 = vector.shape_cast %512 : vector<1x4x128xf32> to vector<4x128xf32>
    %514 = vector.shape_cast %504 : vector<4x128xf32> to vector<1x4x128xf32>
    tpu.vector_store %arg4[%511, %c0_249, %c0_250], %514 {strides = array<i32>} : memref<10x4x128xf32, #tpu.memory_space<vmem>>, vector<1x4x128xf32>,
    %c9_i32_251 = arith.constant 9 : i32
    %515 = arith.subi %c9_i32_251, %c5_i32 : i32
    %516 = arith.index_cast %515 : i32 to index
    %c0_252 = arith.constant 0 : index
    %c0_253 = arith.constant 0 : index
    %517 = vector.load %arg1[%516, %c0_252, %c0_253] : memref<10x4x512xf32, #tpu.memory_space<vmem>>, vector<1x4x512xf32>
    %518 = vector.shape_cast %517 : vector<1x4x512xf32> to vector<4x512xf32>
    %c1_254 = arith.constant 1 : index
    %c0_255 = arith.constant 0 : index
    %c0_256 = arith.constant 0 : index
    %519 = vector.load %arg6[%c1_254, %c0_255, %c0_256] : memref<2x4x128xf32, #tpu.memory_space<vmem>>, vector<1x4x128xf32>
    %520 = vector.shape_cast %519 : vector<1x4x128xf32> to vector<4x128xf32>
    %521 = arith.truncf %520 : vector<4x128xf32> to vector<4x128xbf16>
    %c0_257 = arith.constant 0 : index
    %c0_258 = arith.constant 0 : index
    %522 = vector.load %arg3[%c0_257, %c0_258] : memref<128x512xbf16, #tpu.memory_space<vmem>>, vector<128x512xbf16>
    %cst_259 = arith.constant dense<0.000000e+00> : vector<4x512xf32>
    %523 = tpu.matmul %521, %522, %cst_259 {dimension_numbers = #tpu.dot_dimension_numbers<[1], [0], [0], [1], [0, 0, 1, 1], [], []>} : vector<4x128xbf16>, vector<128x512xbf16>, vector<4x512xf32> -> vector<4x512xf32>
    %524 = arith.addf %518, %523 : vector<4x512xf32>
    %525 = vector.extract_strided_slice %524 {offsets = [0, 0], sizes = [4, 128], strides = [1, 1]} : vector<4x512xf32> to vector<4x128xf32>
    %526 = arith.negf %525 : vector<4x128xf32>
    %527 = math.exp %526 : vector<4x128xf32>
    %cst_260 = arith.constant 1.000000e+00 : f32
    %528 = vector.broadcast %cst_260 : f32 to vector<4x128xf32>
    %529 = arith.addf %528, %527 : vector<4x128xf32>
    %530 = arith.divf %528, %529 : vector<4x128xf32>
    %531 = vector.extract_strided_slice %524 {offsets = [0, 128], sizes = [4, 128], strides = [1, 1]} : vector<4x512xf32> to vector<4x128xf32>
    %532 = arith.negf %531 : vector<4x128xf32>
    %533 = math.exp %532 : vector<4x128xf32>
    %cst_261 = arith.constant 1.000000e+00 : f32
    %534 = vector.broadcast %cst_261 : f32 to vector<4x128xf32>
    %535 = arith.addf %534, %533 : vector<4x128xf32>
    %536 = arith.divf %534, %535 : vector<4x128xf32>
    %537 = vector.extract_strided_slice %524 {offsets = [0, 256], sizes = [4, 128], strides = [1, 1]} : vector<4x512xf32> to vector<4x128xf32>
    %538 = math.tanh %537 : vector<4x128xf32>
    %539 = vector.extract_strided_slice %524 {offsets = [0, 384], sizes = [4, 128], strides = [1, 1]} : vector<4x512xf32> to vector<4x128xf32>
    %540 = arith.negf %539 : vector<4x128xf32>
    %541 = math.exp %540 : vector<4x128xf32>
    %cst_262 = arith.constant 1.000000e+00 : f32
    %542 = vector.broadcast %cst_262 : f32 to vector<4x128xf32>
    %543 = arith.addf %542, %541 : vector<4x128xf32>
    %544 = arith.divf %542, %543 : vector<4x128xf32>
    %c1_263 = arith.constant 1 : index
    %c0_264 = arith.constant 0 : index
    %c0_265 = arith.constant 0 : index
    %545 = vector.load %arg7[%c1_263, %c0_264, %c0_265] : memref<2x4x128xf32, #tpu.memory_space<vmem>>, vector<1x4x128xf32>
    %546 = vector.shape_cast %545 : vector<1x4x128xf32> to vector<4x128xf32>
    %547 = arith.mulf %536, %546 : vector<4x128xf32>
    %548 = arith.mulf %530, %538 : vector<4x128xf32>
    %549 = arith.addf %547, %548 : vector<4x128xf32>
    %550 = math.tanh %549 : vector<4x128xf32>
    %551 = arith.mulf %544, %550 : vector<4x128xf32>
    %c1_266 = arith.constant 1 : index
    %c0_267 = arith.constant 0 : index
    %c0_268 = arith.constant 0 : index
    %552 = vector.load %arg7[%c1_266, %c0_267, %c0_268] : memref<2x4x128xf32, #tpu.memory_space<vmem>>, vector<1x4x128xf32>
    %553 = vector.shape_cast %552 : vector<1x4x128xf32> to vector<4x128xf32>
    %554 = vector.shape_cast %549 : vector<4x128xf32> to vector<1x4x128xf32>
    tpu.vector_store %arg7[%c1_266, %c0_267, %c0_268], %554 {strides = array<i32>} : memref<2x4x128xf32, #tpu.memory_space<vmem>>, vector<1x4x128xf32>,
    %c1_269 = arith.constant 1 : index
    %c0_270 = arith.constant 0 : index
    %c0_271 = arith.constant 0 : index
    %555 = vector.load %arg6[%c1_269, %c0_270, %c0_271] : memref<2x4x128xf32, #tpu.memory_space<vmem>>, vector<1x4x128xf32>
    %556 = vector.shape_cast %555 : vector<1x4x128xf32> to vector<4x128xf32>
    %557 = vector.shape_cast %551 : vector<4x128xf32> to vector<1x4x128xf32>
    tpu.vector_store %arg6[%c1_269, %c0_270, %c0_271], %557 {strides = array<i32>} : memref<2x4x128xf32, #tpu.memory_space<vmem>>, vector<1x4x128xf32>,
    %558 = arith.index_cast %515 : i32 to index
    %c0_272 = arith.constant 0 : index
    %c0_273 = arith.constant 0 : index
    %559 = vector.load %arg5[%558, %c0_272, %c0_273] : memref<10x4x128xf32, #tpu.memory_space<vmem>>, vector<1x4x128xf32>
    %560 = vector.shape_cast %559 : vector<1x4x128xf32> to vector<4x128xf32>
    %561 = vector.shape_cast %551 : vector<4x128xf32> to vector<1x4x128xf32>
    tpu.vector_store %arg5[%558, %c0_272, %c0_273], %561 {strides = array<i32>} : memref<10x4x128xf32, #tpu.memory_space<vmem>>, vector<1x4x128xf32>,
    %c6_i32 = arith.constant 6 : i32
    %562 = arith.index_cast %c6_i32 : i32 to index
    %c0_274 = arith.constant 0 : index
    %c0_275 = arith.constant 0 : index
    %563 = vector.load %arg0[%562, %c0_274, %c0_275] : memref<10x4x512xf32, #tpu.memory_space<vmem>>, vector<1x4x512xf32>
    %564 = vector.shape_cast %563 : vector<1x4x512xf32> to vector<4x512xf32>
    %c0_276 = arith.constant 0 : index
    %c0_277 = arith.constant 0 : index
    %c0_278 = arith.constant 0 : index
    %565 = vector.load %arg6[%c0_276, %c0_277, %c0_278] : memref<2x4x128xf32, #tpu.memory_space<vmem>>, vector<1x4x128xf32>
    %566 = vector.shape_cast %565 : vector<1x4x128xf32> to vector<4x128xf32>
    %567 = arith.truncf %566 : vector<4x128xf32> to vector<4x128xbf16>
    %c0_279 = arith.constant 0 : index
    %c0_280 = arith.constant 0 : index
    %568 = vector.load %arg2[%c0_279, %c0_280] : memref<128x512xbf16, #tpu.memory_space<vmem>>, vector<128x512xbf16>
    %cst_281 = arith.constant dense<0.000000e+00> : vector<4x512xf32>
    %569 = tpu.matmul %567, %568, %cst_281 {dimension_numbers = #tpu.dot_dimension_numbers<[1], [0], [0], [1], [0, 0, 1, 1], [], []>} : vector<4x128xbf16>, vector<128x512xbf16>, vector<4x512xf32> -> vector<4x512xf32>
    %570 = arith.addf %564, %569 : vector<4x512xf32>
    %571 = vector.extract_strided_slice %570 {offsets = [0, 0], sizes = [4, 128], strides = [1, 1]} : vector<4x512xf32> to vector<4x128xf32>
    %572 = arith.negf %571 : vector<4x128xf32>
    %573 = math.exp %572 : vector<4x128xf32>
    %cst_282 = arith.constant 1.000000e+00 : f32
    %574 = vector.broadcast %cst_282 : f32 to vector<4x128xf32>
    %575 = arith.addf %574, %573 : vector<4x128xf32>
    %576 = arith.divf %574, %575 : vector<4x128xf32>
    %577 = vector.extract_strided_slice %570 {offsets = [0, 128], sizes = [4, 128], strides = [1, 1]} : vector<4x512xf32> to vector<4x128xf32>
    %578 = arith.negf %577 : vector<4x128xf32>
    %579 = math.exp %578 : vector<4x128xf32>
    %cst_283 = arith.constant 1.000000e+00 : f32
    %580 = vector.broadcast %cst_283 : f32 to vector<4x128xf32>
    %581 = arith.addf %580, %579 : vector<4x128xf32>
    %582 = arith.divf %580, %581 : vector<4x128xf32>
    %583 = vector.extract_strided_slice %570 {offsets = [0, 256], sizes = [4, 128], strides = [1, 1]} : vector<4x512xf32> to vector<4x128xf32>
    %584 = math.tanh %583 : vector<4x128xf32>
    %585 = vector.extract_strided_slice %570 {offsets = [0, 384], sizes = [4, 128], strides = [1, 1]} : vector<4x512xf32> to vector<4x128xf32>
    %586 = arith.negf %585 : vector<4x128xf32>
    %587 = math.exp %586 : vector<4x128xf32>
    %cst_284 = arith.constant 1.000000e+00 : f32
    %588 = vector.broadcast %cst_284 : f32 to vector<4x128xf32>
    %589 = arith.addf %588, %587 : vector<4x128xf32>
    %590 = arith.divf %588, %589 : vector<4x128xf32>
    %c0_285 = arith.constant 0 : index
    %c0_286 = arith.constant 0 : index
    %c0_287 = arith.constant 0 : index
    %591 = vector.load %arg7[%c0_285, %c0_286, %c0_287] : memref<2x4x128xf32, #tpu.memory_space<vmem>>, vector<1x4x128xf32>
    %592 = vector.shape_cast %591 : vector<1x4x128xf32> to vector<4x128xf32>
    %593 = arith.mulf %582, %592 : vector<4x128xf32>
    %594 = arith.mulf %576, %584 : vector<4x128xf32>
    %595 = arith.addf %593, %594 : vector<4x128xf32>
    %596 = math.tanh %595 : vector<4x128xf32>
    %597 = arith.mulf %590, %596 : vector<4x128xf32>
    %c0_288 = arith.constant 0 : index
    %c0_289 = arith.constant 0 : index
    %c0_290 = arith.constant 0 : index
    %598 = vector.load %arg7[%c0_288, %c0_289, %c0_290] : memref<2x4x128xf32, #tpu.memory_space<vmem>>, vector<1x4x128xf32>
    %599 = vector.shape_cast %598 : vector<1x4x128xf32> to vector<4x128xf32>
    %600 = vector.shape_cast %595 : vector<4x128xf32> to vector<1x4x128xf32>
    tpu.vector_store %arg7[%c0_288, %c0_289, %c0_290], %600 {strides = array<i32>} : memref<2x4x128xf32, #tpu.memory_space<vmem>>, vector<1x4x128xf32>,
    %c0_291 = arith.constant 0 : index
    %c0_292 = arith.constant 0 : index
    %c0_293 = arith.constant 0 : index
    %601 = vector.load %arg6[%c0_291, %c0_292, %c0_293] : memref<2x4x128xf32, #tpu.memory_space<vmem>>, vector<1x4x128xf32>
    %602 = vector.shape_cast %601 : vector<1x4x128xf32> to vector<4x128xf32>
    %603 = vector.shape_cast %597 : vector<4x128xf32> to vector<1x4x128xf32>
    tpu.vector_store %arg6[%c0_291, %c0_292, %c0_293], %603 {strides = array<i32>} : memref<2x4x128xf32, #tpu.memory_space<vmem>>, vector<1x4x128xf32>,
    %604 = arith.index_cast %c6_i32 : i32 to index
    %c0_294 = arith.constant 0 : index
    %c0_295 = arith.constant 0 : index
    %605 = vector.load %arg4[%604, %c0_294, %c0_295] : memref<10x4x128xf32, #tpu.memory_space<vmem>>, vector<1x4x128xf32>
    %606 = vector.shape_cast %605 : vector<1x4x128xf32> to vector<4x128xf32>
    %607 = vector.shape_cast %597 : vector<4x128xf32> to vector<1x4x128xf32>
    tpu.vector_store %arg4[%604, %c0_294, %c0_295], %607 {strides = array<i32>} : memref<10x4x128xf32, #tpu.memory_space<vmem>>, vector<1x4x128xf32>,
    %c9_i32_296 = arith.constant 9 : i32
    %608 = arith.subi %c9_i32_296, %c6_i32 : i32
    %609 = arith.index_cast %608 : i32 to index
    %c0_297 = arith.constant 0 : index
    %c0_298 = arith.constant 0 : index
    %610 = vector.load %arg1[%609, %c0_297, %c0_298] : memref<10x4x512xf32, #tpu.memory_space<vmem>>, vector<1x4x512xf32>
    %611 = vector.shape_cast %610 : vector<1x4x512xf32> to vector<4x512xf32>
    %c1_299 = arith.constant 1 : index
    %c0_300 = arith.constant 0 : index
    %c0_301 = arith.constant 0 : index
    %612 = vector.load %arg6[%c1_299, %c0_300, %c0_301] : memref<2x4x128xf32, #tpu.memory_space<vmem>>, vector<1x4x128xf32>
    %613 = vector.shape_cast %612 : vector<1x4x128xf32> to vector<4x128xf32>
    %614 = arith.truncf %613 : vector<4x128xf32> to vector<4x128xbf16>
    %c0_302 = arith.constant 0 : index
    %c0_303 = arith.constant 0 : index
    %615 = vector.load %arg3[%c0_302, %c0_303] : memref<128x512xbf16, #tpu.memory_space<vmem>>, vector<128x512xbf16>
    %cst_304 = arith.constant dense<0.000000e+00> : vector<4x512xf32>
    %616 = tpu.matmul %614, %615, %cst_304 {dimension_numbers = #tpu.dot_dimension_numbers<[1], [0], [0], [1], [0, 0, 1, 1], [], []>} : vector<4x128xbf16>, vector<128x512xbf16>, vector<4x512xf32> -> vector<4x512xf32>
    %617 = arith.addf %611, %616 : vector<4x512xf32>
    %618 = vector.extract_strided_slice %617 {offsets = [0, 0], sizes = [4, 128], strides = [1, 1]} : vector<4x512xf32> to vector<4x128xf32>
    %619 = arith.negf %618 : vector<4x128xf32>
    %620 = math.exp %619 : vector<4x128xf32>
    %cst_305 = arith.constant 1.000000e+00 : f32
    %621 = vector.broadcast %cst_305 : f32 to vector<4x128xf32>
    %622 = arith.addf %621, %620 : vector<4x128xf32>
    %623 = arith.divf %621, %622 : vector<4x128xf32>
    %624 = vector.extract_strided_slice %617 {offsets = [0, 128], sizes = [4, 128], strides = [1, 1]} : vector<4x512xf32> to vector<4x128xf32>
    %625 = arith.negf %624 : vector<4x128xf32>
    %626 = math.exp %625 : vector<4x128xf32>
    %cst_306 = arith.constant 1.000000e+00 : f32
    %627 = vector.broadcast %cst_306 : f32 to vector<4x128xf32>
    %628 = arith.addf %627, %626 : vector<4x128xf32>
    %629 = arith.divf %627, %628 : vector<4x128xf32>
    %630 = vector.extract_strided_slice %617 {offsets = [0, 256], sizes = [4, 128], strides = [1, 1]} : vector<4x512xf32> to vector<4x128xf32>
    %631 = math.tanh %630 : vector<4x128xf32>
    %632 = vector.extract_strided_slice %617 {offsets = [0, 384], sizes = [4, 128], strides = [1, 1]} : vector<4x512xf32> to vector<4x128xf32>
    %633 = arith.negf %632 : vector<4x128xf32>
    %634 = math.exp %633 : vector<4x128xf32>
    %cst_307 = arith.constant 1.000000e+00 : f32
    %635 = vector.broadcast %cst_307 : f32 to vector<4x128xf32>
    %636 = arith.addf %635, %634 : vector<4x128xf32>
    %637 = arith.divf %635, %636 : vector<4x128xf32>
    %c1_308 = arith.constant 1 : index
    %c0_309 = arith.constant 0 : index
    %c0_310 = arith.constant 0 : index
    %638 = vector.load %arg7[%c1_308, %c0_309, %c0_310] : memref<2x4x128xf32, #tpu.memory_space<vmem>>, vector<1x4x128xf32>
    %639 = vector.shape_cast %638 : vector<1x4x128xf32> to vector<4x128xf32>
    %640 = arith.mulf %629, %639 : vector<4x128xf32>
    %641 = arith.mulf %623, %631 : vector<4x128xf32>
    %642 = arith.addf %640, %641 : vector<4x128xf32>
    %643 = math.tanh %642 : vector<4x128xf32>
    %644 = arith.mulf %637, %643 : vector<4x128xf32>
    %c1_311 = arith.constant 1 : index
    %c0_312 = arith.constant 0 : index
    %c0_313 = arith.constant 0 : index
    %645 = vector.load %arg7[%c1_311, %c0_312, %c0_313] : memref<2x4x128xf32, #tpu.memory_space<vmem>>, vector<1x4x128xf32>
    %646 = vector.shape_cast %645 : vector<1x4x128xf32> to vector<4x128xf32>
    %647 = vector.shape_cast %642 : vector<4x128xf32> to vector<1x4x128xf32>
    tpu.vector_store %arg7[%c1_311, %c0_312, %c0_313], %647 {strides = array<i32>} : memref<2x4x128xf32, #tpu.memory_space<vmem>>, vector<1x4x128xf32>,
    %c1_314 = arith.constant 1 : index
    %c0_315 = arith.constant 0 : index
    %c0_316 = arith.constant 0 : index
    %648 = vector.load %arg6[%c1_314, %c0_315, %c0_316] : memref<2x4x128xf32, #tpu.memory_space<vmem>>, vector<1x4x128xf32>
    %649 = vector.shape_cast %648 : vector<1x4x128xf32> to vector<4x128xf32>
    %650 = vector.shape_cast %644 : vector<4x128xf32> to vector<1x4x128xf32>
    tpu.vector_store %arg6[%c1_314, %c0_315, %c0_316], %650 {strides = array<i32>} : memref<2x4x128xf32, #tpu.memory_space<vmem>>, vector<1x4x128xf32>,
    %651 = arith.index_cast %608 : i32 to index
    %c0_317 = arith.constant 0 : index
    %c0_318 = arith.constant 0 : index
    %652 = vector.load %arg5[%651, %c0_317, %c0_318] : memref<10x4x128xf32, #tpu.memory_space<vmem>>, vector<1x4x128xf32>
    %653 = vector.shape_cast %652 : vector<1x4x128xf32> to vector<4x128xf32>
    %654 = vector.shape_cast %644 : vector<4x128xf32> to vector<1x4x128xf32>
    tpu.vector_store %arg5[%651, %c0_317, %c0_318], %654 {strides = array<i32>} : memref<10x4x128xf32, #tpu.memory_space<vmem>>, vector<1x4x128xf32>,
    %c7_i32 = arith.constant 7 : i32
    %655 = arith.index_cast %c7_i32 : i32 to index
    %c0_319 = arith.constant 0 : index
    %c0_320 = arith.constant 0 : index
    %656 = vector.load %arg0[%655, %c0_319, %c0_320] : memref<10x4x512xf32, #tpu.memory_space<vmem>>, vector<1x4x512xf32>
    %657 = vector.shape_cast %656 : vector<1x4x512xf32> to vector<4x512xf32>
    %c0_321 = arith.constant 0 : index
    %c0_322 = arith.constant 0 : index
    %c0_323 = arith.constant 0 : index
    %658 = vector.load %arg6[%c0_321, %c0_322, %c0_323] : memref<2x4x128xf32, #tpu.memory_space<vmem>>, vector<1x4x128xf32>
    %659 = vector.shape_cast %658 : vector<1x4x128xf32> to vector<4x128xf32>
    %660 = arith.truncf %659 : vector<4x128xf32> to vector<4x128xbf16>
    %c0_324 = arith.constant 0 : index
    %c0_325 = arith.constant 0 : index
    %661 = vector.load %arg2[%c0_324, %c0_325] : memref<128x512xbf16, #tpu.memory_space<vmem>>, vector<128x512xbf16>
    %cst_326 = arith.constant dense<0.000000e+00> : vector<4x512xf32>
    %662 = tpu.matmul %660, %661, %cst_326 {dimension_numbers = #tpu.dot_dimension_numbers<[1], [0], [0], [1], [0, 0, 1, 1], [], []>} : vector<4x128xbf16>, vector<128x512xbf16>, vector<4x512xf32> -> vector<4x512xf32>
    %663 = arith.addf %657, %662 : vector<4x512xf32>
    %664 = vector.extract_strided_slice %663 {offsets = [0, 0], sizes = [4, 128], strides = [1, 1]} : vector<4x512xf32> to vector<4x128xf32>
    %665 = arith.negf %664 : vector<4x128xf32>
    %666 = math.exp %665 : vector<4x128xf32>
    %cst_327 = arith.constant 1.000000e+00 : f32
    %667 = vector.broadcast %cst_327 : f32 to vector<4x128xf32>
    %668 = arith.addf %667, %666 : vector<4x128xf32>
    %669 = arith.divf %667, %668 : vector<4x128xf32>
    %670 = vector.extract_strided_slice %663 {offsets = [0, 128], sizes = [4, 128], strides = [1, 1]} : vector<4x512xf32> to vector<4x128xf32>
    %671 = arith.negf %670 : vector<4x128xf32>
    %672 = math.exp %671 : vector<4x128xf32>
    %cst_328 = arith.constant 1.000000e+00 : f32
    %673 = vector.broadcast %cst_328 : f32 to vector<4x128xf32>
    %674 = arith.addf %673, %672 : vector<4x128xf32>
    %675 = arith.divf %673, %674 : vector<4x128xf32>
    %676 = vector.extract_strided_slice %663 {offsets = [0, 256], sizes = [4, 128], strides = [1, 1]} : vector<4x512xf32> to vector<4x128xf32>
    %677 = math.tanh %676 : vector<4x128xf32>
    %678 = vector.extract_strided_slice %663 {offsets = [0, 384], sizes = [4, 128], strides = [1, 1]} : vector<4x512xf32> to vector<4x128xf32>
    %679 = arith.negf %678 : vector<4x128xf32>
    %680 = math.exp %679 : vector<4x128xf32>
    %cst_329 = arith.constant 1.000000e+00 : f32
    %681 = vector.broadcast %cst_329 : f32 to vector<4x128xf32>
    %682 = arith.addf %681, %680 : vector<4x128xf32>
    %683 = arith.divf %681, %682 : vector<4x128xf32>
    %c0_330 = arith.constant 0 : index
    %c0_331 = arith.constant 0 : index
    %c0_332 = arith.constant 0 : index
    %684 = vector.load %arg7[%c0_330, %c0_331, %c0_332] : memref<2x4x128xf32, #tpu.memory_space<vmem>>, vector<1x4x128xf32>
    %685 = vector.shape_cast %684 : vector<1x4x128xf32> to vector<4x128xf32>
    %686 = arith.mulf %675, %685 : vector<4x128xf32>
    %687 = arith.mulf %669, %677 : vector<4x128xf32>
    %688 = arith.addf %686, %687 : vector<4x128xf32>
    %689 = math.tanh %688 : vector<4x128xf32>
    %690 = arith.mulf %683, %689 : vector<4x128xf32>
    %c0_333 = arith.constant 0 : index
    %c0_334 = arith.constant 0 : index
    %c0_335 = arith.constant 0 : index
    %691 = vector.load %arg7[%c0_333, %c0_334, %c0_335] : memref<2x4x128xf32, #tpu.memory_space<vmem>>, vector<1x4x128xf32>
    %692 = vector.shape_cast %691 : vector<1x4x128xf32> to vector<4x128xf32>
    %693 = vector.shape_cast %688 : vector<4x128xf32> to vector<1x4x128xf32>
    tpu.vector_store %arg7[%c0_333, %c0_334, %c0_335], %693 {strides = array<i32>} : memref<2x4x128xf32, #tpu.memory_space<vmem>>, vector<1x4x128xf32>,
    %c0_336 = arith.constant 0 : index
    %c0_337 = arith.constant 0 : index
    %c0_338 = arith.constant 0 : index
    %694 = vector.load %arg6[%c0_336, %c0_337, %c0_338] : memref<2x4x128xf32, #tpu.memory_space<vmem>>, vector<1x4x128xf32>
    %695 = vector.shape_cast %694 : vector<1x4x128xf32> to vector<4x128xf32>
    %696 = vector.shape_cast %690 : vector<4x128xf32> to vector<1x4x128xf32>
    tpu.vector_store %arg6[%c0_336, %c0_337, %c0_338], %696 {strides = array<i32>} : memref<2x4x128xf32, #tpu.memory_space<vmem>>, vector<1x4x128xf32>,
    %697 = arith.index_cast %c7_i32 : i32 to index
    %c0_339 = arith.constant 0 : index
    %c0_340 = arith.constant 0 : index
    %698 = vector.load %arg4[%697, %c0_339, %c0_340] : memref<10x4x128xf32, #tpu.memory_space<vmem>>, vector<1x4x128xf32>
    %699 = vector.shape_cast %698 : vector<1x4x128xf32> to vector<4x128xf32>
    %700 = vector.shape_cast %690 : vector<4x128xf32> to vector<1x4x128xf32>
    tpu.vector_store %arg4[%697, %c0_339, %c0_340], %700 {strides = array<i32>} : memref<10x4x128xf32, #tpu.memory_space<vmem>>, vector<1x4x128xf32>,
    %c9_i32_341 = arith.constant 9 : i32
    %701 = arith.subi %c9_i32_341, %c7_i32 : i32
    %702 = arith.index_cast %701 : i32 to index
    %c0_342 = arith.constant 0 : index
    %c0_343 = arith.constant 0 : index
    %703 = vector.load %arg1[%702, %c0_342, %c0_343] : memref<10x4x512xf32, #tpu.memory_space<vmem>>, vector<1x4x512xf32>
    %704 = vector.shape_cast %703 : vector<1x4x512xf32> to vector<4x512xf32>
    %c1_344 = arith.constant 1 : index
    %c0_345 = arith.constant 0 : index
    %c0_346 = arith.constant 0 : index
    %705 = vector.load %arg6[%c1_344, %c0_345, %c0_346] : memref<2x4x128xf32, #tpu.memory_space<vmem>>, vector<1x4x128xf32>
    %706 = vector.shape_cast %705 : vector<1x4x128xf32> to vector<4x128xf32>
    %707 = arith.truncf %706 : vector<4x128xf32> to vector<4x128xbf16>
    %c0_347 = arith.constant 0 : index
    %c0_348 = arith.constant 0 : index
    %708 = vector.load %arg3[%c0_347, %c0_348] : memref<128x512xbf16, #tpu.memory_space<vmem>>, vector<128x512xbf16>
    %cst_349 = arith.constant dense<0.000000e+00> : vector<4x512xf32>
    %709 = tpu.matmul %707, %708, %cst_349 {dimension_numbers = #tpu.dot_dimension_numbers<[1], [0], [0], [1], [0, 0, 1, 1], [], []>} : vector<4x128xbf16>, vector<128x512xbf16>, vector<4x512xf32> -> vector<4x512xf32>
    %710 = arith.addf %704, %709 : vector<4x512xf32>
    %711 = vector.extract_strided_slice %710 {offsets = [0, 0], sizes = [4, 128], strides = [1, 1]} : vector<4x512xf32> to vector<4x128xf32>
    %712 = arith.negf %711 : vector<4x128xf32>
    %713 = math.exp %712 : vector<4x128xf32>
    %cst_350 = arith.constant 1.000000e+00 : f32
    %714 = vector.broadcast %cst_350 : f32 to vector<4x128xf32>
    %715 = arith.addf %714, %713 : vector<4x128xf32>
    %716 = arith.divf %714, %715 : vector<4x128xf32>
    %717 = vector.extract_strided_slice %710 {offsets = [0, 128], sizes = [4, 128], strides = [1, 1]} : vector<4x512xf32> to vector<4x128xf32>
    %718 = arith.negf %717 : vector<4x128xf32>
    %719 = math.exp %718 : vector<4x128xf32>
    %cst_351 = arith.constant 1.000000e+00 : f32
    %720 = vector.broadcast %cst_351 : f32 to vector<4x128xf32>
    %721 = arith.addf %720, %719 : vector<4x128xf32>
    %722 = arith.divf %720, %721 : vector<4x128xf32>
    %723 = vector.extract_strided_slice %710 {offsets = [0, 256], sizes = [4, 128], strides = [1, 1]} : vector<4x512xf32> to vector<4x128xf32>
    %724 = math.tanh %723 : vector<4x128xf32>
    %725 = vector.extract_strided_slice %710 {offsets = [0, 384], sizes = [4, 128], strides = [1, 1]} : vector<4x512xf32> to vector<4x128xf32>
    %726 = arith.negf %725 : vector<4x128xf32>
    %727 = math.exp %726 : vector<4x128xf32>
    %cst_352 = arith.constant 1.000000e+00 : f32
    %728 = vector.broadcast %cst_352 : f32 to vector<4x128xf32>
    %729 = arith.addf %728, %727 : vector<4x128xf32>
    %730 = arith.divf %728, %729 : vector<4x128xf32>
    %c1_353 = arith.constant 1 : index
    %c0_354 = arith.constant 0 : index
    %c0_355 = arith.constant 0 : index
    %731 = vector.load %arg7[%c1_353, %c0_354, %c0_355] : memref<2x4x128xf32, #tpu.memory_space<vmem>>, vector<1x4x128xf32>
    %732 = vector.shape_cast %731 : vector<1x4x128xf32> to vector<4x128xf32>
    %733 = arith.mulf %722, %732 : vector<4x128xf32>
    %734 = arith.mulf %716, %724 : vector<4x128xf32>
    %735 = arith.addf %733, %734 : vector<4x128xf32>
    %736 = math.tanh %735 : vector<4x128xf32>
    %737 = arith.mulf %730, %736 : vector<4x128xf32>
    %c1_356 = arith.constant 1 : index
    %c0_357 = arith.constant 0 : index
    %c0_358 = arith.constant 0 : index
    %738 = vector.load %arg7[%c1_356, %c0_357, %c0_358] : memref<2x4x128xf32, #tpu.memory_space<vmem>>, vector<1x4x128xf32>
    %739 = vector.shape_cast %738 : vector<1x4x128xf32> to vector<4x128xf32>
    %740 = vector.shape_cast %735 : vector<4x128xf32> to vector<1x4x128xf32>
    tpu.vector_store %arg7[%c1_356, %c0_357, %c0_358], %740 {strides = array<i32>} : memref<2x4x128xf32, #tpu.memory_space<vmem>>, vector<1x4x128xf32>,
    %c1_359 = arith.constant 1 : index
    %c0_360 = arith.constant 0 : index
    %c0_361 = arith.constant 0 : index
    %741 = vector.load %arg6[%c1_359, %c0_360, %c0_361] : memref<2x4x128xf32, #tpu.memory_space<vmem>>, vector<1x4x128xf32>
    %742 = vector.shape_cast %741 : vector<1x4x128xf32> to vector<4x128xf32>
    %743 = vector.shape_cast %737 : vector<4x128xf32> to vector<1x4x128xf32>
    tpu.vector_store %arg6[%c1_359, %c0_360, %c0_361], %743 {strides = array<i32>} : memref<2x4x128xf32, #tpu.memory_space<vmem>>, vector<1x4x128xf32>,
    %744 = arith.index_cast %701 : i32 to index
    %c0_362 = arith.constant 0 : index
    %c0_363 = arith.constant 0 : index
    %745 = vector.load %arg5[%744, %c0_362, %c0_363] : memref<10x4x128xf32, #tpu.memory_space<vmem>>, vector<1x4x128xf32>
    %746 = vector.shape_cast %745 : vector<1x4x128xf32> to vector<4x128xf32>
    %747 = vector.shape_cast %737 : vector<4x128xf32> to vector<1x4x128xf32>
    tpu.vector_store %arg5[%744, %c0_362, %c0_363], %747 {strides = array<i32>} : memref<10x4x128xf32, #tpu.memory_space<vmem>>, vector<1x4x128xf32>,
    %c8_i32 = arith.constant 8 : i32
    %748 = arith.index_cast %c8_i32 : i32 to index
    %c0_364 = arith.constant 0 : index
    %c0_365 = arith.constant 0 : index
    %749 = vector.load %arg0[%748, %c0_364, %c0_365] : memref<10x4x512xf32, #tpu.memory_space<vmem>>, vector<1x4x512xf32>
    %750 = vector.shape_cast %749 : vector<1x4x512xf32> to vector<4x512xf32>
    %c0_366 = arith.constant 0 : index
    %c0_367 = arith.constant 0 : index
    %c0_368 = arith.constant 0 : index
    %751 = vector.load %arg6[%c0_366, %c0_367, %c0_368] : memref<2x4x128xf32, #tpu.memory_space<vmem>>, vector<1x4x128xf32>
    %752 = vector.shape_cast %751 : vector<1x4x128xf32> to vector<4x128xf32>
    %753 = arith.truncf %752 : vector<4x128xf32> to vector<4x128xbf16>
    %c0_369 = arith.constant 0 : index
    %c0_370 = arith.constant 0 : index
    %754 = vector.load %arg2[%c0_369, %c0_370] : memref<128x512xbf16, #tpu.memory_space<vmem>>, vector<128x512xbf16>
    %cst_371 = arith.constant dense<0.000000e+00> : vector<4x512xf32>
    %755 = tpu.matmul %753, %754, %cst_371 {dimension_numbers = #tpu.dot_dimension_numbers<[1], [0], [0], [1], [0, 0, 1, 1], [], []>} : vector<4x128xbf16>, vector<128x512xbf16>, vector<4x512xf32> -> vector<4x512xf32>
    %756 = arith.addf %750, %755 : vector<4x512xf32>
    %757 = vector.extract_strided_slice %756 {offsets = [0, 0], sizes = [4, 128], strides = [1, 1]} : vector<4x512xf32> to vector<4x128xf32>
    %758 = arith.negf %757 : vector<4x128xf32>
    %759 = math.exp %758 : vector<4x128xf32>
    %cst_372 = arith.constant 1.000000e+00 : f32
    %760 = vector.broadcast %cst_372 : f32 to vector<4x128xf32>
    %761 = arith.addf %760, %759 : vector<4x128xf32>
    %762 = arith.divf %760, %761 : vector<4x128xf32>
    %763 = vector.extract_strided_slice %756 {offsets = [0, 128], sizes = [4, 128], strides = [1, 1]} : vector<4x512xf32> to vector<4x128xf32>
    %764 = arith.negf %763 : vector<4x128xf32>
    %765 = math.exp %764 : vector<4x128xf32>
    %cst_373 = arith.constant 1.000000e+00 : f32
    %766 = vector.broadcast %cst_373 : f32 to vector<4x128xf32>
    %767 = arith.addf %766, %765 : vector<4x128xf32>
    %768 = arith.divf %766, %767 : vector<4x128xf32>
    %769 = vector.extract_strided_slice %756 {offsets = [0, 256], sizes = [4, 128], strides = [1, 1]} : vector<4x512xf32> to vector<4x128xf32>
    %770 = math.tanh %769 : vector<4x128xf32>
    %771 = vector.extract_strided_slice %756 {offsets = [0, 384], sizes = [4, 128], strides = [1, 1]} : vector<4x512xf32> to vector<4x128xf32>
    %772 = arith.negf %771 : vector<4x128xf32>
    %773 = math.exp %772 : vector<4x128xf32>
    %cst_374 = arith.constant 1.000000e+00 : f32
    %774 = vector.broadcast %cst_374 : f32 to vector<4x128xf32>
    %775 = arith.addf %774, %773 : vector<4x128xf32>
    %776 = arith.divf %774, %775 : vector<4x128xf32>
    %c0_375 = arith.constant 0 : index
    %c0_376 = arith.constant 0 : index
    %c0_377 = arith.constant 0 : index
    %777 = vector.load %arg7[%c0_375, %c0_376, %c0_377] : memref<2x4x128xf32, #tpu.memory_space<vmem>>, vector<1x4x128xf32>
    %778 = vector.shape_cast %777 : vector<1x4x128xf32> to vector<4x128xf32>
    %779 = arith.mulf %768, %778 : vector<4x128xf32>
    %780 = arith.mulf %762, %770 : vector<4x128xf32>
    %781 = arith.addf %779, %780 : vector<4x128xf32>
    %782 = math.tanh %781 : vector<4x128xf32>
    %783 = arith.mulf %776, %782 : vector<4x128xf32>
    %c0_378 = arith.constant 0 : index
    %c0_379 = arith.constant 0 : index
    %c0_380 = arith.constant 0 : index
    %784 = vector.load %arg7[%c0_378, %c0_379, %c0_380] : memref<2x4x128xf32, #tpu.memory_space<vmem>>, vector<1x4x128xf32>
    %785 = vector.shape_cast %784 : vector<1x4x128xf32> to vector<4x128xf32>
    %786 = vector.shape_cast %781 : vector<4x128xf32> to vector<1x4x128xf32>
    tpu.vector_store %arg7[%c0_378, %c0_379, %c0_380], %786 {strides = array<i32>} : memref<2x4x128xf32, #tpu.memory_space<vmem>>, vector<1x4x128xf32>,
    %c0_381 = arith.constant 0 : index
    %c0_382 = arith.constant 0 : index
    %c0_383 = arith.constant 0 : index
    %787 = vector.load %arg6[%c0_381, %c0_382, %c0_383] : memref<2x4x128xf32, #tpu.memory_space<vmem>>, vector<1x4x128xf32>
    %788 = vector.shape_cast %787 : vector<1x4x128xf32> to vector<4x128xf32>
    %789 = vector.shape_cast %783 : vector<4x128xf32> to vector<1x4x128xf32>
    tpu.vector_store %arg6[%c0_381, %c0_382, %c0_383], %789 {strides = array<i32>} : memref<2x4x128xf32, #tpu.memory_space<vmem>>, vector<1x4x128xf32>,
    %790 = arith.index_cast %c8_i32 : i32 to index
    %c0_384 = arith.constant 0 : index
    %c0_385 = arith.constant 0 : index
    %791 = vector.load %arg4[%790, %c0_384, %c0_385] : memref<10x4x128xf32, #tpu.memory_space<vmem>>, vector<1x4x128xf32>
    %792 = vector.shape_cast %791 : vector<1x4x128xf32> to vector<4x128xf32>
    %793 = vector.shape_cast %783 : vector<4x128xf32> to vector<1x4x128xf32>
    tpu.vector_store %arg4[%790, %c0_384, %c0_385], %793 {strides = array<i32>} : memref<10x4x128xf32, #tpu.memory_space<vmem>>, vector<1x4x128xf32>,
    %c9_i32_386 = arith.constant 9 : i32
    %794 = arith.subi %c9_i32_386, %c8_i32 : i32
    %795 = arith.index_cast %794 : i32 to index
    %c0_387 = arith.constant 0 : index
    %c0_388 = arith.constant 0 : index
    %796 = vector.load %arg1[%795, %c0_387, %c0_388] : memref<10x4x512xf32, #tpu.memory_space<vmem>>, vector<1x4x512xf32>
    %797 = vector.shape_cast %796 : vector<1x4x512xf32> to vector<4x512xf32>
    %c1_389 = arith.constant 1 : index
    %c0_390 = arith.constant 0 : index
    %c0_391 = arith.constant 0 : index
    %798 = vector.load %arg6[%c1_389, %c0_390, %c0_391] : memref<2x4x128xf32, #tpu.memory_space<vmem>>, vector<1x4x128xf32>
    %799 = vector.shape_cast %798 : vector<1x4x128xf32> to vector<4x128xf32>
    %800 = arith.truncf %799 : vector<4x128xf32> to vector<4x128xbf16>
    %c0_392 = arith.constant 0 : index
    %c0_393 = arith.constant 0 : index
    %801 = vector.load %arg3[%c0_392, %c0_393] : memref<128x512xbf16, #tpu.memory_space<vmem>>, vector<128x512xbf16>
    %cst_394 = arith.constant dense<0.000000e+00> : vector<4x512xf32>
    %802 = tpu.matmul %800, %801, %cst_394 {dimension_numbers = #tpu.dot_dimension_numbers<[1], [0], [0], [1], [0, 0, 1, 1], [], []>} : vector<4x128xbf16>, vector<128x512xbf16>, vector<4x512xf32> -> vector<4x512xf32>
    %803 = arith.addf %797, %802 : vector<4x512xf32>
    %804 = vector.extract_strided_slice %803 {offsets = [0, 0], sizes = [4, 128], strides = [1, 1]} : vector<4x512xf32> to vector<4x128xf32>
    %805 = arith.negf %804 : vector<4x128xf32>
    %806 = math.exp %805 : vector<4x128xf32>
    %cst_395 = arith.constant 1.000000e+00 : f32
    %807 = vector.broadcast %cst_395 : f32 to vector<4x128xf32>
    %808 = arith.addf %807, %806 : vector<4x128xf32>
    %809 = arith.divf %807, %808 : vector<4x128xf32>
    %810 = vector.extract_strided_slice %803 {offsets = [0, 128], sizes = [4, 128], strides = [1, 1]} : vector<4x512xf32> to vector<4x128xf32>
    %811 = arith.negf %810 : vector<4x128xf32>
    %812 = math.exp %811 : vector<4x128xf32>
    %cst_396 = arith.constant 1.000000e+00 : f32
    %813 = vector.broadcast %cst_396 : f32 to vector<4x128xf32>
    %814 = arith.addf %813, %812 : vector<4x128xf32>
    %815 = arith.divf %813, %814 : vector<4x128xf32>
    %816 = vector.extract_strided_slice %803 {offsets = [0, 256], sizes = [4, 128], strides = [1, 1]} : vector<4x512xf32> to vector<4x128xf32>
    %817 = math.tanh %816 : vector<4x128xf32>
    %818 = vector.extract_strided_slice %803 {offsets = [0, 384], sizes = [4, 128], strides = [1, 1]} : vector<4x512xf32> to vector<4x128xf32>
    %819 = arith.negf %818 : vector<4x128xf32>
    %820 = math.exp %819 : vector<4x128xf32>
    %cst_397 = arith.constant 1.000000e+00 : f32
    %821 = vector.broadcast %cst_397 : f32 to vector<4x128xf32>
    %822 = arith.addf %821, %820 : vector<4x128xf32>
    %823 = arith.divf %821, %822 : vector<4x128xf32>
    %c1_398 = arith.constant 1 : index
    %c0_399 = arith.constant 0 : index
    %c0_400 = arith.constant 0 : index
    %824 = vector.load %arg7[%c1_398, %c0_399, %c0_400] : memref<2x4x128xf32, #tpu.memory_space<vmem>>, vector<1x4x128xf32>
    %825 = vector.shape_cast %824 : vector<1x4x128xf32> to vector<4x128xf32>
    %826 = arith.mulf %815, %825 : vector<4x128xf32>
    %827 = arith.mulf %809, %817 : vector<4x128xf32>
    %828 = arith.addf %826, %827 : vector<4x128xf32>
    %829 = math.tanh %828 : vector<4x128xf32>
    %830 = arith.mulf %823, %829 : vector<4x128xf32>
    %c1_401 = arith.constant 1 : index
    %c0_402 = arith.constant 0 : index
    %c0_403 = arith.constant 0 : index
    %831 = vector.load %arg7[%c1_401, %c0_402, %c0_403] : memref<2x4x128xf32, #tpu.memory_space<vmem>>, vector<1x4x128xf32>
    %832 = vector.shape_cast %831 : vector<1x4x128xf32> to vector<4x128xf32>
    %833 = vector.shape_cast %828 : vector<4x128xf32> to vector<1x4x128xf32>
    tpu.vector_store %arg7[%c1_401, %c0_402, %c0_403], %833 {strides = array<i32>} : memref<2x4x128xf32, #tpu.memory_space<vmem>>, vector<1x4x128xf32>,
    %c1_404 = arith.constant 1 : index
    %c0_405 = arith.constant 0 : index
    %c0_406 = arith.constant 0 : index
    %834 = vector.load %arg6[%c1_404, %c0_405, %c0_406] : memref<2x4x128xf32, #tpu.memory_space<vmem>>, vector<1x4x128xf32>
    %835 = vector.shape_cast %834 : vector<1x4x128xf32> to vector<4x128xf32>
    %836 = vector.shape_cast %830 : vector<4x128xf32> to vector<1x4x128xf32>
    tpu.vector_store %arg6[%c1_404, %c0_405, %c0_406], %836 {strides = array<i32>} : memref<2x4x128xf32, #tpu.memory_space<vmem>>, vector<1x4x128xf32>,
    %837 = arith.index_cast %794 : i32 to index
    %c0_407 = arith.constant 0 : index
    %c0_408 = arith.constant 0 : index
    %838 = vector.load %arg5[%837, %c0_407, %c0_408] : memref<10x4x128xf32, #tpu.memory_space<vmem>>, vector<1x4x128xf32>
    %839 = vector.shape_cast %838 : vector<1x4x128xf32> to vector<4x128xf32>
    %840 = vector.shape_cast %830 : vector<4x128xf32> to vector<1x4x128xf32>
    tpu.vector_store %arg5[%837, %c0_407, %c0_408], %840 {strides = array<i32>} : memref<10x4x128xf32, #tpu.memory_space<vmem>>, vector<1x4x128xf32>,
    %c9_i32_409 = arith.constant 9 : i32
    %841 = arith.index_cast %c9_i32_409 : i32 to index
    %c0_410 = arith.constant 0 : index
    %c0_411 = arith.constant 0 : index
    %842 = vector.load %arg0[%841, %c0_410, %c0_411] : memref<10x4x512xf32, #tpu.memory_space<vmem>>, vector<1x4x512xf32>
    %843 = vector.shape_cast %842 : vector<1x4x512xf32> to vector<4x512xf32>
    %c0_412 = arith.constant 0 : index
    %c0_413 = arith.constant 0 : index
    %c0_414 = arith.constant 0 : index
    %844 = vector.load %arg6[%c0_412, %c0_413, %c0_414] : memref<2x4x128xf32, #tpu.memory_space<vmem>>, vector<1x4x128xf32>
    %845 = vector.shape_cast %844 : vector<1x4x128xf32> to vector<4x128xf32>
    %846 = arith.truncf %845 : vector<4x128xf32> to vector<4x128xbf16>
    %c0_415 = arith.constant 0 : index
    %c0_416 = arith.constant 0 : index
    %847 = vector.load %arg2[%c0_415, %c0_416] : memref<128x512xbf16, #tpu.memory_space<vmem>>, vector<128x512xbf16>
    %cst_417 = arith.constant dense<0.000000e+00> : vector<4x512xf32>
    %848 = tpu.matmul %846, %847, %cst_417 {dimension_numbers = #tpu.dot_dimension_numbers<[1], [0], [0], [1], [0, 0, 1, 1], [], []>} : vector<4x128xbf16>, vector<128x512xbf16>, vector<4x512xf32> -> vector<4x512xf32>
    %849 = arith.addf %843, %848 : vector<4x512xf32>
    %850 = vector.extract_strided_slice %849 {offsets = [0, 0], sizes = [4, 128], strides = [1, 1]} : vector<4x512xf32> to vector<4x128xf32>
    %851 = arith.negf %850 : vector<4x128xf32>
    %852 = math.exp %851 : vector<4x128xf32>
    %cst_418 = arith.constant 1.000000e+00 : f32
    %853 = vector.broadcast %cst_418 : f32 to vector<4x128xf32>
    %854 = arith.addf %853, %852 : vector<4x128xf32>
    %855 = arith.divf %853, %854 : vector<4x128xf32>
    %856 = vector.extract_strided_slice %849 {offsets = [0, 128], sizes = [4, 128], strides = [1, 1]} : vector<4x512xf32> to vector<4x128xf32>
    %857 = arith.negf %856 : vector<4x128xf32>
    %858 = math.exp %857 : vector<4x128xf32>
    %cst_419 = arith.constant 1.000000e+00 : f32
    %859 = vector.broadcast %cst_419 : f32 to vector<4x128xf32>
    %860 = arith.addf %859, %858 : vector<4x128xf32>
    %861 = arith.divf %859, %860 : vector<4x128xf32>
    %862 = vector.extract_strided_slice %849 {offsets = [0, 256], sizes = [4, 128], strides = [1, 1]} : vector<4x512xf32> to vector<4x128xf32>
    %863 = math.tanh %862 : vector<4x128xf32>
    %864 = vector.extract_strided_slice %849 {offsets = [0, 384], sizes = [4, 128], strides = [1, 1]} : vector<4x512xf32> to vector<4x128xf32>
    %865 = arith.negf %864 : vector<4x128xf32>
    %866 = math.exp %865 : vector<4x128xf32>
    %cst_420 = arith.constant 1.000000e+00 : f32
    %867 = vector.broadcast %cst_420 : f32 to vector<4x128xf32>
    %868 = arith.addf %867, %866 : vector<4x128xf32>
    %869 = arith.divf %867, %868 : vector<4x128xf32>
    %c0_421 = arith.constant 0 : index
    %c0_422 = arith.constant 0 : index
    %c0_423 = arith.constant 0 : index
    %870 = vector.load %arg7[%c0_421, %c0_422, %c0_423] : memref<2x4x128xf32, #tpu.memory_space<vmem>>, vector<1x4x128xf32>
    %871 = vector.shape_cast %870 : vector<1x4x128xf32> to vector<4x128xf32>
    %872 = arith.mulf %861, %871 : vector<4x128xf32>
    %873 = arith.mulf %855, %863 : vector<4x128xf32>
    %874 = arith.addf %872, %873 : vector<4x128xf32>
    %875 = math.tanh %874 : vector<4x128xf32>
    %876 = arith.mulf %869, %875 : vector<4x128xf32>
    %c0_424 = arith.constant 0 : index
    %c0_425 = arith.constant 0 : index
    %c0_426 = arith.constant 0 : index
    %877 = vector.load %arg7[%c0_424, %c0_425, %c0_426] : memref<2x4x128xf32, #tpu.memory_space<vmem>>, vector<1x4x128xf32>
    %878 = vector.shape_cast %877 : vector<1x4x128xf32> to vector<4x128xf32>
    %879 = vector.shape_cast %874 : vector<4x128xf32> to vector<1x4x128xf32>
    tpu.vector_store %arg7[%c0_424, %c0_425, %c0_426], %879 {strides = array<i32>} : memref<2x4x128xf32, #tpu.memory_space<vmem>>, vector<1x4x128xf32>,
    %c0_427 = arith.constant 0 : index
    %c0_428 = arith.constant 0 : index
    %c0_429 = arith.constant 0 : index
    %880 = vector.load %arg6[%c0_427, %c0_428, %c0_429] : memref<2x4x128xf32, #tpu.memory_space<vmem>>, vector<1x4x128xf32>
    %881 = vector.shape_cast %880 : vector<1x4x128xf32> to vector<4x128xf32>
    %882 = vector.shape_cast %876 : vector<4x128xf32> to vector<1x4x128xf32>
    tpu.vector_store %arg6[%c0_427, %c0_428, %c0_429], %882 {strides = array<i32>} : memref<2x4x128xf32, #tpu.memory_space<vmem>>, vector<1x4x128xf32>,
    %883 = arith.index_cast %c9_i32_409 : i32 to index
    %c0_430 = arith.constant 0 : index
    %c0_431 = arith.constant 0 : index
    %884 = vector.load %arg4[%883, %c0_430, %c0_431] : memref<10x4x128xf32, #tpu.memory_space<vmem>>, vector<1x4x128xf32>
    %885 = vector.shape_cast %884 : vector<1x4x128xf32> to vector<4x128xf32>
    %886 = vector.shape_cast %876 : vector<4x128xf32> to vector<1x4x128xf32>
    tpu.vector_store %arg4[%883, %c0_430, %c0_431], %886 {strides = array<i32>} : memref<10x4x128xf32, #tpu.memory_space<vmem>>, vector<1x4x128xf32>,
    %c9_i32_432 = arith.constant 9 : i32
    %887 = arith.subi %c9_i32_432, %c9_i32_409 : i32
    %888 = arith.index_cast %887 : i32 to index
    %c0_433 = arith.constant 0 : index
    %c0_434 = arith.constant 0 : index
    %889 = vector.load %arg1[%888, %c0_433, %c0_434] : memref<10x4x512xf32, #tpu.memory_space<vmem>>, vector<1x4x512xf32>
    %890 = vector.shape_cast %889 : vector<1x4x512xf32> to vector<4x512xf32>
    %c1_435 = arith.constant 1 : index
    %c0_436 = arith.constant 0 : index
    %c0_437 = arith.constant 0 : index
    %891 = vector.load %arg6[%c1_435, %c0_436, %c0_437] : memref<2x4x128xf32, #tpu.memory_space<vmem>>, vector<1x4x128xf32>
    %892 = vector.shape_cast %891 : vector<1x4x128xf32> to vector<4x128xf32>
    %893 = arith.truncf %892 : vector<4x128xf32> to vector<4x128xbf16>
    %c0_438 = arith.constant 0 : index
    %c0_439 = arith.constant 0 : index
    %894 = vector.load %arg3[%c0_438, %c0_439] : memref<128x512xbf16, #tpu.memory_space<vmem>>, vector<128x512xbf16>
    %cst_440 = arith.constant dense<0.000000e+00> : vector<4x512xf32>
    %895 = tpu.matmul %893, %894, %cst_440 {dimension_numbers = #tpu.dot_dimension_numbers<[1], [0], [0], [1], [0, 0, 1, 1], [], []>} : vector<4x128xbf16>, vector<128x512xbf16>, vector<4x512xf32> -> vector<4x512xf32>
    %896 = arith.addf %890, %895 : vector<4x512xf32>
    %897 = vector.extract_strided_slice %896 {offsets = [0, 0], sizes = [4, 128], strides = [1, 1]} : vector<4x512xf32> to vector<4x128xf32>
    %898 = arith.negf %897 : vector<4x128xf32>
    %899 = math.exp %898 : vector<4x128xf32>
    %cst_441 = arith.constant 1.000000e+00 : f32
    %900 = vector.broadcast %cst_441 : f32 to vector<4x128xf32>
    %901 = arith.addf %900, %899 : vector<4x128xf32>
    %902 = arith.divf %900, %901 : vector<4x128xf32>
    %903 = vector.extract_strided_slice %896 {offsets = [0, 128], sizes = [4, 128], strides = [1, 1]} : vector<4x512xf32> to vector<4x128xf32>
    %904 = arith.negf %903 : vector<4x128xf32>
    %905 = math.exp %904 : vector<4x128xf32>
    %cst_442 = arith.constant 1.000000e+00 : f32
    %906 = vector.broadcast %cst_442 : f32 to vector<4x128xf32>
    %907 = arith.addf %906, %905 : vector<4x128xf32>
    %908 = arith.divf %906, %907 : vector<4x128xf32>
    %909 = vector.extract_strided_slice %896 {offsets = [0, 256], sizes = [4, 128], strides = [1, 1]} : vector<4x512xf32> to vector<4x128xf32>
    %910 = math.tanh %909 : vector<4x128xf32>
    %911 = vector.extract_strided_slice %896 {offsets = [0, 384], sizes = [4, 128], strides = [1, 1]} : vector<4x512xf32> to vector<4x128xf32>
    %912 = arith.negf %911 : vector<4x128xf32>
    %913 = math.exp %912 : vector<4x128xf32>
    %cst_443 = arith.constant 1.000000e+00 : f32
    %914 = vector.broadcast %cst_443 : f32 to vector<4x128xf32>
    %915 = arith.addf %914, %913 : vector<4x128xf32>
    %916 = arith.divf %914, %915 : vector<4x128xf32>
    %c1_444 = arith.constant 1 : index
    %c0_445 = arith.constant 0 : index
    %c0_446 = arith.constant 0 : index
    %917 = vector.load %arg7[%c1_444, %c0_445, %c0_446] : memref<2x4x128xf32, #tpu.memory_space<vmem>>, vector<1x4x128xf32>
    %918 = vector.shape_cast %917 : vector<1x4x128xf32> to vector<4x128xf32>
    %919 = arith.mulf %908, %918 : vector<4x128xf32>
    %920 = arith.mulf %902, %910 : vector<4x128xf32>
    %921 = arith.addf %919, %920 : vector<4x128xf32>
    %922 = math.tanh %921 : vector<4x128xf32>
    %923 = arith.mulf %916, %922 : vector<4x128xf32>
    %c1_447 = arith.constant 1 : index
    %c0_448 = arith.constant 0 : index
    %c0_449 = arith.constant 0 : index
    %924 = vector.load %arg7[%c1_447, %c0_448, %c0_449] : memref<2x4x128xf32, #tpu.memory_space<vmem>>, vector<1x4x128xf32>
    %925 = vector.shape_cast %924 : vector<1x4x128xf32> to vector<4x128xf32>
    %926 = vector.shape_cast %921 : vector<4x128xf32> to vector<1x4x128xf32>
    tpu.vector_store %arg7[%c1_447, %c0_448, %c0_449], %926 {strides = array<i32>} : memref<2x4x128xf32, #tpu.memory_space<vmem>>, vector<1x4x128xf32>,
    %c1_450 = arith.constant 1 : index
    %c0_451 = arith.constant 0 : index
    %c0_452 = arith.constant 0 : index
    %927 = vector.load %arg6[%c1_450, %c0_451, %c0_452] : memref<2x4x128xf32, #tpu.memory_space<vmem>>, vector<1x4x128xf32>
    %928 = vector.shape_cast %927 : vector<1x4x128xf32> to vector<4x128xf32>
    %929 = vector.shape_cast %923 : vector<4x128xf32> to vector<1x4x128xf32>
    tpu.vector_store %arg6[%c1_450, %c0_451, %c0_452], %929 {strides = array<i32>} : memref<2x4x128xf32, #tpu.memory_space<vmem>>, vector<1x4x128xf32>,
    %930 = arith.index_cast %887 : i32 to index
    %c0_453 = arith.constant 0 : index
    %c0_454 = arith.constant 0 : index
    %931 = vector.load %arg5[%930, %c0_453, %c0_454] : memref<10x4x128xf32, #tpu.memory_space<vmem>>, vector<1x4x128xf32>
    %932 = vector.shape_cast %931 : vector<1x4x128xf32> to vector<4x128xf32>
    %933 = vector.shape_cast %923 : vector<4x128xf32> to vector<1x4x128xf32>
    tpu.vector_store %arg5[%930, %c0_453, %c0_454], %933 {strides = array<i32>} : memref<10x4x128xf32, #tpu.memory_space<vmem>>, vector<1x4x128xf32>,
    %c10_i32 = arith.constant 10 : i32
    return
  }
}

module attributes {stable_mosaic.version = 11 : i64} {
  func.func @_linear_kernel(%arg0: i32, %arg1: i32, %arg2: i32, %arg3: memref<40x128xbf16, #tpu.memory_space<vmem>>, %arg4: memref<128x128xbf16, #tpu.memory_space<vmem>>, %arg5: memref<1x128xf32, #tpu.memory_space<vmem>>, %arg6: memref<1x128xf32, #tpu.memory_space<vmem>>, %arg7: memref<1x128xf32, #tpu.memory_space<vmem>>, %arg8: memref<40x128xbf16, #tpu.memory_space<vmem>>, %arg9: memref<40x128xf32, #tpu.memory_space<vmem>>) attributes {dimension_semantics = [#tpu.dimension_semantics<parallel>, #tpu.dimension_semantics<parallel>, #tpu.dimension_semantics<arbitrary>], iteration_bounds = array<i64: 1, 1, 1>, scalar_prefetch = 0 : i64, scratch_operands = 1 : i64, tpu.core_type = #tpu.core_type<tc>, window_params = [{transform_indices = @transform_0, window_bounds = array<i64: 40, 128>}, {transform_indices = @transform_1, window_bounds = array<i64: 128, 128>}, {transform_indices = @transform_2, window_bounds = array<i64: 1, 128>}, {transform_indices = @transform_3, window_bounds = array<i64: 1, 128>}, {transform_indices = @transform_4, window_bounds = array<i64: 1, 128>}, {transform_indices = @transform_5, window_bounds = array<i64: 40, 128>}]} {
    %c0_i32 = arith.constant 0 : i32
    %0 = arith.cmpi eq, %arg2, %c0_i32 : i32
    %1 = arith.extui %0 : i1 to i32
    %c0_i32_0 = arith.constant 0 : i32
    %2 = arith.cmpi ne, %1, %c0_i32_0 : i32
    scf.if %2 {
      %cst_10 = arith.constant 0.000000e+00 : f32
      %12 = vector.broadcast %cst_10 : f32 to vector<40x128xf32>
      %c0_11 = arith.constant 0 : index
      %c0_12 = arith.constant 0 : index
      %13 = vector.load %arg9[%c0_11, %c0_12] : memref<40x128xf32, #tpu.memory_space<vmem>>, vector<40x128xf32>
      tpu.vector_store %arg9[%c0_11, %c0_12], %12 {strides = array<i32>} : memref<40x128xf32, #tpu.memory_space<vmem>>, vector<40x128xf32>,
    } else {
    }
    %c0 = arith.constant 0 : index
    %c0_1 = arith.constant 0 : index
    %3 = vector.load %arg9[%c0, %c0_1] : memref<40x128xf32, #tpu.memory_space<vmem>>, vector<40x128xf32>
    %c0_2 = arith.constant 0 : index
    %c0_3 = arith.constant 0 : index
    %4 = vector.load %arg3[%c0_2, %c0_3] : memref<40x128xbf16, #tpu.memory_space<vmem>>, vector<40x128xbf16>
    %c0_4 = arith.constant 0 : index
    %c0_5 = arith.constant 0 : index
    %5 = vector.load %arg4[%c0_4, %c0_5] : memref<128x128xbf16, #tpu.memory_space<vmem>>, vector<128x128xbf16>
    %cst = arith.constant dense<0.000000e+00> : vector<40x128xf32>
    %6 = tpu.matmul %4, %5, %cst {dimension_numbers = #tpu.dot_dimension_numbers<[1], [0], [0], [1], [0, 0, 1, 1], [], []>} : vector<40x128xbf16>, vector<128x128xbf16>, vector<40x128xf32> -> vector<40x128xf32>
    %7 = arith.addf %3, %6 : vector<40x128xf32>
    %c0_6 = arith.constant 0 : index
    %c0_7 = arith.constant 0 : index
    %8 = vector.load %arg9[%c0_6, %c0_7] : memref<40x128xf32, #tpu.memory_space<vmem>>, vector<40x128xf32>
    tpu.vector_store %arg9[%c0_6, %c0_7], %7 {strides = array<i32>} : memref<40x128xf32, #tpu.memory_space<vmem>>, vector<40x128xf32>,
    %c0_i32_8 = arith.constant 0 : i32
    %9 = arith.cmpi eq, %arg2, %c0_i32_8 : i32
    %10 = arith.extui %9 : i1 to i32
    %c0_i32_9 = arith.constant 0 : i32
    %11 = arith.cmpi ne, %10, %c0_i32_9 : i32
    scf.if %11 {
      %c0_10 = arith.constant 0 : index
      %c0_11 = arith.constant 0 : index
      %12 = vector.load %arg9[%c0_10, %c0_11] : memref<40x128xf32, #tpu.memory_space<vmem>>, vector<40x128xf32>
      %c0_12 = arith.constant 0 : index
      %c0_13 = arith.constant 0 : index
      %13 = vector.load %arg5[%c0_12, %c0_13] : memref<1x128xf32, #tpu.memory_space<vmem>>, vector<1x128xf32>
      %14 = vector.broadcast %13 : vector<1x128xf32> to vector<40x128xf32>
      %15 = arith.addf %12, %14 : vector<40x128xf32>
      %c0_14 = arith.constant 0 : index
      %c0_15 = arith.constant 0 : index
      %16 = vector.load %arg6[%c0_14, %c0_15] : memref<1x128xf32, #tpu.memory_space<vmem>>, vector<1x128xf32>
      %17 = vector.broadcast %16 : vector<1x128xf32> to vector<40x128xf32>
      %18 = arith.mulf %15, %17 : vector<40x128xf32>
      %c0_16 = arith.constant 0 : index
      %c0_17 = arith.constant 0 : index
      %19 = vector.load %arg7[%c0_16, %c0_17] : memref<1x128xf32, #tpu.memory_space<vmem>>, vector<1x128xf32>
      %20 = vector.broadcast %19 : vector<1x128xf32> to vector<40x128xf32>
      %21 = arith.addf %18, %20 : vector<40x128xf32>
      %22 = arith.truncf %21 : vector<40x128xf32> to vector<40x128xbf16>
      %c0_18 = arith.constant 0 : index
      %c0_19 = arith.constant 0 : index
      %23 = vector.load %arg8[%c0_18, %c0_19] : memref<40x128xbf16, #tpu.memory_space<vmem>>, vector<40x128xbf16>
      tpu.vector_store %arg8[%c0_18, %c0_19], %22 {strides = array<i32>} : memref<40x128xbf16, #tpu.memory_space<vmem>>, vector<40x128xbf16>,
    } else {
    }
    return
  }
  func.func @transform_0(%arg0: i32, %arg1: i32, %arg2: i32) -> (i32, i32) {
    %c0_i32 = arith.constant 0 : i32
    return %arg0, %arg2 : i32, i32
  }
  func.func @transform_1(%arg0: i32, %arg1: i32, %arg2: i32) -> (i32, i32) {
    %c0_i32 = arith.constant 0 : i32
    return %arg2, %arg1 : i32, i32
  }
  func.func @transform_2(%arg0: i32, %arg1: i32, %arg2: i32) -> (i32, i32) {
    %c0_i32 = arith.constant 0 : i32
    %c0_i32_0 = arith.constant 0 : i32
    return %c0_i32, %arg1 : i32, i32
  }
  func.func @transform_3(%arg0: i32, %arg1: i32, %arg2: i32) -> (i32, i32) {
    %c0_i32 = arith.constant 0 : i32
    %c0_i32_0 = arith.constant 0 : i32
    return %c0_i32, %arg1 : i32, i32
  }
  func.func @transform_4(%arg0: i32, %arg1: i32, %arg2: i32) -> (i32, i32) {
    %c0_i32 = arith.constant 0 : i32
    %c0_i32_0 = arith.constant 0 : i32
    return %c0_i32, %arg1 : i32, i32
  }
  func.func @transform_5(%arg0: i32, %arg1: i32, %arg2: i32) -> (i32, i32) {
    %c0_i32 = arith.constant 0 : i32
    return %arg0, %arg1 : i32, i32
  }
}

module attributes {stable_mosaic.version = 11 : i64} {
  func.func @_attn_kernel(%arg0: i32, %arg1: memref<40x4x8xbf16, #tpu.memory_space<vmem>>, %arg2: memref<40x4x8xbf16, #tpu.memory_space<vmem>>, %arg3: memref<40x4x8xbf16, #tpu.memory_space<vmem>>, %arg4: memref<40x4x8xbf16, #tpu.memory_space<vmem>>) attributes {dimension_semantics = [#tpu.dimension_semantics<parallel>], iteration_bounds = array<i64: 1>, scalar_prefetch = 0 : i64, scratch_operands = 0 : i64, tpu.core_type = #tpu.core_type<tc>, window_params = [{transform_indices = @transform_0, window_bounds = array<i64: 40, 4, 8>}, {transform_indices = @transform_1, window_bounds = array<i64: 40, 4, 8>}, {transform_indices = @transform_2, window_bounds = array<i64: 40, 4, 8>}, {transform_indices = @transform_3, window_bounds = array<i64: 40, 4, 8>}]} {
    %c0 = arith.constant 0 : index
    %c0_0 = arith.constant 0 : index
    %c0_1 = arith.constant 0 : index
    %0 = vector.load %arg1[%c0, %c0_0, %c0_1] : memref<40x4x8xbf16, #tpu.memory_space<vmem>>, vector<40x4x8xbf16>
    %c0_2 = arith.constant 0 : index
    %c0_3 = arith.constant 0 : index
    %c0_4 = arith.constant 0 : index
    %1 = vector.load %arg2[%c0_2, %c0_3, %c0_4] : memref<40x4x8xbf16, #tpu.memory_space<vmem>>, vector<40x4x8xbf16>
    "tpu.trace_start"() <{level = 10 : i32, message = "gld,gmd->glm"}> : () -> ()
    %cst = arith.constant dense<0.000000e+00> : vector<40x4x4xf32>
    %2 = tpu.matmul %0, %1, %cst {dimension_numbers = #tpu.dot_dimension_numbers<[2], [2], [1], [1], [0, 0, 0, 1, 1, 1], [0], [0]>} : vector<40x4x8xbf16>, vector<40x4x8xbf16>, vector<40x4x4xf32> -> vector<40x4x4xf32>
    "tpu.trace_stop"() : () -> ()
    %cst_5 = arith.constant 0.353553385 : f32
    %3 = vector.broadcast %cst_5 : f32 to vector<40x4x4xf32>
    %4 = arith.mulf %2, %3 : vector<40x4x4xf32>
    %cst_6 = arith.constant dense<0xFF800000> : vector<40x4xf32>
    %5 = vector.multi_reduction <maximumf>, %4, %cst_6 [2] : vector<40x4x4xf32> to vector<40x4xf32>
    %6 = vector.shape_cast %5 : vector<40x4xf32> to vector<40x4x1xf32>
    %7 = vector.broadcast %6 : vector<40x4x1xf32> to vector<40x4x4xf32>
    %8 = arith.subf %4, %7 : vector<40x4x4xf32>
    %9 = math.exp %8 : vector<40x4x4xf32>
    %cst_7 = arith.constant dense<0.000000e+00> : vector<40x4xf32>
    %10 = vector.multi_reduction <add>, %9, %cst_7 [2] : vector<40x4x4xf32> to vector<40x4xf32>
    %11 = vector.shape_cast %10 : vector<40x4xf32> to vector<40x4x1xf32>
    %12 = tpu.reciprocal %11 {approx = true} : vector<40x4x1xf32> -> vector<40x4x1xf32>
    %13 = vector.broadcast %12 : vector<40x4x1xf32> to vector<40x4x4xf32>
    %14 = arith.mulf %9, %13 : vector<40x4x4xf32>
    %15 = arith.truncf %14 : vector<40x4x4xf32> to vector<40x4x4xbf16>
    %c0_8 = arith.constant 0 : index
    %c0_9 = arith.constant 0 : index
    %c0_10 = arith.constant 0 : index
    %16 = vector.load %arg3[%c0_8, %c0_9, %c0_10] : memref<40x4x8xbf16, #tpu.memory_space<vmem>>, vector<40x4x8xbf16>
    "tpu.trace_start"() <{level = 10 : i32, message = "glm,gmd->gld"}> : () -> ()
    %cst_11 = arith.constant dense<0.000000e+00> : vector<40x4x8xf32>
    %17 = tpu.matmul %15, %16, %cst_11 {dimension_numbers = #tpu.dot_dimension_numbers<[2], [1], [1], [2], [0, 0, 0, 1, 1, 2], [0], [0]>} : vector<40x4x4xbf16>, vector<40x4x8xbf16>, vector<40x4x8xf32> -> vector<40x4x8xf32>
    "tpu.trace_stop"() : () -> ()
    %18 = arith.truncf %17 : vector<40x4x8xf32> to vector<40x4x8xbf16>
    %c0_12 = arith.constant 0 : index
    %c0_13 = arith.constant 0 : index
    %c0_14 = arith.constant 0 : index
    %19 = vector.load %arg4[%c0_12, %c0_13, %c0_14] : memref<40x4x8xbf16, #tpu.memory_space<vmem>>, vector<40x4x8xbf16>
    tpu.vector_store %arg4[%c0_12, %c0_13, %c0_14], %18 {strides = array<i32>} : memref<40x4x8xbf16, #tpu.memory_space<vmem>>, vector<40x4x8xbf16>,
    return
  }
  func.func @transform_0(%arg0: i32) -> (i32, i32, i32) {
    %c0_i32 = arith.constant 0 : i32
    %c0_i32_0 = arith.constant 0 : i32
    %c0_i32_1 = arith.constant 0 : i32
    return %arg0, %c0_i32, %c0_i32_0 : i32, i32, i32
  }
  func.func @transform_1(%arg0: i32) -> (i32, i32, i32) {
    %c0_i32 = arith.constant 0 : i32
    %c0_i32_0 = arith.constant 0 : i32
    %c0_i32_1 = arith.constant 0 : i32
    return %arg0, %c0_i32, %c0_i32_0 : i32, i32, i32
  }
  func.func @transform_2(%arg0: i32) -> (i32, i32, i32) {
    %c0_i32 = arith.constant 0 : i32
    %c0_i32_0 = arith.constant 0 : i32
    %c0_i32_1 = arith.constant 0 : i32
    return %arg0, %c0_i32, %c0_i32_0 : i32, i32, i32
  }
  func.func @transform_3(%arg0: i32) -> (i32, i32, i32) {
    %c0_i32 = arith.constant 0 : i32
    %c0_i32_0 = arith.constant 0 : i32
    %c0_i32_1 = arith.constant 0 : i32
    return %arg0, %c0_i32, %c0_i32_0 : i32, i32, i32
  }
}

module attributes {stable_mosaic.version = 11 : i64} {
  func.func @_linear_kernel(%arg0: i32, %arg1: i32, %arg2: i32, %arg3: memref<40x128xbf16, #tpu.memory_space<vmem>>, %arg4: memref<128x128xbf16, #tpu.memory_space<vmem>>, %arg5: memref<1x128xf32, #tpu.memory_space<vmem>>, %arg6: memref<1x128xf32, #tpu.memory_space<vmem>>, %arg7: memref<1x128xf32, #tpu.memory_space<vmem>>, %arg8: memref<40x128xf32, #tpu.memory_space<vmem>>, %arg9: memref<40x128xf32, #tpu.memory_space<vmem>>) attributes {dimension_semantics = [#tpu.dimension_semantics<parallel>, #tpu.dimension_semantics<parallel>, #tpu.dimension_semantics<arbitrary>], iteration_bounds = array<i64: 1, 1, 1>, scalar_prefetch = 0 : i64, scratch_operands = 1 : i64, tpu.core_type = #tpu.core_type<tc>, window_params = [{transform_indices = @transform_0, window_bounds = array<i64: 40, 128>}, {transform_indices = @transform_1, window_bounds = array<i64: 128, 128>}, {transform_indices = @transform_2, window_bounds = array<i64: 1, 128>}, {transform_indices = @transform_3, window_bounds = array<i64: 1, 128>}, {transform_indices = @transform_4, window_bounds = array<i64: 1, 128>}, {transform_indices = @transform_5, window_bounds = array<i64: 40, 128>}]} {
    %c0_i32 = arith.constant 0 : i32
    %0 = arith.cmpi eq, %arg2, %c0_i32 : i32
    %1 = arith.extui %0 : i1 to i32
    %c0_i32_0 = arith.constant 0 : i32
    %2 = arith.cmpi ne, %1, %c0_i32_0 : i32
    scf.if %2 {
      %cst_10 = arith.constant 0.000000e+00 : f32
      %12 = vector.broadcast %cst_10 : f32 to vector<40x128xf32>
      %c0_11 = arith.constant 0 : index
      %c0_12 = arith.constant 0 : index
      %13 = vector.load %arg9[%c0_11, %c0_12] : memref<40x128xf32, #tpu.memory_space<vmem>>, vector<40x128xf32>
      tpu.vector_store %arg9[%c0_11, %c0_12], %12 {strides = array<i32>} : memref<40x128xf32, #tpu.memory_space<vmem>>, vector<40x128xf32>,
    } else {
    }
    %c0 = arith.constant 0 : index
    %c0_1 = arith.constant 0 : index
    %3 = vector.load %arg9[%c0, %c0_1] : memref<40x128xf32, #tpu.memory_space<vmem>>, vector<40x128xf32>
    %c0_2 = arith.constant 0 : index
    %c0_3 = arith.constant 0 : index
    %4 = vector.load %arg3[%c0_2, %c0_3] : memref<40x128xbf16, #tpu.memory_space<vmem>>, vector<40x128xbf16>
    %c0_4 = arith.constant 0 : index
    %c0_5 = arith.constant 0 : index
    %5 = vector.load %arg4[%c0_4, %c0_5] : memref<128x128xbf16, #tpu.memory_space<vmem>>, vector<128x128xbf16>
    %cst = arith.constant dense<0.000000e+00> : vector<40x128xf32>
    %6 = tpu.matmul %4, %5, %cst {dimension_numbers = #tpu.dot_dimension_numbers<[1], [0], [0], [1], [0, 0, 1, 1], [], []>} : vector<40x128xbf16>, vector<128x128xbf16>, vector<40x128xf32> -> vector<40x128xf32>
    %7 = arith.addf %3, %6 : vector<40x128xf32>
    %c0_6 = arith.constant 0 : index
    %c0_7 = arith.constant 0 : index
    %8 = vector.load %arg9[%c0_6, %c0_7] : memref<40x128xf32, #tpu.memory_space<vmem>>, vector<40x128xf32>
    tpu.vector_store %arg9[%c0_6, %c0_7], %7 {strides = array<i32>} : memref<40x128xf32, #tpu.memory_space<vmem>>, vector<40x128xf32>,
    %c0_i32_8 = arith.constant 0 : i32
    %9 = arith.cmpi eq, %arg2, %c0_i32_8 : i32
    %10 = arith.extui %9 : i1 to i32
    %c0_i32_9 = arith.constant 0 : i32
    %11 = arith.cmpi ne, %10, %c0_i32_9 : i32
    scf.if %11 {
      %c0_10 = arith.constant 0 : index
      %c0_11 = arith.constant 0 : index
      %12 = vector.load %arg9[%c0_10, %c0_11] : memref<40x128xf32, #tpu.memory_space<vmem>>, vector<40x128xf32>
      %c0_12 = arith.constant 0 : index
      %c0_13 = arith.constant 0 : index
      %13 = vector.load %arg5[%c0_12, %c0_13] : memref<1x128xf32, #tpu.memory_space<vmem>>, vector<1x128xf32>
      %14 = vector.broadcast %13 : vector<1x128xf32> to vector<40x128xf32>
      %15 = arith.addf %12, %14 : vector<40x128xf32>
      %c0_14 = arith.constant 0 : index
      %c0_15 = arith.constant 0 : index
      %16 = vector.load %arg6[%c0_14, %c0_15] : memref<1x128xf32, #tpu.memory_space<vmem>>, vector<1x128xf32>
      %17 = vector.broadcast %16 : vector<1x128xf32> to vector<40x128xf32>
      %18 = arith.mulf %15, %17 : vector<40x128xf32>
      %c0_16 = arith.constant 0 : index
      %c0_17 = arith.constant 0 : index
      %19 = vector.load %arg7[%c0_16, %c0_17] : memref<1x128xf32, #tpu.memory_space<vmem>>, vector<1x128xf32>
      %20 = vector.broadcast %19 : vector<1x128xf32> to vector<40x128xf32>
      %21 = arith.addf %18, %20 : vector<40x128xf32>
      %c0_18 = arith.constant 0 : index
      %c0_19 = arith.constant 0 : index
      %22 = vector.load %arg8[%c0_18, %c0_19] : memref<40x128xf32, #tpu.memory_space<vmem>>, vector<40x128xf32>
      tpu.vector_store %arg8[%c0_18, %c0_19], %21 {strides = array<i32>} : memref<40x128xf32, #tpu.memory_space<vmem>>, vector<40x128xf32>,
    } else {
    }
    return
  }
  func.func @transform_0(%arg0: i32, %arg1: i32, %arg2: i32) -> (i32, i32) {
    %c0_i32 = arith.constant 0 : i32
    return %arg0, %arg2 : i32, i32
  }
  func.func @transform_1(%arg0: i32, %arg1: i32, %arg2: i32) -> (i32, i32) {
    %c0_i32 = arith.constant 0 : i32
    return %arg2, %arg1 : i32, i32
  }
  func.func @transform_2(%arg0: i32, %arg1: i32, %arg2: i32) -> (i32, i32) {
    %c0_i32 = arith.constant 0 : i32
    %c0_i32_0 = arith.constant 0 : i32
    return %c0_i32, %arg1 : i32, i32
  }
  func.func @transform_3(%arg0: i32, %arg1: i32, %arg2: i32) -> (i32, i32) {
    %c0_i32 = arith.constant 0 : i32
    %c0_i32_0 = arith.constant 0 : i32
    return %c0_i32, %arg1 : i32, i32
  }
  func.func @transform_4(%arg0: i32, %arg1: i32, %arg2: i32) -> (i32, i32) {
    %c0_i32 = arith.constant 0 : i32
    %c0_i32_0 = arith.constant 0 : i32
    return %c0_i32, %arg1 : i32, i32
  }
  func.func @transform_5(%arg0: i32, %arg1: i32, %arg2: i32) -> (i32, i32) {
    %c0_i32 = arith.constant 0 : i32
    return %arg0, %arg1 : i32, i32
  }
}

module attributes {stable_mosaic.version = 11 : i64} {
  func.func @_linear_kernel(%arg0: i32, %arg1: i32, %arg2: i32, %arg3: memref<8x256xbf16, #tpu.memory_space<vmem>>, %arg4: memref<256x128xbf16, #tpu.memory_space<vmem>>, %arg5: memref<1x128xf32, #tpu.memory_space<vmem>>, %arg6: memref<1x128xf32, #tpu.memory_space<vmem>>, %arg7: memref<1x128xf32, #tpu.memory_space<vmem>>, %arg8: memref<8x128xf32, #tpu.memory_space<vmem>>, %arg9: memref<8x128xf32, #tpu.memory_space<vmem>>) attributes {dimension_semantics = [#tpu.dimension_semantics<parallel>, #tpu.dimension_semantics<parallel>, #tpu.dimension_semantics<arbitrary>], iteration_bounds = array<i64: 1, 1, 2>, scalar_prefetch = 0 : i64, scratch_operands = 1 : i64, tpu.core_type = #tpu.core_type<tc>, window_params = [{transform_indices = @transform_0, window_bounds = array<i64: 8, 256>}, {transform_indices = @transform_1, window_bounds = array<i64: 256, 128>}, {transform_indices = @transform_2, window_bounds = array<i64: 1, 128>}, {transform_indices = @transform_3, window_bounds = array<i64: 1, 128>}, {transform_indices = @transform_4, window_bounds = array<i64: 1, 128>}, {transform_indices = @transform_5, window_bounds = array<i64: 8, 128>}]} {
    %c0_i32 = arith.constant 0 : i32
    %0 = arith.cmpi eq, %arg2, %c0_i32 : i32
    %1 = arith.extui %0 : i1 to i32
    %c0_i32_0 = arith.constant 0 : i32
    %2 = arith.cmpi ne, %1, %c0_i32_0 : i32
    scf.if %2 {
      %cst_9 = arith.constant 0.000000e+00 : f32
      %12 = vector.broadcast %cst_9 : f32 to vector<8x128xf32>
      %c0_10 = arith.constant 0 : index
      %c0_11 = arith.constant 0 : index
      %13 = vector.load %arg9[%c0_10, %c0_11] : memref<8x128xf32, #tpu.memory_space<vmem>>, vector<8x128xf32>
      tpu.vector_store %arg9[%c0_10, %c0_11], %12 {strides = array<i32>} : memref<8x128xf32, #tpu.memory_space<vmem>>, vector<8x128xf32>,
    } else {
    }
    %c0 = arith.constant 0 : index
    %c0_1 = arith.constant 0 : index
    %3 = vector.load %arg9[%c0, %c0_1] : memref<8x128xf32, #tpu.memory_space<vmem>>, vector<8x128xf32>
    %c0_2 = arith.constant 0 : index
    %c0_3 = arith.constant 0 : index
    %4 = vector.load %arg3[%c0_2, %c0_3] : memref<8x256xbf16, #tpu.memory_space<vmem>>, vector<8x256xbf16>
    %c0_4 = arith.constant 0 : index
    %c0_5 = arith.constant 0 : index
    %5 = vector.load %arg4[%c0_4, %c0_5] : memref<256x128xbf16, #tpu.memory_space<vmem>>, vector<256x128xbf16>
    %cst = arith.constant dense<0.000000e+00> : vector<8x128xf32>
    %6 = tpu.matmul %4, %5, %cst {dimension_numbers = #tpu.dot_dimension_numbers<[1], [0], [0], [1], [0, 0, 1, 1], [], []>} : vector<8x256xbf16>, vector<256x128xbf16>, vector<8x128xf32> -> vector<8x128xf32>
    %7 = arith.addf %3, %6 : vector<8x128xf32>
    %c0_6 = arith.constant 0 : index
    %c0_7 = arith.constant 0 : index
    %8 = vector.load %arg9[%c0_6, %c0_7] : memref<8x128xf32, #tpu.memory_space<vmem>>, vector<8x128xf32>
    tpu.vector_store %arg9[%c0_6, %c0_7], %7 {strides = array<i32>} : memref<8x128xf32, #tpu.memory_space<vmem>>, vector<8x128xf32>,
    %c1_i32 = arith.constant 1 : i32
    %9 = arith.cmpi eq, %arg2, %c1_i32 : i32
    %10 = arith.extui %9 : i1 to i32
    %c0_i32_8 = arith.constant 0 : i32
    %11 = arith.cmpi ne, %10, %c0_i32_8 : i32
    scf.if %11 {
      %c0_9 = arith.constant 0 : index
      %c0_10 = arith.constant 0 : index
      %12 = vector.load %arg9[%c0_9, %c0_10] : memref<8x128xf32, #tpu.memory_space<vmem>>, vector<8x128xf32>
      %c0_11 = arith.constant 0 : index
      %c0_12 = arith.constant 0 : index
      %13 = vector.load %arg5[%c0_11, %c0_12] : memref<1x128xf32, #tpu.memory_space<vmem>>, vector<1x128xf32>
      %14 = vector.broadcast %13 : vector<1x128xf32> to vector<8x128xf32>
      %15 = arith.addf %12, %14 : vector<8x128xf32>
      %c0_13 = arith.constant 0 : index
      %c0_14 = arith.constant 0 : index
      %16 = vector.load %arg6[%c0_13, %c0_14] : memref<1x128xf32, #tpu.memory_space<vmem>>, vector<1x128xf32>
      %17 = vector.broadcast %16 : vector<1x128xf32> to vector<8x128xf32>
      %18 = arith.mulf %15, %17 : vector<8x128xf32>
      %c0_15 = arith.constant 0 : index
      %c0_16 = arith.constant 0 : index
      %19 = vector.load %arg7[%c0_15, %c0_16] : memref<1x128xf32, #tpu.memory_space<vmem>>, vector<1x128xf32>
      %20 = vector.broadcast %19 : vector<1x128xf32> to vector<8x128xf32>
      %21 = arith.addf %18, %20 : vector<8x128xf32>
      %cst_17 = arith.constant 0.000000e+00 : f32
      %22 = vector.broadcast %cst_17 : f32 to vector<8x128xf32>
      %23 = arith.maximumf %21, %22 : vector<8x128xf32>
      %c0_18 = arith.constant 0 : index
      %c0_19 = arith.constant 0 : index
      %24 = vector.load %arg8[%c0_18, %c0_19] : memref<8x128xf32, #tpu.memory_space<vmem>>, vector<8x128xf32>
      tpu.vector_store %arg8[%c0_18, %c0_19], %23 {strides = array<i32>} : memref<8x128xf32, #tpu.memory_space<vmem>>, vector<8x128xf32>,
    } else {
    }
    return
  }
  func.func @transform_0(%arg0: i32, %arg1: i32, %arg2: i32) -> (i32, i32) {
    %c0_i32 = arith.constant 0 : i32
    return %arg0, %arg2 : i32, i32
  }
  func.func @transform_1(%arg0: i32, %arg1: i32, %arg2: i32) -> (i32, i32) {
    %c0_i32 = arith.constant 0 : i32
    return %arg2, %arg1 : i32, i32
  }
  func.func @transform_2(%arg0: i32, %arg1: i32, %arg2: i32) -> (i32, i32) {
    %c0_i32 = arith.constant 0 : i32
    %c0_i32_0 = arith.constant 0 : i32
    return %c0_i32, %arg1 : i32, i32
  }
  func.func @transform_3(%arg0: i32, %arg1: i32, %arg2: i32) -> (i32, i32) {
    %c0_i32 = arith.constant 0 : i32
    %c0_i32_0 = arith.constant 0 : i32
    return %c0_i32, %arg1 : i32, i32
  }
  func.func @transform_4(%arg0: i32, %arg1: i32, %arg2: i32) -> (i32, i32) {
    %c0_i32 = arith.constant 0 : i32
    %c0_i32_0 = arith.constant 0 : i32
    return %c0_i32, %arg1 : i32, i32
  }
  func.func @transform_5(%arg0: i32, %arg1: i32, %arg2: i32) -> (i32, i32) {
    %c0_i32 = arith.constant 0 : i32
    return %arg0, %arg1 : i32, i32
  }
}

module attributes {stable_mosaic.version = 11 : i64} {
  func.func @_linear_kernel(%arg0: i32, %arg1: i32, %arg2: i32, %arg3: memref<8x128xbf16, #tpu.memory_space<vmem>>, %arg4: memref<128x128xbf16, #tpu.memory_space<vmem>>, %arg5: memref<1x128xf32, #tpu.memory_space<vmem>>, %arg6: memref<1x128xf32, #tpu.memory_space<vmem>>, %arg7: memref<1x128xf32, #tpu.memory_space<vmem>>, %arg8: memref<8x128xf32, #tpu.memory_space<vmem>>, %arg9: memref<8x128xf32, #tpu.memory_space<vmem>>) attributes {dimension_semantics = [#tpu.dimension_semantics<parallel>, #tpu.dimension_semantics<parallel>, #tpu.dimension_semantics<arbitrary>], iteration_bounds = array<i64: 1, 1, 1>, scalar_prefetch = 0 : i64, scratch_operands = 1 : i64, tpu.core_type = #tpu.core_type<tc>, window_params = [{transform_indices = @transform_0, window_bounds = array<i64: 8, 128>}, {transform_indices = @transform_1, window_bounds = array<i64: 128, 128>}, {transform_indices = @transform_2, window_bounds = array<i64: 1, 128>}, {transform_indices = @transform_3, window_bounds = array<i64: 1, 128>}, {transform_indices = @transform_4, window_bounds = array<i64: 1, 128>}, {transform_indices = @transform_5, window_bounds = array<i64: 8, 128>}]} {
    %c0_i32 = arith.constant 0 : i32
    %0 = arith.cmpi eq, %arg2, %c0_i32 : i32
    %1 = arith.extui %0 : i1 to i32
    %c0_i32_0 = arith.constant 0 : i32
    %2 = arith.cmpi ne, %1, %c0_i32_0 : i32
    scf.if %2 {
      %cst_10 = arith.constant 0.000000e+00 : f32
      %12 = vector.broadcast %cst_10 : f32 to vector<8x128xf32>
      %c0_11 = arith.constant 0 : index
      %c0_12 = arith.constant 0 : index
      %13 = vector.load %arg9[%c0_11, %c0_12] : memref<8x128xf32, #tpu.memory_space<vmem>>, vector<8x128xf32>
      tpu.vector_store %arg9[%c0_11, %c0_12], %12 {strides = array<i32>} : memref<8x128xf32, #tpu.memory_space<vmem>>, vector<8x128xf32>,
    } else {
    }
    %c0 = arith.constant 0 : index
    %c0_1 = arith.constant 0 : index
    %3 = vector.load %arg9[%c0, %c0_1] : memref<8x128xf32, #tpu.memory_space<vmem>>, vector<8x128xf32>
    %c0_2 = arith.constant 0 : index
    %c0_3 = arith.constant 0 : index
    %4 = vector.load %arg3[%c0_2, %c0_3] : memref<8x128xbf16, #tpu.memory_space<vmem>>, vector<8x128xbf16>
    %c0_4 = arith.constant 0 : index
    %c0_5 = arith.constant 0 : index
    %5 = vector.load %arg4[%c0_4, %c0_5] : memref<128x128xbf16, #tpu.memory_space<vmem>>, vector<128x128xbf16>
    %cst = arith.constant dense<0.000000e+00> : vector<8x128xf32>
    %6 = tpu.matmul %4, %5, %cst {dimension_numbers = #tpu.dot_dimension_numbers<[1], [0], [0], [1], [0, 0, 1, 1], [], []>} : vector<8x128xbf16>, vector<128x128xbf16>, vector<8x128xf32> -> vector<8x128xf32>
    %7 = arith.addf %3, %6 : vector<8x128xf32>
    %c0_6 = arith.constant 0 : index
    %c0_7 = arith.constant 0 : index
    %8 = vector.load %arg9[%c0_6, %c0_7] : memref<8x128xf32, #tpu.memory_space<vmem>>, vector<8x128xf32>
    tpu.vector_store %arg9[%c0_6, %c0_7], %7 {strides = array<i32>} : memref<8x128xf32, #tpu.memory_space<vmem>>, vector<8x128xf32>,
    %c0_i32_8 = arith.constant 0 : i32
    %9 = arith.cmpi eq, %arg2, %c0_i32_8 : i32
    %10 = arith.extui %9 : i1 to i32
    %c0_i32_9 = arith.constant 0 : i32
    %11 = arith.cmpi ne, %10, %c0_i32_9 : i32
    scf.if %11 {
      %c0_10 = arith.constant 0 : index
      %c0_11 = arith.constant 0 : index
      %12 = vector.load %arg9[%c0_10, %c0_11] : memref<8x128xf32, #tpu.memory_space<vmem>>, vector<8x128xf32>
      %c0_12 = arith.constant 0 : index
      %c0_13 = arith.constant 0 : index
      %13 = vector.load %arg5[%c0_12, %c0_13] : memref<1x128xf32, #tpu.memory_space<vmem>>, vector<1x128xf32>
      %14 = vector.broadcast %13 : vector<1x128xf32> to vector<8x128xf32>
      %15 = arith.addf %12, %14 : vector<8x128xf32>
      %c0_14 = arith.constant 0 : index
      %c0_15 = arith.constant 0 : index
      %16 = vector.load %arg6[%c0_14, %c0_15] : memref<1x128xf32, #tpu.memory_space<vmem>>, vector<1x128xf32>
      %17 = vector.broadcast %16 : vector<1x128xf32> to vector<8x128xf32>
      %18 = arith.mulf %15, %17 : vector<8x128xf32>
      %c0_16 = arith.constant 0 : index
      %c0_17 = arith.constant 0 : index
      %19 = vector.load %arg7[%c0_16, %c0_17] : memref<1x128xf32, #tpu.memory_space<vmem>>, vector<1x128xf32>
      %20 = vector.broadcast %19 : vector<1x128xf32> to vector<8x128xf32>
      %21 = arith.addf %18, %20 : vector<8x128xf32>
      %c0_18 = arith.constant 0 : index
      %c0_19 = arith.constant 0 : index
      %22 = vector.load %arg8[%c0_18, %c0_19] : memref<8x128xf32, #tpu.memory_space<vmem>>, vector<8x128xf32>
      tpu.vector_store %arg8[%c0_18, %c0_19], %21 {strides = array<i32>} : memref<8x128xf32, #tpu.memory_space<vmem>>, vector<8x128xf32>,
    } else {
    }
    return
  }
  func.func @transform_0(%arg0: i32, %arg1: i32, %arg2: i32) -> (i32, i32) {
    %c0_i32 = arith.constant 0 : i32
    return %arg0, %arg2 : i32, i32
  }
  func.func @transform_1(%arg0: i32, %arg1: i32, %arg2: i32) -> (i32, i32) {
    %c0_i32 = arith.constant 0 : i32
    return %arg2, %arg1 : i32, i32
  }
  func.func @transform_2(%arg0: i32, %arg1: i32, %arg2: i32) -> (i32, i32) {
    %c0_i32 = arith.constant 0 : i32
    %c0_i32_0 = arith.constant 0 : i32
    return %c0_i32, %arg1 : i32, i32
  }
  func.func @transform_3(%arg0: i32, %arg1: i32, %arg2: i32) -> (i32, i32) {
    %c0_i32 = arith.constant 0 : i32
    %c0_i32_0 = arith.constant 0 : i32
    return %c0_i32, %arg1 : i32, i32
  }
  func.func @transform_4(%arg0: i32, %arg1: i32, %arg2: i32) -> (i32, i32) {
    %c0_i32 = arith.constant 0 : i32
    %c0_i32_0 = arith.constant 0 : i32
    return %c0_i32, %arg1 : i32, i32
  }
  func.func @transform_5(%arg0: i32, %arg1: i32, %arg2: i32) -> (i32, i32) {
    %c0_i32 = arith.constant 0 : i32
    return %arg0, %arg1 : i32, i32
  }
}

</mosaic_0001>

<bundles_post_ra>
// kernel: carnet_forward.11
= control target key start
LH: loop header
LB: loop body
LE: loop exit
PB: predicated region body
PF: predicated region fallthrough
CT: control target
= control target key end

     0   :  { %s896_s18 = smov 0   ;;  %s1031_s0 = inlined_call_operand.vmem [shape: bf16[4,14,128], index: 0, kind: input, shape index: {}]   ;;  %s1032_s1 = inlined_call_operand.vmem [shape: bf16[3,128,128], index: 1, kind: input, shape index: {}]   ;;  %s1033_s2 = inlined_call_operand.vmem [shape: f32[1,128], index: 2, kind: input, shape index: {}]   ;;  %s1034_s3 = inlined_call_operand.vmem [shape: f32[1,128], index: 3, kind: input, shape index: {}]   ;;  %s1035_s4 = inlined_call_operand.vmem [shape: f32[1,128], index: 4, kind: input, shape index: {}]   ;;  %s1036_s5 = inlined_call_operand.vmem [shape: bf16[4,12,128], index: 5, kind: output, shape index: {}]  }
   0x1 LB: > { %s657_s19 = sadd.s32 4294967295, %s862_s18   ;;  %p661_p0 = scmp.ge.s32.totalorder %s862_s18, 1  ;;  %s862_s18 = sphi %s896_s18, %s15_s18  }
   0x2   : > { %p187_p1 = scmp.lt.s32.totalorder %s862_s18, 5 }
   0x4   : > { %p188_p2 = pnand %p661_p0, %p187_p1 }
   0x5   : > { %v831_v0 = vld [vmem:[%s1032_s1 + $0x40] sm:$0xff] (!%p188_p2)   ;;  %v864_v1 = vmov (!%p188_p2), 0.0   ;;  %v833_v3 = vld [vmem:[%s1032_s1 + $0x48] sm:$0xff] (!%p188_p2)   ;;  %vm865_vm0 = vmmov (!%p188_p2), 0   ;;  %p215_p3 = scmp.lt.s32.totalorder (!%p188_p2), %s657_s19, 3  ;;  %v835_v5 = vld [vmem:[%s1032_s1 + $0x50] sm:$0xff] (!%p188_p2)  }
   0x6   : > { %191 = sbr.rel (%p188_p2) target bundleno = 297 (0x129), region = 40  ;;  %761 = vmatprep.subr.bf16.mxu0 (!%p188_p2), %v864_v1  ;;  %781 = vmatprep.subr.bf16.mxu1 (!%p188_p2), %v864_v1  ;;  %v832_v2 = vld [vmem:[%s1032_s1] sm:$0xff] (!%p188_p2)   ;;  %v834_v4 = vld [vmem:[%s1032_s1 + $0x8] sm:$0xff] (!%p188_p2)   ;;  %v836_v6 = vld [vmem:[%s1032_s1 + $0x10] sm:$0xff] (!%p188_p2)  }
   0x7   : > { %762 = vmatpush3.bf16.msra.mxu0 (!%p188_p2), %v831_v0  ;;  %777 = vmatprep.mubr.msk.bf16.mxu0 (!%p188_p2), %vm865_vm0, %v864_v1  ;;  %v837_v7 = vld [vmem:[%s1032_s1 + $0x58] sm:$0xff] (!%p188_p2)   ;;  %v839_v9 = vld [vmem:[%s1032_s1 + $0x60] sm:$0xff] (!%p188_p2)   ;;  %v841_v12 = vld [vmem:[%s1032_s1 + $0x68] sm:$0xff] (!%p188_p2)  }
   0x8   : > { %782 = vmatpush3.bf16.msra.mxu1 (!%p188_p2), %v832_v2  ;;  %763 = vmatprep.subr.bf16.mxu0 (!%p188_p2), %v864_v1  ;;  %v838_v8 = vld [vmem:[%s1032_s1 + $0x18] sm:$0xff] (!%p188_p2)   ;;  %v840_v10 = vld [vmem:[%s1032_s1 + $0x20] sm:$0xff] (!%p188_p2)   ;;  %v842_v13 = vld [vmem:[%s1032_s1 + $0x28] sm:$0xff] (!%p188_p2)  }
   0x9   : > { %783 = vmatprep.subr.bf16.mxu1 (!%p188_p2), %v864_v1  ;;  %797 = vmatprep.mubr.msk.bf16.mxu1 (!%p188_p2), %vm865_vm0, %v864_v1  ;;  %v843_v15 = vld [vmem:[%s1032_s1 + $0x70] sm:$0xff] (!%p188_p2)   ;;  %v845_v19 = vld [vmem:[%s1032_s1 + $0x78] sm:$0xff] (!%p188_p2)   ;;  %v848_v22 = vld [vmem:[%s1032_s1 + $0x80] sm:$0xff] (!%p188_p2)  }
   0xa   : > { %v844_v16 = vld [vmem:[%s1032_s1 + $0x30] sm:$0xff] (!%p188_p2)   ;;  %v846_v20 = vld [vmem:[%s1032_s1 + $0x38] sm:$0xff] (!%p188_p2)   ;;  %v849_v23 = vld [vmem:[%s1032_s1 + $0x88] sm:$0xff] (!%p188_p2)  }
   0xb   : > { %764 = vmatpush3.bf16.msra.mxu0 (!%p188_p2), %v833_v3  ;;  %v850_v24 = vld [vmem:[%s1032_s1 + $0x90] sm:$0xff] (!%p188_p2)   ;;  %v851_v25 = vld [vmem:[%s1032_s1 + $0x98] sm:$0xff] (!%p188_p2)   ;;  %v852_v26 = vld [vmem:[%s1032_s1 + $0xa0] sm:$0xff] (!%p188_p2)  }
   0xc   : > { %784 = vmatpush3.bf16.msra.mxu1 (!%p188_p2), %v834_v4  ;;  %765 = vmatprep.subr.bf16.mxu0 (!%p188_p2), %v864_v1  ;;  %v853_v27 = vld [vmem:[%s1032_s1 + $0xa8] sm:$0xff] (!%p188_p2)   ;;  %v854_v28 = vld [vmem:[%s1032_s1 + $0xb0] sm:$0xff] (!%p188_p2)   ;;  %v855_v29 = vld [vmem:[%s1032_s1 + $0xb8] sm:$0xff] (!%p188_p2)  }
   0xd   : > { %s1038_s19 = smov (!%p215_p3, %s657_s19), 3  ;;  %785 = vmatprep.subr.bf16.mxu1 %v864_v1  ;;  %v723_v42 = vld [vmem:[%s1033_s2] ss:$0 sm:$0xff] }
   0xe   : > { %s730_s11 = sshll.u32 %s1038_s19, 3  ;;  %v724_v45 = vld [vmem:[%s1034_s3] ss:$0 sm:$0xff] }
   0xf   : > { %766 = vmatpush3.bf16.msra.mxu0 %v835_v5  ;;  %s219_s16 = scalar_lea.vmem %s1031_s0, %s730_s11  ;;  %v725_v50 = vld [vmem:[%s1035_s4] ss:$0 sm:$0xff]  ;;  %s224_s10 = scalar_lea.vmem %s1036_s5, %s730_s11 }
  0x10   : > { %786 = vmatpush3.bf16.msra.mxu1 %v836_v6  ;;  %767 = vmatprep.subr.bf16.mxu0 %v864_v1  ;;  %v847_v11 = vld [vmem:[%s219_s16] sm:$0x7f]  }
  0x11   : > { %787 = vmatprep.subr.bf16.mxu1 %v864_v1  ;;  %v269_v14 = vshll.u32 %v847_v11, 16  ;;  %v267_v17 = vshrl.u32 %v847_v11, 16  ;;  %v470_v30 = vrot.slane %v847_v11, 1 }
  0x13   : > { %768 = vmatpush3.bf16.msra.mxu0 %v837_v7  ;;  %v271_v18 = vrot.slane %v269_v14, 1 }
  0x14   : > { %788 = vmatpush3.bf16.msra.mxu1 %v838_v8  ;;  %769 = vmatprep.subr.bf16.mxu0 %v864_v1 }
  0x15   : > { %789 = vmatprep.subr.bf16.mxu1 %v864_v1  ;;  %v272_v21 = vor.u32 %v271_v18, %v267_v17 }
  0x17   : > { %770 = vmatpush3.bf16.msra.mxu0 %v839_v9 }
  0x18   : > { %790 = vmatpush3.bf16.msra.mxu1 %v840_v10  ;;  %771 = vmatprep.subr.bf16.mxu0 %v864_v1 }
  0x19   : > { %791 = vmatprep.subr.bf16.mxu1 %v864_v1 }
  0x1b   : > { %772 = vmatpush3.bf16.msra.mxu0 %v841_v12 }
  0x1c   : > { %792 = vmatpush3.bf16.msra.mxu1 %v842_v13  ;;  %773 = vmatprep.subr.bf16.mxu0 %v864_v1 }
  0x1d   : > { %793 = vmatprep.subr.bf16.mxu1 %v864_v1 }
  0x1f   : > { %774 = vmatpush3.bf16.msra.mxu0 %v843_v15 }
  0x20   : > { %794 = vmatpush3.bf16.msra.mxu1 %v844_v16  ;;  %775 = vmatprep.subr.bf16.mxu0 %v864_v1 }
  0x21   : > { %795 = vmatprep.subr.bf16.mxu1 %v864_v1 }
  0x23   : > { %776 = vmatpush3.bf16.msra.mxu0 %v845_v19 }
  0x24   : > { %796 = vmatpush3.bf16.msra.mxu1 %v846_v20  ;;  %801 = vmatprep.subr.bf16.mxu0 %v864_v1 }
  0x26   : > { %778 = vmatmul.mubr.bf16.vlgmr.msra.gmra.mrb[0].mxu0 %v272_v21 }
  0x27   : > { %798 = vmatmul.mubr.bf16.vlgmr.msra.gmra.mrb[0].mxu1 %v847_v11  ;;  %802 = vmatpush3.bf16.msra.mxu0 %v848_v22 }
  0x28   : > { %803 = vmatprep.subr.bf16.mxu0 %v864_v1  ;;  %817 = vmatprep.mubr.msk.bf16.mxu0 %vm865_vm0, %v864_v1 }
  0x2b   : > { %804 = vmatpush3.bf16.msra.mxu0 %v849_v23 }
  0x2c   : > { %805 = vmatprep.subr.bf16.mxu0 %v864_v1 }
  0x2f   : > { %806 = vmatpush3.bf16.msra.mxu0 %v850_v24 }
  0x30   : > { %807 = vmatprep.subr.bf16.mxu0 %v864_v1 }
  0x33   : > { %808 = vmatpush3.bf16.msra.mxu0 %v851_v25 }
  0x34   : > { %809 = vmatprep.subr.bf16.mxu0 %v864_v1 }
  0x37   : > { %810 = vmatpush3.bf16.msra.mxu0 %v852_v26 }
  0x38   : > { %811 = vmatprep.subr.bf16.mxu0 %v864_v1 }
  0x3b   : > { %812 = vmatpush3.bf16.msra.mxu0 %v853_v27 }
  0x3c   : > { %813 = vmatprep.subr.bf16.mxu0 %v864_v1 }
  0x3f   : > { %814 = vmatpush3.bf16.msra.mxu0 %v854_v28 }
  0x40   : > { %815 = vmatprep.subr.bf16.mxu0 %v864_v1 }
  0x43   : > { %816 = vmatpush3.bf16.msra.mxu0 %v855_v29 }
  0x46   : > { %818 = vmatmul.mubr.bf16.vlgmr.msra.gmra.mrb[4].mxu0 %v470_v30 }
  0xf9   : > { %v356_v31 = vpop.f32.mrb[0].mxu0 }
  0xfa   : > { %v446_v32 = vpop.f32.mrb[0].mxu1  ;;  %v779_v33 = vpop.f32.mrb[1].mxu0 }
  0xfb   : > { %v447_v34 = vadd.f32 %v446_v32, %v356_v31  ;;  %v799_v35 = vpop.f32.mrb[1].mxu1  ;;  %v359_v36 = vpop.f32.mrb[2].mxu0 }
  0xfc   : > { %v449_v37 = vpop.f32.mrb[2].mxu1  ;;  %v780_v38 = vpop.f32.mrb[3].mxu0 }
  0xfd   : > { %v450_v39 = vadd.f32 %v449_v37, %v359_v36  ;;  %v800_v40 = vpop.f32.mrb[3].mxu1 }
 0x119   : > { %v554_v41 = vpop.f32.mrb[4].mxu0 }
 0x11a   : > { %v561_v43 = vadd.f32 %v554_v41, %v447_v34  ;;  %v819_v44 = vpop.f32.mrb[5].mxu0 }
 0x11b   : > { %v557_v46 = vpop.f32.mrb[6].mxu0 }
 0x11c   : > { %v570_v47 = vadd.f32 %v723_v42, %v561_v43  ;;  %v562_v48 = vadd.f32 %v557_v46, %v450_v39  ;;  %v820_v49 = vpop.f32.mrb[7].mxu0 }
 0x11e   : > { %v579_v51 = vmul.f32 %v724_v45, %v570_v47  ;;  %v571_v52 = vadd.f32 %v723_v42, %v562_v48 }
 0x120   : > { %v588_v53 = vadd.f32 %v725_v50, %v579_v51  ;;  %v580_v54 = vmul.f32 %v724_v45, %v571_v52 }
 0x122   : > { %v590_v55 = vmax.f32 %v588_v53, 0.0  ;;  %v589_v56 = vadd.f32 %v725_v50, %v580_v54 }
 0x124   : > { %v732_v57 = vpack.c.bf16 %v590_v55, %v590_v55  ;;  %v591_v58 = vmax.f32 %v589_v56, 0.0 }
 0x126   : > { %600 = vst [vmem:[%s224_s10] sm:$0xf] %v732_v57  ;;  %v733_v59 = vpack.c.bf16 %v591_v58, %v591_v58 }
 0x128   : > { %601 = vst [vmem:[%s224_s10 + $0x4] sm:$0x3] %v733_v59 }
 0x129 PF: > { %s15_s18 = sadd.s32 1, %s862_s18  }
 0x12a   : > { %p12_p4 = scmp.ge.s32.totalorder %s15_s18, 6  }
 0x12c   :  { %14 = sbr.rel (!%p12_p4) target bundleno = 1 (0x1), region = 72 }

// kernel: carnet_forward.10
= control target key start
LH: loop header
LB: loop body
LE: loop exit
PB: predicated region body
PF: predicated region fallthrough
CT: control target
= control target key end

     0   :  { %s461_s18 = smov 0   ;;  %s503_s0 = inlined_call_operand.vmem [shape: bf16[4,16,1], index: 0, kind: input, shape index: {}]   ;;  %s504_s1 = inlined_call_operand.vmem [shape: bf16[3,1,128], index: 1, kind: input, shape index: {}]   ;;  %s505_s2 = inlined_call_operand.vmem [shape: f32[1,128], index: 2, kind: input, shape index: {}]   ;;  %s506_s3 = inlined_call_operand.vmem [shape: f32[1,128], index: 3, kind: input, shape index: {}]   ;;  %s507_s4 = inlined_call_operand.vmem [shape: f32[1,128], index: 4, kind: input, shape index: {}]   ;;  %s508_s5 = inlined_call_operand.vmem [shape: bf16[4,14,128], index: 5, kind: output, shape index: {}]  }
   0x1 LB: > { %s381_s19 = sadd.s32 4294967295, %s428_s18   ;;  %p385_p0 = scmp.ge.s32.totalorder %s428_s18, 1  ;;  %s428_s18 = sphi %s461_s18, %s15_s18  }
   0x2   : > { %p187_p1 = scmp.lt.s32.totalorder %s428_s18, 5 }
   0x4   : > { %p188_p2 = pnand %p385_p0, %p187_p1 }
   0x5   : > { %p215_p3 = scmp.lt.s32.totalorder (!%p188_p2), %s381_s19, 3  ;;  %v430_v0 = vmov (!%p188_p2), 0   ;;  %v241_v5 = vlaneseq (!%p188_p2)  ;;  %v390_v7 = vld [vmem:[%s504_s1 + $0x1] sm:$0x1] (!%p188_p2)  ;;  %v391_v8 = vld [vmem:[%s504_s1 + $0x2] sm:$0x1] (!%p188_p2) }
   0x6   : > { %191 = sbr.rel (%p188_p2) target bundleno = 171 (0xab), region = 40  ;;  %416 = vset.pattern.permute.xlu0 (!%p188_p2), %v430_v0  ;;  %v227_v9 = vld [vmem:[%s504_s1] sm:$0x1] (!%p188_p2)  ;;  %v251_v11 = vunpack.c.l.bf16 (!%p188_p2), %v390_v7  ;;  %v270_v12 = vunpack.c.l.bf16 (!%p188_p2), %v391_v8  ;;  %vm260_vm0 = vcmask (!%p188_p2), 1046528   ;;  %vm279_vm1 = vcmask (!%p188_p2), 1045504  }
   0x7   : > { %v242_v6 = vshrl.u32 (!%p188_p2), %v241_v5, 7  ;;  %v230_v13 = vunpack.c.l.bf16 (!%p188_p2), %v227_v9  ;;  %v392_v31 = vld [vmem:[%s505_s2] ss:$0 sm:$0xff] (!%p188_p2) }
   0x8   : > { %v393_v35 = vld [vmem:[%s506_s3] ss:$0 sm:$0xff] (!%p188_p2) }
   0x9   : > { %v243_v10 = vsub.s32 (!%p188_p2), 0, %v242_v6  ;;  %v394_v39 = vld [vmem:[%s507_s4] ss:$0 sm:$0xff] (!%p188_p2) }
   0xb   : > { %v255_v14 = vrot.slane (!%p188_p2), %v251_v11, %v243_v10  ;;  %v274_v15 = vrot.slane (!%p188_p2), %v270_v12, %v243_v10  ;;  %v244_v17 = vrot.slane (!%p188_p2), %v230_v13, %v243_v10 }
   0xd   : > { %s510_s19 = smov (!%p215_p3, %s381_s19), 3 }
   0xe   : > { %s399_s20 = sshll.u32 %s510_s19, 3 }
   0xf   : > { %s219_s23 = scalar_lea.vmem %s503_s0, %s399_s20  ;;  %s224_s13 = scalar_lea.vmem %s508_s5, %s399_s20 }
  0x10   : > { %v404_v1 = vld [vmem:[%s219_s23] sm:$0xff]  }
  0x11   : > { %v405_v2 = vunpack.c.l.bf16 %v404_v1  ;;  %v406_v3 = vunpack.c.h.bf16 %v404_v1 }
  0x13   : > { %v417_v4 = vpack.i.bf16 %v406_v3, %v405_v2 }
  0x15   : > { %418 = vperm.xlu0 %416, %v417_v4  }
  0x94   : > { %v419_v16 = vpop.permute.xlu0 %418 }
  0x95   : > { %v421_v18 = vunpack.i.h.bf16 %v419_v16  ;;  %v420_v19 = vunpack.i.l.bf16 %v419_v16 }
  0x97   : > { %v257_v20 = vmul.f32 %v421_v18, %v255_v14  ;;  %v276_v21 = vmul.f32 %v421_v18, %v274_v15  ;;  %v256_v22 = vmul.f32 %v420_v19, %v255_v14  ;;  %v275_v23 = vmul.f32 %v420_v19, %v274_v15 }
  0x98   : > { %v246_v24 = vmul.f32 %v421_v18, %v244_v17  ;;  %v245_v30 = vmul.f32 %v420_v19, %v244_v17 }
  0x99   : > { %v262_v25 = vrot.slane %v257_v20, 1  ;;  %v281_v26 = vrot.slane %v276_v21, 2  ;;  %v261_v27 = vrot.slane %v256_v22, 1  ;;  %v280_v28 = vrot.slane %v275_v23, 2 }
  0x9b   : > { %v267_v29 = vadd.f32 %v262_v25, %v246_v24  ;;  %v263_v32 = vsel %vm260_vm0, %v261_v27, %v262_v25  ;;  %v282_v36 = vsel %vm279_vm1, %v280_v28, %v281_v26 }
  0x9c   : > { %v266_v34 = vadd.f32 %v263_v32, %v245_v30 }
  0x9d   : > { %v286_v33 = vadd.f32 %v281_v26, %v267_v29 }
  0x9e   : > { %v285_v38 = vadd.f32 %v282_v36, %v266_v34 }
  0x9f   : > { %v295_v37 = vadd.f32 %v392_v31, %v286_v33 }
  0xa0   : > { %v294_v41 = vadd.f32 %v392_v31, %v285_v38 }
  0xa1   : > { %v304_v40 = vmul.f32 %v393_v35, %v295_v37 }
  0xa2   : > { %v303_v43 = vmul.f32 %v393_v35, %v294_v41 }
  0xa3   : > { %v313_v42 = vadd.f32 %v394_v39, %v304_v40 }
  0xa4   : > { %v312_v45 = vadd.f32 %v394_v39, %v303_v43 }
  0xa5   : > { %v315_v44 = vmax.f32 %v313_v42, 0.0 }
  0xa6   : > { %v314_v47 = vmax.f32 %v312_v45, 0.0 }
  0xa7   : > { %v402_v46 = vpack.c.bf16 %v315_v44, %v315_v44 }
  0xa8   : > { %v401_v48 = vpack.c.bf16 %v314_v47, %v314_v47 }
  0xa9   : > { %325 = vst [vmem:[%s224_s13 + $0x4] sm:$0x7] %v402_v46 }
  0xaa   : > { %324 = vst [vmem:[%s224_s13] sm:$0xf] %v401_v48 }
  0xab PF: > { %s15_s18 = sadd.s32 1, %s428_s18  }
  0xac   : > { %p12_p4 = scmp.ge.s32.totalorder %s15_s18, 6  }
  0xae   :  { %14 = sbr.rel (!%p12_p4) target bundleno = 1 (0x1), region = 72 }

// kernel: carnet_forward.12
= control target key start
LH: loop header
LB: loop body
LE: loop exit
PB: predicated region body
PF: predicated region fallthrough
CT: control target
= control target key end

     0   :  { %s1015_s18 = smov 0   ;;  %s1195_s0 = inlined_call_operand.vmem [shape: bf16[4,12,128], index: 0, kind: input, shape index: {}]   ;;  %s1196_s1 = inlined_call_operand.vmem [shape: bf16[3,128,256], index: 1, kind: input, shape index: {}]   ;;  %s1197_s2 = inlined_call_operand.vmem [shape: f32[1,256], index: 2, kind: input, shape index: {}]   ;;  %s1198_s3 = inlined_call_operand.vmem [shape: f32[1,256], index: 3, kind: input, shape index: {}]   ;;  %s1199_s4 = inlined_call_operand.vmem [shape: f32[1,256], index: 4, kind: input, shape index: {}]   ;;  %s1200_s5 = inlined_call_operand.vmem [shape: bf16[4,10,256], index: 5, kind: output, shape index: {}]  }
   0x1 LB: > { %s788_s19 = sadd.s32 4294967295, %s982_s18   ;;  %p792_p0 = scmp.ge.s32.totalorder %s982_s18, 1  ;;  %s982_s18 = sphi %s1015_s18, %s15_s18  }
   0x2   : > { %p187_p1 = scmp.lt.s32.totalorder %s982_s18, 5 }
   0x4   : > { %p188_p2 = pnand %p792_p0, %p187_p1 }
   0x5   : > { %v903_v0 = vld [vmem:[%s1196_s1 + $0x4] ss:$8 sps:$4 sm:$0xff] (!%p188_p2)   ;;  %v905_v1 = vld [vmem:[%s1196_s1] ss:$8 sps:$4 sm:$0xff] (!%p188_p2)   ;;  %v984_v2 = vmov (!%p188_p2), 0   ;;  %p215_p3 = scmp.lt.s32.totalorder (!%p188_p2), %s788_s19, 3  ;;  %v669_v59 = vlaneseq (!%p188_p2) }
   0x6   : > { %191 = sbr.rel (%p188_p2) target bundleno = 299 (0x12b), region = 40  ;;  %510 = vmatprep.mubr.bf16.mxu0 (!%p188_p2), %v984_v2  ;;  %386 = vmatprep.mubr.bf16.mxu1 (!%p188_p2), %v984_v2  ;;  %v906_v3 = vld [vmem:[%s1196_s1 + $0x14] ss:$8 sps:$4 sm:$0xff] (!%p188_p2)   ;;  %v908_v4 = vld [vmem:[%s1196_s1 + $0x10] ss:$8 sps:$4 sm:$0xff] (!%p188_p2)  }
   0x7   : > { %478 = vmatprep.subr.bf16.mxu0 (!%p188_p2), %v903_v0  ;;  %v909_v5 = vld [vmem:[%s1196_s1 + $0x24] ss:$8 sps:$4 sm:$0xff] (!%p188_p2)   ;;  %v911_v6 = vld [vmem:[%s1196_s1 + $0x20] ss:$8 sps:$4 sm:$0xff] (!%p188_p2)   ;;  %v912_v7 = vld [vmem:[%s1196_s1 + $0x34] ss:$8 sps:$4 sm:$0xff] (!%p188_p2)  }
   0x8   : > { %479 = vmatpush1.bf16.msra.mxu0 (!%p188_p2), %v905_v1  ;;  %v914_v8 = vld [vmem:[%s1196_s1 + $0x30] ss:$8 sps:$4 sm:$0xff] (!%p188_p2)   ;;  %v926_v9 = vld [vmem:[%s1196_s1 + $0x84] ss:$8 sps:$4 sm:$0xff] (!%p188_p2)   ;;  %v929_v10 = vld [vmem:[%s1196_s1 + $0x80] ss:$8 sps:$4 sm:$0xff] (!%p188_p2)  }
   0x9   : > { %480 = vmatprep.subr.bf16.mxu0 (!%p188_p2), %v906_v3  ;;  %v915_v11 = vld [vmem:[%s1196_s1 + $0x44] ss:$8 sps:$4 sm:$0xff] (!%p188_p2)   ;;  %354 = vmatprep.subr.bf16.mxu1 (!%p188_p2), %v926_v9  ;;  %v933_v12 = vld [vmem:[%s1196_s1 + $0x94] ss:$8 sps:$4 sm:$0xff] (!%p188_p2)   ;;  %v917_v13 = vld [vmem:[%s1196_s1 + $0x40] ss:$8 sps:$4 sm:$0xff] (!%p188_p2)  }
   0xa   : > { %355 = vmatpush1.bf16.msra.mxu1 (!%p188_p2), %v929_v10  ;;  %v936_v14 = vld [vmem:[%s1196_s1 + $0x90] ss:$8 sps:$4 sm:$0xff] (!%p188_p2)   ;;  %v918_v15 = vld [vmem:[%s1196_s1 + $0x54] ss:$8 sps:$4 sm:$0xff] (!%p188_p2)   ;;  %v940_v16 = vld [vmem:[%s1196_s1 + $0xa4] ss:$8 sps:$4 sm:$0xff] (!%p188_p2)  }
   0xb   : > { %356 = vmatprep.subr.bf16.mxu1 (!%p188_p2), %v933_v12  ;;  %v942_v17 = vld [vmem:[%s1196_s1 + $0xa0] ss:$8 sps:$4 sm:$0xff] (!%p188_p2)   ;;  %v920_v18 = vld [vmem:[%s1196_s1 + $0x50] ss:$8 sps:$4 sm:$0xff] (!%p188_p2)   ;;  %v921_v19 = vld [vmem:[%s1196_s1 + $0x64] ss:$8 sps:$4 sm:$0xff] (!%p188_p2)  }
   0xc   : > { %481 = vmatpush1.bf16.msra.mxu0 (!%p188_p2), %v908_v4  ;;  %v946_v20 = vld [vmem:[%s1196_s1 + $0xb4] ss:$8 sps:$4 sm:$0xff] (!%p188_p2)   ;;  %v948_v21 = vld [vmem:[%s1196_s1 + $0xb0] ss:$8 sps:$4 sm:$0xff] (!%p188_p2)   ;;  %v923_v22 = vld [vmem:[%s1196_s1 + $0x60] ss:$8 sps:$4 sm:$0xff] (!%p188_p2)  }
   0xd   : > { %s1202_s19 = smov (!%p215_p3, %s788_s19), 3  ;;  %482 = vmatprep.subr.bf16.mxu0 %v909_v5  ;;  %v952_v23 = vld [vmem:[%s1196_s1 + $0xc4] ss:$8 sps:$4 sm:$0xff]   ;;  %v924_v24 = vld [vmem:[%s1196_s1 + $0x74] ss:$8 sps:$4 sm:$0xff]   ;;  %v670_v60 = vshrl.u32 %v669_v59, 7 }
   0xe   : > { %s882_s9 = sshll.u32 %s1202_s19, 3  ;;  %357 = vmatpush1.bf16.msra.mxu1 %v936_v14  ;;  %v954_v25 = vld [vmem:[%s1196_s1 + $0xc0] ss:$8 sps:$4 sm:$0xff]   ;;  %v928_v26 = vld [vmem:[%s1196_s1 + $0x70] ss:$8 sps:$4 sm:$0xff]   ;;  %s883_s10 = sshll.u32 %s1202_s19, 4 }
   0xf   : > { %s1064_s22 = scalar_lea.vmem %s1195_s0, %s882_s9  ;;  %358 = vmatprep.subr.bf16.mxu1 %v940_v16  ;;  %v958_v27 = vld [vmem:[%s1196_s1 + $0xd4] ss:$8 sps:$4 sm:$0xff]   ;;  %v932_v28 = vld [vmem:[%s1196_s1 + $0x104] ss:$8 sps:$4 sm:$0xff]   ;;  %v960_v30 = vld [vmem:[%s1196_s1 + $0xd0] ss:$8 sps:$4 sm:$0xff]   ;;  %s224_s13 = scalar_lea.vmem %s1200_s5, %s883_s10 }
  0x10   : > { %483 = vmatpush1.bf16.msra.mxu0 %v911_v6  ;;  %v935_v29 = vld [vmem:[%s1064_s22] sm:$0x3f]   ;;  %v939_v33 = vld [vmem:[%s1196_s1 + $0x114] ss:$8 sps:$4 sm:$0xff]   ;;  %v937_v36 = vld [vmem:[%s1196_s1 + $0x110] ss:$8 sps:$4 sm:$0xff]  }
  0x11   : > { %484 = vmatprep.subr.bf16.mxu0 %v912_v7  ;;  %v930_v31 = vld [vmem:[%s1196_s1 + $0x100] ss:$8 sps:$4 sm:$0xff]   ;;  %v964_v32 = vld [vmem:[%s1196_s1 + $0xe4] ss:$8 sps:$4 sm:$0xff]   ;;  %v269_v34 = vshll.u32 %v935_v29, 16  ;;  %v267_v39 = vshrl.u32 %v935_v29, 16 }
  0x12   : > { %359 = vmatpush1.bf16.msra.mxu1 %v942_v17  ;;  %v966_v35 = vld [vmem:[%s1196_s1 + $0xe0] ss:$8 sps:$4 sm:$0xff]   ;;  %v970_v37 = vld [vmem:[%s1196_s1 + $0xf4] ss:$8 sps:$4 sm:$0xff]   ;;  %v945_v38 = vld [vmem:[%s1196_s1 + $0x124] ss:$8 sps:$4 sm:$0xff]  }
  0x13   : > { %360 = vmatprep.subr.bf16.mxu1 %v946_v20  ;;  %v271_v40 = vrot.slane %v269_v34, 1  ;;  %v972_v41 = vld [vmem:[%s1196_s1 + $0xf0] ss:$8 sps:$4 sm:$0xff]   ;;  %v943_v42 = vld [vmem:[%s1196_s1 + $0x120] ss:$8 sps:$4 sm:$0xff]   ;;  %v538_v54 = vrot.slane %v935_v29, 1 }
  0x14   : > { %485 = vmatpush1.bf16.msra.mxu0 %v914_v8  ;;  %v951_v43 = vld [vmem:[%s1196_s1 + $0x134] ss:$8 sps:$4 sm:$0xff]   ;;  %v949_v45 = vld [vmem:[%s1196_s1 + $0x130] ss:$8 sps:$4 sm:$0xff]   ;;  %v957_v46 = vld [vmem:[%s1196_s1 + $0x144] ss:$8 sps:$4 sm:$0xff]  }
  0x15   : > { %486 = vmatprep.subr.bf16.mxu0 %v915_v11  ;;  %v272_v44 = vor.u32 %v271_v40, %v267_v39  ;;  %v955_v47 = vld [vmem:[%s1196_s1 + $0x140] ss:$8 sps:$4 sm:$0xff]   ;;  %v963_v48 = vld [vmem:[%s1196_s1 + $0x154] ss:$8 sps:$4 sm:$0xff]   ;;  %v961_v49 = vld [vmem:[%s1196_s1 + $0x150] ss:$8 sps:$4 sm:$0xff]  }
  0x16   : > { %361 = vmatpush1.bf16.msra.mxu1 %v948_v21  ;;  %v969_v50 = vld [vmem:[%s1196_s1 + $0x164] ss:$8 sps:$4 sm:$0xff]   ;;  %v967_v51 = vld [vmem:[%s1196_s1 + $0x160] ss:$8 sps:$4 sm:$0xff]   ;;  %v975_v52 = vld [vmem:[%s1196_s1 + $0x174] ss:$8 sps:$4 sm:$0xff]  }
  0x17   : > { %362 = vmatprep.subr.bf16.mxu1 %v952_v23  ;;  %v973_v53 = vld [vmem:[%s1196_s1 + $0x170] ss:$8 sps:$4 sm:$0xff]   ;;  %v671_v61 = vsub.s32 0, %v670_v60  ;;  %v667_v62 = vld [vmem:[%s1197_s2] sm:$0x3]  ;;  %v675_v63 = vsub.s32 1, %v670_v60 }
  0x18   : > { %487 = vmatpush1.bf16.msra.mxu0 %v917_v13  ;;  %v683_v0 = vld [vmem:[%s1198_s3] sm:$0x3] }
  0x19   : > { %488 = vmatprep.subr.bf16.mxu0 %v918_v15  ;;  %v672_v1 = vrot.slane %v667_v62, %v671_v61  ;;  %v699_v3 = vld [vmem:[%s1199_s4] sm:$0x3]  ;;  %v676_v4 = vrot.slane %v667_v62, %v675_v63  ;;  %v688_v6 = vrot.slane %v683_v0, %v671_v61  ;;  %v692_v9 = vrot.slane %v683_v0, %v675_v63 }
  0x1a   : > { %363 = vmatpush1.bf16.msra.mxu1 %v954_v25  ;;  %v704_v12 = vrot.slane %v699_v3, %v671_v61  ;;  %v708_v16 = vrot.slane %v699_v3, %v675_v63 }
  0x1b   : > { %364 = vmatprep.subr.bf16.mxu1 %v958_v27 }
  0x1c   : > { %489 = vmatpush1.bf16.msra.mxu0 %v920_v18 }
  0x1d   : > { %490 = vmatprep.subr.bf16.mxu0 %v921_v19 }
  0x1e   : > { %365 = vmatpush1.bf16.msra.mxu1 %v960_v30 }
  0x1f   : > { %366 = vmatprep.subr.bf16.mxu1 %v964_v32 }
  0x20   : > { %491 = vmatpush1.bf16.msra.mxu0 %v923_v22 }
  0x21   : > { %492 = vmatprep.subr.bf16.mxu0 %v924_v24 }
  0x22   : > { %367 = vmatpush1.bf16.msra.mxu1 %v966_v35 }
  0x23   : > { %368 = vmatprep.subr.bf16.mxu1 %v970_v37 }
  0x24   : > { %493 = vmatpush1.bf16.msra.mxu0 %v928_v26 }
  0x25   : > { %620 = vmatprep.subr.bf16.mxu0 %v932_v28 }
  0x26   : > { %369 = vmatpush1.bf16.msra.mxu1 %v972_v41 }
  0x27   : > { %511 = vmatmul.mubr.bf16.vlgmr.msra.gmra.mrb[0].mxu0 %v935_v29 }
  0x28   : > { %621 = vmatpush1.bf16.msra.mxu0 %v930_v31  ;;  %652 = vmatprep.mubr.bf16.mxu0 %v984_v2 }
  0x29   : > { %622 = vmatprep.subr.bf16.mxu0 %v939_v33  ;;  %387 = vmatmul.mubr.bf16.vlgmr.msra.gmra.mrb[0].mxu1 %v272_v44 }
  0x2c   : > { %623 = vmatpush1.bf16.msra.mxu0 %v937_v36 }
  0x2d   : > { %624 = vmatprep.subr.bf16.mxu0 %v945_v38 }
  0x30   : > { %625 = vmatpush1.bf16.msra.mxu0 %v943_v42 }
  0x31   : > { %626 = vmatprep.subr.bf16.mxu0 %v951_v43 }
  0x34   : > { %627 = vmatpush1.bf16.msra.mxu0 %v949_v45 }
  0x35   : > { %628 = vmatprep.subr.bf16.mxu0 %v957_v46 }
  0x38   : > { %629 = vmatpush1.bf16.msra.mxu0 %v955_v47 }
  0x39   : > { %630 = vmatprep.subr.bf16.mxu0 %v963_v48 }
  0x3c   : > { %631 = vmatpush1.bf16.msra.mxu0 %v961_v49 }
  0x3d   : > { %632 = vmatprep.subr.bf16.mxu0 %v969_v50 }
  0x40   : > { %633 = vmatpush1.bf16.msra.mxu0 %v967_v51 }
  0x41   : > { %634 = vmatprep.subr.bf16.mxu0 %v975_v52 }
  0x44   : > { %635 = vmatpush1.bf16.msra.mxu0 %v973_v53 }
  0x47   : > { %653 = vmatmul.mubr.bf16.vlgmr.msra.gmra.mrb[0].mxu0 %v538_v54 }
  0xfc   : > { %v388_v55 = vpop.f32.mrb[0].mxu1 }
  0xfd   : > { %v390_v56 = vpop.f32.mrb[1].mxu1 }
  0xfe   : > { %v392_v57 = vpop.f32.mrb[2].mxu1 }
  0xff   : > { %v394_v58 = vpop.f32.mrb[3].mxu1 }
 0x11a   : > { %v654_v2 = vpop.f32.mrb[0].mxu0 }
 0x11b   : > { %v886_v5 = vadd.f32 %v654_v2, %v388_v55  ;;  %v656_v7 = vpop.f32.mrb[1].mxu0 }
 0x11c   : > { %v887_v8 = vadd.f32 %v656_v7, %v390_v56  ;;  %v658_v10 = vpop.f32.mrb[2].mxu0 }
 0x11d   : > { %v679_v11 = vadd.f32 %v886_v5, %v672_v1  ;;  %v888_v13 = vadd.f32 %v658_v10, %v392_v57  ;;  %v660_v14 = vpop.f32.mrb[3].mxu0 }
 0x11e   : > { %v680_v15 = vadd.f32 %v887_v8, %v676_v4  ;;  %v889_v17 = vadd.f32 %v660_v14, %v394_v58 }
 0x11f   : > { %v695_v18 = vmul.f32 %v688_v6, %v679_v11  ;;  %v681_v19 = vadd.f32 %v888_v13, %v672_v1 }
 0x120   : > { %v696_v20 = vmul.f32 %v692_v9, %v680_v15  ;;  %v682_v21 = vadd.f32 %v889_v17, %v676_v4 }
 0x121   : > { %v711_v22 = vadd.f32 %v704_v12, %v695_v18  ;;  %v697_v23 = vmul.f32 %v688_v6, %v681_v19 }
 0x122   : > { %v712_v24 = vadd.f32 %v708_v16, %v696_v20  ;;  %v698_v25 = vmul.f32 %v692_v9, %v682_v21 }
 0x123   : > { %v715_v26 = vmax.f32 %v711_v22, 0.0  ;;  %v713_v27 = vadd.f32 %v704_v12, %v697_v23 }
 0x124   : > { %v716_v28 = vmax.f32 %v712_v24, 0.0  ;;  %v714_v29 = vadd.f32 %v708_v16, %v698_v25 }
 0x125   : > { %v717_v30 = vmax.f32 %v713_v27, 0.0 }
 0x126   : > { %v884_v31 = vpack.c.bf16 %v716_v28, %v715_v26  ;;  %v718_v32 = vmax.f32 %v714_v29, 0.0 }
 0x128   : > { %731 = vst [vmem:[%s224_s13] sm:$0xff] %v884_v31  ;;  %v885_v33 = vpack.c.bf16 %v718_v32, %v717_v30 }
 0x12a   : > { %732 = vst [vmem:[%s224_s13 + $0x8] sm:$0x11] %v885_v33 }
 0x12b PF: > { %s15_s18 = sadd.s32 1, %s982_s18  }
 0x12c   : > { %p12_p4 = scmp.ge.s32.totalorder %s15_s18, 6  }
 0x12e   :  { %14 = sbr.rel (!%p12_p4) target bundleno = 1 (0x1), region = 72 }

// kernel: carnet_forward.13
= control target key start
LH: loop header
LB: loop body
LE: loop exit
PB: predicated region body
PF: predicated region fallthrough
CT: control target
= control target key end

     0   :  { %s1350_s18 = smov 0   ;;  %s1352_s19 = smov 0   ;;  %s1578_s0 = inlined_call_operand.vmem [shape: bf16[40,256], index: 0, kind: input, shape index: {}]   ;;  %s1579_s1 = inlined_call_operand.vmem [shape: bf16[256,1024], index: 1, kind: input, shape index: {}]   ;;  %s1580_s2 = inlined_call_operand.vmem [shape: f32[1,1024], index: 2, kind: input, shape index: {}]   ;;  %s1581_s3 = inlined_call_operand.vmem [shape: f32[1,1024], index: 3, kind: input, shape index: {}]   ;;  %s1582_s4 = inlined_call_operand.vmem [shape: f32[1,1024], index: 4, kind: input, shape index: {}]   ;;  %s1583_s5 = inlined_call_operand.vmem [shape: f32[40,1024], index: 5, kind: output, shape index: {}]  }
   0x1   :  { %s1354_s20 = smov 0   ;;  %s1356_s21 = smov 0  }
   0x2   :  { %s1358_s22 = smov 0  }
   0x3 LB: > { %s30_s23 = sadd.s32 1, %s1314_s21  ;;  %s1094_s24 = sadd.s32 4294967295, %s1318_s22   ;;  %s1318_s22 = sphi %s1358_s22, %s15_s22   ;;  %s1314_s21 = sphi %s1356_s21, %s1588_s21   ;;  %s1310_s20 = sphi %s1354_s20, %s1587_s20   ;;  %s1306_s19 = sphi %s1352_s19, %s1586_s19   ;;  %s1302_s18 = sphi %s1350_s18, %s1585_s18  }
   0x4   : > { %p32_p0 = scmp.ge.s32.totalorder %s30_s23, 4  ;;  %p78_p1 = scmp.ne.s32.totalorder %s1306_s19, %s1302_s18 }
   0x5   : > { %p79_p2 = scmp.eq.s32.totalorder %s1318_s22, 0  ;;  %p188_p4 = scmp.eq.s32.totalorder %s1094_s24, 3 }
   0x6   : > { %s1590_s23 = smov (%p32_p0, %s30_s23), 0  ;;  %s71_s26 = sadd.s32 1, %s1306_s19 }
   0x7   : > { %p80_p3 = por %p79_p2, %p78_p1  ;;  %s67_s25 = ssub.s32 %s1314_s21, %s1590_s23 }
   0x8   : > { %p69_p5 = scmp.eq.s32.totalorder %s67_s25, 0  ;;  %p1385_p6 = por %p188_p4, %p78_p1 }
   0x9   : > { %p1098_p7 = scmp.ge.s32.totalorder %s1318_s22, 4 }
   0xa   : > { %s1390_s28 = scalar_select %p69_p5, %s1306_s19, %s71_s26  }
   0xb   : > { %225 = sbr.rel (%p1098_p7) target bundleno = 54 (0x36), region = 20 }
  0x12   : > { %228 = sbr.rel (!%p80_p3) target bundleno = 54 (0x36), region = 24  ;;  %s230_s29 = sand.u32 (%p80_p3), 1, %s1306_s19  }
  0x13   : > { %s1149_s30 = sshll.u32 (%p80_p3), %s1314_s21, 3  ;;  %s1099_s6 = sshll.u32 (%p80_p3), %s230_s29, 8 }
  0x14   : > { %s1398_s9 = scalar_lea.vmem (%p80_p3), %s1579_s1, %s1149_s30  ;;  %s1403_s10 = scalar_lea.vmem (%p80_p3), [#allocation3], %s1099_s6 }
  0x15   : > { %v328_v0 = vld [vmem:[%s1398_s9] sm:$0xff] (%p80_p3) }
  0x16   : > { %v330_v1 = vld [vmem:[%s1398_s9 + $0x20] sm:$0xff] (%p80_p3)  ;;  %329 = vst [vmem:[%s1403_s10] sm:$0xff] (%p80_p3), %v328_v0 }
  0x17   : > { %v332_v2 = vld [vmem:[%s1398_s9 + $0x40] sm:$0xff] (%p80_p3)  ;;  %331 = vst [vmem:[%s1403_s10 + $0x8] sm:$0xff] (%p80_p3), %v330_v1 }
  0x18   : > { %333 = vst [vmem:[%s1403_s10 + $0x10] sm:$0xff] (%p80_p3), %v332_v2  ;;  %v334_v3 = vld [vmem:[%s1398_s9 + $0x60] sm:$0xff] (%p80_p3) }
  0x19   : > { %v336_v4 = vld [vmem:[%s1398_s9 + $0x80] sm:$0xff]  ;;  %335 = vst [vmem:[%s1403_s10 + $0x18] sm:$0xff] %v334_v3 }
  0x1a   : > { %v338_v5 = vld [vmem:[%s1398_s9 + $0xa0] sm:$0xff]  ;;  %337 = vst [vmem:[%s1403_s10 + $0x20] sm:$0xff] %v336_v4 }
  0x1b   : > { %339 = vst [vmem:[%s1403_s10 + $0x28] sm:$0xff] %v338_v5  ;;  %v340_v6 = vld [vmem:[%s1398_s9 + $0xc0] sm:$0xff] }
  0x1c   : > { %v342_v7 = vld [vmem:[%s1398_s9 + $0xe0] sm:$0xff]  ;;  %341 = vst [vmem:[%s1403_s10 + $0x30] sm:$0xff] %v340_v6 }
  0x1d   : > { %v344_v8 = vld [vmem:[%s1398_s9 + $0x100] sm:$0xff]  ;;  %343 = vst [vmem:[%s1403_s10 + $0x38] sm:$0xff] %v342_v7 }
  0x1e   : > { %345 = vst [vmem:[%s1403_s10 + $0x40] sm:$0xff] %v344_v8  ;;  %v346_v9 = vld [vmem:[%s1398_s9 + $0x120] sm:$0xff] }
  0x1f   : > { %v348_v10 = vld [vmem:[%s1398_s9 + $0x140] sm:$0xff]  ;;  %347 = vst [vmem:[%s1403_s10 + $0x48] sm:$0xff] %v346_v9 }
  0x20   : > { %v350_v11 = vld [vmem:[%s1398_s9 + $0x160] sm:$0xff]  ;;  %349 = vst [vmem:[%s1403_s10 + $0x50] sm:$0xff] %v348_v10 }
  0x21   : > { %351 = vst [vmem:[%s1403_s10 + $0x58] sm:$0xff] %v350_v11  ;;  %v352_v12 = vld [vmem:[%s1398_s9 + $0x180] sm:$0xff] }
  0x22   : > { %v354_v13 = vld [vmem:[%s1398_s9 + $0x1a0] sm:$0xff]  ;;  %353 = vst [vmem:[%s1403_s10 + $0x60] sm:$0xff] %v352_v12 }
  0x23   : > { %v356_v14 = vld [vmem:[%s1398_s9 + $0x1c0] sm:$0xff]  ;;  %355 = vst [vmem:[%s1403_s10 + $0x68] sm:$0xff] %v354_v13 }
  0x24   : > { %357 = vst [vmem:[%s1403_s10 + $0x70] sm:$0xff] %v356_v14  ;;  %v358_v15 = vld [vmem:[%s1398_s9 + $0x1e0] sm:$0xff] }
  0x25   : > { %v360_v16 = vld [vmem:[%s1398_s9 + $0x200] sm:$0xff]  ;;  %359 = vst [vmem:[%s1403_s10 + $0x78] sm:$0xff] %v358_v15 }
  0x26   : > { %v362_v17 = vld [vmem:[%s1398_s9 + $0x220] sm:$0xff]  ;;  %361 = vst [vmem:[%s1403_s10 + $0x80] sm:$0xff] %v360_v16 }
  0x27   : > { %363 = vst [vmem:[%s1403_s10 + $0x88] sm:$0xff] %v362_v17  ;;  %v364_v18 = vld [vmem:[%s1398_s9 + $0x240] sm:$0xff] }
  0x28   : > { %v366_v19 = vld [vmem:[%s1398_s9 + $0x260] sm:$0xff]  ;;  %365 = vst [vmem:[%s1403_s10 + $0x90] sm:$0xff] %v364_v18 }
  0x29   : > { %v368_v20 = vld [vmem:[%s1398_s9 + $0x280] sm:$0xff]  ;;  %367 = vst [vmem:[%s1403_s10 + $0x98] sm:$0xff] %v366_v19 }
  0x2a   : > { %369 = vst [vmem:[%s1403_s10 + $0xa0] sm:$0xff] %v368_v20  ;;  %v370_v21 = vld [vmem:[%s1398_s9 + $0x2a0] sm:$0xff] }
  0x2b   : > { %v372_v22 = vld [vmem:[%s1398_s9 + $0x2c0] sm:$0xff]  ;;  %371 = vst [vmem:[%s1403_s10 + $0xa8] sm:$0xff] %v370_v21 }
  0x2c   : > { %v374_v23 = vld [vmem:[%s1398_s9 + $0x2e0] sm:$0xff]  ;;  %373 = vst [vmem:[%s1403_s10 + $0xb0] sm:$0xff] %v372_v22 }
  0x2d   : > { %375 = vst [vmem:[%s1403_s10 + $0xb8] sm:$0xff] %v374_v23  ;;  %v376_v24 = vld [vmem:[%s1398_s9 + $0x300] sm:$0xff] }
  0x2e   : > { %v378_v25 = vld [vmem:[%s1398_s9 + $0x320] sm:$0xff]  ;;  %377 = vst [vmem:[%s1403_s10 + $0xc0] sm:$0xff] %v376_v24 }
  0x2f   : > { %v380_v26 = vld [vmem:[%s1398_s9 + $0x340] sm:$0xff]  ;;  %379 = vst [vmem:[%s1403_s10 + $0xc8] sm:$0xff] %v378_v25 }
  0x30   : > { %381 = vst [vmem:[%s1403_s10 + $0xd0] sm:$0xff] %v380_v26  ;;  %v382_v27 = vld [vmem:[%s1398_s9 + $0x360] sm:$0xff] }
  0x31   : > { %v384_v28 = vld [vmem:[%s1398_s9 + $0x380] sm:$0xff]  ;;  %383 = vst [vmem:[%s1403_s10 + $0xd8] sm:$0xff] %v382_v27 }
  0x32   : > { %v386_v29 = vld [vmem:[%s1398_s9 + $0x3a0] sm:$0xff]  ;;  %385 = vst [vmem:[%s1403_s10 + $0xe0] sm:$0xff] %v384_v28 }
  0x33   : > { %387 = vst [vmem:[%s1403_s10 + $0xe8] sm:$0xff] %v386_v29  ;;  %v388_v30 = vld [vmem:[%s1398_s9 + $0x3c0] sm:$0xff] }
  0x34   : > { %v390_v31 = vld [vmem:[%s1398_s9 + $0x3e0] sm:$0xff]  ;;  %389 = vst [vmem:[%s1403_s10 + $0xf0] sm:$0xff] %v388_v30 }
  0x35   : > { %391 = vst [vmem:[%s1403_s10 + $0xf8] sm:$0xff] %v390_v31 }
  0x36 PF: > { %p1102_p8 = scmp.ge.s32.totalorder %s1318_s22, 1  ;;  %p420_p9 = scmp.lt.s32.totalorder %s1318_s22, 5 }
  0x38   : > { %p421_p10 = pnand %p1102_p8, %p420_p9 }
  0x39   : > { %s427_s11 = sand.u32 (!%p421_p10), 1, %s1302_s18   ;;  %v1274_v32 = vld [vmem:[%s1578_s0 + $0x14] ss:$8 sps:$4 sm:$0xff] (!%p421_p10)   ;;  %v1277_v33 = vld [vmem:[%s1578_s0 + $0x4] ss:$8 sps:$4 sm:$0xff] (!%p421_p10)   ;;  %s1104_s7 = sshll.u32 (!%p421_p10), %s1310_s20, 1  ;;  %v850_v7 = vlaneseq (!%p421_p10) }
  0x3a   : > { %424 = sbr.rel (%p421_p10) target bundleno = 361 (0x169), region = 74  ;;  %s1103_s12 = sshll.u32 (!%p421_p10), %s427_s11, 8  ;;  %796 = vmatprep.mubr.bf16.mxu1 (!%p421_p10), %v1274_v32  ;;  %786 = vmatprep.mubr.bf16.mxu0 (!%p421_p10), %v1277_v33  ;;  %v534_v2 = vld [vmem:[%s1578_s0 + $0x20] sm:$0xff] (!%p421_p10)  ;;  %v1272_v3 = vld [vmem:[%s1578_s0 + $0x10] ss:$8 sps:$4 sm:$0xff] (!%p421_p10)  }
  0x3b   : > { %s1477_s17 = scalar_lea.vmem (!%p421_p10), [#allocation3], %s1103_s12  ;;  %v1275_v4 = vld [vmem:[%s1578_s0] ss:$8 sps:$4 sm:$0xff] (!%p421_p10)   ;;  %v1112_v5 = vcombine.high (!%p421_p10), %v534_v2, %v534_v2  ;;  %v1111_v6 = vcombine.low (!%p421_p10), %v534_v2, %v534_v2  ;;  %p490_p11 = scmp.lt.s32.totalorder (!%p421_p10), %s1104_s7, 7  ;;  %v851_v8 = vshrl.u32 (!%p421_p10), %v850_v7, 7 }
  0x3c   : > { %v1224_v34 = vld [vmem:[%s1477_s17 + $0x4] ss:$8 sps:$4 sm:$0xff] (!%p421_p10)   ;;  %v1226_v35 = vld [vmem:[%s1477_s17] ss:$8 sps:$4 sm:$0xff] (!%p421_p10)   ;;  %v1227_v36 = vld [vmem:[%s1477_s17 + $0x14] ss:$8 sps:$4 sm:$0xff] (!%p421_p10)  }
  0x3d   : > { %1151 = vmatprep.subr.bf16.mxu1 (!%p421_p10), %v1224_v34  ;;  %754 = vmatprep.subr.bf16.mxu0 (!%p421_p10), %v1224_v34  ;;  %v1229_v37 = vld [vmem:[%s1477_s17 + $0x10] ss:$8 sps:$4 sm:$0xff] (!%p421_p10)   ;;  %v1230_v38 = vld [vmem:[%s1477_s17 + $0x24] ss:$8 sps:$4 sm:$0xff] (!%p421_p10)   ;;  %v1232_v39 = vld [vmem:[%s1477_s17 + $0x20] ss:$8 sps:$4 sm:$0xff] (!%p421_p10)  }
  0x3e   : > { %1167 = vmatpush1.bf16.msra.mxu1 (!%p421_p10), %v1226_v35  ;;  %755 = vmatpush1.bf16.msra.mxu0 (!%p421_p10), %v1226_v35  ;;  %v1233_v40 = vld [vmem:[%s1477_s17 + $0x34] ss:$8 sps:$4 sm:$0xff] (!%p421_p10)   ;;  %v1235_v41 = vld [vmem:[%s1477_s17 + $0x30] ss:$8 sps:$4 sm:$0xff] (!%p421_p10)   ;;  %v1236_v42 = vld [vmem:[%s1477_s17 + $0x44] ss:$8 sps:$4 sm:$0xff] (!%p421_p10)  }
  0x3f   : > { %1152 = vmatprep.subr.bf16.mxu1 (!%p421_p10), %v1227_v36  ;;  %756 = vmatprep.subr.bf16.mxu0 (!%p421_p10), %v1227_v36  ;;  %v1238_v43 = vld [vmem:[%s1477_s17 + $0x40] ss:$8 sps:$4 sm:$0xff] (!%p421_p10)   ;;  %v1239_v44 = vld [vmem:[%s1477_s17 + $0x54] ss:$8 sps:$4 sm:$0xff] (!%p421_p10)   ;;  %v1241_v45 = vld [vmem:[%s1477_s17 + $0x50] ss:$8 sps:$4 sm:$0xff] (!%p421_p10)  }
  0x40   : > { %v1242_v46 = vld [vmem:[%s1477_s17 + $0x64] ss:$8 sps:$4 sm:$0xff] (!%p421_p10)   ;;  %v1244_v47 = vld [vmem:[%s1477_s17 + $0x60] ss:$8 sps:$4 sm:$0xff] (!%p421_p10)   ;;  %v1245_v48 = vld [vmem:[%s1477_s17 + $0x74] ss:$8 sps:$4 sm:$0xff] (!%p421_p10)  }
  0x41   : > { %v1247_v49 = vld [vmem:[%s1477_s17 + $0x70] ss:$8 sps:$4 sm:$0xff]   ;;  %v1248_v50 = vld [vmem:[%s1477_s17 + $0x84] ss:$8 sps:$4 sm:$0xff]   ;;  %v1250_v51 = vld [vmem:[%s1477_s17 + $0x80] ss:$8 sps:$4 sm:$0xff]  }
  0x42   : > { %1168 = vmatpush1.bf16.msra.mxu1 %v1229_v37  ;;  %757 = vmatpush1.bf16.msra.mxu0 %v1229_v37  ;;  %v1251_v52 = vld [vmem:[%s1477_s17 + $0x94] ss:$8 sps:$4 sm:$0xff]   ;;  %v1253_v53 = vld [vmem:[%s1477_s17 + $0x90] ss:$8 sps:$4 sm:$0xff]   ;;  %v1254_v54 = vld [vmem:[%s1477_s17 + $0xa4] ss:$8 sps:$4 sm:$0xff]  }
  0x43   : > { %1153 = vmatprep.subr.bf16.mxu1 %v1230_v38  ;;  %758 = vmatprep.subr.bf16.mxu0 %v1230_v38  ;;  %v1256_v55 = vld [vmem:[%s1477_s17 + $0xa0] ss:$8 sps:$4 sm:$0xff]   ;;  %v1257_v56 = vld [vmem:[%s1477_s17 + $0xb4] ss:$8 sps:$4 sm:$0xff]   ;;  %v1259_v57 = vld [vmem:[%s1477_s17 + $0xb0] ss:$8 sps:$4 sm:$0xff]  }
  0x44   : > { %v1260_v58 = vld [vmem:[%s1477_s17 + $0xc4] ss:$8 sps:$4 sm:$0xff]   ;;  %v1262_v59 = vld [vmem:[%s1477_s17 + $0xc0] ss:$8 sps:$4 sm:$0xff]   ;;  %v1263_v60 = vld [vmem:[%s1477_s17 + $0xd4] ss:$8 sps:$4 sm:$0xff]  }
  0x45   : > { %v1265_v61 = vld [vmem:[%s1477_s17 + $0xd0] ss:$8 sps:$4 sm:$0xff]   ;;  %v1266_v62 = vld [vmem:[%s1477_s17 + $0xe4] ss:$8 sps:$4 sm:$0xff]   ;;  %v1268_v63 = vld [vmem:[%s1477_s17 + $0xe0] ss:$8 sps:$4 sm:$0xff]  }
  0x46   : > { %1169 = vmatpush1.bf16.msra.mxu1 %v1232_v39  ;;  %759 = vmatpush1.bf16.msra.mxu0 %v1232_v39  ;;  %v1269_v0 = vld [vmem:[%s1477_s17 + $0xf4] ss:$8 sps:$4 sm:$0xff]   ;;  %v1271_v1 = vld [vmem:[%s1477_s17 + $0xf0] ss:$8 sps:$4 sm:$0xff]   ;;  %s1592_s7 = smov (!%p490_p11, %s1104_s7), 7  ;;  %v852_v9 = vsub.s32 0, %v851_v8 }
  0x47   : > { %1154 = vmatprep.subr.bf16.mxu1 %v1233_v40  ;;  %760 = vmatprep.subr.bf16.mxu0 %v1233_v40  ;;  %s492_s10 = scalar_lea.vmem %s1580_s2, %s1592_s7  ;;  %s497_s14 = scalar_lea.vmem %s1581_s3, %s1592_s7  ;;  %v856_v11 = vsub.s32 1, %v851_v8 }
  0x48   : > { %v848_v10 = vld [vmem:[%s492_s10] sm:$0x3]  ;;  %s502_s17 = scalar_lea.vmem %s1582_s4, %s1592_s7  ;;  %s1532_s24 = smul.u32 80, %s427_s11 }
  0x49   : > { %v870_v12 = vld [vmem:[%s497_s14] sm:$0x3]  ;;  %v853_v13 = vrot.slane %v848_v10, %v852_v9  ;;  %v857_v15 = vrot.slane %v848_v10, %v856_v11  ;;  %s1150_s11 = sshll.u32 (%p1385_p6), %s1310_s20, 4 }
  0x4a   : > { %1170 = vmatpush1.bf16.msra.mxu1 %v1235_v41  ;;  %761 = vmatpush1.bf16.msra.mxu0 %v1235_v41  ;;  %v892_v14 = vld [vmem:[%s502_s17] sm:$0x3]  ;;  %v875_v16 = vrot.slane %v870_v12, %v852_v9  ;;  %v879_v18 = vrot.slane %v870_v12, %v856_v11  ;;  %s1535_s18 = scalar_lea.vmem [#allocation4], %s1532_s24  ;;  %s936_s29 = scalar_lea.vmem (%p1385_p6), %s1583_s5, %s1150_s11 }
  0x4b   : > { %1155 = vmatprep.subr.bf16.mxu1 %v1236_v42  ;;  %762 = vmatprep.subr.bf16.mxu0 %v1236_v42  ;;  %v897_v21 = vrot.slane %v892_v14, %v852_v9  ;;  %v901_v26 = vrot.slane %v892_v14, %v856_v11 }
  0x4e   : > { %1171 = vmatpush1.bf16.msra.mxu1 %v1238_v43  ;;  %763 = vmatpush1.bf16.msra.mxu0 %v1238_v43 }
  0x4f   : > { %1156 = vmatprep.subr.bf16.mxu1 %v1239_v44  ;;  %764 = vmatprep.subr.bf16.mxu0 %v1239_v44 }
  0x52   : > { %1172 = vmatpush1.bf16.msra.mxu1 %v1241_v45  ;;  %765 = vmatpush1.bf16.msra.mxu0 %v1241_v45 }
  0x53   : > { %1157 = vmatprep.subr.bf16.mxu1 %v1242_v46  ;;  %766 = vmatprep.subr.bf16.mxu0 %v1242_v46 }
  0x56   : > { %1173 = vmatpush1.bf16.msra.mxu1 %v1244_v47  ;;  %767 = vmatpush1.bf16.msra.mxu0 %v1244_v47 }
  0x57   : > { %1158 = vmatprep.subr.bf16.mxu1 %v1245_v48  ;;  %768 = vmatprep.subr.bf16.mxu0 %v1245_v48 }
  0x5a   : > { %1174 = vmatpush1.bf16.msra.mxu1 %v1247_v49  ;;  %769 = vmatpush1.bf16.msra.mxu0 %v1247_v49 }
  0x5b   : > { %1159 = vmatprep.subr.bf16.mxu1 %v1248_v50  ;;  %770 = vmatprep.subr.bf16.mxu0 %v1248_v50 }
  0x5e   : > { %1175 = vmatpush1.bf16.msra.mxu1 %v1250_v51  ;;  %771 = vmatpush1.bf16.msra.mxu0 %v1250_v51 }
  0x5f   : > { %1160 = vmatprep.subr.bf16.mxu1 %v1251_v52  ;;  %772 = vmatprep.subr.bf16.mxu0 %v1251_v52 }
  0x62   : > { %1176 = vmatpush1.bf16.msra.mxu1 %v1253_v53  ;;  %773 = vmatpush1.bf16.msra.mxu0 %v1253_v53 }
  0x63   : > { %1161 = vmatprep.subr.bf16.mxu1 %v1254_v54  ;;  %774 = vmatprep.subr.bf16.mxu0 %v1254_v54 }
  0x66   : > { %1177 = vmatpush1.bf16.msra.mxu1 %v1256_v55  ;;  %775 = vmatpush1.bf16.msra.mxu0 %v1256_v55 }
  0x67   : > { %1162 = vmatprep.subr.bf16.mxu1 %v1257_v56  ;;  %776 = vmatprep.subr.bf16.mxu0 %v1257_v56 }
  0x6a   : > { %1178 = vmatpush1.bf16.msra.mxu1 %v1259_v57  ;;  %777 = vmatpush1.bf16.msra.mxu0 %v1259_v57 }
  0x6b   : > { %1163 = vmatprep.subr.bf16.mxu1 %v1260_v58  ;;  %778 = vmatprep.subr.bf16.mxu0 %v1260_v58 }
  0x6e   : > { %1179 = vmatpush1.bf16.msra.mxu1 %v1262_v59  ;;  %779 = vmatpush1.bf16.msra.mxu0 %v1262_v59 }
  0x6f   : > { %1164 = vmatprep.subr.bf16.mxu1 %v1263_v60  ;;  %780 = vmatprep.subr.bf16.mxu0 %v1263_v60 }
  0x72   : > { %1180 = vmatpush1.bf16.msra.mxu1 %v1265_v61  ;;  %781 = vmatpush1.bf16.msra.mxu0 %v1265_v61 }
  0x73   : > { %1165 = vmatprep.subr.bf16.mxu1 %v1266_v62  ;;  %782 = vmatprep.subr.bf16.mxu0 %v1266_v62 }
  0x76   : > { %1181 = vmatpush1.bf16.msra.mxu1 %v1268_v63  ;;  %783 = vmatpush1.bf16.msra.mxu0 %v1268_v63 }
  0x77   : > { %1166 = vmatprep.subr.bf16.mxu1 %v1269_v0  ;;  %784 = vmatprep.subr.bf16.mxu0 %v1269_v0 }
  0x7a   : > { %1182 = vmatpush1.bf16.msra.mxu1 %v1271_v1  ;;  %785 = vmatpush1.bf16.msra.mxu0 %v1271_v1 }
  0x7d   : > { %797 = vmatmul.mubr.bf16.vlgmr.msra.gmra.mrb[0].mxu1 %v1272_v3  ;;  %787 = vmatmul.mubr.bf16.vlgmr.msra.gmra.mrb[0].mxu0 %v1275_v4 }
  0x7e   : > { %806 = vmatprep.mubr.bf16.mxu1 %v1112_v5 }
  0x85   : > { %807 = vmatmul.mubr.bf16.gmra.mrb[4].mxu1 %v1111_v6 }
 0x150   : > { %v798_v17 = vpop.f32.mrb[0].mxu1  ;;  %v788_v19 = vpop.f32.mrb[0].mxu0 }
 0x151   : > { %v864_v20 = vadd.f32 %v853_v13, %v798_v17  ;;  %v800_v22 = vpop.f32.mrb[1].mxu1  ;;  %v860_v23 = vadd.f32 %v853_v13, %v788_v19  ;;  %v790_v24 = vpop.f32.mrb[1].mxu0 }
 0x152   : > { %v865_v25 = vadd.f32 %v857_v15, %v800_v22  ;;  %v802_v27 = vpop.f32.mrb[2].mxu1  ;;  %v861_v28 = vadd.f32 %v857_v15, %v790_v24  ;;  %v792_v29 = vpop.f32.mrb[2].mxu0 }
 0x153   : > { %v886_v30 = vmul.f32 %v875_v16, %v864_v20  ;;  %v866_v31 = vadd.f32 %v853_v13, %v802_v27  ;;  %v882_v32 = vmul.f32 %v875_v16, %v860_v23  ;;  %v804_v33 = vpop.f32.mrb[3].mxu1  ;;  %v862_v34 = vadd.f32 %v853_v13, %v792_v29  ;;  %v794_v35 = vpop.f32.mrb[3].mxu0 }
 0x154   : > { %v887_v36 = vmul.f32 %v879_v18, %v865_v25  ;;  %v867_v37 = vadd.f32 %v857_v15, %v804_v33  ;;  %v883_v38 = vmul.f32 %v879_v18, %v861_v28  ;;  %v863_v39 = vadd.f32 %v857_v15, %v794_v35 }
 0x155   : > { %v908_v40 = vadd.f32 %v897_v21, %v886_v30  ;;  %v888_v41 = vmul.f32 %v875_v16, %v866_v31  ;;  %v904_v42 = vadd.f32 %v897_v21, %v882_v32  ;;  %v884_v43 = vmul.f32 %v875_v16, %v862_v34 }
 0x156   : > { %v909_v44 = vadd.f32 %v901_v26, %v887_v36  ;;  %v889_v45 = vmul.f32 %v879_v18, %v867_v37  ;;  %v905_v46 = vadd.f32 %v901_v26, %v883_v38  ;;  %v885_v47 = vmul.f32 %v879_v18, %v863_v39 }
 0x157   : > { %918 = vst [vmem:[%s1535_s18 + $0x20] sm:$0xff] %v908_v40  ;;  %v910_v48 = vadd.f32 %v897_v21, %v888_v41  ;;  %914 = vst [vmem:[%s1535_s18] sm:$0xff] %v904_v42  ;;  %v906_v49 = vadd.f32 %v897_v21, %v884_v43 }
 0x158   : > { %919 = vst [vmem:[%s1535_s18 + $0x28] sm:$0xff] %v909_v44  ;;  %v911_v50 = vadd.f32 %v901_v26, %v889_v45  ;;  %915 = vst [vmem:[%s1535_s18 + $0x8] sm:$0xff] %v905_v46  ;;  %v907_v51 = vadd.f32 %v901_v26, %v885_v47  ;;  %v808_v52 = vpop.f32.mrb[4].mxu1 }
 0x159   : > { %920 = vst [vmem:[%s1535_s18 + $0x30] sm:$0xff] %v910_v48  ;;  %916 = vst [vmem:[%s1535_s18 + $0x10] sm:$0xff] %v906_v49  ;;  %v868_v53 = vadd.f32 %v853_v13, %v808_v52  ;;  %v810_v54 = vpop.f32.mrb[5].mxu1 }
 0x15a   : > { %921 = vst [vmem:[%s1535_s18 + $0x38] sm:$0xff] %v911_v50  ;;  %917 = vst [vmem:[%s1535_s18 + $0x18] sm:$0xff] %v907_v51  ;;  %v869_v55 = vadd.f32 %v857_v15, %v810_v54  ;;  %v812_v56 = vpop.f32.mrb[6].mxu1  ;;  %930 = sbr.rel (!%p1385_p6) target bundleno = 361 (0x169), region = 90 }
 0x15b   : > { %v890_v57 = vmul.f32 %v875_v16, %v868_v53  ;;  %v813_v58 = vpop.f32.mrb[7].mxu1 }
 0x15c   : > { %v891_v59 = vmul.f32 %v879_v18, %v869_v55 }
 0x15d   : > { %v912_v60 = vadd.f32 %v897_v21, %v890_v57 }
 0x15e   : > { %v913_v61 = vadd.f32 %v901_v26, %v891_v59  ;;  %v949_v62 = vld [vmem:[%s1535_s18] sm:$0xff] (%p1385_p6) }
 0x15f   : > { %922 = vst [vmem:[%s1535_s18 + $0x40] sm:$0xff] %v912_v60  ;;  %v951_v63 = vld [vmem:[%s1535_s18 + $0x8] sm:$0xff] (%p1385_p6)  ;;  %v957_v2 = vld [vmem:[%s1535_s18 + $0x20] sm:$0xff] (%p1385_p6)  ;;  %950 = vst [vmem:[%s936_s29] sm:$0xff] (%p1385_p6), %v949_v62 }
 0x160   : > { %923 = vst [vmem:[%s1535_s18 + $0x48] sm:$0xff] %v913_v61  ;;  %v953_v0 = vld [vmem:[%s1535_s18 + $0x10] sm:$0xff] (%p1385_p6)  ;;  %v959_v3 = vld [vmem:[%s1535_s18 + $0x28] sm:$0xff] (%p1385_p6)  ;;  %952 = vst [vmem:[%s936_s29 + $0x8] sm:$0xff] (%p1385_p6), %v951_v63 }
 0x161   : > { %v955_v1 = vld [vmem:[%s1535_s18 + $0x18] sm:$0xff]  ;;  %954 = vst [vmem:[%s936_s29 + $0x40] sm:$0xff] %v953_v0  ;;  %958 = vst [vmem:[%s936_s29 + $0x80] sm:$0xff] %v957_v2  ;;  %v961_v4 = vld [vmem:[%s1535_s18 + $0x30] sm:$0xff] }
 0x162   : > { %956 = vst [vmem:[%s936_s29 + $0x48] sm:$0xff] %v955_v1  ;;  %960 = vst [vmem:[%s936_s29 + $0x88] sm:$0xff] %v959_v3  ;;  %v963_v5 = vld [vmem:[%s1535_s18 + $0x38] sm:$0xff] }
 0x163   : > { %962 = vst [vmem:[%s936_s29 + $0xc0] sm:$0xff] %v961_v4  ;;  %964 = vst [vmem:[%s936_s29 + $0xc8] sm:$0xff] %v963_v5 }
 0x166   : > { %v965_v6 = vld [vmem:[%s1535_s18 + $0x40] sm:$0xff] }
 0x167   : > { %966 = vst [vmem:[%s936_s29 + $0x100] sm:$0xff] %v965_v6  ;;  %v967_v7 = vld [vmem:[%s1535_s18 + $0x48] sm:$0xff] }
 0x168   : > { %968 = vst [vmem:[%s936_s29 + $0x108] sm:$0xff] %v967_v7 }
 0x169 PF: > { %s15_s22 = sadd.s32 1, %s1318_s22   ;;  %s1585_s18 = smov %s1306_s19 }
 0x16a   : > { %p12_p12 = scmp.ge.s32.totalorder %s15_s22, 6   ;;  %s1586_s19 = smov %s1390_s28 }
 0x16b   : > { %s1587_s20 = smov %s1314_s21  ;;  %s1588_s21 = smov %s1590_s23 }
 0x16c   :  { %14 = sbr.rel (!%p12_p12) target bundleno = 3 (0x3), region = 156 }

// kernel: carnet_forward.15
= control target key start
LH: loop header
LB: loop body
LE: loop exit
PB: predicated region body
PF: predicated region fallthrough
CT: control target
= control target key end

     0   :  { %v363_v0 = vmov 0.0   ;;  %vm364_vm0 = vmmov 0   ;;  %s449_s1 = inlined_call_operand.vmem [shape: bf16[128,128], index: 1, kind: input, shape index: {}]   ;;  %s450_s0 = inlined_call_operand.vmem [shape: bf16[40,128], index: 0, kind: input, shape index: {}]   ;;  %s451_s2 = inlined_call_operand.vmem [shape: f32[1,128], index: 2, kind: input, shape index: {}]   ;;  %s452_s3 = inlined_call_operand.vmem [shape: f32[1,128], index: 3, kind: input, shape index: {}]   ;;  %s453_s4 = inlined_call_operand.vmem [shape: f32[1,128], index: 4, kind: input, shape index: {}]   ;;  %s454_s5 = inlined_call_operand.vmem [shape: bf16[40,128], index: 5, kind: output, shape index: {}]  }
   0x1   :  { %334 = vmatprep.subr.bf16.mxu1 %v363_v0  ;;  %v352_v1 = vld [vmem:[%s449_s1] sm:$0xff]   ;;  %306 = vmatprep.subr.bf16.mxu0 %v363_v0  ;;  %v353_v2 = vld [vmem:[%s449_s1 + $0x8] sm:$0xff]   ;;  %v354_v3 = vld [vmem:[%s449_s1 + $0x10] sm:$0xff]  }
   0x2   :  { %326 = vmatprep.mubr.msk.bf16.mxu1 %vm364_vm0, %v363_v0  ;;  %322 = vmatprep.mubr.msk.bf16.mxu0 %vm364_vm0, %v363_v0  ;;  %v355_v4 = vld [vmem:[%s449_s1 + $0x18] sm:$0xff]   ;;  %v356_v5 = vld [vmem:[%s449_s1 + $0x20] sm:$0xff]   ;;  %v357_v6 = vld [vmem:[%s449_s1 + $0x28] sm:$0xff]  }
   0x3   :  { %342 = vmatpush3.bf16.msra.mxu1 %v352_v1  ;;  %307 = vmatpush3.bf16.msra.mxu0 %v352_v1  ;;  %v358_v7 = vld [vmem:[%s449_s1 + $0x30] sm:$0xff]   ;;  %v359_v8 = vld [vmem:[%s449_s1 + $0x38] sm:$0xff]   ;;  %v360_v9 = vld [vmem:[%s450_s0 + $0x8] sm:$0xff]  }
   0x4   :  { %335 = vmatprep.subr.bf16.mxu1 %v363_v0  ;;  %308 = vmatprep.subr.bf16.mxu0 %v363_v0  ;;  %v361_v10 = vld [vmem:[%s450_s0] sm:$0xff]   ;;  %v362_v11 = vld [vmem:[%s450_s0 + $0x10] ss:$0 sps:$4 sm:$0xff]  }
   0x5   :  { %v271_v12 = vld [vmem:[%s451_s2] ss:$0 sm:$0xff] }
   0x6   :  { %v272_v14 = vld [vmem:[%s452_s3] ss:$0 sm:$0xff] }
   0x7   :  { %343 = vmatpush3.bf16.msra.mxu1 %v353_v2  ;;  %309 = vmatpush3.bf16.msra.mxu0 %v353_v2  ;;  %v273_v28 = vld [vmem:[%s453_s4] ss:$0 sm:$0xff] }
   0x8   :  { %336 = vmatprep.subr.bf16.mxu1 %v363_v0  ;;  %310 = vmatprep.subr.bf16.mxu0 %v363_v0 }
   0xb   :  { %344 = vmatpush3.bf16.msra.mxu1 %v354_v3  ;;  %311 = vmatpush3.bf16.msra.mxu0 %v354_v3 }
   0xc   :  { %337 = vmatprep.subr.bf16.mxu1 %v363_v0  ;;  %312 = vmatprep.subr.bf16.mxu0 %v363_v0 }
   0xf   :  { %345 = vmatpush3.bf16.msra.mxu1 %v355_v4  ;;  %313 = vmatpush3.bf16.msra.mxu0 %v355_v4 }
  0x10   :  { %338 = vmatprep.subr.bf16.mxu1 %v363_v0  ;;  %314 = vmatprep.subr.bf16.mxu0 %v363_v0 }
  0x13   :  { %346 = vmatpush3.bf16.msra.mxu1 %v356_v5  ;;  %315 = vmatpush3.bf16.msra.mxu0 %v356_v5 }
  0x14   :  { %339 = vmatprep.subr.bf16.mxu1 %v363_v0  ;;  %316 = vmatprep.subr.bf16.mxu0 %v363_v0 }
  0x17   :  { %347 = vmatpush3.bf16.msra.mxu1 %v357_v6  ;;  %317 = vmatpush3.bf16.msra.mxu0 %v357_v6 }
  0x18   :  { %340 = vmatprep.subr.bf16.mxu1 %v363_v0  ;;  %318 = vmatprep.subr.bf16.mxu0 %v363_v0 }
  0x1b   :  { %348 = vmatpush3.bf16.msra.mxu1 %v358_v7  ;;  %319 = vmatpush3.bf16.msra.mxu0 %v358_v7 }
  0x1c   :  { %341 = vmatprep.subr.bf16.mxu1 %v363_v0  ;;  %320 = vmatprep.subr.bf16.mxu0 %v363_v0 }
  0x1f   :  { %349 = vmatpush3.bf16.msra.mxu1 %v359_v8  ;;  %321 = vmatpush3.bf16.msra.mxu0 %v359_v8 }
  0x22   :  { %327 = vmatmul.mubr.bf16.vlgmr.msra.gmra.mrb[0].mxu1 %v360_v9  ;;  %323 = vmatmul.mubr.bf16.vlgmr.msra.gmra.mrb[0].mxu0 %v361_v10 }
  0x23   :  { %330 = vmatprep.mubr.msk.bf16.mxu1 %vm364_vm0, %v363_v0 }
  0x2a   :  { %331 = vmatmul.mubr.bf16.gmra.mrb[4].mxu1 %v362_v11 }
  0xf5   :  { %v162_v13 = vpop.f32.mrb[0].mxu1  ;;  %v154_v15 = vpop.f32.mrb[0].mxu0 }
  0xf6   :  { %v203_v16 = vadd.f32 %v271_v12, %v162_v13  ;;  %v328_v17 = vpop.f32.mrb[1].mxu1  ;;  %v201_v18 = vadd.f32 %v271_v12, %v154_v15  ;;  %v324_v19 = vpop.f32.mrb[1].mxu0 }
  0xf7   :  { %v165_v20 = vpop.f32.mrb[2].mxu1  ;;  %v157_v21 = vpop.f32.mrb[2].mxu0 }
  0xf8   :  { %v215_v22 = vmul.f32 %v272_v14, %v203_v16  ;;  %v204_v23 = vadd.f32 %v271_v12, %v165_v20  ;;  %v213_v24 = vmul.f32 %v272_v14, %v201_v18  ;;  %v329_v25 = vpop.f32.mrb[3].mxu1  ;;  %v202_v26 = vadd.f32 %v271_v12, %v157_v21  ;;  %v325_v27 = vpop.f32.mrb[3].mxu0 }
  0xfa   :  { %v216_v29 = vmul.f32 %v272_v14, %v204_v23  ;;  %v225_v30 = vadd.f32 %v273_v28, %v213_v24  ;;  %v214_v31 = vmul.f32 %v272_v14, %v202_v26  ;;  %v227_v32 = vadd.f32 %v273_v28, %v215_v22 }
  0xfc   :  { %v228_v33 = vadd.f32 %v273_v28, %v216_v29  ;;  %v226_v34 = vadd.f32 %v273_v28, %v214_v31 }
  0xfd   :  { %v170_v35 = vpop.f32.mrb[4].mxu1 }
  0xfe   :  { %v292_v36 = vpack.c.bf16 %v228_v33, %v227_v32  ;;  %v287_v37 = vpack.c.bf16 %v226_v34, %v225_v30  ;;  %v205_v38 = vadd.f32 %v271_v12, %v170_v35  ;;  %v332_v39 = vpop.f32.mrb[5].mxu1 }
  0xff   :  { %v173_v40 = vpop.f32.mrb[6].mxu1 }
 0x100   :  { %294 = vst [vmem:[%s454_s5 + $0x8] sm:$0xff] %v292_v36   ;;  %288 = vst [vmem:[%s454_s5] sm:$0xff] %v287_v37   ;;  %v217_v41 = vmul.f32 %v272_v14, %v205_v38  ;;  %v333_v42 = vpop.f32.mrb[7].mxu1 }
 0x102   :  { %v229_v43 = vadd.f32 %v273_v28, %v217_v41 }
 0x104   :  { %v283_v44 = vpack.c.bf16 %v229_v43, %v229_v43 }
 0x106   :  { %255 = vst [vmem:[%s454_s5 + $0x10] sm:$0xf] %v283_v44 }

// kernel: carnet_forward.17
= control target key start
LH: loop header
LB: loop body
LE: loop exit
PB: predicated region body
PF: predicated region fallthrough
CT: control target
= control target key end

     0   :  { %v321_v0 = vmov 0.0   ;;  %vm322_vm0 = vmmov 0   ;;  %s413_s1 = inlined_call_operand.vmem [shape: bf16[128,128], index: 1, kind: input, shape index: {}]   ;;  %s414_s0 = inlined_call_operand.vmem [shape: bf16[40,128], index: 0, kind: input, shape index: {}]   ;;  %s415_s2 = inlined_call_operand.vmem [shape: f32[1,128], index: 2, kind: input, shape index: {}]   ;;  %s416_s3 = inlined_call_operand.vmem [shape: f32[1,128], index: 3, kind: input, shape index: {}]   ;;  %s417_s4 = inlined_call_operand.vmem [shape: f32[1,128], index: 4, kind: input, shape index: {}]   ;;  %s418_s5 = inlined_call_operand.vmem [shape: f32[40,128], index: 5, kind: output, shape index: {}]  }
   0x1   :  { %292 = vmatprep.subr.bf16.mxu1 %v321_v0  ;;  %v310_v1 = vld [vmem:[%s413_s1] sm:$0xff]   ;;  %264 = vmatprep.subr.bf16.mxu0 %v321_v0  ;;  %v311_v2 = vld [vmem:[%s413_s1 + $0x8] sm:$0xff]   ;;  %v312_v3 = vld [vmem:[%s413_s1 + $0x10] sm:$0xff]  }
   0x2   :  { %284 = vmatprep.mubr.msk.bf16.mxu1 %vm322_vm0, %v321_v0  ;;  %280 = vmatprep.mubr.msk.bf16.mxu0 %vm322_vm0, %v321_v0  ;;  %v313_v4 = vld [vmem:[%s413_s1 + $0x18] sm:$0xff]   ;;  %v314_v5 = vld [vmem:[%s413_s1 + $0x20] sm:$0xff]   ;;  %v315_v6 = vld [vmem:[%s413_s1 + $0x28] sm:$0xff]  }
   0x3   :  { %300 = vmatpush3.bf16.msra.mxu1 %v310_v1  ;;  %265 = vmatpush3.bf16.msra.mxu0 %v310_v1  ;;  %v316_v7 = vld [vmem:[%s413_s1 + $0x30] sm:$0xff]   ;;  %v317_v8 = vld [vmem:[%s413_s1 + $0x38] sm:$0xff]   ;;  %v318_v9 = vld [vmem:[%s414_s0 + $0x8] sm:$0xff]  }
   0x4   :  { %293 = vmatprep.subr.bf16.mxu1 %v321_v0  ;;  %266 = vmatprep.subr.bf16.mxu0 %v321_v0  ;;  %v319_v10 = vld [vmem:[%s414_s0] sm:$0xff]   ;;  %v320_v11 = vld [vmem:[%s414_s0 + $0x10] ss:$0 sps:$4 sm:$0xff]  }
   0x5   :  { %v250_v12 = vld [vmem:[%s415_s2] ss:$0 sm:$0xff] }
   0x6   :  { %v251_v14 = vld [vmem:[%s416_s3] ss:$0 sm:$0xff] }
   0x7   :  { %301 = vmatpush3.bf16.msra.mxu1 %v311_v2  ;;  %267 = vmatpush3.bf16.msra.mxu0 %v311_v2  ;;  %v252_v20 = vld [vmem:[%s417_s4] ss:$0 sm:$0xff] }
   0x8   :  { %294 = vmatprep.subr.bf16.mxu1 %v321_v0  ;;  %268 = vmatprep.subr.bf16.mxu0 %v321_v0 }
   0xb   :  { %302 = vmatpush3.bf16.msra.mxu1 %v312_v3  ;;  %269 = vmatpush3.bf16.msra.mxu0 %v312_v3 }
   0xc   :  { %295 = vmatprep.subr.bf16.mxu1 %v321_v0  ;;  %270 = vmatprep.subr.bf16.mxu0 %v321_v0 }
   0xf   :  { %303 = vmatpush3.bf16.msra.mxu1 %v313_v4  ;;  %271 = vmatpush3.bf16.msra.mxu0 %v313_v4 }
  0x10   :  { %296 = vmatprep.subr.bf16.mxu1 %v321_v0  ;;  %272 = vmatprep.subr.bf16.mxu0 %v321_v0 }
  0x13   :  { %304 = vmatpush3.bf16.msra.mxu1 %v314_v5  ;;  %273 = vmatpush3.bf16.msra.mxu0 %v314_v5 }
  0x14   :  { %297 = vmatprep.subr.bf16.mxu1 %v321_v0  ;;  %274 = vmatprep.subr.bf16.mxu0 %v321_v0 }
  0x17   :  { %305 = vmatpush3.bf16.msra.mxu1 %v315_v6  ;;  %275 = vmatpush3.bf16.msra.mxu0 %v315_v6 }
  0x18   :  { %298 = vmatprep.subr.bf16.mxu1 %v321_v0  ;;  %276 = vmatprep.subr.bf16.mxu0 %v321_v0 }
  0x1b   :  { %306 = vmatpush3.bf16.msra.mxu1 %v316_v7  ;;  %277 = vmatpush3.bf16.msra.mxu0 %v316_v7 }
  0x1c   :  { %299 = vmatprep.subr.bf16.mxu1 %v321_v0  ;;  %278 = vmatprep.subr.bf16.mxu0 %v321_v0 }
  0x1f   :  { %307 = vmatpush3.bf16.msra.mxu1 %v317_v8  ;;  %279 = vmatpush3.bf16.msra.mxu0 %v317_v8 }
  0x22   :  { %285 = vmatmul.mubr.bf16.vlgmr.msra.gmra.mrb[0].mxu1 %v318_v9  ;;  %281 = vmatmul.mubr.bf16.vlgmr.msra.gmra.mrb[0].mxu0 %v319_v10 }
  0x23   :  { %288 = vmatprep.mubr.msk.bf16.mxu1 %vm322_vm0, %v321_v0 }
  0x2a   :  { %289 = vmatmul.mubr.bf16.gmra.mrb[4].mxu1 %v320_v11 }
  0xf5   :  { %v162_v13 = vpop.f32.mrb[0].mxu1  ;;  %v154_v15 = vpop.f32.mrb[0].mxu0 }
  0xf6   :  { %v203_v16 = vadd.f32 %v250_v12, %v162_v13  ;;  %v286_v17 = vpop.f32.mrb[1].mxu1  ;;  %v201_v18 = vadd.f32 %v250_v12, %v154_v15  ;;  %v282_v19 = vpop.f32.mrb[1].mxu0 }
  0xf7   :  { %v165_v21 = vpop.f32.mrb[2].mxu1  ;;  %v157_v22 = vpop.f32.mrb[2].mxu0 }
  0xf8   :  { %v215_v23 = vmul.f32 %v251_v14, %v203_v16  ;;  %v204_v24 = vadd.f32 %v250_v12, %v165_v21  ;;  %v213_v25 = vmul.f32 %v251_v14, %v201_v18  ;;  %v287_v26 = vpop.f32.mrb[3].mxu1  ;;  %v202_v27 = vadd.f32 %v250_v12, %v157_v22  ;;  %v283_v28 = vpop.f32.mrb[3].mxu0 }
  0xfa   :  { %v227_v29 = vadd.f32 %v252_v20, %v215_v23  ;;  %v216_v30 = vmul.f32 %v251_v14, %v204_v24  ;;  %v225_v31 = vadd.f32 %v252_v20, %v213_v25  ;;  %v214_v32 = vmul.f32 %v251_v14, %v202_v27 }
  0xfc   :  { %232 = vst [vmem:[%s418_s5 + $0x10] sm:$0xff] %v227_v29  ;;  %v228_v33 = vadd.f32 %v252_v20, %v216_v30  ;;  %230 = vst [vmem:[%s418_s5] sm:$0xff] %v225_v31  ;;  %v226_v34 = vadd.f32 %v252_v20, %v214_v32 }
  0xfd   :  { %v170_v35 = vpop.f32.mrb[4].mxu1 }
  0xfe   :  { %233 = vst [vmem:[%s418_s5 + $0x18] sm:$0xff] %v228_v33  ;;  %231 = vst [vmem:[%s418_s5 + $0x8] sm:$0xff] %v226_v34  ;;  %v205_v36 = vadd.f32 %v250_v12, %v170_v35  ;;  %v290_v37 = vpop.f32.mrb[5].mxu1 }
  0xff   :  { %v173_v38 = vpop.f32.mrb[6].mxu1 }
 0x100   :  { %v217_v39 = vmul.f32 %v251_v14, %v205_v36  ;;  %v291_v40 = vpop.f32.mrb[7].mxu1 }
 0x102   :  { %v229_v41 = vadd.f32 %v252_v20, %v217_v39 }
 0x104   :  { %234 = vst [vmem:[%s418_s5 + $0x20] sm:$0xff] %v229_v41 }

// kernel: carnet_forward.18
= control target key start
LH: loop header
LB: loop body
LE: loop exit
PB: predicated region body
PF: predicated region fallthrough
CT: control target
= control target key end

     0   :  { %s843_s18 = smov 0   ;;  %s845_s19 = smov 0   ;;  %s912_s0 = inlined_call_operand.vmem [shape: bf16[8,512], index: 0, kind: input, shape index: {}]   ;;  %s913_s1 = inlined_call_operand.vmem [shape: bf16[512,128], index: 1, kind: input, shape index: {}]   ;;  %s914_s2 = inlined_call_operand.vmem [shape: f32[1,128], index: 2, kind: input, shape index: {}]   ;;  %s915_s3 = inlined_call_operand.vmem [shape: f32[1,128], index: 3, kind: input, shape index: {}]   ;;  %s916_s4 = inlined_call_operand.vmem [shape: f32[1,128], index: 4, kind: input, shape index: {}]   ;;  %s917_s5 = inlined_call_operand.vmem [shape: f32[8,128], index: 5, kind: output, shape index: {}]  }
   0x1   :  { %s847_s20 = smov 0  }
   0x2 LB: > { %s27_s21 = sadd.s32 1, %s806_s19  ;;  %p692_p0 = scmp.ge.s32.totalorder %s810_s20, 1  ;;  %s810_s20 = sphi %s847_s20, %s15_s20   ;;  %s806_s19 = sphi %s845_s19, %s919_s19   ;;  %s802_s18 = sphi %s843_s18, %s918_s18  }
   0x3   : > { %p28_p1 = scmp.ge.s32.totalorder %s27_s21, 2  ;;  %p255_p2 = scmp.lt.s32.totalorder %s810_s20, 3 }
   0x5   : > { %s921_s21 = smov (%p28_p1, %s27_s21), 0  ;;  %p256_p3 = pnand %p692_p0, %p255_p2 }
   0x6   : > { %s693_s22 = sshll.u32 (!%p256_p3), %s802_s18, 1  ;;  %s695_s23 = sshll.u32 (!%p256_p3), %s802_s18, 5 }
   0x7   : > { %259 = sbr.rel (%p256_p3) target bundleno = 291 (0x123), region = 40  ;;  %p309_p4 = scmp.lt.s32.totalorder (!%p256_p3), %s693_s22, 3 }
   0x8   : > { %p317_p5 = scmp.lt.s32.totalorder (!%p256_p3), %s695_s23, 63  ;;  %p697_p6 = scmp.ne.s32.totalorder (!%p256_p3), %s802_s18, 0 }
   0xe   : > { %s923_s22 = smov (!%p309_p4, %s693_s22), 3  ;;  %s925_s23 = smov (!%p317_p5, %s695_s23), 63 }
   0xf   : > { %s694_s24 = sshll.u32 %s923_s22, 2  ;;  %s696_s28 = sshll.u32 %s925_s23, 2  ;;  %v812_v0 = vmov (!%p697_p6), 0.0  }
  0x10   : > { %s314_s27 = scalar_lea.vmem %s912_s0, %s694_s24  ;;  %s871_s6 = scalar_lea.vmem %s913_s1, %s696_s28  ;;  %346 = vst [vmem:[#allocation2] sm:$0xff] (!%p697_p6), %v812_v0 }
  0x11   : > { %345 = sbr.rel (%p697_p6) target bundleno = 24 (0x18), region = 44 }
  0x18 PF: > { %v770_v1 = vld [vmem:[%s871_s6 + $0x40] sm:$0xff]   ;;  %v772_v3 = vld [vmem:[%s871_s6 + $0x48] sm:$0xff]   ;;  %v774_v5 = vld [vmem:[%s871_s6 + $0x50] sm:$0xff]   ;;  %p716_p7 = scmp.ne.s32.totalorder %s802_s18, 1 }
  0x19   : > { %v771_v2 = vld [vmem:[%s871_s6] sm:$0xff]   ;;  %723 = vmatprep.subr.bf16.mxu0 %v770_v1  ;;  %v773_v4 = vld [vmem:[%s871_s6 + $0x8] sm:$0xff]   ;;  %v775_v6 = vld [vmem:[%s871_s6 + $0x10] sm:$0xff]  }
  0x1a   : > { %724 = vmatpush3.bf16.msra.mxu0 %v771_v2  ;;  %v776_v7 = vld [vmem:[%s871_s6 + $0x58] sm:$0xff]   ;;  %v778_v9 = vld [vmem:[%s871_s6 + $0x60] sm:$0xff]   ;;  %v780_v11 = vld [vmem:[%s871_s6 + $0x68] sm:$0xff]  }
  0x1b   : > { %725 = vmatprep.subr.bf16.mxu0 %v772_v3  ;;  %v777_v8 = vld [vmem:[%s871_s6 + $0x18] sm:$0xff]   ;;  %v779_v10 = vld [vmem:[%s871_s6 + $0x20] sm:$0xff]   ;;  %v781_v14 = vld [vmem:[%s871_s6 + $0x28] sm:$0xff]  }
  0x1c   : > { %v348_v12 = vld [vmem:[%s314_s27] sm:$0xff]  ;;  %v782_v15 = vld [vmem:[%s871_s6 + $0x70] sm:$0xff]   ;;  %v784_v17 = vld [vmem:[%s871_s6 + $0x78] sm:$0xff]  }
  0x1d   : > { %v699_v13 = vcombine.high %v348_v12, %v348_v12  ;;  %v783_v16 = vld [vmem:[%s871_s6 + $0x30] sm:$0xff]   ;;  %v785_v18 = vld [vmem:[%s871_s6 + $0x38] sm:$0xff]   ;;  %v698_v19 = vcombine.low %v348_v12, %v348_v12  ;;  %v347_v21 = vld [vmem:[#allocation2] sm:$0xff] }
  0x1e   : > { %726 = vmatpush3.bf16.msra.mxu0 %v773_v4  ;;  %v717_v28 = vld [vmem:[%s914_s2] ss:$0 sm:$0xff] (!%p716_p7) }
  0x1f   : > { %727 = vmatprep.subr.bf16.mxu0 %v774_v5  ;;  %516 = vmatprep.mubr.bf16.mxu0 %v699_v13  ;;  %v718_v29 = vld [vmem:[%s915_s3] ss:$0 sm:$0xff] (!%p716_p7) }
  0x20   : > { %v719_v31 = vld [vmem:[%s916_s4] ss:$0 sm:$0xff] (!%p716_p7) }
  0x22   : > { %728 = vmatpush3.bf16.msra.mxu0 %v775_v6 }
  0x23   : > { %729 = vmatprep.subr.bf16.mxu0 %v776_v7 }
  0x26   : > { %730 = vmatpush3.bf16.msra.mxu0 %v777_v8 }
  0x27   : > { %731 = vmatprep.subr.bf16.mxu0 %v778_v9 }
  0x2a   : > { %732 = vmatpush3.bf16.msra.mxu0 %v779_v10 }
  0x2b   : > { %733 = vmatprep.subr.bf16.mxu0 %v780_v11 }
  0x2e   : > { %734 = vmatpush3.bf16.msra.mxu0 %v781_v14 }
  0x2f   : > { %735 = vmatprep.subr.bf16.mxu0 %v782_v15 }
  0x32   : > { %736 = vmatpush3.bf16.msra.mxu0 %v783_v16 }
  0x33   : > { %737 = vmatprep.subr.bf16.mxu0 %v784_v17 }
  0x36   : > { %738 = vmatpush3.bf16.msra.mxu0 %v785_v18 }
  0x39   : > { %517 = vmatmul.mubr.bf16.vlgmr.msra.gmra.mrb[0].mxu0 %v698_v19 }
 0x10c   : > { %v739_v20 = vpop.f32.mrb[0].mxu0  ;;  %529 = sbr.rel (%p716_p7) target bundleno = 291 (0x123), region = 48 }
 0x10d   : > { %v740_v22 = vpop.f32.mrb[1].mxu0 }
 0x10e   : > { %v741_v23 = vadd.f32 %v740_v22, %v739_v20  ;;  %v742_v24 = vpop.f32.mrb[2].mxu0 }
 0x10f   : > { %v743_v25 = vpop.f32.mrb[3].mxu0 }
 0x110   : > { %v524_v26 = vadd.f32 %v741_v23, %v347_v21 }
 0x112   : > { %525 = vst [vmem:[#allocation2] sm:$0xff] %v524_v26 }
 0x119   : > { %v530_v27 = vld [vmem:[#allocation2] sm:$0xff] }
 0x11a   : > { %v538_v30 = vadd.f32 %v717_v28, %v530_v27 }
 0x11c   : > { %v546_v32 = vmul.f32 %v718_v29, %v538_v30 }
 0x11e   : > { %v554_v33 = vadd.f32 %v719_v31, %v546_v32 }
 0x120   : > { %v555_v34 = vmax.f32 %v554_v33, 0.0 }
 0x122   : > { %556 = vst [vmem:[%s917_s5] sm:$0xff] %v555_v34 }
 0x123 PF: > { %s15_s20 = sadd.s32 1, %s810_s20   ;;  %s918_s18 = smov %s806_s19 }
 0x124   : > { %p12_p8 = scmp.ge.s32.totalorder %s15_s20, 4   ;;  %s919_s19 = smov %s921_s21 }
 0x126   :  { %14 = sbr.rel (!%p12_p8) target bundleno = 2 (0x2), region = 90 }

// kernel: carnet_forward.19
= control target key start
LH: loop header
LB: loop body
LE: loop exit
PB: predicated region body
PF: predicated region fallthrough
CT: control target
= control target key end

     0   :  { %v217_v0 = vmov 0.0   ;;  %vm218_vm0 = vmmov 0   ;;  %s288_s1 = inlined_call_operand.vmem [shape: bf16[128,128], index: 1, kind: input, shape index: {}]   ;;  %s289_s0 = inlined_call_operand.vmem [shape: bf16[8,128], index: 0, kind: input, shape index: {}]   ;;  %s290_s2 = inlined_call_operand.vmem [shape: f32[1,128], index: 2, kind: input, shape index: {}]   ;;  %s291_s3 = inlined_call_operand.vmem [shape: f32[1,128], index: 3, kind: input, shape index: {}]   ;;  %s292_s4 = inlined_call_operand.vmem [shape: f32[1,128], index: 4, kind: input, shape index: {}]   ;;  %s293_s5 = inlined_call_operand.vmem [shape: f32[8,128], index: 5, kind: output, shape index: {}]  }
   0x1   :  { %187 = vmatprep.subr.bf16.mxu0 %v217_v0  ;;  %v209_v1 = vld [vmem:[%s288_s1] sm:$0xff]   ;;  %203 = vmatprep.mubr.msk.bf16.mxu0 %vm218_vm0, %v217_v0  ;;  %v210_v2 = vld [vmem:[%s288_s1 + $0x8] sm:$0xff]   ;;  %v211_v3 = vld [vmem:[%s288_s1 + $0x10] sm:$0xff]  }
   0x2   :  { %188 = vmatpush3.bf16.msra.mxu0 %v209_v1  ;;  %v212_v4 = vld [vmem:[%s288_s1 + $0x18] sm:$0xff]   ;;  %v213_v5 = vld [vmem:[%s288_s1 + $0x20] sm:$0xff]   ;;  %v214_v6 = vld [vmem:[%s288_s1 + $0x28] sm:$0xff]  }
   0x3   :  { %189 = vmatprep.subr.bf16.mxu0 %v217_v0  ;;  %v215_v7 = vld [vmem:[%s288_s1 + $0x30] sm:$0xff]   ;;  %v216_v8 = vld [vmem:[%s288_s1 + $0x38] sm:$0xff]   ;;  %v27_v9 = vld [vmem:[%s289_s0] sm:$0xf] }
   0x4   :  { %v175_v10 = vld [vmem:[%s290_s2] ss:$0 sm:$0xff] }
   0x5   :  { %v176_v12 = vld [vmem:[%s291_s3] ss:$0 sm:$0xff] }
   0x6   :  { %190 = vmatpush3.bf16.msra.mxu0 %v210_v2  ;;  %v177_v15 = vld [vmem:[%s292_s4] ss:$0 sm:$0xff] }
   0x7   :  { %191 = vmatprep.subr.bf16.mxu0 %v217_v0 }
   0xa   :  { %192 = vmatpush3.bf16.msra.mxu0 %v211_v3 }
   0xb   :  { %193 = vmatprep.subr.bf16.mxu0 %v217_v0 }
   0xe   :  { %194 = vmatpush3.bf16.msra.mxu0 %v212_v4 }
   0xf   :  { %195 = vmatprep.subr.bf16.mxu0 %v217_v0 }
  0x12   :  { %196 = vmatpush3.bf16.msra.mxu0 %v213_v5 }
  0x13   :  { %197 = vmatprep.subr.bf16.mxu0 %v217_v0 }
  0x16   :  { %198 = vmatpush3.bf16.msra.mxu0 %v214_v6 }
  0x17   :  { %199 = vmatprep.subr.bf16.mxu0 %v217_v0 }
  0x1a   :  { %200 = vmatpush3.bf16.msra.mxu0 %v215_v7 }
  0x1b   :  { %201 = vmatprep.subr.bf16.mxu0 %v217_v0 }
  0x1e   :  { %202 = vmatpush3.bf16.msra.mxu0 %v216_v8 }
  0x21   :  { %204 = vmatmul.mubr.bf16.vlgmr.msra.gmra.mrb[0].mxu0 %v27_v9 }
  0xf4   :  { %v126_v11 = vpop.f32.mrb[0].mxu0 }
  0xf5   :  { %v145_v13 = vadd.f32 %v175_v10, %v126_v11  ;;  %v205_v14 = vpop.f32.mrb[1].mxu0 }
  0xf6   :  { %v129_v16 = vpop.f32.mrb[2].mxu0 }
  0xf7   :  { %v153_v17 = vmul.f32 %v176_v12, %v145_v13  ;;  %v206_v18 = vpop.f32.mrb[3].mxu0 }
  0xf9   :  { %v161_v19 = vadd.f32 %v177_v15, %v153_v17 }
  0xfb   :  { %162 = vst [vmem:[%s293_s5] sm:$0xff] %v161_v19 }

// kernel: carnet_forward.16
= control target key start
LH: loop header
LB: loop body
LE: loop exit
PB: predicated region body
PF: predicated region fallthrough
CT: control target
= control target key end

     0   :  { %vm95_vm0 = vcmask 64512   ;;  %v5306_v0 = vmov 0.0   ;;  %vm5307_vm1 = vmmov 0   ;;  %vm1976_vm2 = vcmask 27648   ;;  %s6696_s1 = inlined_call_operand.vmem [shape: bf16[40,4,8], index: 1, kind: input, shape index: {}]   ;;  %s6697_s0 = inlined_call_operand.vmem [shape: bf16[40,4,8], index: 0, kind: input, shape index: {}]   ;;  %s6698_s2 = inlined_call_operand.vmem [shape: bf16[40,4,8], index: 2, kind: input, shape index: {}]   ;;  %s6699_s3 = inlined_call_operand.vmem [shape: bf16[40,4,8], index: 3, kind: output, shape index: {}]  }
   0x1   :  { %4664 = vmatprep.subr.bf16.mxu0 %v5306_v0  ;;  %4670 = vmatprep.subr.bf16.mxu1 %v5306_v0  ;;  %v55_v1 = vld [vmem:[%s6696_s1] sm:$0x3]  ;;  %v56_v2 = vld [vmem:[%s6696_s1 + $0x2] sm:$0x3]  ;;  %v57_v5 = vld [vmem:[%s6696_s1 + $0x4] sm:$0x3] }
   0x2   :  { %v100_v3 = vsel %vm95_vm0, %v55_v1, 0  ;;  %v146_v4 = vsel %vm95_vm0, %v56_v2, 0  ;;  %4666 = vmatprep.mubr.msk.bf16.mxu0 %vm5307_vm1, %v5306_v0  ;;  %4672 = vmatprep.mubr.msk.bf16.mxu1 %vm5307_vm1, %v5306_v0  ;;  %v58_v6 = vld [vmem:[%s6696_s1 + $0x6] sm:$0x3]  ;;  %v15_v7 = vld [vmem:[%s6697_s0] sm:$0x3] }
   0x3   :  { %4665 = vmatpush3.bf16.xpose.msra.mxu0 %v100_v3  ;;  %4671 = vmatpush3.bf16.xpose.msra.mxu1 %v146_v4  ;;  %v16_v8 = vld [vmem:[%s6697_s0 + $0x2] sm:$0x3]  ;;  %v192_v9 = vsel %vm95_vm0, %v57_v5, 0  ;;  %v238_v10 = vsel %vm95_vm0, %v58_v6, 0  ;;  %v59_v11 = vld [vmem:[%s6696_s1 + $0x8] sm:$0x3] }
   0x4   :  { %4676 = vmatprep.subr.bf16.mxu0 %v5306_v0  ;;  %4682 = vmatprep.subr.bf16.mxu1 %v5306_v0  ;;  %v60_v12 = vld [vmem:[%s6696_s1 + $0xa] sm:$0x3]  ;;  %v17_v13 = vld [vmem:[%s6697_s0 + $0x4] sm:$0x3]  ;;  %v18_v14 = vld [vmem:[%s6697_s0 + $0x6] sm:$0x3] }
   0x5   :  { %v284_v15 = vsel %vm95_vm0, %v59_v11, 0  ;;  %v330_v16 = vsel %vm95_vm0, %v60_v12, 0  ;;  %v61_v17 = vld [vmem:[%s6696_s1 + $0xc] sm:$0x3]  ;;  %v62_v18 = vld [vmem:[%s6696_s1 + $0xe] sm:$0x3] }
   0x6   :  { %v19_v19 = vld [vmem:[%s6697_s0 + $0x8] sm:$0x3]  ;;  %v20_v20 = vld [vmem:[%s6697_s0 + $0xa] sm:$0x3]  ;;  %v376_v21 = vsel %vm95_vm0, %v61_v17, 0  ;;  %v422_v22 = vsel %vm95_vm0, %v62_v18, 0 }
   0x7   :  { %v63_v23 = vld [vmem:[%s6696_s1 + $0x10] sm:$0x3]  ;;  %v64_v24 = vld [vmem:[%s6696_s1 + $0x12] sm:$0x3]  ;;  %v21_v25 = vld [vmem:[%s6697_s0 + $0xc] sm:$0x3] }
   0x8   :  { %v22_v26 = vld [vmem:[%s6697_s0 + $0xe] sm:$0x3]  ;;  %v468_v27 = vsel %vm95_vm0, %v63_v23, 0  ;;  %v514_v28 = vsel %vm95_vm0, %v64_v24, 0  ;;  %v65_v29 = vld [vmem:[%s6696_s1 + $0x14] sm:$0x3] }
   0x9   :  { %v66_v30 = vld [vmem:[%s6696_s1 + $0x16] sm:$0x3]  ;;  %v23_v31 = vld [vmem:[%s6697_s0 + $0x10] sm:$0x3]  ;;  %v24_v32 = vld [vmem:[%s6697_s0 + $0x12] sm:$0x3] }
   0xa   :  { %4667 = vmatmul.mubr.msk.bf16.vlgmr.msra.gmra.mrb[0].mxu0 %vm95_vm0, %v15_v7  ;;  %4673 = vmatmul.mubr.msk.bf16.vlgmr.msra.gmra.mrb[0].mxu1 %vm95_vm0, %v16_v8  ;;  %v560_v33 = vsel %vm95_vm0, %v65_v29, 0  ;;  %v606_v34 = vsel %vm95_vm0, %v66_v30, 0  ;;  %v67_v35 = vld [vmem:[%s6696_s1 + $0x18] sm:$0x3]  ;;  %v68_v36 = vld [vmem:[%s6696_s1 + $0x1a] sm:$0x3] }
   0xb   :  { %4677 = vmatpush3.bf16.xpose.msra.mxu0 %v192_v9  ;;  %4683 = vmatpush3.bf16.xpose.msra.mxu1 %v238_v10  ;;  %v25_v37 = vld [vmem:[%s6697_s0 + $0x14] sm:$0x3]  ;;  %v26_v38 = vld [vmem:[%s6697_s0 + $0x16] sm:$0x3]  ;;  %v652_v39 = vsel %vm95_vm0, %v67_v35, 0  ;;  %v698_v40 = vsel %vm95_vm0, %v68_v36, 0 }
   0xc   :  { %4678 = vmatprep.mubr.msk.bf16.mxu0 %vm5307_vm1, %v5306_v0  ;;  %4684 = vmatprep.mubr.msk.bf16.mxu1 %vm5307_vm1, %v5306_v0  ;;  %v69_v41 = vld [vmem:[%s6696_s1 + $0x1c] sm:$0x3]  ;;  %v70_v42 = vld [vmem:[%s6696_s1 + $0x1e] sm:$0x3]  ;;  %v27_v43 = vld [vmem:[%s6697_s0 + $0x18] sm:$0x3] }
   0xd   :  { %4688 = vmatprep.subr.bf16.mxu0 %v5306_v0  ;;  %4694 = vmatprep.subr.bf16.mxu1 %v5306_v0  ;;  %v28_v44 = vld [vmem:[%s6697_s0 + $0x1a] sm:$0x3]  ;;  %v744_v45 = vsel %vm95_vm0, %v69_v41, 0  ;;  %v790_v46 = vsel %vm95_vm0, %v70_v42, 0  ;;  %v71_v47 = vld [vmem:[%s6696_s1 + $0x20] sm:$0x3] }
   0xe   :  { %v72_v48 = vld [vmem:[%s6696_s1 + $0x22] sm:$0x3]  ;;  %v29_v49 = vld [vmem:[%s6697_s0 + $0x1c] sm:$0x3]  ;;  %v30_v50 = vld [vmem:[%s6697_s0 + $0x1e] sm:$0x3] }
   0xf   :  { %v836_v51 = vsel %vm95_vm0, %v71_v47, 0  ;;  %v882_v52 = vsel %vm95_vm0, %v72_v48, 0  ;;  %v73_v53 = vld [vmem:[%s6696_s1 + $0x24] sm:$0x3]  ;;  %v74_v54 = vld [vmem:[%s6696_s1 + $0x26] sm:$0x3] }
  0x10   :  { %v31_v55 = vld [vmem:[%s6697_s0 + $0x20] sm:$0x3]  ;;  %v32_v56 = vld [vmem:[%s6697_s0 + $0x22] sm:$0x3]  ;;  %v928_v57 = vsel %vm95_vm0, %v73_v53, 0  ;;  %v974_v58 = vsel %vm95_vm0, %v74_v54, 0 }
  0x11   :  { %v75_v59 = vld [vmem:[%s6696_s1 + $0x28] sm:$0x3]  ;;  %v76_v60 = vld [vmem:[%s6696_s1 + $0x2a] sm:$0x3]  ;;  %v33_v61 = vld [vmem:[%s6697_s0 + $0x24] sm:$0x3] }
  0x12   :  { %4679 = vmatmul.mubr.msk.bf16.vlgmr.msra.gmra.mrb[4].mxu0 %vm95_vm0, %v17_v13  ;;  %4685 = vmatmul.mubr.msk.bf16.vlgmr.msra.gmra.mrb[4].mxu1 %vm95_vm0, %v18_v14  ;;  %v34_v62 = vld [vmem:[%s6697_s0 + $0x26] sm:$0x3]  ;;  %v1020_v63 = vsel %vm95_vm0, %v75_v59, 0  ;;  %v1066_v1 = vsel %vm95_vm0, %v76_v60, 0  ;;  %v77_v2 = vld [vmem:[%s6696_s1 + $0x2c] sm:$0x3] }
  0x13   :  { %4689 = vmatpush3.bf16.xpose.msra.mxu0 %v284_v15  ;;  %4695 = vmatpush3.bf16.xpose.msra.mxu1 %v330_v16  ;;  %v78_v3 = vld [vmem:[%s6696_s1 + $0x2e] sm:$0x3]  ;;  %v35_v4 = vld [vmem:[%s6697_s0 + $0x28] sm:$0x3]  ;;  %v36_v5 = vld [vmem:[%s6697_s0 + $0x2a] sm:$0x3] }
  0x14   :  { %4690 = vmatprep.mubr.msk.bf16.mxu0 %vm5307_vm1, %v5306_v0  ;;  %4696 = vmatprep.mubr.msk.bf16.mxu1 %vm5307_vm1, %v5306_v0  ;;  %v1112_v6 = vsel %vm95_vm0, %v77_v2, 0  ;;  %v1158_v7 = vsel %vm95_vm0, %v78_v3, 0  ;;  %v79_v8 = vld [vmem:[%s6696_s1 + $0x30] sm:$0x3]  ;;  %v80_v9 = vld [vmem:[%s6696_s1 + $0x32] sm:$0x3] }
  0x15   :  { %4700 = vmatprep.subr.bf16.mxu0 %v5306_v0  ;;  %4706 = vmatprep.subr.bf16.mxu1 %v5306_v0  ;;  %v37_v10 = vld [vmem:[%s6697_s0 + $0x2c] sm:$0x3]  ;;  %v38_v11 = vld [vmem:[%s6697_s0 + $0x2e] sm:$0x3]  ;;  %v1204_v12 = vsel %vm95_vm0, %v79_v8, 0  ;;  %v1250_v13 = vsel %vm95_vm0, %v80_v9, 0 }
  0x16   :  { %v81_v14 = vld [vmem:[%s6696_s1 + $0x34] sm:$0x3]  ;;  %v82_v15 = vld [vmem:[%s6696_s1 + $0x36] sm:$0x3]  ;;  %v39_v16 = vld [vmem:[%s6697_s0 + $0x30] sm:$0x3] }
  0x17   :  { %v40_v17 = vld [vmem:[%s6697_s0 + $0x32] sm:$0x3]  ;;  %v1296_v18 = vsel %vm95_vm0, %v81_v14, 0  ;;  %v42_v23 = vld [vmem:[%s6697_s0 + $0x36] sm:$0x3]  ;;  %vm2501_vm3 = vcmask 1041408  }
  0x18   :  { %v44_v29 = vld [vmem:[%s6697_s0 + $0x3a] sm:$0x3]  ;;  %v46_v35 = vld [vmem:[%s6697_s0 + $0x3e] sm:$0x3]  ;;  %v48_v41 = vld [vmem:[%s6697_s0 + $0x42] sm:$0x3] }
  0x19   :  { %v50_v47 = vld [vmem:[%s6697_s0 + $0x46] sm:$0x3]  ;;  %v52_v53 = vld [vmem:[%s6697_s0 + $0x4a] sm:$0x3]  ;;  %vm2497_vm4 = vcmask 31744   ;;  %vm4379_vm5 = vcmask 58368  }
  0x1a   :  { %4691 = vmatmul.mubr.msk.bf16.vlgmr.msra.gmra.mrb[8].mxu0 %vm95_vm0, %v19_v19  ;;  %4697 = vmatmul.mubr.msk.bf16.vlgmr.msra.gmra.mrb[8].mxu1 %vm95_vm0, %v20_v20  ;;  %v1342_v19 = vsel %vm95_vm0, %v82_v15, 0  ;;  %v83_v20 = vld [vmem:[%s6696_s1 + $0x38] sm:$0x3] }
  0x1b   :  { %4701 = vmatpush3.bf16.xpose.msra.mxu0 %v376_v21  ;;  %4707 = vmatpush3.bf16.xpose.msra.mxu1 %v422_v22  ;;  %v84_v21 = vld [vmem:[%s6696_s1 + $0x3a] sm:$0x3]  ;;  %v41_v22 = vld [vmem:[%s6697_s0 + $0x34] sm:$0x3]  ;;  %v1388_v24 = vsel %vm95_vm0, %v83_v20, 0 }
  0x1c   :  { %4702 = vmatprep.mubr.msk.bf16.mxu0 %vm5307_vm1, %v5306_v0  ;;  %4708 = vmatprep.mubr.msk.bf16.mxu1 %vm5307_vm1, %v5306_v0 }
  0x1d   :  { %4712 = vmatprep.subr.bf16.mxu0 %v5306_v0  ;;  %4718 = vmatprep.subr.bf16.mxu1 %v5306_v0 }
  0x22   :  { %4703 = vmatmul.mubr.msk.bf16.vlgmr.msra.gmra.mrb[12].mxu0 %vm95_vm0, %v21_v25  ;;  %4709 = vmatmul.mubr.msk.bf16.vlgmr.msra.gmra.mrb[12].mxu1 %vm95_vm0, %v22_v26  ;;  %v1434_v25 = vsel %vm95_vm0, %v84_v21, 0  ;;  %v85_v26 = vld [vmem:[%s6696_s1 + $0x3c] sm:$0x3] }
  0x23   :  { %4713 = vmatpush3.bf16.xpose.msra.mxu0 %v468_v27  ;;  %4719 = vmatpush3.bf16.xpose.msra.mxu1 %v514_v28  ;;  %v86_v27 = vld [vmem:[%s6696_s1 + $0x3e] sm:$0x3]  ;;  %v43_v28 = vld [vmem:[%s6697_s0 + $0x38] sm:$0x3]  ;;  %v1480_v30 = vsel %vm95_vm0, %v85_v26, 0 }
  0x24   :  { %4714 = vmatprep.mubr.msk.bf16.mxu0 %vm5307_vm1, %v5306_v0  ;;  %4720 = vmatprep.mubr.msk.bf16.mxu1 %vm5307_vm1, %v5306_v0 }
  0x25   :  { %4724 = vmatprep.subr.bf16.mxu0 %v5306_v0  ;;  %4730 = vmatprep.subr.bf16.mxu1 %v5306_v0 }
  0x2a   :  { %4715 = vmatmul.mubr.msk.bf16.vlgmr.msra.gmra.mrb[16].mxu0 %vm95_vm0, %v23_v31  ;;  %4721 = vmatmul.mubr.msk.bf16.vlgmr.msra.gmra.mrb[16].mxu1 %vm95_vm0, %v24_v32  ;;  %v1526_v31 = vsel %vm95_vm0, %v86_v27, 0  ;;  %v87_v32 = vld [vmem:[%s6696_s1 + $0x40] sm:$0x3] }
  0x2b   :  { %4725 = vmatpush3.bf16.xpose.msra.mxu0 %v560_v33  ;;  %4731 = vmatpush3.bf16.xpose.msra.mxu1 %v606_v34  ;;  %v88_v33 = vld [vmem:[%s6696_s1 + $0x42] sm:$0x3]  ;;  %v45_v34 = vld [vmem:[%s6697_s0 + $0x3c] sm:$0x3]  ;;  %v1572_v36 = vsel %vm95_vm0, %v87_v32, 0 }
  0x2c   :  { %4726 = vmatprep.mubr.msk.bf16.mxu0 %vm5307_vm1, %v5306_v0  ;;  %4732 = vmatprep.mubr.msk.bf16.mxu1 %vm5307_vm1, %v5306_v0 }
  0x2d   :  { %4736 = vmatprep.subr.bf16.mxu0 %v5306_v0  ;;  %4742 = vmatprep.subr.bf16.mxu1 %v5306_v0 }
  0x32   :  { %4727 = vmatmul.mubr.msk.bf16.vlgmr.msra.gmra.mrb[20].mxu0 %vm95_vm0, %v25_v37  ;;  %4733 = vmatmul.mubr.msk.bf16.vlgmr.msra.gmra.mrb[20].mxu1 %vm95_vm0, %v26_v38  ;;  %v1618_v37 = vsel %vm95_vm0, %v88_v33, 0  ;;  %v89_v38 = vld [vmem:[%s6696_s1 + $0x44] sm:$0x3] }
  0x33   :  { %4737 = vmatpush3.bf16.xpose.msra.mxu0 %v652_v39  ;;  %4743 = vmatpush3.bf16.xpose.msra.mxu1 %v698_v40  ;;  %v90_v39 = vld [vmem:[%s6696_s1 + $0x46] sm:$0x3]  ;;  %v47_v40 = vld [vmem:[%s6697_s0 + $0x40] sm:$0x3]  ;;  %v1664_v42 = vsel %vm95_vm0, %v89_v38, 0 }
  0x34   :  { %4738 = vmatprep.mubr.msk.bf16.mxu0 %vm5307_vm1, %v5306_v0  ;;  %4744 = vmatprep.mubr.msk.bf16.mxu1 %vm5307_vm1, %v5306_v0 }
  0x35   :  { %4748 = vmatprep.subr.bf16.mxu0 %v5306_v0  ;;  %4754 = vmatprep.subr.bf16.mxu1 %v5306_v0 }
  0x3a   :  { %4739 = vmatmul.mubr.msk.bf16.vlgmr.msra.gmra.mrb[24].mxu0 %vm95_vm0, %v27_v43  ;;  %4745 = vmatmul.mubr.msk.bf16.vlgmr.msra.gmra.mrb[24].mxu1 %vm95_vm0, %v28_v44  ;;  %v1710_v43 = vsel %vm95_vm0, %v90_v39, 0  ;;  %v91_v44 = vld [vmem:[%s6696_s1 + $0x48] sm:$0x3] }
  0x3b   :  { %4749 = vmatpush3.bf16.xpose.msra.mxu0 %v744_v45  ;;  %4755 = vmatpush3.bf16.xpose.msra.mxu1 %v790_v46  ;;  %v92_v45 = vld [vmem:[%s6696_s1 + $0x4a] sm:$0x3]  ;;  %v49_v46 = vld [vmem:[%s6697_s0 + $0x44] sm:$0x3]  ;;  %v1756_v48 = vsel %vm95_vm0, %v91_v44, 0 }
  0x3c   :  { %4750 = vmatprep.mubr.msk.bf16.mxu0 %vm5307_vm1, %v5306_v0  ;;  %4756 = vmatprep.mubr.msk.bf16.mxu1 %vm5307_vm1, %v5306_v0 }
  0x3d   :  { %4760 = vmatprep.subr.bf16.mxu0 %v5306_v0  ;;  %4766 = vmatprep.subr.bf16.mxu1 %v5306_v0 }
  0x42   :  { %4751 = vmatmul.mubr.msk.bf16.vlgmr.msra.gmra.mrb[28].mxu0 %vm95_vm0, %v29_v49  ;;  %4757 = vmatmul.mubr.msk.bf16.vlgmr.msra.gmra.mrb[28].mxu1 %vm95_vm0, %v30_v50  ;;  %v1802_v49 = vsel %vm95_vm0, %v92_v45, 0  ;;  %v93_v50 = vld [vmem:[%s6696_s1 + $0x4c] sm:$0x3] }
  0x43   :  { %4761 = vmatpush3.bf16.xpose.msra.mxu0 %v836_v51  ;;  %4767 = vmatpush3.bf16.xpose.msra.mxu1 %v882_v52  ;;  %v94_v51 = vld [vmem:[%s6696_s1 + $0x4e] sm:$0x3]  ;;  %v51_v52 = vld [vmem:[%s6697_s0 + $0x48] sm:$0x3]  ;;  %v1848_v54 = vsel %vm95_vm0, %v93_v50, 0 }
  0x44   :  { %4762 = vmatprep.mubr.msk.bf16.mxu0 %vm5307_vm1, %v5306_v0  ;;  %4768 = vmatprep.mubr.msk.bf16.mxu1 %vm5307_vm1, %v5306_v0 }
  0x45   :  { %4772 = vmatprep.subr.bf16.mxu0 %v5306_v0  ;;  %4778 = vmatprep.subr.bf16.mxu1 %v5306_v0 }
  0x4a   :  { %4763 = vmatmul.mubr.msk.bf16.vlgmr.msra.gmra.mrb[32].mxu0 %vm95_vm0, %v31_v55  ;;  %4769 = vmatmul.mubr.msk.bf16.vlgmr.msra.gmra.mrb[32].mxu1 %vm95_vm0, %v32_v56  ;;  %v1894_v55 = vsel %vm95_vm0, %v94_v51, 0  ;;  %v53_v56 = vld [vmem:[%s6697_s0 + $0x4c] sm:$0x3] }
  0x4b   :  { %4773 = vmatpush3.bf16.xpose.msra.mxu0 %v928_v57  ;;  %4779 = vmatpush3.bf16.xpose.msra.mxu1 %v974_v58  ;;  %v54_v57 = vld [vmem:[%s6697_s0 + $0x4e] sm:$0x3] }
  0x4c   :  { %4774 = vmatprep.mubr.msk.bf16.mxu0 %vm5307_vm1, %v5306_v0  ;;  %4780 = vmatprep.mubr.msk.bf16.mxu1 %vm5307_vm1, %v5306_v0 }
  0x4d   :  { %4784 = vmatprep.subr.bf16.mxu0 %v5306_v0  ;;  %4790 = vmatprep.subr.bf16.mxu1 %v5306_v0 }
  0x52   :  { %4775 = vmatmul.mubr.msk.bf16.vlgmr.msra.gmra.mrb[36].mxu0 %vm95_vm0, %v33_v61  ;;  %4781 = vmatmul.mubr.msk.bf16.vlgmr.msra.gmra.mrb[36].mxu1 %vm95_vm0, %v34_v62 }
  0x53   :  { %4785 = vmatpush3.bf16.xpose.msra.mxu0 %v1020_v63  ;;  %4791 = vmatpush3.bf16.xpose.msra.mxu1 %v1066_v1 }
  0x54   :  { %4786 = vmatprep.mubr.msk.bf16.mxu0 %vm5307_vm1, %v5306_v0  ;;  %4792 = vmatprep.mubr.msk.bf16.mxu1 %vm5307_vm1, %v5306_v0 }
  0x55   :  { %4796 = vmatprep.subr.bf16.mxu0 %v5306_v0  ;;  %4802 = vmatprep.subr.bf16.mxu1 %v5306_v0 }
  0x5a   :  { %4787 = vmatmul.mubr.msk.bf16.vlgmr.msra.gmra.mrb[40].mxu0 %vm95_vm0, %v35_v4  ;;  %4793 = vmatmul.mubr.msk.bf16.vlgmr.msra.gmra.mrb[40].mxu1 %vm95_vm0, %v36_v5 }
  0x5b   :  { %4797 = vmatpush3.bf16.xpose.msra.mxu0 %v1112_v6  ;;  %4803 = vmatpush3.bf16.xpose.msra.mxu1 %v1158_v7 }
  0x5c   :  { %4798 = vmatprep.mubr.msk.bf16.mxu0 %vm5307_vm1, %v5306_v0  ;;  %4804 = vmatprep.mubr.msk.bf16.mxu1 %vm5307_vm1, %v5306_v0 }
  0x5d   :  { %4808 = vmatprep.subr.bf16.mxu0 %v5306_v0  ;;  %4814 = vmatprep.subr.bf16.mxu1 %v5306_v0 }
  0x62   :  { %4799 = vmatmul.mubr.msk.bf16.vlgmr.msra.gmra.mrb[44].mxu0 %vm95_vm0, %v37_v10  ;;  %4805 = vmatmul.mubr.msk.bf16.vlgmr.msra.gmra.mrb[44].mxu1 %vm95_vm0, %v38_v11 }
  0x63   :  { %4809 = vmatpush3.bf16.xpose.msra.mxu0 %v1204_v12  ;;  %4815 = vmatpush3.bf16.xpose.msra.mxu1 %v1250_v13 }
  0x64   :  { %4810 = vmatprep.mubr.msk.bf16.mxu0 %vm5307_vm1, %v5306_v0  ;;  %4820 = vmatprep.subr.bf16.mxu0 %v5306_v0 }
  0x65   :  { %4816 = vmatprep.mubr.msk.bf16.mxu1 %vm5307_vm1, %v5306_v0  ;;  %4826 = vmatprep.subr.bf16.mxu1 %v5306_v0 }
  0x6a   :  { %4811 = vmatmul.mubr.msk.bf16.vlgmr.msra.gmra.mrb[48].mxu0 %vm95_vm0, %v39_v16  ;;  %4817 = vmatmul.mubr.msk.bf16.vlgmr.msra.gmra.mrb[48].mxu1 %vm95_vm0, %v40_v17 }
  0x6b   :  { %4821 = vmatpush3.bf16.xpose.msra.mxu0 %v1296_v18  ;;  %4827 = vmatpush3.bf16.xpose.msra.mxu1 %v1342_v19 }
  0x6c   :  { %4822 = vmatprep.mubr.msk.bf16.mxu0 %vm5307_vm1, %v5306_v0  ;;  %4832 = vmatprep.subr.bf16.mxu0 %v5306_v0 }
  0x6d   :  { %4828 = vmatprep.mubr.msk.bf16.mxu1 %vm5307_vm1, %v5306_v0  ;;  %4838 = vmatprep.subr.bf16.mxu1 %v5306_v0 }
  0x72   :  { %4823 = vmatmul.mubr.msk.bf16.vlgmr.msra.gmra.mrb[52].mxu0 %vm95_vm0, %v41_v22  ;;  %4829 = vmatmul.mubr.msk.bf16.vlgmr.msra.gmra.mrb[52].mxu1 %vm95_vm0, %v42_v23 }
  0x73   :  { %4833 = vmatpush3.bf16.xpose.msra.mxu0 %v1388_v24  ;;  %4839 = vmatpush3.bf16.xpose.msra.mxu1 %v1434_v25 }
  0x74   :  { %4834 = vmatprep.mubr.msk.bf16.mxu0 %vm5307_vm1, %v5306_v0  ;;  %4844 = vmatprep.subr.bf16.mxu0 %v5306_v0 }
  0x75   :  { %4840 = vmatprep.mubr.msk.bf16.mxu1 %vm5307_vm1, %v5306_v0  ;;  %4850 = vmatprep.subr.bf16.mxu1 %v5306_v0 }
  0x7a   :  { %4835 = vmatmul.mubr.msk.bf16.vlgmr.msra.gmra.mrb[56].mxu0 %vm95_vm0, %v43_v28  ;;  %4841 = vmatmul.mubr.msk.bf16.vlgmr.msra.gmra.mrb[56].mxu1 %vm95_vm0, %v44_v29 }
  0x7b   :  { %4845 = vmatpush3.bf16.xpose.msra.mxu0 %v1480_v30  ;;  %4851 = vmatpush3.bf16.xpose.msra.mxu1 %v1526_v31 }
  0x7c   :  { %4846 = vmatprep.mubr.msk.bf16.mxu0 %vm5307_vm1, %v5306_v0  ;;  %4856 = vmatprep.subr.bf16.mxu0 %v5306_v0 }
  0x7d   :  { %4852 = vmatprep.mubr.msk.bf16.mxu1 %vm5307_vm1, %v5306_v0  ;;  %4862 = vmatprep.subr.bf16.mxu1 %v5306_v0 }
  0x82   :  { %4847 = vmatmul.mubr.msk.bf16.vlgmr.msra.gmra.mrb[60].mxu0 %vm95_vm0, %v45_v34  ;;  %4853 = vmatmul.mubr.msk.bf16.vlgmr.msra.gmra.mrb[60].mxu1 %vm95_vm0, %v46_v35 }
  0x83   :  { %4857 = vmatpush3.bf16.xpose.msra.mxu0 %v1572_v36  ;;  %4863 = vmatpush3.bf16.xpose.msra.mxu1 %v1618_v37 }
  0x84   :  { %4858 = vmatprep.mubr.msk.bf16.mxu0 %vm5307_vm1, %v5306_v0  ;;  %4868 = vmatprep.subr.bf16.mxu0 %v5306_v0 }
  0x85   :  { %4864 = vmatprep.mubr.msk.bf16.mxu1 %vm5307_vm1, %v5306_v0  ;;  %4874 = vmatprep.subr.bf16.mxu1 %v5306_v0 }
  0x8a   :  { %4859 = vmatmul.mubr.msk.bf16.vlgmr.msra.gmra.mrb[64].mxu0 %vm95_vm0, %v47_v40  ;;  %4865 = vmatmul.mubr.msk.bf16.vlgmr.msra.gmra.mrb[64].mxu1 %vm95_vm0, %v48_v41 }
  0x8b   :  { %4869 = vmatpush3.bf16.xpose.msra.mxu0 %v1664_v42  ;;  %4875 = vmatpush3.bf16.xpose.msra.mxu1 %v1710_v43 }
  0x8c   :  { %4870 = vmatprep.mubr.msk.bf16.mxu0 %vm5307_vm1, %v5306_v0  ;;  %4880 = vmatprep.subr.bf16.mxu0 %v5306_v0 }
  0x8d   :  { %4876 = vmatprep.mubr.msk.bf16.mxu1 %vm5307_vm1, %v5306_v0  ;;  %4886 = vmatprep.subr.bf16.mxu1 %v5306_v0 }
  0x92   :  { %4871 = vmatmul.mubr.msk.bf16.vlgmr.msra.gmra.mrb[68].mxu0 %vm95_vm0, %v49_v46  ;;  %4877 = vmatmul.mubr.msk.bf16.vlgmr.msra.gmra.mrb[68].mxu1 %vm95_vm0, %v50_v47 }
  0x93   :  { %4881 = vmatpush3.bf16.xpose.msra.mxu0 %v1756_v48  ;;  %4887 = vmatpush3.bf16.xpose.msra.mxu1 %v1802_v49 }
  0x94   :  { %4882 = vmatprep.mubr.msk.bf16.mxu0 %vm5307_vm1, %v5306_v0  ;;  %4892 = vmatprep.subr.bf16.mxu0 %v5306_v0 }
  0x95   :  { %4888 = vmatprep.mubr.msk.bf16.mxu1 %vm5307_vm1, %v5306_v0  ;;  %4898 = vmatprep.subr.bf16.mxu1 %v5306_v0 }
  0x9a   :  { %4883 = vmatmul.mubr.msk.bf16.vlgmr.msra.gmra.mrb[72].mxu0 %vm95_vm0, %v51_v52  ;;  %4889 = vmatmul.mubr.msk.bf16.vlgmr.msra.gmra.mrb[72].mxu1 %vm95_vm0, %v52_v53 }
  0x9b   :  { %4893 = vmatpush3.bf16.xpose.msra.mxu0 %v1848_v54  ;;  %4899 = vmatpush3.bf16.xpose.msra.mxu1 %v1894_v55 }
  0x9c   :  { %4894 = vmatprep.mubr.msk.bf16.mxu0 %vm5307_vm1, %v5306_v0  ;;  %4900 = vmatprep.mubr.msk.bf16.mxu1 %vm5307_vm1, %v5306_v0 }
  0x9d   :  { %4904 = vmatprep.subr.bf16.mxu0 %v5306_v0  ;;  %4910 = vmatprep.subr.bf16.mxu1 %v5306_v0 }
  0xa2   :  { %4895 = vmatmul.mubr.msk.bf16.vlgmr.msra.gmra.mrb[76].mxu0 %vm95_vm0, %v53_v56  ;;  %4901 = vmatmul.mubr.msk.bf16.vlgmr.msra.gmra.mrb[76].mxu1 %vm95_vm0, %v54_v57 }
  0xa3   :  { %4906 = vmatprep.mubr.msk.bf16.mxu0 %vm5307_vm1, %v5306_v0  ;;  %4912 = vmatprep.mubr.msk.bf16.mxu1 %vm5307_vm1, %v5306_v0 }
  0xdd   :  { %v136_v58 = vpop.f32.mrb[0].mxu0  ;;  %v182_v59 = vpop.f32.mrb[0].mxu1 }
  0xde   :  { %v5774_v60 = vmul.f32 0.35355338, %v136_v58  ;;  %v4668_v61 = vpop.f32.mrb[1].mxu0  ;;  %v5776_v62 = vmul.f32 0.35355338, %v182_v59  ;;  %v4674_v63 = vpop.f32.mrb[1].mxu1 }
  0xdf   :  { %v139_v1 = vpop.f32.mrb[2].mxu0  ;;  %v185_v2 = vpop.f32.mrb[2].mxu1 }
  0xe0   :  { %v4669_v3 = vpop.f32.mrb[3].mxu0  ;;  %v1977_v4 = vsel %vm1976_vm2, %v5774_v60, -inf  ;;  %v4675_v5 = vpop.f32.mrb[3].mxu1  ;;  %v1980_v6 = vsel %vm1976_vm2, %v5776_v62, -inf }
  0xe1   :  { %1978 = vmax.xlane.f32.xlu0 %v1977_v4 }
  0xe5   :  { %1981 = vmax.xlane.f32.xlu0 %v1980_v6  ;;  %v228_v7 = vpop.f32.mrb[4].mxu0  ;;  %v274_v8 = vpop.f32.mrb[4].mxu1 }
  0xe6   :  { %v5782_v9 = vmul.f32 0.35355338, %v228_v7  ;;  %v4680_v10 = vpop.f32.mrb[5].mxu0  ;;  %v5784_v11 = vmul.f32 0.35355338, %v274_v8  ;;  %v4686_v12 = vpop.f32.mrb[5].mxu1 }
  0xe7   :  { %v231_v13 = vpop.f32.mrb[6].mxu0  ;;  %v277_v14 = vpop.f32.mrb[6].mxu1 }
  0xe8   :  { %v4681_v15 = vpop.f32.mrb[7].mxu0  ;;  %v1983_v16 = vsel %vm1976_vm2, %v5782_v9, -inf  ;;  %v4687_v17 = vpop.f32.mrb[7].mxu1  ;;  %v1986_v18 = vsel %vm1976_vm2, %v5784_v11, -inf }
  0xe9   :  { %1984 = vmax.xlane.f32.xlu1 %v1983_v16 }
  0xed   :  { %v366_v19 = vpop.f32.mrb[8].mxu1  ;;  %1987 = vmax.xlane.f32.xlu1 %v1986_v18  ;;  %v320_v20 = vpop.f32.mrb[8].mxu0 }
  0xee   :  { %v5790_v21 = vmul.f32 0.35355338, %v366_v19  ;;  %v5792_v22 = vmul.f32 0.35355338, %v320_v20  ;;  %v4692_v23 = vpop.f32.mrb[9].mxu0  ;;  %v4698_v24 = vpop.f32.mrb[9].mxu1 }
  0xef   :  { %v369_v25 = vpop.f32.mrb[10].mxu1  ;;  %v323_v26 = vpop.f32.mrb[10].mxu0 }
  0xf0   :  { %v1992_v27 = vsel %vm1976_vm2, %v5790_v21, -inf  ;;  %v1989_v28 = vsel %vm1976_vm2, %v5792_v22, -inf  ;;  %v4693_v29 = vpop.f32.mrb[11].mxu0  ;;  %v4699_v30 = vpop.f32.mrb[11].mxu1 }
  0xf1   :  { %1993 = vmax.xlane.f32.xlu1 %v1992_v27  ;;  %1990 = vmax.xlane.f32.xlu0 %v1989_v28 }
  0xf5   :  { %v412_v31 = vpop.f32.mrb[12].mxu0  ;;  %v458_v32 = vpop.f32.mrb[12].mxu1 }
  0xf6   :  { %v5798_v33 = vmul.f32 0.35355338, %v412_v31  ;;  %v5800_v34 = vmul.f32 0.35355338, %v458_v32  ;;  %v4704_v35 = vpop.f32.mrb[13].mxu0  ;;  %v4710_v36 = vpop.f32.mrb[13].mxu1 }
  0xf7   :  { %v461_v37 = vpop.f32.mrb[14].mxu1  ;;  %v415_v38 = vpop.f32.mrb[14].mxu0 }
  0xf8   :  { %v1998_v39 = vsel %vm1976_vm2, %v5800_v34, -inf  ;;  %v1995_v40 = vsel %vm1976_vm2, %v5798_v33, -inf  ;;  %v4705_v41 = vpop.f32.mrb[15].mxu0  ;;  %v4711_v42 = vpop.f32.mrb[15].mxu1 }
  0xf9   :  { %1999 = vmax.xlane.f32.xlu1 %v1998_v39  ;;  %1996 = vmax.xlane.f32.xlu0 %v1995_v40 }
  0xfd   :  { %v504_v43 = vpop.f32.mrb[16].mxu0  ;;  %v550_v44 = vpop.f32.mrb[16].mxu1 }
  0xfe   :  { %v5806_v45 = vmul.f32 0.35355338, %v504_v43  ;;  %v5808_v46 = vmul.f32 0.35355338, %v550_v44  ;;  %v4716_v47 = vpop.f32.mrb[17].mxu0  ;;  %v4722_v48 = vpop.f32.mrb[17].mxu1 }
  0xff   :  { %v553_v49 = vpop.f32.mrb[18].mxu1  ;;  %v507_v50 = vpop.f32.mrb[18].mxu0 }
 0x100   :  { %v2004_v51 = vsel %vm1976_vm2, %v5808_v46, -inf  ;;  %v2001_v52 = vsel %vm1976_vm2, %v5806_v45, -inf  ;;  %v4717_v53 = vpop.f32.mrb[19].mxu0  ;;  %v4723_v54 = vpop.f32.mrb[19].mxu1 }
 0x101   :  { %2005 = vmax.xlane.f32.xlu1 %v2004_v51  ;;  %2002 = vmax.xlane.f32.xlu0 %v2001_v52 }
 0x105   :  { %v596_v55 = vpop.f32.mrb[20].mxu0  ;;  %v642_v56 = vpop.f32.mrb[20].mxu1 }
 0x106   :  { %v5814_v57 = vmul.f32 0.35355338, %v596_v55  ;;  %v5816_v58 = vmul.f32 0.35355338, %v642_v56  ;;  %v4728_v59 = vpop.f32.mrb[21].mxu0  ;;  %v4734_v61 = vpop.f32.mrb[21].mxu1 }
 0x107   :  { %v645_v63 = vpop.f32.mrb[22].mxu1  ;;  %v599_v1 = vpop.f32.mrb[22].mxu0 }
 0x108   :  { %v2010_v2 = vsel %vm1976_vm2, %v5816_v58, -inf  ;;  %v2007_v3 = vsel %vm1976_vm2, %v5814_v57, -inf  ;;  %v4729_v4 = vpop.f32.mrb[23].mxu0  ;;  %v4735_v5 = vpop.f32.mrb[23].mxu1 }
 0x109   :  { %2011 = vmax.xlane.f32.xlu1 %v2010_v2  ;;  %2008 = vmax.xlane.f32.xlu0 %v2007_v3 }
 0x10d   :  { %v688_v6 = vpop.f32.mrb[24].mxu0  ;;  %v734_v7 = vpop.f32.mrb[24].mxu1 }
 0x10e   :  { %v5822_v8 = vmul.f32 0.35355338, %v688_v6  ;;  %v5824_v10 = vmul.f32 0.35355338, %v734_v7  ;;  %v4740_v12 = vpop.f32.mrb[25].mxu0  ;;  %v4746_v13 = vpop.f32.mrb[25].mxu1 }
 0x10f   :  { %v737_v14 = vpop.f32.mrb[26].mxu1  ;;  %v691_v15 = vpop.f32.mrb[26].mxu0 }
 0x110   :  { %v2016_v16 = vsel %vm1976_vm2, %v5824_v10, -inf  ;;  %v2013_v17 = vsel %vm1976_vm2, %v5822_v8, -inf  ;;  %v4741_v18 = vpop.f32.mrb[27].mxu0  ;;  %v4747_v19 = vpop.f32.mrb[27].mxu1 }
 0x111   :  { %2017 = vmax.xlane.f32.xlu1 %v2016_v16  ;;  %2014 = vmax.xlane.f32.xlu0 %v2013_v17 }
 0x115   :  { %v780_v20 = vpop.f32.mrb[28].mxu0  ;;  %v826_v23 = vpop.f32.mrb[28].mxu1 }
 0x116   :  { %v5830_v24 = vmul.f32 0.35355338, %v780_v20  ;;  %v5832_v25 = vmul.f32 0.35355338, %v826_v23  ;;  %v4752_v26 = vpop.f32.mrb[29].mxu0  ;;  %v4758_v27 = vpop.f32.mrb[29].mxu1 }
 0x117   :  { %v829_v28 = vpop.f32.mrb[30].mxu1  ;;  %v783_v29 = vpop.f32.mrb[30].mxu0 }
 0x118   :  { %v2022_v30 = vsel %vm1976_vm2, %v5832_v25, -inf  ;;  %v2019_v31 = vsel %vm1976_vm2, %v5830_v24, -inf  ;;  %v4753_v32 = vpop.f32.mrb[31].mxu0  ;;  %v4759_v35 = vpop.f32.mrb[31].mxu1 }
 0x119   :  { %2023 = vmax.xlane.f32.xlu1 %v2022_v30  ;;  %2020 = vmax.xlane.f32.xlu0 %v2019_v31 }
 0x11d   :  { %v872_v36 = vpop.f32.mrb[32].mxu0  ;;  %v918_v37 = vpop.f32.mrb[32].mxu1 }
 0x11e   :  { %v5838_v38 = vmul.f32 0.35355338, %v872_v36  ;;  %v5840_v39 = vmul.f32 0.35355338, %v918_v37  ;;  %v4764_v40 = vpop.f32.mrb[33].mxu0  ;;  %v4770_v41 = vpop.f32.mrb[33].mxu1 }
 0x11f   :  { %v875_v42 = vpop.f32.mrb[34].mxu0  ;;  %v921_v43 = vpop.f32.mrb[34].mxu1 }
 0x120   :  { %v2028_v44 = vsel %vm1976_vm2, %v5840_v39, -inf  ;;  %v2025_v47 = vsel %vm1976_vm2, %v5838_v38, -inf  ;;  %v4765_v48 = vpop.f32.mrb[35].mxu0  ;;  %v4771_v49 = vpop.f32.mrb[35].mxu1 }
 0x121   :  { %2029 = vmax.xlane.f32.xlu1 %v2028_v44  ;;  %2026 = vmax.xlane.f32.xlu0 %v2025_v47 }
 0x125   :  { %v964_v50 = vpop.f32.mrb[36].mxu0  ;;  %v1010_v51 = vpop.f32.mrb[36].mxu1 }
 0x126   :  { %v5846_v52 = vmul.f32 0.35355338, %v964_v50  ;;  %v5848_v53 = vmul.f32 0.35355338, %v1010_v51  ;;  %v4776_v54 = vpop.f32.mrb[37].mxu0  ;;  %v4782_v55 = vpop.f32.mrb[37].mxu1 }
 0x127   :  { %v967_v56 = vpop.f32.mrb[38].mxu0  ;;  %v1013_v59 = vpop.f32.mrb[38].mxu1 }
 0x128   :  { %v2034_v61 = vsel %vm1976_vm2, %v5848_v53, -inf  ;;  %v2031_v63 = vsel %vm1976_vm2, %v5846_v52, -inf  ;;  %v4777_v1 = vpop.f32.mrb[39].mxu0  ;;  %v4783_v2 = vpop.f32.mrb[39].mxu1 }
 0x129   :  { %2035 = vmax.xlane.f32.xlu1 %v2034_v61  ;;  %2032 = vmax.xlane.f32.xlu0 %v2031_v63 }
 0x12d   :  { %v1056_v3 = vpop.f32.mrb[40].mxu0  ;;  %v1102_v4 = vpop.f32.mrb[40].mxu1 }
 0x12e   :  { %v5854_v5 = vmul.f32 0.35355338, %v1056_v3  ;;  %v5856_v6 = vmul.f32 0.35355338, %v1102_v4  ;;  %v4788_v7 = vpop.f32.mrb[41].mxu0  ;;  %v4794_v12 = vpop.f32.mrb[41].mxu1 }
 0x12f   :  { %v1059_v13 = vpop.f32.mrb[42].mxu0  ;;  %v1105_v14 = vpop.f32.mrb[42].mxu1 }
 0x130   :  { %v2040_v15 = vsel %vm1976_vm2, %v5856_v6, -inf  ;;  %v2037_v16 = vsel %vm1976_vm2, %v5854_v5, -inf  ;;  %v4789_v17 = vpop.f32.mrb[43].mxu0  ;;  %v4795_v18 = vpop.f32.mrb[43].mxu1 }
 0x131   :  { %2041 = vmax.xlane.f32.xlu1 %v2040_v15  ;;  %2038 = vmax.xlane.f32.xlu0 %v2037_v16 }
 0x135   :  { %v1148_v19 = vpop.f32.mrb[44].mxu0  ;;  %v1194_v20 = vpop.f32.mrb[44].mxu1 }
 0x136   :  { %v5862_v23 = vmul.f32 0.35355338, %v1148_v19  ;;  %v5864_v26 = vmul.f32 0.35355338, %v1194_v20  ;;  %v4806_v27 = vpop.f32.mrb[45].mxu1  ;;  %v4800_v28 = vpop.f32.mrb[45].mxu0 }
 0x137   :  { %v1151_v29 = vpop.f32.mrb[46].mxu0  ;;  %v1197_v30 = vpop.f32.mrb[46].mxu1 }
 0x138   :  { %v2046_v31 = vsel %vm1976_vm2, %v5864_v26, -inf  ;;  %v2043_v32 = vsel %vm1976_vm2, %v5862_v23, -inf  ;;  %v4801_v35 = vpop.f32.mrb[47].mxu0  ;;  %v4807_v36 = vpop.f32.mrb[47].mxu1 }
 0x139   :  { %2047 = vmax.xlane.f32.xlu1 %v2046_v31  ;;  %2044 = vmax.xlane.f32.xlu0 %v2043_v32 }
 0x13d   :  { %v5870_v37 = vpop.f32.mrb[48].mxu0  ;;  %v5872_v40 = vpop.f32.mrb[48].mxu1 }
 0x13e   :  { %v4812_v41 = vpop.f32.mrb[49].mxu0  ;;  %v4818_v42 = vpop.f32.mrb[49].mxu1 }
 0x13f   :  { %v1289_v43 = vpop.f32.mrb[50].mxu1  ;;  %v1243_v44 = vpop.f32.mrb[50].mxu0 }
 0x140   :  { %v4813_v47 = vpop.f32.mrb[51].mxu0  ;;  %v4819_v48 = vpop.f32.mrb[51].mxu1 }
 0x145   :  { %v5874_v49 = vpop.f32.mrb[52].mxu0  ;;  %v5876_v50 = vpop.f32.mrb[52].mxu1 }
 0x146   :  { %v4824_v51 = vpop.f32.mrb[53].mxu0  ;;  %v4830_v54 = vpop.f32.mrb[53].mxu1 }
 0x147   :  { %v1381_v55 = vpop.f32.mrb[54].mxu1  ;;  %v1335_v56 = vpop.f32.mrb[54].mxu0 }
 0x148   :  { %v4825_v59 = vpop.f32.mrb[55].mxu0  ;;  %v4831_v61 = vpop.f32.mrb[55].mxu1 }
 0x14d   :  { %v5878_v63 = vpop.f32.mrb[56].mxu0  ;;  %v5880_v1 = vpop.f32.mrb[56].mxu1 }
 0x14e   :  { %v4836_v2 = vpop.f32.mrb[57].mxu0  ;;  %v4842_v3 = vpop.f32.mrb[57].mxu1 }
 0x14f   :  { %v1473_v4 = vpop.f32.mrb[58].mxu1  ;;  %v1427_v7 = vpop.f32.mrb[58].mxu0 }
 0x150   :  { %v4837_v12 = vpop.f32.mrb[59].mxu0  ;;  %v4843_v13 = vpop.f32.mrb[59].mxu1 }
 0x155   :  { %v5882_v14 = vpop.f32.mrb[60].mxu0  ;;  %v5884_v15 = vpop.f32.mrb[60].mxu1 }
 0x156   :  { %v4848_v16 = vpop.f32.mrb[61].mxu0  ;;  %v4854_v17 = vpop.f32.mrb[61].mxu1 }
 0x157   :  { %v1565_v18 = vpop.f32.mrb[62].mxu1  ;;  %v1519_v19 = vpop.f32.mrb[62].mxu0 }
 0x158   :  { %v4849_v20 = vpop.f32.mrb[63].mxu0  ;;  %v4855_v27 = vpop.f32.mrb[63].mxu1 }
 0x15d   :  { %v5886_v28 = vpop.f32.mrb[64].mxu0  ;;  %v5888_v29 = vpop.f32.mrb[64].mxu1 }
 0x15e   :  { %v4860_v30 = vpop.f32.mrb[65].mxu0  ;;  %v4866_v31 = vpop.f32.mrb[65].mxu1 }
 0x15f   :  { %v1657_v32 = vpop.f32.mrb[66].mxu1  ;;  %v1611_v35 = vpop.f32.mrb[66].mxu0 }
 0x160   :  { %v4861_v36 = vpop.f32.mrb[67].mxu0  ;;  %v4867_v41 = vpop.f32.mrb[67].mxu1 }
 0x165   :  { %v5890_v42 = vpop.f32.mrb[68].mxu0  ;;  %v5892_v43 = vpop.f32.mrb[68].mxu1 }
 0x166   :  { %v4872_v44 = vpop.f32.mrb[69].mxu0  ;;  %v4878_v47 = vpop.f32.mrb[69].mxu1 }
 0x167   :  { %v1749_v48 = vpop.f32.mrb[70].mxu1  ;;  %v1703_v51 = vpop.f32.mrb[70].mxu0 }
 0x168   :  { %v4873_v54 = vpop.f32.mrb[71].mxu0  ;;  %v4879_v55 = vpop.f32.mrb[71].mxu1 }
 0x169   :  { %v5907_v54 = vmul.f32 0.35355338, %v5870_v37 }
 0x16d   :  { %v5894_v56 = vpop.f32.mrb[72].mxu0  ;;  %v5896_v59 = vpop.f32.mrb[72].mxu1 }
 0x16e   :  { %v1979_v61 = vpop.xlane.xlu0 %1978  ;;  %v4884_v2 = vpop.f32.mrb[73].mxu0 }
 0x16f   :  { %v2097_v3 = vsub.f32 %v5774_v60, %v1979_v61  ;;  %v4890_v4 = vpop.f32.mrb[73].mxu1  ;;  %v1795_v7 = vpop.f32.mrb[74].mxu0 }
 0x170   :  { %v1841_v12 = vpop.f32.mrb[74].mxu1  ;;  %v4885_v13 = vpop.f32.mrb[75].mxu0 }
 0x171   :  { %v2137_v16 = vmul.f32 1.442695, %v2097_v3  ;;  %v4891_v17 = vpop.f32.mrb[75].mxu1  ;;  %v5916_v12 = vmul.f32 0.35355338, %v5872_v40 }
 0x172   :  { %v1982_v18 = vpop.xlane.xlu0 %1981 }
 0x173   :  { %5146 = vpow2.f32 %v2137_v16  ;;  %v2098_v19 = vsub.f32 %v5776_v62, %v1982_v18 }
 0x175   :  { %v2139_v20 = vmul.f32 1.442695, %v2098_v19  ;;  %v5900_v27 = vpop.f32.mrb[76].mxu0  ;;  %v5902_v30 = vpop.f32.mrb[76].mxu1 }
 0x176   :  { %v1985_v31 = vpop.xlane.xlu1 %1984  ;;  %v4896_v32 = vpop.f32.mrb[77].mxu0 }
 0x177   :  { %5148 = vpow2.f32 %v2139_v20  ;;  %v2099_v60 = vsub.f32 %v5782_v9, %v1985_v31  ;;  %v4902_v35 = vpop.f32.mrb[77].mxu1  ;;  %v1887_v36 = vpop.f32.mrb[78].mxu0 }
 0x178   :  { %v1933_v41 = vpop.f32.mrb[78].mxu1  ;;  %v4897_v44 = vpop.f32.mrb[79].mxu0 }
 0x179   :  { %v2141_v47 = vmul.f32 1.442695, %v2099_v60  ;;  %v4903_v48 = vpop.f32.mrb[79].mxu1  ;;  %v5936_v60 = vmul.f32 0.35355338, %v5876_v50 }
 0x17a   :  { %v1988_v51 = vpop.xlane.xlu1 %1987 }
 0x17b   :  { %5150 = vpow2.f32 %v2141_v47  ;;  %v2100_v62 = vsub.f32 %v5784_v11, %v1988_v51  ;;  %v2049_v11 = vsel %vm1976_vm2, %v5907_v54, -inf }
 0x17d   :  { %v5909_v55 = vpop.eup %5146  ;;  %v2143_v61 = vmul.f32 1.442695, %v2100_v62 }
 0x17e   :  { %v1994_v2 = vpop.xlane.xlu1 %1993  ;;  %v1991_v3 = vpop.xlane.xlu0 %1990  ;;  %v2217_v9 = vsel %vm1976_vm2, %v5909_v55, 0.0 }
 0x17f   :  { %5152 = vpow2.f32 %v2143_v61  ;;  %v2102_v4 = vsub.f32 %v5790_v21, %v1994_v2  ;;  %v2101_v7 = vsub.f32 %v5792_v22, %v1991_v3  ;;  %2218 = vadd.xlane.f32.xlu0 %v2217_v9  ;;  %v2052_v21 = vsel %vm1976_vm2, %v5916_v12, -inf }
 0x180   :  { %v5927_v22 = vmul.f32 0.35355338, %v5874_v49  ;;  %v5958_v3 = vmul.f32 0.35355338, %v5880_v1 }
 0x181   :  { %v5920_v37 = vpop.eup %5148  ;;  %v2147_v13 = vmul.f32 1.442695, %v2102_v4  ;;  %v2145_v16 = vmul.f32 1.442695, %v2101_v7 }
 0x182   :  { %v2220_v17 = vsel %vm1976_vm2, %v5920_v37, 0.0  ;;  %v2055_v49 = vsel %vm1976_vm2, %v5927_v22, -inf }
 0x183   :  { %2221 = vadd.xlane.f32.xlu1 %v2220_v17  ;;  %2050 = vmax.xlane.f32.xlu0 %v2049_v11  ;;  %5154 = vpow2.f32 %v2145_v16 }
 0x184   :  { %5156 = vpow2.f32 %v2147_v13 }
 0x185   :  { %v5929_v40 = vpop.eup %5150 }
 0x186   :  { %v2000_v18 = vpop.xlane.xlu1 %1999  ;;  %v1997_v19 = vpop.xlane.xlu0 %1996  ;;  %v2223_v20 = vsel %vm1976_vm2, %v5929_v40, 0.0 }
 0x187   :  { %v2104_v31 = vsub.f32 %v5800_v34, %v2000_v18  ;;  %v2103_v32 = vsub.f32 %v5798_v33, %v1997_v19  ;;  %2053 = vmax.xlane.f32.xlu1 %v2052_v21  ;;  %2224 = vadd.xlane.f32.xlu0 %v2223_v20  ;;  %v2058_v33 = vsel %vm1976_vm2, %v5936_v60, -inf  ;;  %v5947_v34 = vmul.f32 0.35355338, %v5878_v63 }
 0x188   :  { %v5978_v19 = vmul.f32 0.35355338, %v5884_v15 }
 0x189   :  { %v5940_v35 = vpop.eup %5152  ;;  %v2151_v36 = vmul.f32 1.442695, %v2104_v31  ;;  %v2149_v41 = vmul.f32 1.442695, %v2103_v32  ;;  %v2061_v4 = vsel %vm1976_vm2, %v5947_v34, -inf }
 0x18a   :  { %v2226_v44 = vsel %vm1976_vm2, %v5940_v35, 0.0  ;;  %v2070_v15 = vsel %vm1976_vm2, %v5978_v19, -inf }
 0x18b   :  { %2227 = vadd.xlane.f32.xlu1 %v2226_v44  ;;  %2056 = vmax.xlane.f32.xlu0 %v2055_v49  ;;  %5158 = vpow2.f32 %v2149_v41  ;;  %v2458_v49 = vld [vmem:[%s6698_s2 + $0x2] sm:$0x3] }
 0x18c   :  { %5160 = vpow2.f32 %v2151_v36  ;;  %v5995_v36 = vmul.f32 0.35355338, %v5886_v28  ;;  %v2549_v41 = vsel %vm2501_vm3, %v2458_v49, 0  ;;  %v6008_v28 = vmul.f32 0.35355338, %v5888_v29 }
 0x18d   :  { %v5949_v50 = vpop.eup %5154  ;;  %4911 = vmatpush3.bf16.msra.mxu1 %v2549_v41 }
 0x18e   :  { %v2006_v47 = vpop.xlane.xlu1 %2005  ;;  %v2003_v48 = vpop.xlane.xlu0 %2002  ;;  %v2229_v2 = vsel %vm1976_vm2, %v5949_v50, 0.0  ;;  %4922 = vmatprep.subr.bf16.mxu1 %v5306_v0 }
 0x18f   :  { %v5951_v51 = vpop.eup %5156  ;;  %v2106_v62 = vsub.f32 %v5808_v46, %v2006_v47  ;;  %v2105_v61 = vsub.f32 %v5806_v45, %v2003_v48  ;;  %2059 = vmax.xlane.f32.xlu1 %v2058_v33  ;;  %2230 = vadd.xlane.f32.xlu0 %v2229_v2  ;;  %v2064_v45 = vsel %vm1976_vm2, %v5958_v3, -inf  ;;  %v5967_v46 = vmul.f32 0.35355338, %v5882_v14  ;;  %v2457_v14 = vld [vmem:[%s6698_s2] sm:$0x3] }
 0x190   :  { %v2232_v7 = vsel %vm1976_vm2, %v5951_v51, 0.0 }
 0x191   :  { %v2155_v63 = vmul.f32 1.442695, %v2106_v62  ;;  %v2153_v9 = vmul.f32 1.442695, %v2105_v61 }
 0x193   :  { %2233 = vadd.xlane.f32.xlu1 %v2232_v7  ;;  %5162 = vpow2.f32 %v2153_v9  ;;  %2062 = vmax.xlane.f32.xlu0 %v2061_v4  ;;  %v2073_v4 = vsel %vm1976_vm2, %v5995_v36, -inf  ;;  %v6017_v7 = vmul.f32 0.35355338, %v5890_v42 }
 0x194   :  { %5164 = vpow2.f32 %v2155_v63 }
 0x195   :  { %v5969_v1 = vpop.eup %5158 }
 0x196   :  { %v2012_v11 = vpop.xlane.xlu1 %2011  ;;  %v2009_v13 = vpop.xlane.xlu0 %2008  ;;  %v2235_v18 = vsel %vm1976_vm2, %v5969_v1, 0.0 }
 0x197   :  { %v5971_v16 = vpop.eup %5160  ;;  %v2108_v17 = vsub.f32 %v5816_v58, %v2012_v11  ;;  %v2107_v21 = vsub.f32 %v5814_v57, %v2009_v13  ;;  %2065 = vmax.xlane.f32.xlu1 %v2064_v45  ;;  %2236 = vadd.xlane.f32.xlu0 %v2235_v18  ;;  %v2067_v58 = vsel %vm1976_vm2, %v5967_v46, -inf  ;;  %v2503_v57 = vsel %vm2501_vm3, %v2457_v14, 0 }
 0x198   :  { %v2238_v32 = vsel %vm1976_vm2, %v5971_v16, 0.0  ;;  %4905 = vmatpush3.bf16.msra.mxu0 %v2503_v57  ;;  %v6028_v14 = vmul.f32 0.35355338, %v5892_v43 }
 0x199   :  { %v2159_v20 = vmul.f32 1.442695, %v2108_v17  ;;  %v2157_v31 = vmul.f32 1.442695, %v2107_v21  ;;  %4916 = vmatprep.subr.bf16.mxu0 %v5306_v0 }
 0x19b   :  { %2239 = vadd.xlane.f32.xlu1 %v2238_v32  ;;  %5166 = vpow2.f32 %v2157_v31  ;;  %2068 = vmax.xlane.f32.xlu0 %v2067_v58  ;;  %v2079_v31 = vsel %vm1976_vm2, %v6017_v7, -inf }
 0x19c   :  { %5168 = vpow2.f32 %v2159_v20 }
 0x19d   :  { %v5998_v44 = vpop.eup %5162 }
 0x19e   :  { %v2018_v33 = vpop.xlane.xlu1 %2017  ;;  %v2015_v47 = vpop.xlane.xlu0 %2014  ;;  %v2241_v2 = vsel %vm1976_vm2, %v5998_v44, 0.0 }
 0x19f   :  { %v6000_v48 = vpop.eup %5164  ;;  %v2110_v62 = vsub.f32 %v5824_v10, %v2018_v33  ;;  %v2109_v61 = vsub.f32 %v5822_v8, %v2015_v47  ;;  %2071 = vmax.xlane.f32.xlu1 %v2070_v15  ;;  %2242 = vadd.xlane.f32.xlu0 %v2241_v2  ;;  %v2076_v8 = vsel %vm1976_vm2, %v6008_v28, -inf  ;;  %v6048_v47 = vmul.f32 0.35355338, %v5896_v59 }
 0x1a0   :  { %v2244_v10 = vsel %vm1976_vm2, %v6000_v48, 0.0 }
 0x1a1   :  { %v2163_v63 = vmul.f32 1.442695, %v2110_v62  ;;  %v2161_v9 = vmul.f32 1.442695, %v2109_v61 }
 0x1a3   :  { %2245 = vadd.xlane.f32.xlu1 %v2244_v10  ;;  %5170 = vpow2.f32 %v2161_v9  ;;  %2074 = vmax.xlane.f32.xlu0 %v2073_v4 }
 0x1a4   :  { %5172 = vpow2.f32 %v2163_v63 }
 0x1a5   :  { %v6019_v29 = vpop.eup %5166 }
 0x1a6   :  { %v2024_v45 = vpop.xlane.xlu1 %2023  ;;  %v2021_v11 = vpop.xlane.xlu0 %2020  ;;  %v2247_v18 = vsel %vm1976_vm2, %v6019_v29, 0.0 }
 0x1a7   :  { %v6021_v13 = vpop.eup %5168  ;;  %v2112_v17 = vsub.f32 %v5832_v25, %v2024_v45  ;;  %v2111_v21 = vsub.f32 %v5830_v24, %v2021_v11  ;;  %2077 = vmax.xlane.f32.xlu1 %v2076_v8  ;;  %2248 = vadd.xlane.f32.xlu0 %v2247_v18  ;;  %v2082_v24 = vsel %vm1976_vm2, %v6028_v14, -inf  ;;  %v6037_v25 = vmul.f32 0.35355338, %v5894_v56 }
 0x1a8   :  { %v2250_v58 = vsel %vm1976_vm2, %v6021_v13, 0.0  ;;  %v6068_v11 = vmul.f32 0.35355338, %v5902_v30 }
 0x1a9   :  { %v2167_v42 = vmul.f32 1.442695, %v2112_v17  ;;  %v2165_v20 = vmul.f32 1.442695, %v2111_v21  ;;  %v2085_v61 = vsel %vm1976_vm2, %v6037_v25, -inf }
 0x1ab   :  { %2251 = vadd.xlane.f32.xlu1 %v2250_v58  ;;  %5174 = vpow2.f32 %v2165_v20  ;;  %2080 = vmax.xlane.f32.xlu0 %v2079_v31 }
 0x1ac   :  { %5176 = vpow2.f32 %v2167_v42 }
 0x1ad   :  { %v6039_v43 = vpop.eup %5170 }
 0x1ae   :  { %v2030_v57 = vpop.xlane.xlu1 %2029  ;;  %v2027_v32 = vpop.xlane.xlu0 %2026  ;;  %v2253_v33 = vsel %vm1976_vm2, %v6039_v43, 0.0 }
 0x1af   :  { %v6041_v15 = vpop.eup %5172  ;;  %v2114_v49 = vsub.f32 %v5840_v39, %v2030_v57  ;;  %v2113_v41 = vsub.f32 %v5838_v38, %v2027_v32  ;;  %2083 = vmax.xlane.f32.xlu1 %v2082_v24  ;;  %2254 = vadd.xlane.f32.xlu0 %v2253_v33  ;;  %v2088_v38 = vsel %vm1976_vm2, %v6048_v47, -inf  ;;  %v6057_v39 = vmul.f32 0.35355338, %v5900_v27 }
 0x1b0   :  { %v2256_v2 = vsel %vm1976_vm2, %v6041_v15, 0.0 }
 0x1b1   :  { %v2171_v56 = vmul.f32 1.442695, %v2114_v49  ;;  %v2169_v62 = vmul.f32 1.442695, %v2113_v41  ;;  %v2091_v21 = vsel %vm1976_vm2, %v6057_v39, -inf }
 0x1b3   :  { %2257 = vadd.xlane.f32.xlu1 %v2256_v2  ;;  %5178 = vpow2.f32 %v2169_v62  ;;  %2086 = vmax.xlane.f32.xlu0 %v2085_v61 }
 0x1b4   :  { %5180 = vpow2.f32 %v2171_v56 }
 0x1b5   :  { %v6059_v59 = vpop.eup %5174 }
 0x1b6   :  { %v2036_v63 = vpop.xlane.xlu1 %2035  ;;  %v2033_v9 = vpop.xlane.xlu0 %2032  ;;  %v2259_v45 = vsel %vm1976_vm2, %v6059_v59, 0.0 }
 0x1b7   :  { %v6061_v4 = vpop.eup %5176  ;;  %v2116_v10 = vsub.f32 %v5848_v53, %v2036_v63  ;;  %v2115_v8 = vsub.f32 %v5846_v52, %v2033_v9  ;;  %2089 = vmax.xlane.f32.xlu1 %v2088_v38  ;;  %2260 = vadd.xlane.f32.xlu0 %v2259_v45  ;;  %v2094_v52 = vsel %vm1976_vm2, %v6068_v11, -inf }
 0x1b8   :  { %v2262_v18 = vsel %vm1976_vm2, %v6061_v4, 0.0 }
 0x1b9   :  { %v2175_v27 = vmul.f32 1.442695, %v2116_v10  ;;  %v2173_v17 = vmul.f32 1.442695, %v2115_v8 }
 0x1bb   :  { %5182 = vpow2.f32 %v2175_v27  ;;  %2263 = vadd.xlane.f32.xlu1 %v2262_v18  ;;  %2092 = vmax.xlane.f32.xlu0 %v2091_v21 }
 0x1bc   :  { %5184 = vpow2.f32 %v2173_v17 }
 0x1bd   :  { %v6076_v53 = vpop.eup %5178 }
 0x1be   :  { %v2042_v42 = vpop.xlane.xlu1 %2041  ;;  %v2039_v30 = vpop.xlane.xlu0 %2038  ;;  %v2265_v24 = vsel %vm1976_vm2, %v6076_v53, 0.0 }
 0x1bf   :  { %v6078_v20 = vpop.eup %5180  ;;  %v2118_v31 = vsub.f32 %v5856_v6, %v2042_v42  ;;  %v2117_v58 = vsub.f32 %v5854_v5, %v2039_v30  ;;  %2095 = vmax.xlane.f32.xlu1 %v2094_v52  ;;  %2266 = vadd.xlane.f32.xlu0 %v2265_v24 }
 0x1c0   :  { %v2268_v49 = vsel %vm1976_vm2, %v6078_v20, 0.0 }
 0x1c1   :  { %v2179_v57 = vmul.f32 1.442695, %v2118_v31  ;;  %v2177_v32 = vmul.f32 1.442695, %v2117_v58 }
 0x1c3   :  { %5186 = vpow2.f32 %v2179_v57  ;;  %2269 = vadd.xlane.f32.xlu1 %v2268_v49  ;;  %v2459_v49 = vld [vmem:[%s6698_s2 + $0x4] sm:$0x3] }
 0x1c4   :  { %5188 = vpow2.f32 %v2177_v32 }
 0x1c5   :  { %v6086_v41 = vpop.eup %5182 }
 0x1c6   :  { %v6088_v33 = vpop.eup %5184  ;;  %v2048_v6 = vpop.xlane.xlu1 %2047  ;;  %v2274_v5 = vsel %vm1976_vm2, %v6086_v41, 0.0 }
 0x1c7   :  { %v2045_v56 = vpop.xlane.xlu0 %2044  ;;  %v2120_v62 = vsub.f32 %v5864_v26, %v2048_v6  ;;  %2275 = vadd.xlane.f32.xlu1 %v2274_v5  ;;  %v2271_v2 = vsel %vm1976_vm2, %v6088_v33, 0.0 }
 0x1c8   :  { %v2119_v61 = vsub.f32 %v5862_v23, %v2045_v56  ;;  %2272 = vadd.xlane.f32.xlu0 %v2271_v2 }
 0x1c9   :  { %v2183_v38 = vmul.f32 1.442695, %v2120_v62 }
 0x1ca   :  { %v2181_v63 = vmul.f32 1.442695, %v2119_v61  ;;  %v2595_v61 = vsel %vm2501_vm3, %v2459_v49, 0 }
 0x1cb   :  { %5190 = vpow2.f32 %v2183_v38  ;;  %v2460_v38 = vld [vmem:[%s6698_s2 + $0x6] sm:$0x3] }
 0x1cc   :  { %5192 = vpow2.f32 %v2181_v63 }
 0x1cd   :  { %v6096_v9 = vpop.eup %5186 }
 0x1ce   :  { %v6098_v10 = vpop.eup %5188  ;;  %v2280_v8 = vsel %vm1976_vm2, %v6096_v9, 0.0 }
 0x1cf   :  { %2281 = vadd.xlane.f32.xlu1 %v2280_v8  ;;  %v2277_v23 = vsel %vm1976_vm2, %v6098_v10, 0.0 }
 0x1d0   :  { %2278 = vadd.xlane.f32.xlu0 %v2277_v23 }
 0x1d5   :  { %v6104_v26 = vpop.eup %5190 }
 0x1d6   :  { %v6106_v45 = vpop.eup %5192  ;;  %v2286_v27 = vsel %vm1976_vm2, %v6104_v26, 0.0 }
 0x1d7   :  { %2287 = vadd.xlane.f32.xlu1 %v2286_v27  ;;  %v2283_v17 = vsel %vm1976_vm2, %v6106_v45, 0.0  ;;  %v2641_v27 = vsel %vm2501_vm3, %v2460_v38, 0 }
 0x1d8   :  { %2284 = vadd.xlane.f32.xlu0 %v2283_v17 }
 0x20c   :  { %v2219_v21 = vpop.xlane.xlu0 %2218 }
 0x20d   :  { %5194 = vrcp.f32 %v2219_v21 }
 0x210   :  { %v2222_v18 = vpop.xlane.xlu1 %2221  ;;  %v2051_v52 = vpop.xlane.xlu0 %2050 }
 0x211   :  { %5196 = vrcp.f32 %v2222_v18  ;;  %v2121_v42 = vsub.f32 %v5907_v54, %v2051_v52  ;;  %v2461_v52 = vld [vmem:[%s6698_s2 + $0x8] sm:$0x3] }
 0x213   :  { %v2185_v30 = vmul.f32 1.442695, %v2121_v42 }
 0x214   :  { %v2054_v31 = vpop.xlane.xlu1 %2053  ;;  %v2225_v58 = vpop.xlane.xlu0 %2224 }
 0x215   :  { %5198 = vpow2.f32 %v2185_v30  ;;  %v2122_v24 = vsub.f32 %v5916_v12, %v2054_v31 }
 0x216   :  { %5200 = vrcp.f32 %v2225_v58 }
 0x217   :  { %v5195_v57 = vpop.eup %5194  ;;  %v2187_v32 = vmul.f32 1.442695, %v2122_v24 }
 0x218   :  { %v2377_v6 = vmul.f32 %v5195_v57, %v5909_v55  ;;  %v2228_v56 = vpop.xlane.xlu1 %2227  ;;  %v2057_v5 = vpop.xlane.xlu0 %2056  ;;  %v2687_v57 = vsel %vm2501_vm3, %v2461_v52, 0 }
 0x219   :  { %5202 = vpow2.f32 %v2187_v32  ;;  %v2123_v54 = vsub.f32 %v5927_v22, %v2057_v5 }
 0x21a   :  { %5204 = vrcp.f32 %v2228_v56  ;;  %v2417_v62 = vpack.c.bf16 %v2377_v6, %v2377_v6 }
 0x21b   :  { %v5197_v12 = vpop.eup %5196  ;;  %v2189_v2 = vmul.f32 1.442695, %v2123_v54 }
 0x21c   :  { %v2378_v63 = vmul.f32 %v5197_v12, %v5920_v37  ;;  %v2060_v8 = vpop.xlane.xlu1 %2059  ;;  %4907 = vmatmul.mubr.msk.bf16.vlgmr.msra.gmra.mrb[80].mxu0 %vm2497_vm4, %v2417_v62  ;;  %v2231_v22 = vpop.xlane.xlu0 %2230 }
 0x21d   :  { %5206 = vpow2.f32 %v2189_v2  ;;  %v2124_v55 = vsub.f32 %v5936_v60, %v2060_v8  ;;  %4917 = vmatpush3.bf16.msra.mxu0 %v2595_v61  ;;  %4918 = vmatprep.mubr.msk.bf16.mxu0 %vm5307_vm1, %v5306_v0 }
 0x21e   :  { %5208 = vrcp.f32 %v2231_v22  ;;  %v2418_v23 = vpack.c.bf16 %v2378_v63, %v2378_v63  ;;  %4928 = vmatprep.subr.bf16.mxu0 %v5306_v0  ;;  %v2463_v63 = vld [vmem:[%s6698_s2 + $0xc] sm:$0x3] }
 0x21f   :  { %v6130_v17 = vpop.eup %5198  ;;  %v2191_v37 = vmul.f32 1.442695, %v2124_v55 }
 0x220   :  { %v5201_v21 = vpop.eup %5200  ;;  %4913 = vmatmul.mubr.msk.bf16.vlgmr.msra.gmra.mrb[80].mxu1 %vm2497_vm4, %v2418_v23  ;;  %v2234_v18 = vpop.xlane.xlu1 %2233  ;;  %v2289_v60 = vsel %vm1976_vm2, %v6130_v17, 0.0 }
 0x221   :  { %v2379_v42 = vmul.f32 %v5201_v21, %v5929_v40  ;;  %5210 = vpow2.f32 %v2191_v37  ;;  %v2063_v30 = vpop.xlane.xlu0 %2062  ;;  %2290 = vadd.xlane.f32.xlu0 %v2289_v60  ;;  %4923 = vmatpush3.bf16.msra.mxu1 %v2641_v27  ;;  %v2779_v37 = vsel %vm2501_vm3, %v2463_v63, 0 }
 0x222   :  { %5212 = vrcp.f32 %v2234_v18  ;;  %v2125_v31 = vsub.f32 %v5947_v34, %v2063_v30  ;;  %4924 = vmatprep.mubr.msk.bf16.mxu1 %vm5307_vm1, %v5306_v0  ;;  %4934 = vmatprep.subr.bf16.mxu1 %v5306_v0  ;;  %v2462_v34 = vld [vmem:[%s6698_s2 + $0xa] sm:$0x3] }
 0x223   :  { %v6143_v58 = vpop.eup %5202  ;;  %v2419_v24 = vpack.c.bf16 %v2379_v42, %v2379_v42  ;;  %v2733_v2 = vsel %vm2501_vm3, %v2462_v34, 0 }
 0x224   :  { %v5205_v32 = vpop.eup %5204  ;;  %v2193_v49 = vmul.f32 1.442695, %v2125_v31  ;;  %v2066_v40 = vpop.xlane.xlu1 %2065  ;;  %v2292_v6 = vsel %vm1976_vm2, %v6143_v58, 0.0 }
 0x225   :  { %v2380_v56 = vmul.f32 %v5205_v32, %v5940_v35  ;;  %v2126_v5 = vsub.f32 %v5958_v3, %v2066_v40  ;;  %4919 = vmatmul.mubr.msk.bf16.vlgmr.msra.gmra.mrb[84].mxu0 %vm2497_vm4, %v2419_v24  ;;  %v2237_v54 = vpop.xlane.xlu0 %2236  ;;  %2293 = vadd.xlane.f32.xlu1 %v2292_v6  ;;  %v2465_v6 = vld [vmem:[%s6698_s2 + $0x10] sm:$0x3] }
 0x226   :  { %5214 = vpow2.f32 %v2193_v49  ;;  %4929 = vmatpush3.bf16.msra.mxu0 %v2687_v57  ;;  %4930 = vmatprep.mubr.msk.bf16.mxu0 %vm5307_vm1, %v5306_v0 }
 0x227   :  { %v6156_v62 = vpop.eup %5206  ;;  %v2195_v61 = vmul.f32 1.442695, %v2126_v5  ;;  %5216 = vrcp.f32 %v2237_v54  ;;  %v2420_v12 = vpack.c.bf16 %v2380_v56, %v2380_v56  ;;  %4940 = vmatprep.subr.bf16.mxu0 %v5306_v0 }
 0x228   :  { %v5209_v35 = vpop.eup %5208  ;;  %v2240_v3 = vpop.xlane.xlu1 %2239  ;;  %v2295_v38 = vsel %vm1976_vm2, %v6156_v62, 0.0 }
 0x229   :  { %v2381_v8 = vmul.f32 %v5209_v35, %v5949_v50  ;;  %5218 = vpow2.f32 %v2195_v61  ;;  %4925 = vmatmul.mubr.msk.bf16.vlgmr.msra.gmra.mrb[84].mxu1 %vm2497_vm4, %v2420_v12  ;;  %v2069_v55 = vpop.xlane.xlu0 %2068  ;;  %2296 = vadd.xlane.f32.xlu0 %v2295_v38 }
 0x22a   :  { %5220 = vrcp.f32 %v2240_v3  ;;  %v2127_v22 = vsub.f32 %v5967_v46, %v2069_v55  ;;  %4935 = vmatpush3.bf16.msra.mxu1 %v2733_v2  ;;  %4936 = vmatprep.mubr.msk.bf16.mxu1 %vm5307_vm1, %v5306_v0  ;;  %v2464_v46 = vld [vmem:[%s6698_s2 + $0xe] sm:$0x3] }
 0x22b   :  { %v6170_v23 = vpop.eup %5210  ;;  %v2421_v27 = vpack.c.bf16 %v2381_v8, %v2381_v8  ;;  %4946 = vmatprep.subr.bf16.mxu1 %v5306_v0  ;;  %v2825_v57 = vsel %vm2501_vm3, %v2464_v46, 0 }
 0x22c   :  { %v5213_v50 = vpop.eup %5212  ;;  %v2197_v21 = vmul.f32 1.442695, %v2127_v22  ;;  %v2072_v18 = vpop.xlane.xlu1 %2071  ;;  %v2298_v60 = vsel %vm1976_vm2, %v6170_v23, 0.0 }
 0x22d   :  { %v2382_v52 = vmul.f32 %v5213_v50, %v5951_v51  ;;  %v2128_v42 = vsub.f32 %v5978_v19, %v2072_v18  ;;  %4931 = vmatmul.mubr.msk.bf16.vlgmr.msra.gmra.mrb[88].mxu0 %vm2497_vm4, %v2421_v27  ;;  %v2243_v30 = vpop.xlane.xlu0 %2242  ;;  %2299 = vadd.xlane.f32.xlu1 %v2298_v60 }
 0x22e   :  { %5222 = vpow2.f32 %v2197_v21  ;;  %4941 = vmatpush3.bf16.msra.mxu0 %v2779_v37  ;;  %4942 = vmatprep.mubr.msk.bf16.mxu0 %vm5307_vm1, %v5306_v0  ;;  %v2467_v21 = vld [vmem:[%s6698_s2 + $0x14] sm:$0x3] }
 0x22f   :  { %v2199_v31 = vmul.f32 1.442695, %v2128_v42  ;;  %5224 = vrcp.f32 %v2243_v30  ;;  %v2422_v24 = vpack.c.bf16 %v2382_v52, %v2382_v52  ;;  %4952 = vmatprep.subr.bf16.mxu0 %v5306_v0 }
 0x230   :  { %v6186_v32 = vpop.eup %5214  ;;  %v2246_v51 = vpop.xlane.xlu1 %2245 }
 0x231   :  { %v5217_v19 = vpop.eup %5216  ;;  %5226 = vpow2.f32 %v2199_v31  ;;  %4937 = vmatmul.mubr.msk.bf16.vlgmr.msra.gmra.mrb[88].mxu1 %vm2497_vm4, %v2422_v24  ;;  %v2075_v49 = vpop.xlane.xlu0 %2074  ;;  %v2301_v40 = vsel %vm1976_vm2, %v6186_v32, 0.0 }
 0x232   :  { %v2383_v34 = vmul.f32 %v5217_v19, %v5969_v1  ;;  %5228 = vrcp.f32 %v2246_v51  ;;  %v2129_v56 = vsub.f32 %v5995_v36, %v2075_v49  ;;  %2302 = vadd.xlane.f32.xlu0 %v2301_v40  ;;  %4947 = vmatpush3.bf16.msra.mxu1 %v2825_v57  ;;  %v2871_v1 = vsel %vm2501_vm3, %v2465_v6, 0  ;;  %v2466_v36 = vld [vmem:[%s6698_s2 + $0x12] sm:$0x3] }
 0x233   :  { %v6196_v5 = vpop.eup %5218  ;;  %4948 = vmatprep.mubr.msk.bf16.mxu1 %vm5307_vm1, %v5306_v0  ;;  %4958 = vmatprep.subr.bf16.mxu1 %v5306_v0  ;;  %v2917_v22 = vsel %vm2501_vm3, %v2466_v36, 0 }
 0x234   :  { %v5221_v54 = vpop.eup %5220  ;;  %v2201_v61 = vmul.f32 1.442695, %v2129_v56  ;;  %v2078_v12 = vpop.xlane.xlu1 %2077  ;;  %v2423_v2 = vpack.c.bf16 %v2383_v34, %v2383_v34  ;;  %v2304_v35 = vsel %vm1976_vm2, %v6196_v5, 0.0 }
 0x235   :  { %v2384_v3 = vmul.f32 %v5221_v54, %v5971_v16  ;;  %v2130_v38 = vsub.f32 %v6008_v28, %v2078_v12  ;;  %v2249_v63 = vpop.xlane.xlu0 %2248  ;;  %2305 = vadd.xlane.f32.xlu1 %v2304_v35 }
 0x236   :  { %5230 = vpow2.f32 %v2201_v61  ;;  %4943 = vmatmul.mubr.msk.bf16.vlgmr.msra.gmra.mrb[92].mxu0 %vm2497_vm4, %v2423_v2  ;;  %v2469_v61 = vld [vmem:[%s6698_s2 + $0x18] sm:$0x3] }
 0x237   :  { %v2203_v8 = vmul.f32 1.442695, %v2130_v38  ;;  %5232 = vrcp.f32 %v2249_v63  ;;  %v2424_v55 = vpack.c.bf16 %v2384_v3, %v2384_v3  ;;  %4953 = vmatpush3.bf16.msra.mxu0 %v2871_v1  ;;  %4954 = vmatprep.mubr.msk.bf16.mxu0 %vm5307_vm1, %v5306_v0 }
 0x238   :  { %v6213_v27 = vpop.eup %5222  ;;  %v2252_v37 = vpop.xlane.xlu1 %2251  ;;  %4964 = vmatprep.subr.bf16.mxu0 %v5306_v0 }
 0x239   :  { %v5225_v16 = vpop.eup %5224  ;;  %5234 = vpow2.f32 %v2203_v8  ;;  %4949 = vmatmul.mubr.msk.bf16.vlgmr.msra.gmra.mrb[92].mxu1 %vm2497_vm4, %v2424_v55  ;;  %v2081_v28 = vpop.xlane.xlu0 %2080  ;;  %v2307_v50 = vsel %vm1976_vm2, %v6213_v27, 0.0 }
 0x23a   :  { %v2385_v18 = vmul.f32 %v5225_v16, %v5998_v44  ;;  %5236 = vrcp.f32 %v2252_v37  ;;  %v2131_v60 = vsub.f32 %v6017_v7, %v2081_v28  ;;  %2308 = vadd.xlane.f32.xlu0 %v2307_v50  ;;  %4959 = vmatpush3.bf16.msra.mxu1 %v2917_v22  ;;  %v2963_v44 = vsel %vm2501_vm3, %v2467_v21, 0  ;;  %v2468_v7 = vld [vmem:[%s6698_s2 + $0x16] sm:$0x3] }
 0x23b   :  { %v6224_v46 = vpop.eup %5226  ;;  %4960 = vmatprep.mubr.msk.bf16.mxu1 %vm5307_vm1, %v5306_v0  ;;  %4970 = vmatprep.subr.bf16.mxu1 %v5306_v0  ;;  %v3009_v6 = vsel %vm2501_vm3, %v2468_v7, 0 }
 0x23c   :  { %v5229_v52 = vpop.eup %5228  ;;  %v2205_v42 = vmul.f32 1.442695, %v2131_v60  ;;  %v2084_v30 = vpop.xlane.xlu1 %2083  ;;  %v2425_v31 = vpack.c.bf16 %v2385_v18, %v2385_v18  ;;  %v2310_v24 = vsel %vm1976_vm2, %v6224_v46, 0.0  ;;  %v2471_v60 = vld [vmem:[%s6698_s2 + $0x1c] sm:$0x3] }
 0x23d   :  { %v2386_v57 = vmul.f32 %v5229_v52, %v6000_v48  ;;  %v2132_v51 = vsub.f32 %v6028_v14, %v2084_v30  ;;  %v2255_v19 = vpop.xlane.xlu0 %2254  ;;  %2311 = vadd.xlane.f32.xlu1 %v2310_v24 }
 0x23e   :  { %5238 = vpow2.f32 %v2205_v42  ;;  %4955 = vmatmul.mubr.msk.bf16.vlgmr.msra.gmra.mrb[96].mxu0 %vm2497_vm4, %v2425_v31 }
 0x23f   :  { %v2207_v49 = vmul.f32 1.442695, %v2132_v51  ;;  %5240 = vrcp.f32 %v2255_v19  ;;  %v2426_v40 = vpack.c.bf16 %v2386_v57, %v2386_v57  ;;  %4965 = vmatpush3.bf16.msra.mxu0 %v2963_v44  ;;  %4966 = vmatprep.mubr.msk.bf16.mxu0 %vm5307_vm1, %v5306_v0 }
 0x240   :  { %v6241_v34 = vpop.eup %5230  ;;  %v2258_v56 = vpop.xlane.xlu1 %2257  ;;  %4976 = vmatprep.subr.bf16.mxu0 %v5306_v0 }
 0x241   :  { %v5233_v48 = vpop.eup %5232  ;;  %5242 = vpow2.f32 %v2207_v49  ;;  %4961 = vmatmul.mubr.msk.bf16.vlgmr.msra.gmra.mrb[96].mxu1 %vm2497_vm4, %v2426_v40  ;;  %v2087_v14 = vpop.xlane.xlu0 %2086  ;;  %v2313_v54 = vsel %vm1976_vm2, %v6241_v34, 0.0 }
 0x242   :  { %v2387_v12 = vmul.f32 %v5233_v48, %v6019_v29  ;;  %5244 = vrcp.f32 %v2258_v56  ;;  %v2133_v2 = vsub.f32 %v6037_v25, %v2087_v14  ;;  %2314 = vadd.xlane.f32.xlu0 %v2313_v54  ;;  %4971 = vmatpush3.bf16.msra.mxu1 %v3009_v6  ;;  %v3055_v29 = vsel %vm2501_vm3, %v2469_v61, 0  ;;  %v2470_v25 = vld [vmem:[%s6698_s2 + $0x1a] sm:$0x3]  ;;  %v2473_v54 = vld [vmem:[%s6698_s2 + $0x20] sm:$0x3] }
 0x243   :  { %v6252_v35 = vpop.eup %5234  ;;  %4972 = vmatprep.mubr.msk.bf16.mxu1 %vm5307_vm1, %v5306_v0  ;;  %4982 = vmatprep.subr.bf16.mxu1 %v5306_v0  ;;  %v3101_v28 = vsel %vm2501_vm3, %v2470_v25, 0 }
 0x244   :  { %v5237_v1 = vpop.eup %5236  ;;  %v2209_v36 = vmul.f32 1.442695, %v2133_v2  ;;  %v2090_v3 = vpop.xlane.xlu1 %2089  ;;  %v2427_v38 = vpack.c.bf16 %v2387_v12, %v2387_v12  ;;  %v2316_v63 = vsel %vm1976_vm2, %v6252_v35, 0.0 }
 0x245   :  { %v2388_v8 = vmul.f32 %v5237_v1, %v6021_v13  ;;  %v2134_v55 = vsub.f32 %v6048_v47, %v2090_v3  ;;  %v2261_v22 = vpop.xlane.xlu0 %2260  ;;  %2317 = vadd.xlane.f32.xlu1 %v2316_v63 }
 0x246   :  { %5246 = vpow2.f32 %v2209_v36  ;;  %4967 = vmatmul.mubr.msk.bf16.vlgmr.msra.gmra.mrb[100].mxu0 %vm2497_vm4, %v2427_v38  ;;  %v3239_v38 = vsel %vm2501_vm3, %v2473_v54, 0 }
 0x247   :  { %v2211_v37 = vmul.f32 1.442695, %v2134_v55  ;;  %5248 = vrcp.f32 %v2261_v22  ;;  %v2428_v16 = vpack.c.bf16 %v2388_v8, %v2388_v8  ;;  %4977 = vmatpush3.bf16.msra.mxu0 %v3055_v29  ;;  %4978 = vmatprep.mubr.msk.bf16.mxu0 %vm5307_vm1, %v5306_v0 }
 0x248   :  { %v6269_v50 = vpop.eup %5238  ;;  %v2264_v21 = vpop.xlane.xlu1 %2263  ;;  %4988 = vmatprep.subr.bf16.mxu0 %v5306_v0 }
 0x249   :  { %v5241_v13 = vpop.eup %5240  ;;  %5250 = vpow2.f32 %v2211_v37  ;;  %4973 = vmatmul.mubr.msk.bf16.vlgmr.msra.gmra.mrb[100].mxu1 %vm2497_vm4, %v2428_v16  ;;  %v2093_v47 = vpop.xlane.xlu0 %2092  ;;  %v2319_v18 = vsel %vm1976_vm2, %v6269_v50, 0.0  ;;  %v2475_v37 = vld [vmem:[%s6698_s2 + $0x24] sm:$0x3] }
 0x24a   :  { %v2389_v52 = vmul.f32 %v5241_v13, %v6039_v43  ;;  %5252 = vrcp.f32 %v2264_v21  ;;  %v2135_v42 = vsub.f32 %v6057_v39, %v2093_v47  ;;  %2320 = vadd.xlane.f32.xlu0 %v2319_v18  ;;  %4983 = vmatpush3.bf16.msra.mxu1 %v3101_v28  ;;  %v3147_v43 = vsel %vm2501_vm3, %v2471_v60, 0  ;;  %v2472_v39 = vld [vmem:[%s6698_s2 + $0x1e] sm:$0x3] }
 0x24b   :  { %v6280_v30 = vpop.eup %5242  ;;  %4984 = vmatprep.mubr.msk.bf16.mxu1 %vm5307_vm1, %v5306_v0  ;;  %4994 = vmatprep.subr.bf16.mxu1 %v5306_v0  ;;  %v3193_v56 = vsel %vm2501_vm3, %v2472_v39, 0  ;;  %v3331_v60 = vsel %vm2501_vm3, %v2475_v37, 0 }
 0x24c   :  { %v5245_v31 = vpop.eup %5244  ;;  %v2213_v24 = vmul.f32 1.442695, %v2135_v42  ;;  %v2096_v44 = vpop.xlane.xlu1 %2095  ;;  %v2429_v7 = vpack.c.bf16 %v2389_v52, %v2389_v52  ;;  %v2322_v57 = vsel %vm1976_vm2, %v6280_v30, 0.0 }
 0x24d   :  { %v2390_v51 = vmul.f32 %v5245_v31, %v6041_v15  ;;  %v2136_v19 = vsub.f32 %v6068_v11, %v2096_v44  ;;  %v2267_v49 = vpop.xlane.xlu0 %2266  ;;  %2323 = vadd.xlane.f32.xlu1 %v2322_v57 }
 0x24e   :  { %5254 = vpow2.f32 %v2213_v24  ;;  %4979 = vmatmul.mubr.msk.bf16.vlgmr.msra.gmra.mrb[104].mxu0 %vm2497_vm4, %v2429_v7 }
 0x24f   :  { %v2215_v40 = vmul.f32 1.442695, %v2136_v19  ;;  %5256 = vrcp.f32 %v2267_v49  ;;  %v2430_v6 = vpack.c.bf16 %v2390_v51, %v2390_v51  ;;  %4989 = vmatpush3.bf16.msra.mxu0 %v3147_v43  ;;  %4990 = vmatprep.mubr.msk.bf16.mxu0 %vm5307_vm1, %v5306_v0 }
 0x250   :  { %v6297_v48 = vpop.eup %5246  ;;  %v2270_v14 = vpop.xlane.xlu1 %2269  ;;  %5000 = vmatprep.subr.bf16.mxu0 %v5306_v0 }
 0x251   :  { %v5249_v15 = vpop.eup %5248  ;;  %5258 = vpow2.f32 %v2215_v40  ;;  %4985 = vmatmul.mubr.msk.bf16.vlgmr.msra.gmra.mrb[104].mxu1 %vm2497_vm4, %v2430_v6  ;;  %v2325_v11 = vsel %vm1976_vm2, %v6297_v48, 0.0 }
 0x252   :  { %v2391_v61 = vmul.f32 %v5249_v15, %v6059_v59  ;;  %5260 = vrcp.f32 %v2270_v14  ;;  %2326 = vadd.xlane.f32.xlu0 %v2325_v11  ;;  %4995 = vmatpush3.bf16.msra.mxu1 %v3193_v56  ;;  %v2474_v59 = vld [vmem:[%s6698_s2 + $0x22] sm:$0x3]  ;;  %v2479_v15 = vld [vmem:[%s6698_s2 + $0x2c] sm:$0x3] }
 0x253   :  { %v6307_v12 = vpop.eup %5250  ;;  %4996 = vmatprep.mubr.msk.bf16.mxu1 %vm5307_vm1, %v5306_v0  ;;  %5006 = vmatprep.subr.bf16.mxu1 %v5306_v0  ;;  %v3285_v8 = vsel %vm2501_vm3, %v2474_v59, 0 }
 0x254   :  { %v5253_v2 = vpop.eup %5252  ;;  %v2276_v1 = vpop.xlane.xlu1 %2275  ;;  %v2431_v36 = vpack.c.bf16 %v2391_v61, %v2391_v61  ;;  %v2328_v3 = vsel %vm1976_vm2, %v6307_v12, 0.0  ;;  %v3515_v61 = vsel %vm2501_vm3, %v2479_v15, 0  ;;  %v2488_v15 = vld [vmem:[%s6698_s2 + $0x3e] sm:$0x3] }
 0x255   :  { %v2392_v63 = vmul.f32 %v5253_v2, %v6061_v4  ;;  %5262 = vrcp.f32 %v2276_v1  ;;  %v2273_v29 = vpop.xlane.xlu0 %2272  ;;  %2329 = vadd.xlane.f32.xlu1 %v2328_v3 }
 0x256   :  { %4991 = vmatmul.mubr.msk.bf16.vlgmr.msra.gmra.mrb[108].mxu0 %vm2497_vm4, %v2431_v36  ;;  %5264 = vrcp.f32 %v2273_v29 }
 0x257   :  { %v2432_v25 = vpack.c.bf16 %v2392_v63, %v2392_v63  ;;  %5001 = vmatpush3.bf16.msra.mxu0 %v3239_v38  ;;  %5002 = vmatprep.mubr.msk.bf16.mxu0 %vm5307_vm1, %v5306_v0  ;;  %v2481_v38 = vld [vmem:[%s6698_s2 + $0x30] sm:$0x3] }
 0x258   :  { %v6323_v55 = vpop.eup %5254  ;;  %5012 = vmatprep.subr.bf16.mxu0 %v5306_v0  ;;  %v3607_v29 = vsel %vm2501_vm3, %v2481_v38, 0  ;;  %v2490_v38 = vld [vmem:[%s6698_s2 + $0x42] sm:$0x3] }
 0x259   :  { %v5257_v22 = vpop.eup %5256  ;;  %4997 = vmatmul.mubr.msk.bf16.vlgmr.msra.gmra.mrb[108].mxu1 %vm2497_vm4, %v2432_v25  ;;  %v2331_v4 = vsel %vm1976_vm2, %v6323_v55, 0.0 }
 0x25a   :  { %v2393_v16 = vmul.f32 %v5257_v22, %v6076_v53  ;;  %2332 = vadd.xlane.f32.xlu0 %v2331_v4  ;;  %5007 = vmatpush3.bf16.msra.mxu1 %v3285_v8  ;;  %v2476_v53 = vld [vmem:[%s6698_s2 + $0x26] sm:$0x3] }
 0x25b   :  { %v6333_v28 = vpop.eup %5258  ;;  %5008 = vmatprep.mubr.msk.bf16.mxu1 %vm5307_vm1, %v5306_v0  ;;  %5018 = vmatprep.subr.bf16.mxu1 %v5306_v0  ;;  %v3377_v44 = vsel %vm2501_vm3, %v2476_v53, 0  ;;  %v2484_v53 = vld [vmem:[%s6698_s2 + $0x36] sm:$0x3] }
 0x25c   :  { %v5261_v21 = vpop.eup %5260  ;;  %v2282_v13 = vpop.xlane.xlu1 %2281  ;;  %v2433_v47 = vpack.c.bf16 %v2393_v16, %v2393_v16  ;;  %v2334_v18 = vsel %vm1976_vm2, %v6333_v28, 0.0  ;;  %v2483_v16 = vld [vmem:[%s6698_s2 + $0x34] sm:$0x3] }
 0x25d   :  { %v2394_v52 = vmul.f32 %v5261_v21, %v6078_v20  ;;  %5266 = vrcp.f32 %v2282_v13  ;;  %v2279_v42 = vpop.xlane.xlu0 %2278  ;;  %2335 = vadd.xlane.f32.xlu1 %v2334_v18  ;;  %v2477_v20 = vld [vmem:[%s6698_s2 + $0x28] sm:$0x3]  ;;  %v3699_v18 = vsel %vm2501_vm3, %v2483_v16, 0 }
 0x25e   :  { %5003 = vmatmul.mubr.msk.bf16.vlgmr.msra.gmra.mrb[112].mxu0 %vm2497_vm4, %v2433_v47  ;;  %5268 = vrcp.f32 %v2279_v42  ;;  %v3423_v19 = vsel %vm2501_vm3, %v2477_v20, 0 }
 0x25f   :  { %v5263_v31 = vpop.eup %5262  ;;  %v2434_v24 = vpack.c.bf16 %v2394_v52, %v2394_v52  ;;  %5013 = vmatpush3.bf16.msra.mxu0 %v3331_v60  ;;  %5014 = vmatprep.mubr.msk.bf16.mxu0 %vm5307_vm1, %v5306_v0 }
 0x260   :  { %v5265_v7 = vpop.eup %5264  ;;  %5024 = vmatprep.subr.bf16.mxu0 %v5306_v0  ;;  %v2396_v43 = vmul.f32 %v5263_v31, %v6086_v41  ;;  %v3745_v31 = vsel %vm2501_vm3, %v2484_v53, 0 }
 0x261   :  { %v2395_v57 = vmul.f32 %v5265_v7, %v6088_v33  ;;  %5009 = vmatmul.mubr.msk.bf16.vlgmr.msra.gmra.mrb[112].mxu1 %vm2497_vm4, %v2434_v24  ;;  %v2478_v33 = vld [vmem:[%s6698_s2 + $0x2a] sm:$0x3] }
 0x262   :  { %5019 = vmatpush3.bf16.msra.mxu1 %v3377_v44  ;;  %5020 = vmatprep.mubr.msk.bf16.mxu1 %vm5307_vm1, %v5306_v0  ;;  %v2436_v6 = vpack.c.bf16 %v2396_v43, %v2396_v43  ;;  %v3469_v41 = vsel %vm2501_vm3, %v2478_v33, 0  ;;  %v2485_v44 = vld [vmem:[%s6698_s2 + $0x38] sm:$0x3] }
 0x263   :  { %v2435_v39 = vpack.c.bf16 %v2395_v57, %v2395_v57  ;;  %5030 = vmatprep.subr.bf16.mxu1 %v5306_v0  ;;  %v3791_v20 = vsel %vm2501_vm3, %v2485_v44, 0 }
 0x264   :  { %v2288_v51 = vpop.xlane.xlu1 %2287 }
 0x265   :  { %5270 = vrcp.f32 %v2288_v51  ;;  %v2285_v49 = vpop.xlane.xlu0 %2284 }
 0x266   :  { %5015 = vmatmul.mubr.msk.bf16.vlgmr.msra.gmra.mrb[116].mxu0 %vm2497_vm4, %v2435_v39  ;;  %5272 = vrcp.f32 %v2285_v49  ;;  %v2486_v39 = vld [vmem:[%s6698_s2 + $0x3a] sm:$0x3] }
 0x267   :  { %v5267_v40 = vpop.eup %5266  ;;  %5025 = vmatpush3.bf16.msra.mxu0 %v3423_v19  ;;  %5026 = vmatprep.mubr.msk.bf16.mxu0 %vm5307_vm1, %v5306_v0  ;;  %v3837_v33 = vsel %vm2501_vm3, %v2486_v39, 0 }
 0x268   :  { %v5269_v56 = vpop.eup %5268  ;;  %5036 = vmatprep.subr.bf16.mxu0 %v5306_v0  ;;  %v2398_v11 = vmul.f32 %v5267_v40, %v6096_v9 }
 0x269   :  { %v2397_v14 = vmul.f32 %v5269_v56, %v6098_v10  ;;  %5021 = vmatmul.mubr.msk.bf16.vlgmr.msra.gmra.mrb[116].mxu1 %vm2497_vm4, %v2436_v6  ;;  %v2480_v10 = vld [vmem:[%s6698_s2 + $0x2e] sm:$0x3] }
 0x26a   :  { %5031 = vmatpush3.bf16.msra.mxu1 %v3469_v41  ;;  %5032 = vmatprep.mubr.msk.bf16.mxu1 %vm5307_vm1, %v5306_v0  ;;  %v2438_v1 = vpack.c.bf16 %v2398_v11, %v2398_v11  ;;  %v3561_v36 = vsel %vm2501_vm3, %v2480_v10, 0 }
 0x26b   :  { %v2437_v54 = vpack.c.bf16 %v2397_v14, %v2397_v14  ;;  %5042 = vmatprep.subr.bf16.mxu1 %v5306_v0 }
 0x26e   :  { %5027 = vmatmul.mubr.msk.bf16.vlgmr.msra.gmra.mrb[120].mxu0 %vm2497_vm4, %v2437_v54 }
 0x26f   :  { %v5271_v2 = vpop.eup %5270  ;;  %5037 = vmatpush3.bf16.msra.mxu0 %v3515_v61  ;;  %5038 = vmatprep.mubr.msk.bf16.mxu0 %vm5307_vm1, %v5306_v0  ;;  %v3929_v61 = vsel %vm2501_vm3, %v2488_v15, 0 }
 0x270   :  { %v5273_v9 = vpop.eup %5272  ;;  %5048 = vmatprep.subr.bf16.mxu0 %v5306_v0  ;;  %v2400_v59 = vmul.f32 %v5271_v2, %v6104_v26 }
 0x271   :  { %v2399_v3 = vmul.f32 %v5273_v9, %v6106_v45  ;;  %5033 = vmatmul.mubr.msk.bf16.vlgmr.msra.gmra.mrb[120].mxu1 %vm2497_vm4, %v2438_v1  ;;  %v2482_v45 = vld [vmem:[%s6698_s2 + $0x32] sm:$0x3] }
 0x272   :  { %5043 = vmatpush3.bf16.msra.mxu1 %v3561_v36  ;;  %5044 = vmatprep.mubr.msk.bf16.mxu1 %vm5307_vm1, %v5306_v0  ;;  %v2440_v25 = vpack.c.bf16 %v2400_v59, %v2400_v59  ;;  %v3653_v8 = vsel %vm2501_vm3, %v2482_v45, 0 }
 0x273   :  { %v2439_v63 = vpack.c.bf16 %v2399_v3, %v2399_v3  ;;  %5054 = vmatprep.subr.bf16.mxu1 %v5306_v0 }
 0x276   :  { %5039 = vmatmul.mubr.msk.bf16.vlgmr.msra.gmra.mrb[124].mxu0 %vm2497_vm4, %v2439_v63 }
 0x277   :  { %5049 = vmatpush3.bf16.msra.mxu0 %v3607_v29  ;;  %5050 = vmatprep.mubr.msk.bf16.mxu0 %vm5307_vm1, %v5306_v0  ;;  %v4021_v29 = vsel %vm2501_vm3, %v2490_v38, 0 }
 0x278   :  { %5060 = vmatprep.subr.bf16.mxu0 %v5306_v0 }
 0x279   :  { %5045 = vmatmul.mubr.msk.bf16.vlgmr.msra.gmra.mrb[124].mxu1 %vm2497_vm4, %v2440_v25 }
 0x27a   :  { %5055 = vmatpush3.bf16.msra.mxu1 %v3653_v8  ;;  %5056 = vmatprep.mubr.msk.bf16.mxu1 %vm5307_vm1, %v5306_v0 }
 0x27b   :  { %5066 = vmatprep.subr.bf16.mxu1 %v5306_v0 }
 0x2ae   :  { %v2291_v26 = vpop.xlane.xlu0 %2290 }
 0x2af   :  { %5274 = vrcp.f32 %v2291_v26 }
 0x2b2   :  { %v2294_v22 = vpop.xlane.xlu1 %2293 }
 0x2b3   :  { %5276 = vrcp.f32 %v2294_v22 }
 0x2b6   :  { %v2297_v4 = vpop.xlane.xlu0 %2296 }
 0x2b7   :  { %5278 = vrcp.f32 %v2297_v4 }
 0x2b9   :  { %v5275_v37 = vpop.eup %5274 }
 0x2ba   :  { %v2401_v21 = vmul.f32 %v5275_v37, %v6130_v17  ;;  %v2300_v13 = vpop.xlane.xlu1 %2299  ;;  %v2492_v37 = vld [vmem:[%s6698_s2 + $0x46] sm:$0x3] }
 0x2bb   :  { %5280 = vrcp.f32 %v2300_v13  ;;  %v4113_v13 = vsel %vm2501_vm3, %v2492_v37, 0 }
 0x2bc   :  { %v2441_v47 = vpack.c.bf16 %v2401_v21, %v2401_v21 }
 0x2bd   :  { %v5277_v60 = vpop.eup %5276 }
 0x2be   :  { %v2402_v52 = vmul.f32 %v5277_v60, %v6143_v58  ;;  %5051 = vmatmul.mubr.msk.bf16.vlgmr.msra.gmra.mrb[128].mxu0 %vm2497_vm4, %v2441_v47 }
 0x2bf   :  { %v2303_v42 = vpop.xlane.xlu0 %2302  ;;  %5061 = vmatpush3.bf16.msra.mxu0 %v3699_v18  ;;  %5062 = vmatprep.mubr.msk.bf16.mxu0 %vm5307_vm1, %v5306_v0 }
 0x2c0   :  { %5282 = vrcp.f32 %v2303_v42  ;;  %v2442_v17 = vpack.c.bf16 %v2402_v52, %v2402_v52  ;;  %5072 = vmatprep.subr.bf16.mxu0 %v5306_v0 }
 0x2c1   :  { %v5279_v24 = vpop.eup %5278 }
 0x2c2   :  { %v2403_v58 = vmul.f32 %v5279_v24, %v6156_v62  ;;  %5057 = vmatmul.mubr.msk.bf16.vlgmr.msra.gmra.mrb[128].mxu1 %vm2497_vm4, %v2442_v17  ;;  %v2306_v7 = vpop.xlane.xlu1 %2305  ;;  %v2494_v17 = vld [vmem:[%s6698_s2 + $0x4a] sm:$0x3] }
 0x2c3   :  { %5284 = vrcp.f32 %v2306_v7  ;;  %5067 = vmatpush3.bf16.msra.mxu1 %v3745_v31  ;;  %5068 = vmatprep.mubr.msk.bf16.mxu1 %vm5307_vm1, %v5306_v0  ;;  %v4205_v44 = vsel %vm2501_vm3, %v2494_v17, 0 }
 0x2c4   :  { %v2443_v57 = vpack.c.bf16 %v2403_v58, %v2403_v58  ;;  %5078 = vmatprep.subr.bf16.mxu1 %v5306_v0 }
 0x2c5   :  { %v5281_v43 = vpop.eup %5280 }
 0x2c6   :  { %v2404_v62 = vmul.f32 %v5281_v43, %v6170_v23  ;;  %5063 = vmatmul.mubr.msk.bf16.vlgmr.msra.gmra.mrb[132].mxu0 %vm2497_vm4, %v2443_v57  ;;  %v2487_v23 = vld [vmem:[%s6698_s2 + $0x3c] sm:$0x3] }
 0x2c7   :  { %v2309_v51 = vpop.xlane.xlu0 %2308  ;;  %5073 = vmatpush3.bf16.msra.mxu0 %v3791_v20  ;;  %5074 = vmatprep.mubr.msk.bf16.mxu0 %vm5307_vm1, %v5306_v0  ;;  %v3883_v14 = vsel %vm2501_vm3, %v2487_v23, 0 }
 0x2c8   :  { %5286 = vrcp.f32 %v2309_v51  ;;  %v2444_v19 = vpack.c.bf16 %v2404_v62, %v2404_v62  ;;  %5084 = vmatprep.subr.bf16.mxu0 %v5306_v0  ;;  %v2496_v62 = vld [vmem:[%s6698_s2 + $0x4e] sm:$0x3] }
 0x2ca   :  { %v5283_v49 = vpop.eup %5282  ;;  %5069 = vmatmul.mubr.msk.bf16.vlgmr.msra.gmra.mrb[132].mxu1 %vm2497_vm4, %v2444_v19  ;;  %v2312_v40 = vpop.xlane.xlu1 %2311 }
 0x2cb   :  { %v2405_v6 = vmul.f32 %v5283_v49, %v6186_v32  ;;  %5288 = vrcp.f32 %v2312_v40  ;;  %5079 = vmatpush3.bf16.msra.mxu1 %v3837_v33  ;;  %5080 = vmatprep.mubr.msk.bf16.mxu1 %vm5307_vm1, %v5306_v0  ;;  %v4297_v40 = vsel %vm2501_vm3, %v2496_v62, 0 }
 0x2cc   :  { %5090 = vmatprep.subr.bf16.mxu1 %v5306_v0 }
 0x2cd   :  { %v5285_v41 = vpop.eup %5284  ;;  %v2445_v56 = vpack.c.bf16 %v2405_v6, %v2405_v6 }
 0x2ce   :  { %v2406_v11 = vmul.f32 %v5285_v41, %v6196_v5  ;;  %v2489_v5 = vld [vmem:[%s6698_s2 + $0x40] sm:$0x3] }
 0x2cf   :  { %5075 = vmatmul.mubr.msk.bf16.vlgmr.msra.gmra.mrb[136].mxu0 %vm2497_vm4, %v2445_v56  ;;  %v2315_v32 = vpop.xlane.xlu0 %2314  ;;  %v3975_v3 = vsel %vm2501_vm3, %v2489_v5, 0 }
 0x2d0   :  { %5290 = vrcp.f32 %v2315_v32  ;;  %v2446_v54 = vpack.c.bf16 %v2406_v11, %v2406_v11  ;;  %5085 = vmatpush3.bf16.msra.mxu0 %v3883_v14  ;;  %5086 = vmatprep.mubr.msk.bf16.mxu0 %vm5307_vm1, %v5306_v0 }
 0x2d1   :  { %5096 = vmatprep.subr.bf16.mxu0 %v5306_v0 }
 0x2d2   :  { %v5287_v10 = vpop.eup %5286  ;;  %5081 = vmatmul.mubr.msk.bf16.vlgmr.msra.gmra.mrb[136].mxu1 %vm2497_vm4, %v2446_v54  ;;  %v2318_v2 = vpop.xlane.xlu1 %2317 }
 0x2d3   :  { %v2407_v1 = vmul.f32 %v5287_v10, %v6213_v27  ;;  %5292 = vrcp.f32 %v2318_v2  ;;  %5091 = vmatpush3.bf16.msra.mxu1 %v3929_v61  ;;  %5092 = vmatprep.mubr.msk.bf16.mxu1 %vm5307_vm1, %v5306_v0 }
 0x2d4   :  { %5102 = vmatprep.subr.bf16.mxu1 %v5306_v0 }
 0x2d5   :  { %v5289_v36 = vpop.eup %5288  ;;  %v2447_v9 = vpack.c.bf16 %v2407_v1, %v2407_v1 }
 0x2d6   :  { %v2408_v59 = vmul.f32 %v5289_v36, %v6224_v46  ;;  %v2491_v46 = vld [vmem:[%s6698_s2 + $0x44] sm:$0x3] }
 0x2d7   :  { %5087 = vmatmul.mubr.msk.bf16.vlgmr.msra.gmra.mrb[140].mxu0 %vm2497_vm4, %v2447_v9  ;;  %v2321_v27 = vpop.xlane.xlu0 %2320  ;;  %v4067_v4 = vsel %vm2501_vm3, %v2491_v46, 0 }
 0x2d8   :  { %5294 = vrcp.f32 %v2321_v27  ;;  %v2448_v63 = vpack.c.bf16 %v2408_v59, %v2408_v59  ;;  %5097 = vmatpush3.bf16.msra.mxu0 %v3975_v3  ;;  %5098 = vmatprep.mubr.msk.bf16.mxu0 %vm5307_vm1, %v5306_v0 }
 0x2d9   :  { %5108 = vmatprep.subr.bf16.mxu0 %v5306_v0 }
 0x2da   :  { %v5291_v45 = vpop.eup %5290  ;;  %5093 = vmatmul.mubr.msk.bf16.vlgmr.msra.gmra.mrb[140].mxu1 %vm2497_vm4, %v2448_v63  ;;  %v2324_v25 = vpop.xlane.xlu1 %2323 }
 0x2db   :  { %v2409_v8 = vmul.f32 %v5291_v45, %v6241_v34  ;;  %5296 = vrcp.f32 %v2324_v25  ;;  %5103 = vmatpush3.bf16.msra.mxu1 %v4021_v29  ;;  %5104 = vmatprep.mubr.msk.bf16.mxu1 %vm5307_vm1, %v5306_v0 }
 0x2dc   :  { %5114 = vmatprep.subr.bf16.mxu1 %v5306_v0 }
 0x2dd   :  { %v5293_v26 = vpop.eup %5292  ;;  %v2449_v22 = vpack.c.bf16 %v2409_v8, %v2409_v8 }
 0x2de   :  { %v2410_v16 = vmul.f32 %v5293_v26, %v6252_v35  ;;  %v2493_v35 = vld [vmem:[%s6698_s2 + $0x48] sm:$0x3] }
 0x2df   :  { %5099 = vmatmul.mubr.msk.bf16.vlgmr.msra.gmra.mrb[144].mxu0 %vm2497_vm4, %v2449_v22  ;;  %v2327_v34 = vpop.xlane.xlu0 %2326  ;;  %v4159_v42 = vsel %vm2501_vm3, %v2493_v35, 0 }
 0x2e0   :  { %5298 = vrcp.f32 %v2327_v34  ;;  %v2450_v21 = vpack.c.bf16 %v2410_v16, %v2410_v16  ;;  %5109 = vmatpush3.bf16.msra.mxu0 %v4067_v4  ;;  %5110 = vmatprep.mubr.msk.bf16.mxu0 %vm5307_vm1, %v5306_v0 }
 0x2e1   :  { %5120 = vmatprep.subr.bf16.mxu0 %v5306_v0 }
 0x2e2   :  { %v5295_v47 = vpop.eup %5294  ;;  %5105 = vmatmul.mubr.msk.bf16.vlgmr.msra.gmra.mrb[144].mxu1 %vm2497_vm4, %v2450_v21  ;;  %v2330_v18 = vpop.xlane.xlu1 %2329 }
 0x2e3   :  { %v2411_v60 = vmul.f32 %v5295_v47, %v6269_v50  ;;  %5300 = vrcp.f32 %v2330_v18  ;;  %5115 = vmatpush3.bf16.msra.mxu1 %v4113_v13  ;;  %5116 = vmatprep.mubr.msk.bf16.mxu1 %vm5307_vm1, %v5306_v0 }
 0x2e4   :  { %5126 = vmatprep.subr.bf16.mxu1 %v5306_v0 }
 0x2e5   :  { %v5297_v53 = vpop.eup %5296  ;;  %v2451_v52 = vpack.c.bf16 %v2411_v60, %v2411_v60 }
 0x2e6   :  { %v2412_v31 = vmul.f32 %v5297_v53, %v6280_v30  ;;  %v2495_v30 = vld [vmem:[%s6698_s2 + $0x4c] sm:$0x3] }
 0x2e7   :  { %5111 = vmatmul.mubr.msk.bf16.vlgmr.msra.gmra.mrb[148].mxu0 %vm2497_vm4, %v2451_v52  ;;  %v2333_v50 = vpop.xlane.xlu0 %2332  ;;  %v4251_v39 = vsel %vm2501_vm3, %v2495_v30, 0 }
 0x2e8   :  { %5302 = vrcp.f32 %v2333_v50  ;;  %v2452_v24 = vpack.c.bf16 %v2412_v31, %v2412_v31  ;;  %5121 = vmatpush3.bf16.msra.mxu0 %v4159_v42  ;;  %5122 = vmatprep.mubr.msk.bf16.mxu0 %vm5307_vm1, %v5306_v0 }
 0x2e9   :  { %5132 = vmatprep.subr.bf16.mxu0 %v5306_v0 }
 0x2ea   :  { %v5299_v58 = vpop.eup %5298  ;;  %5117 = vmatmul.mubr.msk.bf16.vlgmr.msra.gmra.mrb[148].mxu1 %vm2497_vm4, %v2452_v24  ;;  %v2336_v7 = vpop.xlane.xlu1 %2335 }
 0x2eb   :  { %v2413_v57 = vmul.f32 %v5299_v58, %v6297_v48  ;;  %5304 = vrcp.f32 %v2336_v7  ;;  %5127 = vmatpush3.bf16.msra.mxu1 %v4205_v44  ;;  %5128 = vmatprep.mubr.msk.bf16.mxu1 %vm5307_vm1, %v5306_v0 }
 0x2ec   :  { %5138 = vmatprep.subr.bf16.mxu1 %v5306_v0 }
 0x2ed   :  { %v5301_v20 = vpop.eup %5300  ;;  %v2453_v43 = vpack.c.bf16 %v2413_v57, %v2413_v57 }
 0x2ee   :  { %v2414_v51 = vmul.f32 %v5301_v20, %v6307_v12 }
 0x2ef   :  { %5123 = vmatmul.mubr.msk.bf16.vlgmr.msra.gmra.mrb[152].mxu0 %vm2497_vm4, %v2453_v43  ;;  %v2539_v48 = vpop.f32.mrb[80].mxu0 }
 0x2f0   :  { %v4339_v19 = vpack.c.bf16 %v2539_v48, %v2539_v48  ;;  %v4908_v33 = vpop.f32.mrb[81].mxu0  ;;  %v2454_v49 = vpack.c.bf16 %v2414_v51, %v2414_v51  ;;  %5133 = vmatpush3.bf16.msra.mxu0 %v4251_v39  ;;  %5134 = vmatprep.mubr.msk.bf16.mxu0 %vm5307_vm1, %v5306_v0 }
 0x2f1   :  { %v2542_v23 = vpop.f32.mrb[82].mxu0 }
 0x2f2   :  { %v5303_v6 = vpop.eup %5302  ;;  %4380 = vst.msk [vmem:[%s6699_s3] sm:$0x3] %vm4379_vm5, %v4339_v19  ;;  %v4909_v12 = vpop.f32.mrb[83].mxu0  ;;  %5129 = vmatmul.mubr.msk.bf16.vlgmr.msra.gmra.mrb[152].mxu1 %vm2497_vm4, %v2454_v49 }
 0x2f3   :  { %v2415_v41 = vmul.f32 %v5303_v6, %v6323_v55  ;;  %v2585_v56 = vpop.f32.mrb[80].mxu1  ;;  %5139 = vmatpush3.bf16.msra.mxu1 %v4297_v40  ;;  %5140 = vmatprep.mubr.msk.bf16.mxu1 %vm5307_vm1, %v5306_v0 }
 0x2f4   :  { %v4340_v14 = vpack.c.bf16 %v2585_v56, %v2585_v56  ;;  %v4914_v15 = vpop.f32.mrb[81].mxu1 }
 0x2f5   :  { %v5305_v11 = vpop.eup %5304  ;;  %v2455_v32 = vpack.c.bf16 %v2415_v41, %v2415_v41  ;;  %v2588_v54 = vpop.f32.mrb[82].mxu1 }
 0x2f6   :  { %v2416_v61 = vmul.f32 %v5305_v11, %v6333_v28  ;;  %4381 = vst.msk [vmem:[%s6699_s3 + $0x2] sm:$0x3] %vm4379_vm5, %v4340_v14  ;;  %v4915_v10 = vpop.f32.mrb[83].mxu1 }
 0x2f7   :  { %5135 = vmatmul.mubr.msk.bf16.vlgmr.msra.gmra.mrb[156].mxu0 %vm2497_vm4, %v2455_v32 }
 0x2f8   :  { %v2456_v55 = vpack.c.bf16 %v2416_v61, %v2416_v61  ;;  %v2631_v2 = vpop.f32.mrb[84].mxu0 }
 0x2f9   :  { %v4341_v5 = vpack.c.bf16 %v2631_v2, %v2631_v2  ;;  %v4920_v1 = vpop.f32.mrb[85].mxu0 }
 0x2fa   :  { %v2634_v0 = vpop.f32.mrb[86].mxu0  ;;  %5141 = vmatmul.mubr.msk.bf16.vlgmr.msra.gmra.mrb[156].mxu1 %vm2497_vm4, %v2456_v55 }
 0x2fb   :  { %4382 = vst.msk [vmem:[%s6699_s3 + $0x4] sm:$0x3] %vm4379_vm5, %v4341_v5  ;;  %v4921_v28 = vpop.f32.mrb[87].mxu0 }
 0x2fc   :  { %v2677_v36 = vpop.f32.mrb[84].mxu1 }
 0x2fd   :  { %v4342_v9 = vpack.c.bf16 %v2677_v36, %v2677_v36  ;;  %v4926_v3 = vpop.f32.mrb[85].mxu1 }
 0x2fe   :  { %v2680_v38 = vpop.f32.mrb[86].mxu1 }
 0x2ff   :  { %4383 = vst.msk [vmem:[%s6699_s3 + $0x6] sm:$0x3] %vm4379_vm5, %v4342_v9  ;;  %v4927_v59 = vpop.f32.mrb[87].mxu1 }
 0x300   :  { %v2723_v27 = vpop.f32.mrb[88].mxu0 }
 0x301   :  { %v4343_v63 = vpack.c.bf16 %v2723_v27, %v2723_v27  ;;  %v4932_v29 = vpop.f32.mrb[89].mxu0 }
 0x302   :  { %v2726_v45 = vpop.f32.mrb[90].mxu0 }
 0x303   :  { %4384 = vst.msk [vmem:[%s6699_s3 + $0x8] sm:$0x3] %vm4379_vm5, %v4343_v63  ;;  %v4933_v25 = vpop.f32.mrb[91].mxu0 }
 0x304   :  { %v2769_v46 = vpop.f32.mrb[88].mxu1 }
 0x305   :  { %v4344_v8 = vpack.c.bf16 %v2769_v46, %v2769_v46  ;;  %v4938_v26 = vpop.f32.mrb[89].mxu1 }
 0x306   :  { %v2772_v22 = vpop.f32.mrb[90].mxu1 }
 0x307   :  { %4385 = vst.msk [vmem:[%s6699_s3 + $0xa] sm:$0x3] %vm4379_vm5, %v4344_v8  ;;  %v4939_v4 = vpop.f32.mrb[91].mxu1 }
 0x309   :  { %v2815_v37 = vpop.f32.mrb[92].mxu0 }
 0x30a   :  { %v4345_v16 = vpack.c.bf16 %v2815_v37, %v2815_v37  ;;  %v4944_v34 = vpop.f32.mrb[93].mxu0 }
 0x30b   :  { %v2818_v21 = vpop.f32.mrb[94].mxu0 }
 0x30c   :  { %4386 = vst.msk [vmem:[%s6699_s3 + $0xc] sm:$0x3] %vm4379_vm5, %v4345_v16  ;;  %v4945_v13 = vpop.f32.mrb[95].mxu0  ;;  %v2861_v47 = vpop.f32.mrb[92].mxu1 }
 0x30d   :  { %v4346_v18 = vpack.c.bf16 %v2861_v47, %v2861_v47  ;;  %v4950_v35 = vpop.f32.mrb[93].mxu1 }
 0x30e   :  { %v2864_v60 = vpop.f32.mrb[94].mxu1 }
 0x30f   :  { %4387 = vst.msk [vmem:[%s6699_s3 + $0xe] sm:$0x3] %vm4379_vm5, %v4346_v18  ;;  %v4951_v53 = vpop.f32.mrb[95].mxu1 }
 0x311   :  { %v2907_v52 = vpop.f32.mrb[96].mxu0 }
 0x312   :  { %v4347_v42 = vpack.c.bf16 %v2907_v52, %v2907_v52  ;;  %v4956_v17 = vpop.f32.mrb[97].mxu0 }
 0x313   :  { %v2910_v31 = vpop.f32.mrb[98].mxu0 }
 0x314   :  { %4388 = vst.msk [vmem:[%s6699_s3 + $0x10] sm:$0x3] %vm4379_vm5, %v4347_v42  ;;  %v4957_v50 = vpop.f32.mrb[99].mxu0  ;;  %v2953_v24 = vpop.f32.mrb[96].mxu1 }
 0x315   :  { %v4348_v44 = vpack.c.bf16 %v2953_v24, %v2953_v24  ;;  %v4962_v58 = vpop.f32.mrb[97].mxu1 }
 0x316   :  { %v2956_v7 = vpop.f32.mrb[98].mxu1 }
 0x317   :  { %4389 = vst.msk [vmem:[%s6699_s3 + $0x12] sm:$0x3] %vm4379_vm5, %v4348_v44  ;;  %v4963_v30 = vpop.f32.mrb[99].mxu1 }
 0x319   :  { %v2999_v57 = vpop.f32.mrb[100].mxu0 }
 0x31a   :  { %v4349_v20 = vpack.c.bf16 %v2999_v57, %v2999_v57  ;;  %v4968_v43 = vpop.f32.mrb[101].mxu0 }
 0x31b   :  { %v3002_v39 = vpop.f32.mrb[102].mxu0 }
 0x31c   :  { %4390 = vst.msk [vmem:[%s6699_s3 + $0x14] sm:$0x3] %vm4379_vm5, %v4349_v20  ;;  %v4969_v62 = vpop.f32.mrb[103].mxu0  ;;  %v3045_v51 = vpop.f32.mrb[100].mxu1 }
 0x31d   :  { %v4350_v48 = vpack.c.bf16 %v3045_v51, %v3045_v51  ;;  %v4974_v19 = vpop.f32.mrb[101].mxu1 }
 0x31e   :  { %v3048_v33 = vpop.f32.mrb[102].mxu1 }
 0x31f   :  { %4391 = vst.msk [vmem:[%s6699_s3 + $0x16] sm:$0x3] %vm4379_vm5, %v4350_v48  ;;  %v4975_v49 = vpop.f32.mrb[103].mxu1 }
 0x321   :  { %v3091_v40 = vpop.f32.mrb[104].mxu0 }
 0x322   :  { %v4351_v23 = vpack.c.bf16 %v3091_v40, %v3091_v40  ;;  %v4980_v6 = vpop.f32.mrb[105].mxu0 }
 0x323   :  { %v3094_v12 = vpop.f32.mrb[106].mxu0 }
 0x324   :  { %4392 = vst.msk [vmem:[%s6699_s3 + $0x18] sm:$0x3] %vm4379_vm5, %v4351_v23  ;;  %v4981_v41 = vpop.f32.mrb[107].mxu0  ;;  %v3137_v56 = vpop.f32.mrb[104].mxu1 }
 0x325   :  { %v4352_v14 = vpack.c.bf16 %v3137_v56, %v3137_v56  ;;  %v4986_v15 = vpop.f32.mrb[105].mxu1 }
 0x326   :  { %v3140_v11 = vpop.f32.mrb[106].mxu1 }
 0x327   :  { %4393 = vst.msk [vmem:[%s6699_s3 + $0x1a] sm:$0x3] %vm4379_vm5, %v4352_v14  ;;  %v4987_v32 = vpop.f32.mrb[107].mxu1 }
 0x329   :  { %v3183_v54 = vpop.f32.mrb[108].mxu0 }
 0x32a   :  { %v4353_v61 = vpack.c.bf16 %v3183_v54, %v3183_v54  ;;  %v4992_v10 = vpop.f32.mrb[109].mxu0 }
 0x32b   :  { %v3186_v55 = vpop.f32.mrb[110].mxu0 }
 0x32c   :  { %4394 = vst.msk [vmem:[%s6699_s3 + $0x1c] sm:$0x3] %vm4379_vm5, %v4353_v61  ;;  %v4993_v2 = vpop.f32.mrb[111].mxu0  ;;  %v3229_v5 = vpop.f32.mrb[108].mxu1 }
 0x32d   :  { %v4354_v1 = vpack.c.bf16 %v3229_v5, %v3229_v5  ;;  %v4998_v0 = vpop.f32.mrb[109].mxu1 }
 0x32e   :  { %v3232_v28 = vpop.f32.mrb[110].mxu1 }
 0x32f   :  { %4395 = vst.msk [vmem:[%s6699_s3 + $0x1e] sm:$0x3] %vm4379_vm5, %v4354_v1  ;;  %v4999_v36 = vpop.f32.mrb[111].mxu1 }
 0x331   :  { %v3275_v9 = vpop.f32.mrb[112].mxu0 }
 0x332   :  { %v4355_v3 = vpack.c.bf16 %v3275_v9, %v3275_v9  ;;  %v5004_v38 = vpop.f32.mrb[113].mxu0 }
 0x333   :  { %v3278_v59 = vpop.f32.mrb[114].mxu0 }
 0x334   :  { %4396 = vst.msk [vmem:[%s6699_s3 + $0x20] sm:$0x3] %vm4379_vm5, %v4355_v3  ;;  %v5005_v27 = vpop.f32.mrb[115].mxu0  ;;  %v3321_v63 = vpop.f32.mrb[112].mxu1 }
 0x335   :  { %v4356_v29 = vpack.c.bf16 %v3321_v63, %v3321_v63  ;;  %v5010_v45 = vpop.f32.mrb[113].mxu1 }
 0x336   :  { %v3324_v25 = vpop.f32.mrb[114].mxu1 }
 0x337   :  { %4397 = vst.msk [vmem:[%s6699_s3 + $0x22] sm:$0x3] %vm4379_vm5, %v4356_v29  ;;  %v5011_v46 = vpop.f32.mrb[115].mxu1 }
 0x339   :  { %v3367_v8 = vpop.f32.mrb[116].mxu0 }
 0x33a   :  { %v4357_v26 = vpack.c.bf16 %v3367_v8, %v3367_v8  ;;  %v5016_v22 = vpop.f32.mrb[117].mxu0 }
 0x33b   :  { %v3370_v4 = vpop.f32.mrb[118].mxu0 }
 0x33c   :  { %4398 = vst.msk [vmem:[%s6699_s3 + $0x24] sm:$0x3] %vm4379_vm5, %v4357_v26  ;;  %v5017_v37 = vpop.f32.mrb[119].mxu0  ;;  %v3413_v16 = vpop.f32.mrb[116].mxu1 }
 0x33d   :  { %v4358_v34 = vpack.c.bf16 %v3413_v16, %v3413_v16  ;;  %v5022_v21 = vpop.f32.mrb[117].mxu1 }
 0x33e   :  { %v3416_v13 = vpop.f32.mrb[118].mxu1 }
 0x33f   :  { %4399 = vst.msk [vmem:[%s6699_s3 + $0x26] sm:$0x3] %vm4379_vm5, %v4358_v34  ;;  %v5023_v47 = vpop.f32.mrb[119].mxu1 }
 0x341   :  { %v3459_v18 = vpop.f32.mrb[120].mxu0 }
 0x342   :  { %v4359_v35 = vpack.c.bf16 %v3459_v18, %v3459_v18  ;;  %v5028_v60 = vpop.f32.mrb[121].mxu0 }
 0x343   :  { %v3462_v53 = vpop.f32.mrb[122].mxu0 }
 0x344   :  { %4400 = vst.msk [vmem:[%s6699_s3 + $0x28] sm:$0x3] %vm4379_vm5, %v4359_v35  ;;  %v5029_v52 = vpop.f32.mrb[123].mxu0  ;;  %v3505_v42 = vpop.f32.mrb[120].mxu1 }
 0x345   :  { %v4360_v17 = vpack.c.bf16 %v3505_v42, %v3505_v42  ;;  %v5034_v31 = vpop.f32.mrb[121].mxu1 }
 0x346   :  { %v3508_v50 = vpop.f32.mrb[122].mxu1 }
 0x347   :  { %4401 = vst.msk [vmem:[%s6699_s3 + $0x2a] sm:$0x3] %vm4379_vm5, %v4360_v17  ;;  %v5035_v24 = vpop.f32.mrb[123].mxu1 }
 0x349   :  { %v3551_v44 = vpop.f32.mrb[124].mxu0 }
 0x34a   :  { %v4361_v58 = vpack.c.bf16 %v3551_v44, %v3551_v44  ;;  %v5040_v7 = vpop.f32.mrb[125].mxu0 }
 0x34b   :  { %v3554_v30 = vpop.f32.mrb[126].mxu0 }
 0x34c   :  { %4402 = vst.msk [vmem:[%s6699_s3 + $0x2c] sm:$0x3] %vm4379_vm5, %v4361_v58  ;;  %v5041_v57 = vpop.f32.mrb[127].mxu0  ;;  %v3597_v20 = vpop.f32.mrb[124].mxu1 }
 0x34d   :  { %v4362_v43 = vpack.c.bf16 %v3597_v20, %v3597_v20  ;;  %v5046_v39 = vpop.f32.mrb[125].mxu1 }
 0x34e   :  { %v3600_v62 = vpop.f32.mrb[126].mxu1 }
 0x34f   :  { %4403 = vst.msk [vmem:[%s6699_s3 + $0x2e] sm:$0x3] %vm4379_vm5, %v4362_v43  ;;  %v5047_v51 = vpop.f32.mrb[127].mxu1 }
 0x391   :  { %v3643_v48 = vpop.f32.mrb[128].mxu0 }
 0x392   :  { %v4363_v19 = vpack.c.bf16 %v3643_v48, %v3643_v48  ;;  %v5052_v33 = vpop.f32.mrb[129].mxu0 }
 0x393   :  { %v3646_v49 = vpop.f32.mrb[130].mxu0 }
 0x394   :  { %4404 = vst.msk [vmem:[%s6699_s3 + $0x30] sm:$0x3] %vm4379_vm5, %v4363_v19  ;;  %v5053_v40 = vpop.f32.mrb[131].mxu0 }
 0x395   :  { %v3689_v23 = vpop.f32.mrb[128].mxu1 }
 0x396   :  { %v4364_v6 = vpack.c.bf16 %v3689_v23, %v3689_v23  ;;  %v5058_v12 = vpop.f32.mrb[129].mxu1 }
 0x397   :  { %v3692_v41 = vpop.f32.mrb[130].mxu1 }
 0x398   :  { %4405 = vst.msk [vmem:[%s6699_s3 + $0x32] sm:$0x3] %vm4379_vm5, %v4364_v6  ;;  %v5059_v56 = vpop.f32.mrb[131].mxu1 }
 0x399   :  { %v3735_v14 = vpop.f32.mrb[132].mxu0 }
 0x39a   :  { %v4365_v15 = vpack.c.bf16 %v3735_v14, %v3735_v14  ;;  %v5064_v11 = vpop.f32.mrb[133].mxu0 }
 0x39b   :  { %v3738_v32 = vpop.f32.mrb[134].mxu0 }
 0x39c   :  { %4406 = vst.msk [vmem:[%s6699_s3 + $0x34] sm:$0x3] %vm4379_vm5, %v4365_v15  ;;  %v5065_v54 = vpop.f32.mrb[135].mxu0 }
 0x39d   :  { %v3781_v61 = vpop.f32.mrb[132].mxu1 }
 0x39e   :  { %v4366_v10 = vpack.c.bf16 %v3781_v61, %v3781_v61  ;;  %v5070_v55 = vpop.f32.mrb[133].mxu1 }
 0x39f   :  { %v3784_v2 = vpop.f32.mrb[134].mxu1 }
 0x3a0   :  { %4407 = vst.msk [vmem:[%s6699_s3 + $0x36] sm:$0x3] %vm4379_vm5, %v4366_v10  ;;  %v5071_v5 = vpop.f32.mrb[135].mxu1 }
 0x3a2   :  { %v3827_v1 = vpop.f32.mrb[136].mxu0 }
 0x3a3   :  { %v4367_v0 = vpack.c.bf16 %v3827_v1, %v3827_v1  ;;  %v5076_v28 = vpop.f32.mrb[137].mxu0 }
 0x3a4   :  { %v3830_v36 = vpop.f32.mrb[138].mxu0 }
 0x3a5   :  { %4408 = vst.msk [vmem:[%s6699_s3 + $0x38] sm:$0x3] %vm4379_vm5, %v4367_v0  ;;  %v5077_v9 = vpop.f32.mrb[139].mxu0  ;;  %v3873_v3 = vpop.f32.mrb[136].mxu1 }
 0x3a6   :  { %v4368_v38 = vpack.c.bf16 %v3873_v3, %v3873_v3  ;;  %v5082_v59 = vpop.f32.mrb[137].mxu1 }
 0x3a7   :  { %v3876_v27 = vpop.f32.mrb[138].mxu1 }
 0x3a8   :  { %4409 = vst.msk [vmem:[%s6699_s3 + $0x3a] sm:$0x3] %vm4379_vm5, %v4368_v38  ;;  %v5083_v63 = vpop.f32.mrb[139].mxu1 }
 0x3aa   :  { %v3919_v29 = vpop.f32.mrb[140].mxu0 }
 0x3ab   :  { %v4369_v45 = vpack.c.bf16 %v3919_v29, %v3919_v29  ;;  %v5088_v25 = vpop.f32.mrb[141].mxu0 }
 0x3ac   :  { %v3922_v46 = vpop.f32.mrb[142].mxu0 }
 0x3ad   :  { %4410 = vst.msk [vmem:[%s6699_s3 + $0x3c] sm:$0x3] %vm4379_vm5, %v4369_v45  ;;  %v5089_v8 = vpop.f32.mrb[143].mxu0  ;;  %v3965_v26 = vpop.f32.mrb[140].mxu1 }
 0x3ae   :  { %v4370_v22 = vpack.c.bf16 %v3965_v26, %v3965_v26  ;;  %v5094_v4 = vpop.f32.mrb[141].mxu1 }
 0x3af   :  { %v3968_v37 = vpop.f32.mrb[142].mxu1 }
 0x3b0   :  { %4411 = vst.msk [vmem:[%s6699_s3 + $0x3e] sm:$0x3] %vm4379_vm5, %v4370_v22  ;;  %v5095_v16 = vpop.f32.mrb[143].mxu1 }
 0x3b2   :  { %v4011_v34 = vpop.f32.mrb[144].mxu0 }
 0x3b3   :  { %v4371_v21 = vpack.c.bf16 %v4011_v34, %v4011_v34  ;;  %v5100_v13 = vpop.f32.mrb[145].mxu0 }
 0x3b4   :  { %v4014_v47 = vpop.f32.mrb[146].mxu0 }
 0x3b5   :  { %4412 = vst.msk [vmem:[%s6699_s3 + $0x40] sm:$0x3] %vm4379_vm5, %v4371_v21  ;;  %v5101_v18 = vpop.f32.mrb[147].mxu0  ;;  %v4057_v35 = vpop.f32.mrb[144].mxu1 }
 0x3b6   :  { %v4372_v60 = vpack.c.bf16 %v4057_v35, %v4057_v35  ;;  %v5106_v53 = vpop.f32.mrb[145].mxu1 }
 0x3b7   :  { %v4060_v52 = vpop.f32.mrb[146].mxu1 }
 0x3b8   :  { %4413 = vst.msk [vmem:[%s6699_s3 + $0x42] sm:$0x3] %vm4379_vm5, %v4372_v60  ;;  %v5107_v42 = vpop.f32.mrb[147].mxu1 }
 0x3ba   :  { %v4103_v17 = vpop.f32.mrb[148].mxu0 }
 0x3bb   :  { %v4373_v31 = vpack.c.bf16 %v4103_v17, %v4103_v17  ;;  %v5112_v50 = vpop.f32.mrb[149].mxu0 }
 0x3bc   :  { %v4106_v24 = vpop.f32.mrb[150].mxu0 }
 0x3bd   :  { %4414 = vst.msk [vmem:[%s6699_s3 + $0x44] sm:$0x3] %vm4379_vm5, %v4373_v31  ;;  %v5113_v44 = vpop.f32.mrb[151].mxu0  ;;  %v4149_v58 = vpop.f32.mrb[148].mxu1 }
 0x3be   :  { %v4374_v7 = vpack.c.bf16 %v4149_v58, %v4149_v58  ;;  %v5118_v30 = vpop.f32.mrb[149].mxu1 }
 0x3bf   :  { %v4152_v57 = vpop.f32.mrb[150].mxu1 }
 0x3c0   :  { %4415 = vst.msk [vmem:[%s6699_s3 + $0x46] sm:$0x3] %vm4379_vm5, %v4374_v7  ;;  %v5119_v20 = vpop.f32.mrb[151].mxu1 }
 0x3c2   :  { %v4195_v43 = vpop.f32.mrb[152].mxu0 }
 0x3c3   :  { %v4375_v39 = vpack.c.bf16 %v4195_v43, %v4195_v43  ;;  %v5124_v62 = vpop.f32.mrb[153].mxu0 }
 0x3c4   :  { %v4198_v51 = vpop.f32.mrb[154].mxu0 }
 0x3c5   :  { %4416 = vst.msk [vmem:[%s6699_s3 + $0x48] sm:$0x3] %vm4379_vm5, %v4375_v39  ;;  %v5125_v48 = vpop.f32.mrb[155].mxu0  ;;  %v4241_v19 = vpop.f32.mrb[152].mxu1 }
 0x3c6   :  { %v4376_v33 = vpack.c.bf16 %v4241_v19, %v4241_v19  ;;  %v5130_v49 = vpop.f32.mrb[153].mxu1 }
 0x3c7   :  { %v4244_v40 = vpop.f32.mrb[154].mxu1 }
 0x3c8   :  { %4417 = vst.msk [vmem:[%s6699_s3 + $0x4a] sm:$0x3] %vm4379_vm5, %v4376_v33  ;;  %v5131_v23 = vpop.f32.mrb[155].mxu1 }
 0x3ca   :  { %v4287_v6 = vpop.f32.mrb[156].mxu0 }
 0x3cb   :  { %v4377_v12 = vpack.c.bf16 %v4287_v6, %v4287_v6  ;;  %v5136_v41 = vpop.f32.mrb[157].mxu0 }
 0x3cc   :  { %v4290_v56 = vpop.f32.mrb[158].mxu0 }
 0x3cd   :  { %4418 = vst.msk [vmem:[%s6699_s3 + $0x4c] sm:$0x3] %vm4379_vm5, %v4377_v12  ;;  %v5137_v14 = vpop.f32.mrb[159].mxu0  ;;  %v4333_v15 = vpop.f32.mrb[156].mxu1 }
 0x3ce   :  { %v4378_v11 = vpack.c.bf16 %v4333_v15, %v4333_v15  ;;  %v5142_v32 = vpop.f32.mrb[157].mxu1 }
 0x3cf   :  { %v4336_v54 = vpop.f32.mrb[158].mxu1 }
 0x3d0   :  { %4419 = vst.msk [vmem:[%s6699_s3 + $0x4e] sm:$0x3] %vm4379_vm5, %v4378_v11  ;;  %v5143_v61 = vpop.f32.mrb[159].mxu1 }

// kernel: carnet_forward.14
= control target key start
LH: loop header
LB: loop body
LE: loop exit
PB: predicated region body
PF: predicated region fallthrough
CT: control target
= control target key end

     0   :  { %v10564_v1 = vmov 0   ;;  %v8067_v2 = vmov 0.0   ;;  %s10558_s2 = inlined_call_operand.vmem [shape: bf16[128,512], index: 2, kind: input, shape index: {}]   ;;  %s10559_s3 = inlined_call_operand.vmem [shape: bf16[128,512], index: 3, kind: input, shape index: {}]   ;;  %s10560_s0 = inlined_call_operand.vmem [shape: f32[10,4,512], index: 0, kind: input, shape index: {}]   ;;  %s10561_s1 = inlined_call_operand.vmem [shape: f32[10,4,512], index: 1, kind: input, shape index: {}]   ;;  %s10562_s4 = inlined_call_operand.vmem [shape: f32[10,4,128], index: 4, kind: output, shape index: {0}]   ;;  %s10563_s5 = inlined_call_operand.vmem [shape: f32[10,4,128], index: 5, kind: output, shape index: {1}]  }
   0x1   :  { %v8101_v0 = vld [vmem:[%s10558_s2 + $0x4] ss:$16 sps:$4 sm:$0xff]   ;;  %252 = vmatprep.mubr.bf16.mxu0 %v10564_v1  ;;  %20 = vst [vmem:[#allocation2] sm:$0xf] %v8067_v2  ;;  %21 = vst [vmem:[#allocation2 + $0x4] sm:$0xf] %v8067_v2  ;;  %293 = vmatprep.mubr.bf16.mxu1 %v10564_v1 }
   0x2   :  { %22 = vst [vmem:[#allocation3] sm:$0xf] %v8067_v2  ;;  %23 = vst [vmem:[#allocation3 + $0x4] sm:$0xf] %v8067_v2  ;;  %v8108_v3 = vld [vmem:[%s10558_s2] ss:$16 sps:$4 sm:$0xff]   ;;  %220 = vmatprep.subr.bf16.mxu0 %v8101_v0 }
   0x3   :  { %v8114_v4 = vld [vmem:[%s10558_s2 + $0x24] ss:$16 sps:$4 sm:$0xff]   ;;  %221 = vmatpush1.bf16.msra.mxu0 %v8108_v3  ;;  %v8120_v5 = vld [vmem:[%s10558_s2 + $0x20] ss:$16 sps:$4 sm:$0xff]   ;;  %v8131_v7 = vld [vmem:[%s10558_s2 + $0xc] ss:$16 sps:$4 sm:$0xff]  }
   0x4   :  { %222 = vmatprep.subr.bf16.mxu0 %v8114_v4  ;;  %v8126_v6 = vld [vmem:[%s10558_s2 + $0x44] ss:$16 sps:$4 sm:$0xff]   ;;  %v8136_v8 = vld [vmem:[%s10558_s2 + $0x8] ss:$16 sps:$4 sm:$0xff]   ;;  %v8142_v9 = vld [vmem:[%s10558_s2 + $0x40] ss:$16 sps:$4 sm:$0xff]   ;;  %261 = vmatprep.subr.bf16.mxu1 %v8131_v7 }
   0x5   :  { %v8149_v10 = vld [vmem:[%s10558_s2 + $0x64] ss:$16 sps:$4 sm:$0xff]   ;;  %262 = vmatpush1.bf16.msra.mxu1 %v8136_v8  ;;  %v8155_v11 = vld [vmem:[%s10558_s2 + $0x2c] ss:$16 sps:$4 sm:$0xff]   ;;  %v8160_v12 = vld [vmem:[%s10558_s2 + $0x28] ss:$16 sps:$4 sm:$0xff]  }
   0x6   :  { %263 = vmatprep.subr.bf16.mxu1 %v8155_v11  ;;  %v8167_v13 = vld [vmem:[%s10558_s2 + $0x60] ss:$16 sps:$4 sm:$0xff]   ;;  %v8172_v14 = vld [vmem:[%s10558_s2 + $0x84] ss:$16 sps:$4 sm:$0xff]   ;;  %v8177_v15 = vld [vmem:[%s10558_s2 + $0x4c] ss:$16 sps:$4 sm:$0xff]  }
   0x7   :  { %223 = vmatpush1.bf16.msra.mxu0 %v8120_v5  ;;  %v8184_v16 = vld [vmem:[%s10558_s2 + $0x48] ss:$16 sps:$4 sm:$0xff]   ;;  %v8190_v17 = vld [vmem:[%s10558_s2 + $0x6c] ss:$16 sps:$4 sm:$0xff]   ;;  %v8196_v18 = vld [vmem:[%s10558_s2 + $0x80] ss:$16 sps:$4 sm:$0xff]  }
   0x8   :  { %224 = vmatprep.subr.bf16.mxu0 %v8126_v6  ;;  %v8202_v19 = vld [vmem:[%s10558_s2 + $0xa4] ss:$16 sps:$4 sm:$0xff]   ;;  %v8208_v20 = vld [vmem:[%s10558_s2 + $0x68] ss:$16 sps:$4 sm:$0xff]   ;;  %v8214_v21 = vld [vmem:[%s10558_s2 + $0x8c] ss:$16 sps:$4 sm:$0xff]  }
   0x9   :  { %264 = vmatpush1.bf16.msra.mxu1 %v8160_v12  ;;  %v8220_v22 = vld [vmem:[%s10558_s2 + $0xa0] ss:$16 sps:$4 sm:$0xff]   ;;  %v8225_v23 = vld [vmem:[%s10558_s2 + $0xc4] ss:$16 sps:$4 sm:$0xff]   ;;  %v8232_v24 = vld [vmem:[%s10558_s2 + $0x88] ss:$16 sps:$4 sm:$0xff]  }
   0xa   :  { %265 = vmatprep.subr.bf16.mxu1 %v8177_v15  ;;  %v8238_v25 = vld [vmem:[%s10558_s2 + $0xac] ss:$16 sps:$4 sm:$0xff]   ;;  %v8243_v26 = vld [vmem:[%s10558_s2 + $0xc0] ss:$16 sps:$4 sm:$0xff]   ;;  %v8249_v27 = vld [vmem:[%s10558_s2 + $0xe4] ss:$16 sps:$4 sm:$0xff]  }
   0xb   :  { %225 = vmatpush1.bf16.msra.mxu0 %v8142_v9  ;;  %v8256_v28 = vld [vmem:[%s10558_s2 + $0xa8] ss:$16 sps:$4 sm:$0xff]   ;;  %v8262_v29 = vld [vmem:[%s10558_s2 + $0xcc] ss:$16 sps:$4 sm:$0xff]   ;;  %v8267_v30 = vld [vmem:[%s10558_s2 + $0xe0] ss:$16 sps:$4 sm:$0xff]  }
   0xc   :  { %226 = vmatprep.subr.bf16.mxu0 %v8149_v10  ;;  %v26_v31 = vld [vmem:[#allocation2] sm:$0xf]  ;;  %v8273_v32 = vld [vmem:[%s10559_s3 + $0x4] ss:$16 sps:$4 sm:$0xff]   ;;  %v8280_v33 = vld [vmem:[%s10558_s2 + $0xc8] ss:$16 sps:$4 sm:$0xff]  }
   0xd   :  { %266 = vmatpush1.bf16.msra.mxu1 %v8184_v16  ;;  %v8286_v34 = vld [vmem:[%s10558_s2 + $0xec] ss:$16 sps:$4 sm:$0xff]   ;;  %v27_v35 = vpack.c.bf16 %v26_v31, %v26_v31  ;;  %v8291_v36 = vld [vmem:[%s10559_s3] ss:$16 sps:$4 sm:$0xff]   ;;  %v8297_v37 = vld [vmem:[%s10559_s3 + $0x24] ss:$16 sps:$4 sm:$0xff]  }
   0xe   :  { %267 = vmatprep.subr.bf16.mxu1 %v8190_v17  ;;  %v8304_v38 = vld [vmem:[%s10558_s2 + $0xe8] ss:$16 sps:$4 sm:$0xff]   ;;  %v8310_v39 = vld [vmem:[%s10559_s3 + $0xc] ss:$16 sps:$4 sm:$0xff]   ;;  %v8315_v40 = vld [vmem:[%s10559_s3 + $0x20] ss:$16 sps:$4 sm:$0xff]  }
   0xf   :  { %227 = vmatpush1.bf16.msra.mxu0 %v8167_v13  ;;  %v8321_v41 = vld [vmem:[%s10559_s3 + $0x44] ss:$16 sps:$4 sm:$0xff]   ;;  %v8329_v42 = vld [vmem:[%s10559_s3 + $0x8] ss:$16 sps:$4 sm:$0xff]   ;;  %v8335_v43 = vld [vmem:[%s10559_s3 + $0x2c] ss:$16 sps:$4 sm:$0xff]  }
  0x10   :  { %228 = vmatprep.subr.bf16.mxu0 %v8172_v14  ;;  %v8341_v44 = vld [vmem:[%s10559_s3 + $0x40] ss:$16 sps:$4 sm:$0xff]   ;;  %v8347_v45 = vld [vmem:[%s10559_s3 + $0x64] ss:$16 sps:$4 sm:$0xff]   ;;  %v8353_v46 = vld [vmem:[%s10559_s3 + $0x28] ss:$16 sps:$4 sm:$0xff]  }
  0x11   :  { %268 = vmatpush1.bf16.msra.mxu1 %v8208_v20  ;;  %v8358_v47 = vld [vmem:[%s10559_s3 + $0x60] ss:$16 sps:$4 sm:$0xff]   ;;  %v8364_v48 = vld [vmem:[%s10559_s3 + $0x4c] ss:$16 sps:$4 sm:$0xff]   ;;  %v8370_v49 = vld [vmem:[%s10559_s3 + $0x84] ss:$16 sps:$4 sm:$0xff]  }
  0x12   :  { %269 = vmatprep.subr.bf16.mxu1 %v8214_v21  ;;  %v8375_v50 = vld [vmem:[%s10559_s3 + $0x48] ss:$16 sps:$4 sm:$0xff]   ;;  %v8381_v51 = vld [vmem:[%s10559_s3 + $0x6c] ss:$16 sps:$4 sm:$0xff]   ;;  %v8388_v52 = vld [vmem:[%s10559_s3 + $0x80] ss:$16 sps:$4 sm:$0xff]  }
  0x13   :  { %229 = vmatpush1.bf16.msra.mxu0 %v8196_v18  ;;  %v8394_v53 = vld [vmem:[%s10559_s3 + $0xa4] ss:$16 sps:$4 sm:$0xff]   ;;  %v8399_v54 = vld [vmem:[%s10559_s3 + $0x68] ss:$16 sps:$4 sm:$0xff]   ;;  %v8405_v55 = vld [vmem:[%s10559_s3 + $0x8c] ss:$16 sps:$4 sm:$0xff]  }
  0x14   :  { %230 = vmatprep.subr.bf16.mxu0 %v8202_v19  ;;  %v8412_v56 = vld [vmem:[%s10559_s3 + $0xa0] ss:$16 sps:$4 sm:$0xff]   ;;  %v8418_v57 = vld [vmem:[%s10559_s3 + $0xc4] ss:$16 sps:$4 sm:$0xff]   ;;  %v8423_v58 = vld [vmem:[%s10559_s3 + $0x88] ss:$16 sps:$4 sm:$0xff]  }
  0x15   :  { %270 = vmatpush1.bf16.msra.mxu1 %v8232_v24  ;;  %10581 = vst [vmem:[#allocation4_spill] sm:$0xff] %v8412_v56  ;;  %10582 = vst [vmem:[#allocation5_spill] sm:$0xff] %v8418_v57  ;;  %v8429_v59 = vld [vmem:[%s10559_s3 + $0xac] ss:$16 sps:$4 sm:$0xff]   ;;  %v8436_v60 = vld [vmem:[%s10559_s3 + $0xc0] ss:$16 sps:$4 sm:$0xff]  }
  0x16   :  { %271 = vmatprep.subr.bf16.mxu1 %v8238_v25  ;;  %v8442_v61 = vld [vmem:[%s10559_s3 + $0xe4] ss:$16 sps:$4 sm:$0xff]   ;;  %v8447_v62 = vld [vmem:[%s10559_s3 + $0xa8] ss:$16 sps:$4 sm:$0xff]   ;;  %v8453_v63 = vld [vmem:[%s10559_s3 + $0xcc] ss:$16 sps:$4 sm:$0xff]  }
  0x17   :  { %231 = vmatpush1.bf16.msra.mxu0 %v8220_v22  ;;  %10583 = vst [vmem:[#allocation6_spill] sm:$0xff] %v8442_v61  ;;  %v8460_v2 = vld [vmem:[%s10559_s3 + $0xe0] ss:$16 sps:$4 sm:$0xff]   ;;  %v350_v31 = vld [vmem:[#allocation2 + $0x4] sm:$0xf] }
  0x18   :  { %232 = vmatprep.subr.bf16.mxu0 %v8225_v23 }
  0x19   :  { %272 = vmatpush1.bf16.msra.mxu1 %v8256_v28 }
  0x1a   :  { %273 = vmatprep.subr.bf16.mxu1 %v8262_v29 }
  0x1b   :  { %233 = vmatpush1.bf16.msra.mxu0 %v8243_v26 }
  0x1c   :  { %234 = vmatprep.subr.bf16.mxu0 %v8249_v27 }
  0x1d   :  { %274 = vmatpush1.bf16.msra.mxu1 %v8280_v33 }
  0x1e   :  { %275 = vmatprep.subr.bf16.mxu1 %v8286_v34 }
  0x1f   :  { %235 = vmatpush1.bf16.msra.mxu0 %v8267_v30 }
  0x20   :  { %544 = vmatprep.subr.bf16.mxu0 %v8273_v32 }
  0x21   :  { %276 = vmatpush1.bf16.msra.mxu1 %v8304_v38 }
  0x22   :  { %253 = vmatmul.mubr.bf16.vlgmr.msra.gmra.mrb[0].mxu0 %v27_v35  ;;  %585 = vmatprep.subr.bf16.mxu1 %v8310_v39 }
  0x23   :  { %545 = vmatpush1.bf16.msra.mxu0 %v8291_v36  ;;  %576 = vmatprep.mubr.bf16.mxu0 %v10564_v1 }
  0x24   :  { %546 = vmatprep.subr.bf16.mxu0 %v8297_v37  ;;  %294 = vmatmul.mubr.bf16.vlgmr.msra.gmra.mrb[0].mxu1 %v27_v35  ;;  %v8466_v35 = vld [vmem:[%s10559_s3 + $0xc8] ss:$16 sps:$4 sm:$0xff]  }
  0x25   :  { %586 = vmatpush1.bf16.msra.mxu1 %v8329_v42  ;;  %617 = vmatprep.mubr.bf16.mxu1 %v10564_v1  ;;  %v8472_v1 = vld [vmem:[%s10559_s3 + $0xec] ss:$16 sps:$4 sm:$0xff]  }
  0x26   :  { %587 = vmatprep.subr.bf16.mxu1 %v8335_v43 }
  0x27   :  { %547 = vmatpush1.bf16.msra.mxu0 %v8315_v40 }
  0x28   :  { %548 = vmatprep.subr.bf16.mxu0 %v8321_v41 }
  0x29   :  { %588 = vmatpush1.bf16.msra.mxu1 %v8353_v46 }
  0x2a   :  { %589 = vmatprep.subr.bf16.mxu1 %v8364_v48 }
  0x2b   :  { %549 = vmatpush1.bf16.msra.mxu0 %v8341_v44 }
  0x2c   :  { %550 = vmatprep.subr.bf16.mxu0 %v8347_v45 }
  0x2d   :  { %590 = vmatpush1.bf16.msra.mxu1 %v8375_v50 }
  0x2e   :  { %591 = vmatprep.subr.bf16.mxu1 %v8381_v51 }
  0x2f   :  { %551 = vmatpush1.bf16.msra.mxu0 %v8358_v47 }
  0x30   :  { %552 = vmatprep.subr.bf16.mxu0 %v8370_v49 }
  0x31   :  { %592 = vmatpush1.bf16.msra.mxu1 %v8399_v54 }
  0x32   :  { %593 = vmatprep.subr.bf16.mxu1 %v8405_v55 }
  0x33   :  { %553 = vmatpush1.bf16.msra.mxu0 %v8388_v52 }
  0x34   :  { %554 = vmatprep.subr.bf16.mxu0 %v8394_v53 }
  0x35   :  { %594 = vmatpush1.bf16.msra.mxu1 %v8423_v58 }
  0x36   :  { %595 = vmatprep.subr.bf16.mxu1 %v8429_v59 }
  0x37   :  { %555 = vmatpush1.bf16.msra.mxu0 %v8412_v56  ;;  %v8480_v56 = vld [vmem:[%s10559_s3 + $0xe8] ss:$16 sps:$4 sm:$0xff]  }
  0x38   :  { %556 = vmatprep.subr.bf16.mxu0 %v8418_v57  ;;  %v351_v57 = vpack.c.bf16 %v350_v31, %v350_v31 }
  0x39   :  { %596 = vmatpush1.bf16.msra.mxu1 %v8447_v62 }
  0x3a   :  { %597 = vmatprep.subr.bf16.mxu1 %v8453_v63 }
  0x3b   :  { %557 = vmatpush1.bf16.msra.mxu0 %v8436_v60 }
  0x3c   :  { %558 = vmatprep.subr.bf16.mxu0 %v8442_v61  ;;  %v10584_v61 = vmov 0  }
  0x3d   :  { %598 = vmatpush1.bf16.msra.mxu1 %v8466_v35 }
  0x3e   :  { %599 = vmatprep.subr.bf16.mxu1 %v8472_v1 }
  0x3f   :  { %559 = vmatpush1.bf16.msra.mxu0 %v8460_v2 }
  0x40   :  { %869 = vmatprep.subr.bf16.mxu0 %v8101_v0 }
  0x41   :  { %600 = vmatpush1.bf16.msra.mxu1 %v8480_v56 }
  0x42   :  { %577 = vmatmul.mubr.bf16.vlgmr.msra.gmra.mrb[4].mxu0 %v351_v57  ;;  %910 = vmatprep.subr.bf16.mxu1 %v8131_v7 }
  0x43   :  { %870 = vmatpush1.bf16.msra.mxu0 %v8108_v3  ;;  %901 = vmatprep.mubr.bf16.mxu0 %v10584_v61  ;;  %v24_v3 = vld [vmem:[%s10560_s0] sm:$0xff] }
  0x44   :  { %871 = vmatprep.subr.bf16.mxu0 %v8114_v4  ;;  %618 = vmatmul.mubr.bf16.vlgmr.msra.gmra.mrb[4].mxu1 %v351_v57 }
  0x45   :  { %911 = vmatpush1.bf16.msra.mxu1 %v8136_v8  ;;  %942 = vmatprep.mubr.bf16.mxu1 %v10584_v61 }
  0x46   :  { %912 = vmatprep.subr.bf16.mxu1 %v8155_v11 }
  0x47   :  { %872 = vmatpush1.bf16.msra.mxu0 %v8120_v5 }
  0x48   :  { %873 = vmatprep.subr.bf16.mxu0 %v8126_v6 }
  0x49   :  { %913 = vmatpush1.bf16.msra.mxu1 %v8160_v12  ;;  %v25_v12 = vld [vmem:[%s10560_s0 + $0x8] sm:$0xff] }
  0x4a   :  { %914 = vmatprep.subr.bf16.mxu1 %v8177_v15 }
  0x4b   :  { %874 = vmatpush1.bf16.msra.mxu0 %v8142_v9 }
  0x4c   :  { %875 = vmatprep.subr.bf16.mxu0 %v8149_v10 }
  0x4d   :  { %915 = vmatpush1.bf16.msra.mxu1 %v8184_v16 }
  0x4e   :  { %916 = vmatprep.subr.bf16.mxu1 %v8190_v17 }
  0x4f   :  { %876 = vmatpush1.bf16.msra.mxu0 %v8167_v13 }
  0x50   :  { %877 = vmatprep.subr.bf16.mxu0 %v8172_v14 }
  0x51   :  { %917 = vmatpush1.bf16.msra.mxu1 %v8208_v20 }
  0x52   :  { %918 = vmatprep.subr.bf16.mxu1 %v8214_v21 }
  0x53   :  { %878 = vmatpush1.bf16.msra.mxu0 %v8196_v18 }
  0x54   :  { %879 = vmatprep.subr.bf16.mxu0 %v8202_v19 }
  0x55   :  { %919 = vmatpush1.bf16.msra.mxu1 %v8232_v24 }
  0x56   :  { %920 = vmatprep.subr.bf16.mxu1 %v8238_v25 }
  0x57   :  { %880 = vmatpush1.bf16.msra.mxu0 %v8220_v22 }
  0x58   :  { %881 = vmatprep.subr.bf16.mxu0 %v8225_v23 }
  0x59   :  { %921 = vmatpush1.bf16.msra.mxu1 %v8256_v28  ;;  %v337_v28 = vld [vmem:[#allocation3] sm:$0xf] }
  0x5a   :  { %922 = vmatprep.subr.bf16.mxu1 %v8262_v29 }
  0x5b   :  { %882 = vmatpush1.bf16.msra.mxu0 %v8243_v26 }
  0x5c   :  { %883 = vmatprep.subr.bf16.mxu0 %v8249_v27 }
  0x5d   :  { %923 = vmatpush1.bf16.msra.mxu1 %v8280_v33 }
  0x5e   :  { %924 = vmatprep.subr.bf16.mxu1 %v8286_v34  ;;  %v6545_v34 = vld [vmem:[%s10561_s1 + $0x90] sm:$0xff] }
  0x5f   :  { %884 = vmatpush1.bf16.msra.mxu0 %v8267_v30 }
  0x60   :  { %1193 = vmatprep.subr.bf16.mxu0 %v8273_v32 }
  0x61   :  { %925 = vmatpush1.bf16.msra.mxu1 %v8304_v38 }
  0x62   :  { %1234 = vmatprep.subr.bf16.mxu1 %v8310_v39 }
  0xf5   :  { %v254_v0 = vpop.f32.mrb[0].mxu0 }
  0xf6   :  { %v256_v4 = vpop.f32.mrb[1].mxu0 }
  0xf7   :  { %v306_v5 = vcombine.low %v254_v0, %v256_v4  ;;  %v258_v6 = vpop.f32.mrb[2].mxu0  ;;  %v295_v9 = vpop.f32.mrb[0].mxu1 }
  0xf8   :  { %v259_v7 = vpop.f32.mrb[3].mxu0  ;;  %v297_v13 = vpop.f32.mrb[1].mxu1 }
  0xf9   :  { %v310_v8 = vadd.f32 %v306_v5, %v24_v3  ;;  %v307_v14 = vcombine.low %v295_v9, %v297_v13  ;;  %v299_v15 = vpop.f32.mrb[2].mxu1 }
  0xfa   :  { %v300_v17 = vpop.f32.mrb[3].mxu1 }
  0xfb   :  { %v6542_v10 = vmul.f32 -1.442695, %v310_v8  ;;  %v319_v11 = vrot.slane %v310_v8, 4  ;;  %v311_v18 = vadd.f32 %v307_v14, %v25_v12  ;;  %v6546_v8 = vld [vmem:[%s10561_s1 + $0x98] sm:$0xff] }
  0xfd   :  { %7746 = vpow2.f32 %v6542_v10  ;;  %v6543_v16 = vmul.f32 -1.442695, %v319_v11  ;;  %v329_v19 = vrot.slane %v311_v18, 4 }
  0xff   :  { %7748 = vpow2.f32 %v6543_v16  ;;  %v6544_v20 = vmul.f32 -1.442695, %v329_v19 }
 0x100   :  { %7750 = vtanh.f32 %v311_v18 }
 0x101   :  { %7752 = vpow2.f32 %v6544_v20 }
 0x107   :  { %v7747_v21 = vpop.eup %7746 }
 0x108   :  { %v315_v22 = vadd.f32 1.0, %v7747_v21 }
 0x109   :  { %v7749_v23 = vpop.eup %7748 }
 0x10a   :  { %7754 = vrcp.f32 %v315_v22  ;;  %v324_v24 = vadd.f32 1.0, %v7749_v23  ;;  %v7751_v25 = vpop.eup %7750 }
 0x10b   :  { %v7753_v26 = vpop.eup %7752 }
 0x10c   :  { %7756 = vrcp.f32 %v324_v24  ;;  %v334_v29 = vadd.f32 1.0, %v7753_v26 }
 0x10e   :  { %7758 = vrcp.f32 %v334_v29  ;;  %v662_v29 = vld [vmem:[#allocation3 + $0x4] sm:$0xf] }
 0x114   :  { %v7755_v27 = vpop.eup %7754 }
 0x115   :  { %v339_v30 = vmul.f32 %v7755_v27, %v7751_v25  ;;  %v578_v32 = vpop.f32.mrb[4].mxu0 }
 0x116   :  { %v7757_v33 = vpop.eup %7756  ;;  %v580_v38 = vpop.f32.mrb[5].mxu0 }
 0x117   :  { %v338_v39 = vmul.f32 %v7757_v33, %v337_v28  ;;  %v630_v57 = vcombine.low %v578_v32, %v580_v38  ;;  %v582_v31 = vpop.f32.mrb[6].mxu0  ;;  %v619_v5 = vpop.f32.mrb[4].mxu1  ;;  %v8683_v38 = vld [vmem:[%s10558_s2 + $0x80] ss:$16 sps:$4 sm:$0xff]  }
 0x118   :  { %v583_v0 = vpop.f32.mrb[7].mxu0  ;;  %v621_v9 = vpop.f32.mrb[5].mxu1  ;;  %v8702_v31 = vld [vmem:[%s10558_s2 + $0xac] ss:$16 sps:$4 sm:$0xff]  }
 0x119   :  { %v340_v3 = vadd.f32 %v339_v30, %v338_v39  ;;  %v634_v4 = vadd.f32 %v6545_v34, %v630_v57  ;;  %v631_v10 = vcombine.low %v619_v5, %v621_v9  ;;  %v623_v11 = vpop.f32.mrb[6].mxu1  ;;  %v7759_v16 = vpop.eup %7758  ;;  %v8688_v39 = vld [vmem:[%s10558_s2 + $0x88] ss:$16 sps:$4 sm:$0xff]   ;;  %v8697_v57 = vld [vmem:[%s10558_s2 + $0xa4] ss:$16 sps:$4 sm:$0xff]  }
 0x11a   :  { %v624_v13 = vpop.f32.mrb[7].mxu1  ;;  %v8707_v0 = vld [vmem:[%s10558_s2 + $0xa0] ss:$16 sps:$4 sm:$0xff]   ;;  %v8726_v5 = vld [vmem:[%s10558_s2 + $0xcc] ss:$16 sps:$4 sm:$0xff]  }
 0x11b   :  { %7760 = vtanh.f32 %v340_v3  ;;  %343 = vst [vmem:[#allocation3] sm:$0xf] %v340_v3  ;;  %v6579_v6 = vmul.f32 -1.442695, %v634_v4  ;;  %v643_v7 = vrot.slane %v634_v4, 4  ;;  %v635_v14 = vadd.f32 %v6546_v8, %v631_v10 }
 0x11c   :  { %v8712_v3 = vld [vmem:[%s10558_s2 + $0xa8] ss:$16 sps:$4 sm:$0xff]   ;;  %v8721_v4 = vld [vmem:[%s10558_s2 + $0xc4] ss:$16 sps:$4 sm:$0xff]   ;;  %v8750_v9 = vld [vmem:[%s10558_s2 + $0xec] ss:$16 sps:$4 sm:$0xff]  }
 0x11d   :  { %7762 = vpow2.f32 %v6579_v6  ;;  %v6580_v12 = vmul.f32 -1.442695, %v643_v7  ;;  %v653_v15 = vrot.slane %v635_v14, 4  ;;  %v8731_v6 = vld [vmem:[%s10558_s2 + $0xc0] ss:$16 sps:$4 sm:$0xff]  }
 0x11e   :  { %v8736_v7 = vld [vmem:[%s10558_s2 + $0xc8] ss:$16 sps:$4 sm:$0xff]   ;;  %v8745_v8 = vld [vmem:[%s10558_s2 + $0xe4] ss:$16 sps:$4 sm:$0xff]   ;;  %v8755_v10 = vld [vmem:[%s10558_s2 + $0xe0] ss:$16 sps:$4 sm:$0xff]  }
 0x11f   :  { %7764 = vpow2.f32 %v6580_v12  ;;  %v6581_v17 = vmul.f32 -1.442695, %v653_v15  ;;  %v8760_v11 = vld [vmem:[%s10558_s2 + $0xe8] ss:$16 sps:$4 sm:$0xff]   ;;  %v8769_v12 = vld [vmem:[%s10559_s3 + $0x4] ss:$16 sps:$4 sm:$0xff]  }
 0x120   :  { %7766 = vtanh.f32 %v635_v14  ;;  %v8774_v13 = vld [vmem:[%s10559_s3 + $0xc] ss:$16 sps:$4 sm:$0xff]  }
 0x121   :  { %7768 = vpow2.f32 %v6581_v17 }
 0x125   :  { %v7761_v18 = vpop.eup %7760 }
 0x126   :  { %v342_v19 = vmul.f32 %v7761_v18, %v7759_v16  ;;  %v6583_v16 = vld [vmem:[%s10560_s0 + $0x10] sm:$0xff] }
 0x127   :  { %v7763_v20 = vpop.eup %7762 }
 0x128   :  { %344 = vst [vmem:[#allocation2] sm:$0xf] %v342_v19  ;;  %345 = vst [vmem:[%s10562_s4] sm:$0xf] %v342_v19  ;;  %v639_v21 = vadd.f32 1.0, %v7763_v20 }
 0x129   :  { %v7765_v22 = vpop.eup %7764 }
 0x12a   :  { %7770 = vrcp.f32 %v639_v21  ;;  %v648_v23 = vadd.f32 1.0, %v7765_v22  ;;  %v7767_v26 = vpop.eup %7766 }
 0x12b   :  { %v7769_v27 = vpop.eup %7768 }
 0x12c   :  { %7772 = vrcp.f32 %v648_v23  ;;  %v658_v30 = vadd.f32 1.0, %v7769_v27 }
 0x12e   :  { %7774 = vrcp.f32 %v658_v30 }
 0x12f   :  { %v675_v24 = vld [vmem:[#allocation2] sm:$0xf] }
 0x130   :  { %v676_v25 = vpack.c.bf16 %v675_v24, %v675_v24 }
 0x132   :  { %902 = vmatmul.mubr.bf16.vlgmr.msra.gmra.mrb[8].mxu0 %v676_v25  ;;  %943 = vmatmul.mubr.bf16.vlgmr.msra.gmra.mrb[8].mxu1 %v676_v25 }
 0x133   :  { %1194 = vmatpush1.bf16.msra.mxu0 %v8291_v36  ;;  %1235 = vmatpush1.bf16.msra.mxu1 %v8329_v42  ;;  %v10585_v42 = vld [vmem:[#allocation4_spill] sm:$0xff] }
 0x134   :  { %v7771_v28 = vpop.eup %7770  ;;  %1195 = vmatprep.subr.bf16.mxu0 %v8297_v37  ;;  %1236 = vmatprep.subr.bf16.mxu1 %v8335_v43  ;;  %v10586_v43 = vld [vmem:[#allocation5_spill] sm:$0xff] }
 0x135   :  { %v664_v32 = vmul.f32 %v7771_v28, %v7767_v26  ;;  %1225 = vmatprep.mubr.bf16.mxu0 %v10584_v61  ;;  %1266 = vmatprep.mubr.bf16.mxu1 %v10584_v61  ;;  %v6584_v26 = vld [vmem:[%s10560_s0 + $0x18] sm:$0xff] }
 0x136   :  { %v7773_v33 = vpop.eup %7772 }
 0x137   :  { %v663_v34 = vmul.f32 %v7773_v33, %v662_v29  ;;  %1196 = vmatpush1.bf16.msra.mxu0 %v8315_v40  ;;  %1237 = vmatpush1.bf16.msra.mxu1 %v8353_v46 }
 0x138   :  { %1197 = vmatprep.subr.bf16.mxu0 %v8321_v41  ;;  %1238 = vmatprep.subr.bf16.mxu1 %v8364_v48  ;;  %v7775_v37 = vpop.eup %7774  ;;  %v8587_v48 = vld [vmem:[%s10558_s2] ss:$16 sps:$4 sm:$0xff]  }
 0x139   :  { %v665_v36 = vadd.f32 %v664_v32, %v663_v34 }
 0x13b   :  { %7776 = vtanh.f32 %v665_v36  ;;  %668 = vst [vmem:[#allocation3 + $0x4] sm:$0xf] %v665_v36  ;;  %1198 = vmatpush1.bf16.msra.mxu0 %v8341_v44  ;;  %1239 = vmatpush1.bf16.msra.mxu1 %v8375_v50  ;;  %v10587_v44 = vld [vmem:[#allocation6_spill] sm:$0xff] }
 0x13c   :  { %1199 = vmatprep.subr.bf16.mxu0 %v8347_v45  ;;  %1240 = vmatprep.subr.bf16.mxu1 %v8381_v51  ;;  %v8601_v50 = vld [vmem:[%s10558_s2 + $0x24] ss:$16 sps:$4 sm:$0xff]   ;;  %v8606_v51 = vld [vmem:[%s10558_s2 + $0x2c] ss:$16 sps:$4 sm:$0xff]  }
 0x13f   :  { %1200 = vmatpush1.bf16.msra.mxu0 %v8358_v47  ;;  %1241 = vmatpush1.bf16.msra.mxu1 %v8399_v54  ;;  %v8577_v47 = vld [vmem:[%s10558_s2 + $0x4] ss:$16 sps:$4 sm:$0xff]  }
 0x140   :  { %1201 = vmatprep.subr.bf16.mxu0 %v8370_v49  ;;  %1242 = vmatprep.subr.bf16.mxu1 %v8405_v55  ;;  %v8592_v49 = vld [vmem:[%s10558_s2 + $0x8] ss:$16 sps:$4 sm:$0xff]   ;;  %v8625_v54 = vld [vmem:[%s10558_s2 + $0x44] ss:$16 sps:$4 sm:$0xff]   ;;  %v8630_v55 = vld [vmem:[%s10558_s2 + $0x40] ss:$16 sps:$4 sm:$0xff]  }
 0x143   :  { %1202 = vmatpush1.bf16.msra.mxu0 %v8388_v52  ;;  %1243 = vmatpush1.bf16.msra.mxu1 %v8423_v58  ;;  %v8611_v52 = vld [vmem:[%s10558_s2 + $0x20] ss:$16 sps:$4 sm:$0xff]   ;;  %v8640_v58 = vld [vmem:[%s10558_s2 + $0x4c] ss:$16 sps:$4 sm:$0xff]  }
 0x144   :  { %1203 = vmatprep.subr.bf16.mxu0 %v8394_v53  ;;  %1244 = vmatprep.subr.bf16.mxu1 %v8429_v59  ;;  %v8616_v53 = vld [vmem:[%s10558_s2 + $0x28] ss:$16 sps:$4 sm:$0xff]   ;;  %v8649_v59 = vld [vmem:[%s10558_s2 + $0x64] ss:$16 sps:$4 sm:$0xff]  }
 0x145   :  { %v7777_v40 = vpop.eup %7776 }
 0x146   :  { %v667_v41 = vmul.f32 %v7777_v40, %v7775_v37 }
 0x147   :  { %1204 = vmatpush1.bf16.msra.mxu0 %v10585_v42  ;;  %1245 = vmatpush1.bf16.msra.mxu1 %v8447_v62  ;;  %v8659_v62 = vld [vmem:[%s10558_s2 + $0x60] ss:$16 sps:$4 sm:$0xff]  }
 0x148   :  { %669 = vst [vmem:[#allocation2 + $0x4] sm:$0xf] %v667_v41  ;;  %6582 = vst [vmem:[%s10563_s5 + $0x24] sm:$0xf] %v667_v41  ;;  %1205 = vmatprep.subr.bf16.mxu0 %v10586_v43  ;;  %1246 = vmatprep.subr.bf16.mxu1 %v8453_v63  ;;  %v8664_v63 = vld [vmem:[%s10558_s2 + $0x68] ss:$16 sps:$4 sm:$0xff]  }
 0x14b   :  { %1206 = vmatpush1.bf16.msra.mxu0 %v8436_v60  ;;  %1247 = vmatpush1.bf16.msra.mxu1 %v8466_v35  ;;  %v8654_v60 = vld [vmem:[%s10558_s2 + $0x6c] ss:$16 sps:$4 sm:$0xff]  }
 0x14c   :  { %1207 = vmatprep.subr.bf16.mxu0 %v10587_v44  ;;  %1248 = vmatprep.subr.bf16.mxu1 %v8472_v1  ;;  %v8582_v1 = vld [vmem:[%s10558_s2 + $0xc] ss:$16 sps:$4 sm:$0xff]  }
 0x14d   :  { %v8678_v35 = vld [vmem:[%s10558_s2 + $0x8c] ss:$16 sps:$4 sm:$0xff]  }
 0x14f   :  { %1208 = vmatpush1.bf16.msra.mxu0 %v8460_v2  ;;  %1249 = vmatpush1.bf16.msra.mxu1 %v8480_v56  ;;  %v999_v45 = vld [vmem:[#allocation2 + $0x4] sm:$0xf]  ;;  %v8635_v56 = vld [vmem:[%s10558_s2 + $0x48] ss:$16 sps:$4 sm:$0xff]  }
 0x150   :  { %v1000_v46 = vpack.c.bf16 %v999_v45, %v999_v45  ;;  %1517 = vmatprep.subr.bf16.mxu0 %v8577_v47  ;;  %1558 = vmatprep.subr.bf16.mxu1 %v8582_v1  ;;  %v8673_v2 = vld [vmem:[%s10558_s2 + $0x84] ss:$16 sps:$4 sm:$0xff]  }
 0x152   :  { %1226 = vmatmul.mubr.bf16.vlgmr.msra.gmra.mrb[12].mxu0 %v1000_v46  ;;  %1267 = vmatmul.mubr.bf16.vlgmr.msra.gmra.mrb[12].mxu1 %v1000_v46 }
 0x153   :  { %1549 = vmatprep.mubr.bf16.mxu0 %v10584_v61  ;;  %1590 = vmatprep.mubr.bf16.mxu1 %v10584_v61 }
 0x154   :  { %1518 = vmatpush1.bf16.msra.mxu0 %v8587_v48  ;;  %1559 = vmatpush1.bf16.msra.mxu1 %v8592_v49 }
 0x155   :  { %1519 = vmatprep.subr.bf16.mxu0 %v8601_v50  ;;  %1560 = vmatprep.subr.bf16.mxu1 %v8606_v51 }
 0x158   :  { %1520 = vmatpush1.bf16.msra.mxu0 %v8611_v52  ;;  %1561 = vmatpush1.bf16.msra.mxu1 %v8616_v53 }
 0x159   :  { %1521 = vmatprep.subr.bf16.mxu0 %v8625_v54  ;;  %1562 = vmatprep.subr.bf16.mxu1 %v8640_v58 }
 0x15c   :  { %1522 = vmatpush1.bf16.msra.mxu0 %v8630_v55  ;;  %1563 = vmatpush1.bf16.msra.mxu1 %v8635_v56 }
 0x15d   :  { %1523 = vmatprep.subr.bf16.mxu0 %v8649_v59  ;;  %1564 = vmatprep.subr.bf16.mxu1 %v8654_v60 }
 0x160   :  { %1524 = vmatpush1.bf16.msra.mxu0 %v8659_v62  ;;  %1565 = vmatpush1.bf16.msra.mxu1 %v8664_v63 }
 0x161   :  { %1525 = vmatprep.subr.bf16.mxu0 %v8673_v2  ;;  %1566 = vmatprep.subr.bf16.mxu1 %v8678_v35 }
 0x164   :  { %1526 = vmatpush1.bf16.msra.mxu0 %v8683_v38  ;;  %1567 = vmatpush1.bf16.msra.mxu1 %v8688_v39 }
 0x165   :  { %1527 = vmatprep.subr.bf16.mxu0 %v8697_v57  ;;  %1568 = vmatprep.subr.bf16.mxu1 %v8702_v31 }
 0x168   :  { %1528 = vmatpush1.bf16.msra.mxu0 %v8707_v0  ;;  %1569 = vmatpush1.bf16.msra.mxu1 %v8712_v3 }
 0x169   :  { %1529 = vmatprep.subr.bf16.mxu0 %v8721_v4  ;;  %1570 = vmatprep.subr.bf16.mxu1 %v8726_v5 }
 0x16c   :  { %1530 = vmatpush1.bf16.msra.mxu0 %v8731_v6  ;;  %1571 = vmatpush1.bf16.msra.mxu1 %v8736_v7 }
 0x16d   :  { %1531 = vmatprep.subr.bf16.mxu0 %v8745_v8  ;;  %1572 = vmatprep.subr.bf16.mxu1 %v8750_v9 }
 0x170   :  { %1532 = vmatpush1.bf16.msra.mxu0 %v8755_v10  ;;  %1573 = vmatpush1.bf16.msra.mxu1 %v8760_v11 }
 0x171   :  { %1841 = vmatprep.subr.bf16.mxu0 %v8769_v12  ;;  %1882 = vmatprep.subr.bf16.mxu1 %v8774_v13 }
 0x205   :  { %v903_v14 = vpop.f32.mrb[8].mxu0  ;;  %v944_v15 = vpop.f32.mrb[8].mxu1 }
 0x206   :  { %v905_v17 = vpop.f32.mrb[9].mxu0  ;;  %v946_v18 = vpop.f32.mrb[9].mxu1 }
 0x207   :  { %v955_v19 = vcombine.low %v903_v14, %v905_v17  ;;  %v956_v20 = vcombine.low %v944_v15, %v946_v18  ;;  %v907_v21 = vpop.f32.mrb[10].mxu0  ;;  %v948_v22 = vpop.f32.mrb[10].mxu1  ;;  %v6621_v17 = vld [vmem:[%s10561_s1 + $0x80] sm:$0xff] }
 0x208   :  { %v908_v23 = vpop.f32.mrb[11].mxu0  ;;  %v949_v24 = vpop.f32.mrb[11].mxu1 }
 0x209   :  { %v959_v25 = vadd.f32 %v6583_v16, %v955_v19  ;;  %v960_v30 = vadd.f32 %v6584_v26, %v956_v20  ;;  %v986_v16 = vld [vmem:[#allocation3] sm:$0xf] }
 0x20b   :  { %v6617_v27 = vmul.f32 -1.442695, %v959_v25  ;;  %v968_v28 = vrot.slane %v959_v25, 4  ;;  %v978_v32 = vrot.slane %v960_v30, 4 }
 0x20d   :  { %7778 = vpow2.f32 %v6617_v27  ;;  %v6618_v29 = vmul.f32 -1.442695, %v968_v28  ;;  %v6619_v33 = vmul.f32 -1.442695, %v978_v32 }
 0x20f   :  { %7780 = vpow2.f32 %v6618_v29  ;;  %v6622_v29 = vld [vmem:[%s10561_s1 + $0x88] sm:$0xff] }
 0x210   :  { %7782 = vtanh.f32 %v960_v30 }
 0x211   :  { %7784 = vpow2.f32 %v6619_v33 }
 0x217   :  { %v7779_v34 = vpop.eup %7778 }
 0x218   :  { %v964_v36 = vadd.f32 1.0, %v7779_v34 }
 0x219   :  { %v7781_v37 = vpop.eup %7780 }
 0x21a   :  { %7786 = vrcp.f32 %v964_v36  ;;  %v973_v40 = vadd.f32 1.0, %v7781_v37  ;;  %v7783_v41 = vpop.eup %7782 }
 0x21b   :  { %v7785_v42 = vpop.eup %7784 }
 0x21c   :  { %7788 = vrcp.f32 %v973_v40  ;;  %v983_v15 = vadd.f32 1.0, %v7785_v42 }
 0x21e   :  { %7790 = vrcp.f32 %v983_v15  ;;  %v8796_v15 = vld [vmem:[%s10559_s3] ss:$16 sps:$4 sm:$0xff]  }
 0x224   :  { %v7787_v43 = vpop.eup %7786 }
 0x225   :  { %v988_v44 = vmul.f32 %v7787_v43, %v7783_v41  ;;  %v1227_v45 = vpop.f32.mrb[12].mxu0  ;;  %v1268_v46 = vpop.f32.mrb[12].mxu1 }
 0x226   :  { %v7789_v14 = vpop.eup %7788  ;;  %v1229_v18 = vpop.f32.mrb[13].mxu0 }
 0x227   :  { %v1270_v19 = vpop.f32.mrb[13].mxu1  ;;  %v987_v20 = vmul.f32 %v7789_v14, %v986_v16  ;;  %v1279_v21 = vcombine.low %v1227_v45, %v1229_v18  ;;  %v1231_v23 = vpop.f32.mrb[14].mxu0  ;;  %v8801_v16 = vld [vmem:[%s10559_s3 + $0x8] ss:$16 sps:$4 sm:$0xff]   ;;  %v8806_v18 = vld [vmem:[%s10559_s3 + $0x24] ss:$16 sps:$4 sm:$0xff]  }
 0x228   :  { %v1280_v22 = vcombine.low %v1268_v46, %v1270_v19  ;;  %v1272_v24 = vpop.f32.mrb[14].mxu1  ;;  %v1232_v25 = vpop.f32.mrb[15].mxu0  ;;  %v8811_v19 = vld [vmem:[%s10559_s3 + $0x2c] ss:$16 sps:$4 sm:$0xff]   ;;  %v8823_v23 = vld [vmem:[%s10559_s3 + $0x28] ss:$16 sps:$4 sm:$0xff]  }
 0x229   :  { %v1273_v26 = vpop.f32.mrb[15].mxu1  ;;  %v989_v27 = vadd.f32 %v988_v44, %v987_v20  ;;  %v1283_v28 = vadd.f32 %v6621_v17, %v1279_v21  ;;  %v7791_v37 = vpop.eup %7790  ;;  %v8830_v25 = vld [vmem:[%s10559_s3 + $0x44] ss:$16 sps:$4 sm:$0xff]  }
 0x22a   :  { %v1284_v34 = vadd.f32 %v6622_v29, %v1280_v22  ;;  %v8818_v22 = vld [vmem:[%s10559_s3 + $0x20] ss:$16 sps:$4 sm:$0xff]   ;;  %v8835_v26 = vld [vmem:[%s10559_s3 + $0x4c] ss:$16 sps:$4 sm:$0xff]  }
 0x22b   :  { %7792 = vtanh.f32 %v989_v27  ;;  %992 = vst [vmem:[#allocation3] sm:$0xf] %v989_v27  ;;  %v6655_v30 = vmul.f32 -1.442695, %v1283_v28  ;;  %v1292_v32 = vrot.slane %v1283_v28, 4 }
 0x22c   :  { %v1302_v36 = vrot.slane %v1284_v34, 4 }
 0x22d   :  { %7794 = vpow2.f32 %v6655_v30  ;;  %v6656_v33 = vmul.f32 -1.442695, %v1292_v32  ;;  %v1310_v30 = vld [vmem:[#allocation3 + $0x4] sm:$0xf] }
 0x22e   :  { %v6657_v41 = vmul.f32 -1.442695, %v1302_v36  ;;  %v8856_v36 = vld [vmem:[%s10559_s3 + $0x64] ss:$16 sps:$4 sm:$0xff]  }
 0x22f   :  { %7796 = vpow2.f32 %v6656_v33  ;;  %v8844_v33 = vld [vmem:[%s10559_s3 + $0x40] ss:$16 sps:$4 sm:$0xff]  }
 0x230   :  { %7798 = vtanh.f32 %v1284_v34  ;;  %v8849_v34 = vld [vmem:[%s10559_s3 + $0x48] ss:$16 sps:$4 sm:$0xff]  }
 0x231   :  { %7800 = vpow2.f32 %v6657_v41  ;;  %v8868_v41 = vld [vmem:[%s10559_s3 + $0x60] ss:$16 sps:$4 sm:$0xff]  }
 0x235   :  { %v7793_v40 = vpop.eup %7792 }
 0x236   :  { %v991_v42 = vmul.f32 %v7793_v40, %v7791_v37  ;;  %v8861_v37 = vld [vmem:[%s10559_s3 + $0x6c] ss:$16 sps:$4 sm:$0xff]  }
 0x237   :  { %v7795_v43 = vpop.eup %7794 }
 0x238   :  { %993 = vst [vmem:[#allocation2] sm:$0xf] %v991_v42  ;;  %6620 = vst [vmem:[%s10562_s4 + $0x4] sm:$0xf] %v991_v42  ;;  %v1288_v44 = vadd.f32 1.0, %v7795_v43 }
 0x239   :  { %v7797_v45 = vpop.eup %7796  ;;  %v8873_v42 = vld [vmem:[%s10559_s3 + $0x68] ss:$16 sps:$4 sm:$0xff]   ;;  %v8880_v43 = vld [vmem:[%s10559_s3 + $0x84] ss:$16 sps:$4 sm:$0xff]  }
 0x23a   :  { %7802 = vrcp.f32 %v1288_v44  ;;  %v1297_v46 = vadd.f32 1.0, %v7797_v45  ;;  %v7799_v20 = vpop.eup %7798  ;;  %v8885_v44 = vld [vmem:[%s10559_s3 + $0x8c] ss:$16 sps:$4 sm:$0xff]   ;;  %v8892_v45 = vld [vmem:[%s10559_s3 + $0x80] ss:$16 sps:$4 sm:$0xff]  }
 0x23b   :  { %v7801_v21 = vpop.eup %7800 }
 0x23c   :  { %7804 = vrcp.f32 %v1297_v46  ;;  %v1307_v29 = vadd.f32 1.0, %v7801_v21  ;;  %v8897_v46 = vld [vmem:[%s10559_s3 + $0x88] ss:$16 sps:$4 sm:$0xff]  }
 0x23d   :  { %v8921_v21 = vld [vmem:[%s10559_s3 + $0xa8] ss:$16 sps:$4 sm:$0xff]  }
 0x23e   :  { %7806 = vrcp.f32 %v1307_v29 }
 0x23f   :  { %v1323_v14 = vld [vmem:[#allocation2] sm:$0xf] }
 0x240   :  { %v1324_v17 = vpack.c.bf16 %v1323_v14, %v1323_v14  ;;  %v8904_v14 = vld [vmem:[%s10559_s3 + $0xa4] ss:$16 sps:$4 sm:$0xff]  }
 0x242   :  { %1550 = vmatmul.mubr.bf16.vlgmr.msra.gmra.mrb[16].mxu0 %v1324_v17  ;;  %1591 = vmatmul.mubr.bf16.vlgmr.msra.gmra.mrb[16].mxu1 %v1324_v17  ;;  %v8909_v17 = vld [vmem:[%s10559_s3 + $0xac] ss:$16 sps:$4 sm:$0xff]  }
 0x243   :  { %1842 = vmatpush1.bf16.msra.mxu0 %v8796_v15  ;;  %1883 = vmatpush1.bf16.msra.mxu1 %v8801_v16 }
 0x244   :  { %v7803_v24 = vpop.eup %7802  ;;  %1843 = vmatprep.subr.bf16.mxu0 %v8806_v18  ;;  %1884 = vmatprep.subr.bf16.mxu1 %v8811_v19 }
 0x245   :  { %v1312_v27 = vmul.f32 %v7803_v24, %v7799_v20  ;;  %1873 = vmatprep.mubr.bf16.mxu0 %v10584_v61  ;;  %1914 = vmatprep.mubr.bf16.mxu1 %v10584_v61  ;;  %v8916_v20 = vld [vmem:[%s10559_s3 + $0xa0] ss:$16 sps:$4 sm:$0xff]  }
 0x246   :  { %v7805_v28 = vpop.eup %7804 }
 0x247   :  { %v1311_v32 = vmul.f32 %v7805_v28, %v1310_v30  ;;  %1844 = vmatpush1.bf16.msra.mxu0 %v8818_v22  ;;  %1885 = vmatpush1.bf16.msra.mxu1 %v8823_v23  ;;  %v8933_v28 = vld [vmem:[%s10559_s3 + $0xcc] ss:$16 sps:$4 sm:$0xff]  }
 0x248   :  { %1845 = vmatprep.subr.bf16.mxu0 %v8830_v25  ;;  %1886 = vmatprep.subr.bf16.mxu1 %v8835_v26  ;;  %v7807_v24 = vpop.eup %7806  ;;  %10588 = vst [vmem:[#allocation4_spill] sm:$0xff] %v8933_v28 }
 0x249   :  { %v1313_v40 = vadd.f32 %v1312_v27, %v1311_v32  ;;  %v8928_v27 = vld [vmem:[%s10559_s3 + $0xc4] ss:$16 sps:$4 sm:$0xff]   ;;  %v8940_v32 = vld [vmem:[%s10559_s3 + $0xc0] ss:$16 sps:$4 sm:$0xff]  }
 0x24a   :  { %10589 = vst [vmem:[#allocation5_spill] sm:$0xff] %v8940_v32 }
 0x24b   :  { %7808 = vtanh.f32 %v1313_v40  ;;  %1316 = vst [vmem:[#allocation3 + $0x4] sm:$0xf] %v1313_v40  ;;  %1846 = vmatpush1.bf16.msra.mxu0 %v8844_v33  ;;  %1887 = vmatpush1.bf16.msra.mxu1 %v8849_v34  ;;  %v8945_v40 = vld [vmem:[%s10559_s3 + $0xc8] ss:$16 sps:$4 sm:$0xff]  }
 0x24c   :  { %1847 = vmatprep.subr.bf16.mxu0 %v8856_v36  ;;  %1888 = vmatprep.subr.bf16.mxu1 %v8861_v37  ;;  %10590 = vst [vmem:[#allocation6_spill] sm:$0xff] %v8945_v40 }
 0x24f   :  { %1848 = vmatpush1.bf16.msra.mxu0 %v8868_v41  ;;  %1889 = vmatpush1.bf16.msra.mxu1 %v8873_v42 }
 0x250   :  { %1849 = vmatprep.subr.bf16.mxu0 %v8880_v43  ;;  %1890 = vmatprep.subr.bf16.mxu1 %v8885_v44 }
 0x253   :  { %1850 = vmatpush1.bf16.msra.mxu0 %v8892_v45  ;;  %1891 = vmatpush1.bf16.msra.mxu1 %v8897_v46 }
 0x254   :  { %1851 = vmatprep.subr.bf16.mxu0 %v8904_v14  ;;  %1892 = vmatprep.subr.bf16.mxu1 %v8909_v17 }
 0x255   :  { %v7809_v29 = vpop.eup %7808 }
 0x256   :  { %v1315_v30 = vmul.f32 %v7809_v29, %v7807_v24  ;;  %v8955_v24 = vld [vmem:[%s10559_s3 + $0xe4] ss:$16 sps:$4 sm:$0xff]   ;;  %v8960_v29 = vld [vmem:[%s10559_s3 + $0xec] ss:$16 sps:$4 sm:$0xff]  }
 0x257   :  { %1852 = vmatpush1.bf16.msra.mxu0 %v8916_v20  ;;  %1893 = vmatpush1.bf16.msra.mxu1 %v8921_v21 }
 0x258   :  { %1317 = vst [vmem:[#allocation2 + $0x4] sm:$0xf] %v1315_v30  ;;  %6658 = vst [vmem:[%s10563_s5 + $0x20] sm:$0xf] %v1315_v30  ;;  %1853 = vmatprep.subr.bf16.mxu0 %v8928_v27  ;;  %1894 = vmatprep.subr.bf16.mxu1 %v8933_v28  ;;  %v8967_v30 = vld [vmem:[%s10559_s3 + $0xe0] ss:$16 sps:$4 sm:$0xff]  }
 0x259   :  { %v8972_v28 = vld [vmem:[%s10559_s3 + $0xe8] ss:$16 sps:$4 sm:$0xff]  }
 0x25b   :  { %1854 = vmatpush1.bf16.msra.mxu0 %v8940_v32  ;;  %1895 = vmatpush1.bf16.msra.mxu1 %v8945_v40 }
 0x25c   :  { %1855 = vmatprep.subr.bf16.mxu0 %v8955_v24  ;;  %1896 = vmatprep.subr.bf16.mxu1 %v8960_v29 }
 0x25f   :  { %1856 = vmatpush1.bf16.msra.mxu0 %v8967_v30  ;;  %1897 = vmatpush1.bf16.msra.mxu1 %v8972_v28  ;;  %v1647_v32 = vld [vmem:[#allocation2 + $0x4] sm:$0xf] }
 0x260   :  { %v1648_v40 = vpack.c.bf16 %v1647_v32, %v1647_v32  ;;  %2165 = vmatprep.subr.bf16.mxu0 %v8577_v47  ;;  %2206 = vmatprep.subr.bf16.mxu1 %v8582_v1 }
 0x262   :  { %1874 = vmatmul.mubr.bf16.vlgmr.msra.gmra.mrb[20].mxu0 %v1648_v40  ;;  %1915 = vmatmul.mubr.bf16.vlgmr.msra.gmra.mrb[20].mxu1 %v1648_v40 }
 0x263   :  { %2166 = vmatpush1.bf16.msra.mxu0 %v8587_v48  ;;  %2207 = vmatpush1.bf16.msra.mxu1 %v8592_v49  ;;  %v6659_v48 = vld [vmem:[%s10560_s0 + $0x20] sm:$0xff] }
 0x264   :  { %2167 = vmatprep.subr.bf16.mxu0 %v8601_v50  ;;  %2208 = vmatprep.subr.bf16.mxu1 %v8606_v51 }
 0x265   :  { %2197 = vmatprep.mubr.bf16.mxu0 %v10584_v61  ;;  %2238 = vmatprep.mubr.bf16.mxu1 %v10584_v61 }
 0x267   :  { %2168 = vmatpush1.bf16.msra.mxu0 %v8611_v52  ;;  %2209 = vmatpush1.bf16.msra.mxu1 %v8616_v53 }
 0x268   :  { %2169 = vmatprep.subr.bf16.mxu0 %v8625_v54  ;;  %2210 = vmatprep.subr.bf16.mxu1 %v8640_v58 }
 0x26b   :  { %2170 = vmatpush1.bf16.msra.mxu0 %v8630_v55  ;;  %2211 = vmatpush1.bf16.msra.mxu1 %v8635_v56 }
 0x26c   :  { %2171 = vmatprep.subr.bf16.mxu0 %v8649_v59  ;;  %2212 = vmatprep.subr.bf16.mxu1 %v8654_v60  ;;  %v6660_v59 = vld [vmem:[%s10560_s0 + $0x28] sm:$0xff] }
 0x26f   :  { %2172 = vmatpush1.bf16.msra.mxu0 %v8659_v62  ;;  %2213 = vmatpush1.bf16.msra.mxu1 %v8664_v63 }
 0x270   :  { %2173 = vmatprep.subr.bf16.mxu0 %v8673_v2  ;;  %2214 = vmatprep.subr.bf16.mxu1 %v8678_v35 }
 0x273   :  { %2174 = vmatpush1.bf16.msra.mxu0 %v8683_v38  ;;  %2215 = vmatpush1.bf16.msra.mxu1 %v8688_v39 }
 0x274   :  { %2175 = vmatprep.subr.bf16.mxu0 %v8697_v57  ;;  %2216 = vmatprep.subr.bf16.mxu1 %v8702_v31 }
 0x277   :  { %2176 = vmatpush1.bf16.msra.mxu0 %v8707_v0  ;;  %2217 = vmatpush1.bf16.msra.mxu1 %v8712_v3 }
 0x278   :  { %2177 = vmatprep.subr.bf16.mxu0 %v8721_v4  ;;  %2218 = vmatprep.subr.bf16.mxu1 %v8726_v5 }
 0x27b   :  { %2178 = vmatpush1.bf16.msra.mxu0 %v8731_v6  ;;  %2219 = vmatpush1.bf16.msra.mxu1 %v8736_v7 }
 0x27c   :  { %2179 = vmatprep.subr.bf16.mxu0 %v8745_v8  ;;  %2220 = vmatprep.subr.bf16.mxu1 %v8750_v9 }
 0x27f   :  { %2180 = vmatpush1.bf16.msra.mxu0 %v8755_v10  ;;  %2221 = vmatpush1.bf16.msra.mxu1 %v8760_v11  ;;  %v1634_v11 = vld [vmem:[#allocation3] sm:$0xf] }
 0x280   :  { %2489 = vmatprep.subr.bf16.mxu0 %v8769_v12  ;;  %2530 = vmatprep.subr.bf16.mxu1 %v8774_v13  ;;  %v6697_v12 = vld [vmem:[%s10561_s1 + $0x70] sm:$0xff] }
 0x315   :  { %v1551_v47 = vpop.f32.mrb[16].mxu0  ;;  %v1592_v1 = vpop.f32.mrb[16].mxu1 }
 0x316   :  { %v1553_v49 = vpop.f32.mrb[17].mxu0  ;;  %v1594_v50 = vpop.f32.mrb[17].mxu1 }
 0x317   :  { %v1603_v51 = vcombine.low %v1551_v47, %v1553_v49  ;;  %v1604_v52 = vcombine.low %v1592_v1, %v1594_v50  ;;  %v1555_v53 = vpop.f32.mrb[18].mxu0  ;;  %v1596_v54 = vpop.f32.mrb[18].mxu1 }
 0x318   :  { %v1556_v55 = vpop.f32.mrb[19].mxu0  ;;  %v1597_v56 = vpop.f32.mrb[19].mxu1  ;;  %v6698_v54 = vld [vmem:[%s10561_s1 + $0x78] sm:$0xff] }
 0x319   :  { %v1607_v58 = vadd.f32 %v6659_v48, %v1603_v51  ;;  %v1608_v2 = vadd.f32 %v6660_v59, %v1604_v52 }
 0x31b   :  { %v6693_v60 = vmul.f32 -1.442695, %v1607_v58  ;;  %v1616_v62 = vrot.slane %v1607_v58, 4  ;;  %v1626_v35 = vrot.slane %v1608_v2, 4 }
 0x31d   :  { %7810 = vpow2.f32 %v6693_v60  ;;  %v6694_v63 = vmul.f32 -1.442695, %v1616_v62  ;;  %v6695_v38 = vmul.f32 -1.442695, %v1626_v35 }
 0x31f   :  { %7812 = vpow2.f32 %v6694_v63 }
 0x320   :  { %7814 = vtanh.f32 %v1608_v2 }
 0x321   :  { %7816 = vpow2.f32 %v6695_v38 }
 0x327   :  { %v7811_v39 = vpop.eup %7810 }
 0x328   :  { %v1612_v57 = vadd.f32 1.0, %v7811_v39 }
 0x329   :  { %v7813_v31 = vpop.eup %7812 }
 0x32a   :  { %7818 = vrcp.f32 %v1612_v57  ;;  %v1621_v0 = vadd.f32 1.0, %v7813_v31  ;;  %v7815_v3 = vpop.eup %7814 }
 0x32b   :  { %v7817_v4 = vpop.eup %7816 }
 0x32c   :  { %7820 = vrcp.f32 %v1621_v0  ;;  %v1631_v10 = vadd.f32 1.0, %v7817_v4 }
 0x32e   :  { %7822 = vrcp.f32 %v1631_v10  ;;  %v1958_v10 = vld [vmem:[#allocation3 + $0x4] sm:$0xf] }
 0x334   :  { %v7819_v5 = vpop.eup %7818 }
 0x335   :  { %v1636_v6 = vmul.f32 %v7819_v5, %v7815_v3  ;;  %v1875_v7 = vpop.f32.mrb[20].mxu0  ;;  %v1916_v8 = vpop.f32.mrb[20].mxu1 }
 0x336   :  { %v7821_v9 = vpop.eup %7820  ;;  %v1877_v13 = vpop.f32.mrb[21].mxu0 }
 0x337   :  { %v1918_v32 = vpop.f32.mrb[21].mxu1  ;;  %v1635_v40 = vmul.f32 %v7821_v9, %v1634_v11  ;;  %v1927_v47 = vcombine.low %v1875_v7, %v1877_v13  ;;  %v1879_v48 = vpop.f32.mrb[22].mxu0  ;;  %v9180_v13 = vld [vmem:[%s10558_s2 + $0x88] ss:$16 sps:$4 sm:$0xff]  }
 0x338   :  { %v1928_v1 = vcombine.low %v1916_v8, %v1918_v32  ;;  %v1920_v49 = vpop.f32.mrb[22].mxu1  ;;  %v1880_v50 = vpop.f32.mrb[23].mxu0  ;;  %v9189_v32 = vld [vmem:[%s10558_s2 + $0xa4] ss:$16 sps:$4 sm:$0xff]  }
 0x339   :  { %v1921_v51 = vpop.f32.mrb[23].mxu1  ;;  %v1637_v52 = vadd.f32 %v1636_v6, %v1635_v40  ;;  %v1931_v53 = vadd.f32 %v6697_v12, %v1927_v47  ;;  %v7823_v62 = vpop.eup %7822  ;;  %v9175_v12 = vld [vmem:[%s10558_s2 + $0x80] ss:$16 sps:$4 sm:$0xff]   ;;  %v9194_v40 = vld [vmem:[%s10558_s2 + $0xac] ss:$16 sps:$4 sm:$0xff]  }
 0x33a   :  { %v1932_v59 = vadd.f32 %v6698_v54, %v1928_v1  ;;  %v9199_v47 = vld [vmem:[%s10558_s2 + $0xa0] ss:$16 sps:$4 sm:$0xff]   ;;  %v9204_v1 = vld [vmem:[%s10558_s2 + $0xa8] ss:$16 sps:$4 sm:$0xff]   ;;  %v9213_v48 = vld [vmem:[%s10558_s2 + $0xc4] ss:$16 sps:$4 sm:$0xff]  }
 0x33b   :  { %7824 = vtanh.f32 %v1637_v52  ;;  %1640 = vst [vmem:[#allocation3] sm:$0xf] %v1637_v52  ;;  %v6731_v55 = vmul.f32 -1.442695, %v1931_v53  ;;  %v1940_v56 = vrot.slane %v1931_v53, 4 }
 0x33c   :  { %v1950_v60 = vrot.slane %v1932_v59, 4  ;;  %v9218_v49 = vld [vmem:[%s10558_s2 + $0xcc] ss:$16 sps:$4 sm:$0xff]   ;;  %v9223_v50 = vld [vmem:[%s10558_s2 + $0xc0] ss:$16 sps:$4 sm:$0xff]  }
 0x33d   :  { %7826 = vpow2.f32 %v6731_v55  ;;  %v6732_v58 = vmul.f32 -1.442695, %v1940_v56  ;;  %v9228_v51 = vld [vmem:[%s10558_s2 + $0xc8] ss:$16 sps:$4 sm:$0xff]   ;;  %v9237_v52 = vld [vmem:[%s10558_s2 + $0xe4] ss:$16 sps:$4 sm:$0xff]  }
 0x33e   :  { %v6733_v2 = vmul.f32 -1.442695, %v1950_v60  ;;  %v9242_v53 = vld [vmem:[%s10558_s2 + $0xec] ss:$16 sps:$4 sm:$0xff]   ;;  %v9247_v54 = vld [vmem:[%s10558_s2 + $0xe0] ss:$16 sps:$4 sm:$0xff]  }
 0x33f   :  { %7828 = vpow2.f32 %v6732_v58  ;;  %v9252_v55 = vld [vmem:[%s10558_s2 + $0xe8] ss:$16 sps:$4 sm:$0xff]   ;;  %v9261_v56 = vld [vmem:[%s10559_s3 + $0x4] ss:$16 sps:$4 sm:$0xff]   ;;  %v9266_v58 = vld [vmem:[%s10559_s3 + $0xc] ss:$16 sps:$4 sm:$0xff]  }
 0x340   :  { %7830 = vtanh.f32 %v1932_v59 }
 0x341   :  { %7832 = vpow2.f32 %v6733_v2 }
 0x345   :  { %v7825_v63 = vpop.eup %7824 }
 0x346   :  { %v1639_v35 = vmul.f32 %v7825_v63, %v7823_v62  ;;  %v6735_v62 = vld [vmem:[%s10560_s0 + $0x30] sm:$0xff] }
 0x347   :  { %v7827_v38 = vpop.eup %7826 }
 0x348   :  { %1641 = vst [vmem:[#allocation2] sm:$0xf] %v1639_v35  ;;  %6696 = vst [vmem:[%s10562_s4 + $0x8] sm:$0xf] %v1639_v35  ;;  %v1936_v39 = vadd.f32 1.0, %v7827_v38 }
 0x349   :  { %v7829_v57 = vpop.eup %7828 }
 0x34a   :  { %7834 = vrcp.f32 %v1936_v39  ;;  %v1945_v31 = vadd.f32 1.0, %v7829_v57  ;;  %v7831_v4 = vpop.eup %7830 }
 0x34b   :  { %v7833_v5 = vpop.eup %7832 }
 0x34c   :  { %7836 = vrcp.f32 %v1945_v31  ;;  %v1955_v9 = vadd.f32 1.0, %v7833_v5 }
 0x34e   :  { %7838 = vrcp.f32 %v1955_v9 }
 0x34f   :  { %v1971_v0 = vld [vmem:[#allocation2] sm:$0xf] }
 0x350   :  { %v1972_v3 = vpack.c.bf16 %v1971_v0, %v1971_v0 }
 0x352   :  { %2198 = vmatmul.mubr.bf16.vlgmr.msra.gmra.mrb[24].mxu0 %v1972_v3  ;;  %2239 = vmatmul.mubr.bf16.vlgmr.msra.gmra.mrb[24].mxu1 %v1972_v3 }
 0x353   :  { %2490 = vmatpush1.bf16.msra.mxu0 %v8796_v15  ;;  %2531 = vmatpush1.bf16.msra.mxu1 %v8801_v16 }
 0x354   :  { %v7835_v6 = vpop.eup %7834  ;;  %2491 = vmatprep.subr.bf16.mxu0 %v8806_v18  ;;  %2532 = vmatprep.subr.bf16.mxu1 %v8811_v19 }
 0x355   :  { %v1960_v7 = vmul.f32 %v7835_v6, %v7831_v4  ;;  %2521 = vmatprep.mubr.bf16.mxu0 %v10584_v61  ;;  %2562 = vmatprep.mubr.bf16.mxu1 %v10584_v61  ;;  %v6736_v4 = vld [vmem:[%s10560_s0 + $0x38] sm:$0xff] }
 0x356   :  { %v7837_v8 = vpop.eup %7836 }
 0x357   :  { %v1959_v11 = vmul.f32 %v7837_v8, %v1958_v10  ;;  %2492 = vmatpush1.bf16.msra.mxu0 %v8818_v22  ;;  %2533 = vmatpush1.bf16.msra.mxu1 %v8823_v23  ;;  %v10591_v22 = vld [vmem:[#allocation4_spill] sm:$0xff]  ;;  %v10592_v23 = vld [vmem:[#allocation5_spill] sm:$0xff] }
 0x358   :  { %2493 = vmatprep.subr.bf16.mxu0 %v8830_v25  ;;  %2534 = vmatprep.subr.bf16.mxu1 %v8835_v26  ;;  %v7839_v16 = vpop.eup %7838  ;;  %v10593_v25 = vld [vmem:[#allocation6_spill] sm:$0xff] }
 0x359   :  { %v1961_v15 = vadd.f32 %v1960_v7, %v1959_v11 }
 0x35b   :  { %7840 = vtanh.f32 %v1961_v15  ;;  %1964 = vst [vmem:[#allocation3 + $0x4] sm:$0xf] %v1961_v15  ;;  %2494 = vmatpush1.bf16.msra.mxu0 %v8844_v33  ;;  %2535 = vmatpush1.bf16.msra.mxu1 %v8849_v34  ;;  %v9069_v34 = vld [vmem:[%s10558_s2 + $0x4] ss:$16 sps:$4 sm:$0xff]  }
 0x35c   :  { %2495 = vmatprep.subr.bf16.mxu0 %v8856_v36  ;;  %2536 = vmatprep.subr.bf16.mxu1 %v8861_v37  ;;  %v9074_v36 = vld [vmem:[%s10558_s2 + $0xc] ss:$16 sps:$4 sm:$0xff]   ;;  %v9079_v37 = vld [vmem:[%s10558_s2] ss:$16 sps:$4 sm:$0xff]  }
 0x35f   :  { %2496 = vmatpush1.bf16.msra.mxu0 %v8868_v41  ;;  %2537 = vmatpush1.bf16.msra.mxu1 %v8873_v42  ;;  %v9084_v41 = vld [vmem:[%s10558_s2 + $0x8] ss:$16 sps:$4 sm:$0xff]   ;;  %v9093_v42 = vld [vmem:[%s10558_s2 + $0x24] ss:$16 sps:$4 sm:$0xff]  }
 0x360   :  { %2497 = vmatprep.subr.bf16.mxu0 %v8880_v43  ;;  %2538 = vmatprep.subr.bf16.mxu1 %v8885_v44  ;;  %v9098_v43 = vld [vmem:[%s10558_s2 + $0x2c] ss:$16 sps:$4 sm:$0xff]   ;;  %v9103_v44 = vld [vmem:[%s10558_s2 + $0x20] ss:$16 sps:$4 sm:$0xff]  }
 0x363   :  { %2498 = vmatpush1.bf16.msra.mxu0 %v8892_v45  ;;  %2539 = vmatpush1.bf16.msra.mxu1 %v8897_v46  ;;  %v9108_v45 = vld [vmem:[%s10558_s2 + $0x28] ss:$16 sps:$4 sm:$0xff]   ;;  %v9117_v46 = vld [vmem:[%s10558_s2 + $0x44] ss:$16 sps:$4 sm:$0xff]  }
 0x364   :  { %2499 = vmatprep.subr.bf16.mxu0 %v8904_v14  ;;  %2540 = vmatprep.subr.bf16.mxu1 %v8909_v17  ;;  %v9122_v14 = vld [vmem:[%s10558_s2 + $0x40] ss:$16 sps:$4 sm:$0xff]   ;;  %v9127_v17 = vld [vmem:[%s10558_s2 + $0x48] ss:$16 sps:$4 sm:$0xff]  }
 0x365   :  { %v7841_v18 = vpop.eup %7840 }
 0x366   :  { %v1963_v19 = vmul.f32 %v7841_v18, %v7839_v16 }
 0x367   :  { %2500 = vmatpush1.bf16.msra.mxu0 %v8916_v20  ;;  %2541 = vmatpush1.bf16.msra.mxu1 %v8921_v21  ;;  %v9132_v20 = vld [vmem:[%s10558_s2 + $0x4c] ss:$16 sps:$4 sm:$0xff]   ;;  %v9141_v21 = vld [vmem:[%s10558_s2 + $0x64] ss:$16 sps:$4 sm:$0xff]  }
 0x368   :  { %1965 = vst [vmem:[#allocation2 + $0x4] sm:$0xf] %v1963_v19  ;;  %6734 = vst [vmem:[%s10563_s5 + $0x1c] sm:$0xf] %v1963_v19  ;;  %2501 = vmatprep.subr.bf16.mxu0 %v8928_v27  ;;  %2542 = vmatprep.subr.bf16.mxu1 %v10591_v22  ;;  %v9146_v27 = vld [vmem:[%s10558_s2 + $0x6c] ss:$16 sps:$4 sm:$0xff]  }
 0x36b   :  { %2502 = vmatpush1.bf16.msra.mxu0 %v10592_v23  ;;  %2543 = vmatpush1.bf16.msra.mxu1 %v10593_v25 }
 0x36c   :  { %2503 = vmatprep.subr.bf16.mxu0 %v8955_v24  ;;  %2544 = vmatprep.subr.bf16.mxu1 %v8960_v29  ;;  %v9156_v24 = vld [vmem:[%s10558_s2 + $0x68] ss:$16 sps:$4 sm:$0xff]   ;;  %v9165_v29 = vld [vmem:[%s10558_s2 + $0x84] ss:$16 sps:$4 sm:$0xff]  }
 0x36f   :  { %2504 = vmatpush1.bf16.msra.mxu0 %v8967_v30  ;;  %2545 = vmatpush1.bf16.msra.mxu1 %v8972_v28  ;;  %v2295_v26 = vld [vmem:[#allocation2 + $0x4] sm:$0xf]  ;;  %v9151_v28 = vld [vmem:[%s10558_s2 + $0x60] ss:$16 sps:$4 sm:$0xff]   ;;  %v9170_v30 = vld [vmem:[%s10558_s2 + $0x8c] ss:$16 sps:$4 sm:$0xff]  }
 0x370   :  { %v2296_v33 = vpack.c.bf16 %v2295_v26, %v2295_v26  ;;  %2813 = vmatprep.subr.bf16.mxu0 %v9069_v34  ;;  %2854 = vmatprep.subr.bf16.mxu1 %v9074_v36 }
 0x372   :  { %2522 = vmatmul.mubr.bf16.vlgmr.msra.gmra.mrb[28].mxu0 %v2296_v33  ;;  %2563 = vmatmul.mubr.bf16.vlgmr.msra.gmra.mrb[28].mxu1 %v2296_v33 }
 0x373   :  { %2845 = vmatprep.mubr.bf16.mxu0 %v10584_v61  ;;  %2886 = vmatprep.mubr.bf16.mxu1 %v10584_v61 }
 0x374   :  { %2814 = vmatpush1.bf16.msra.mxu0 %v9079_v37  ;;  %2855 = vmatpush1.bf16.msra.mxu1 %v9084_v41 }
 0x375   :  { %2815 = vmatprep.subr.bf16.mxu0 %v9093_v42  ;;  %2856 = vmatprep.subr.bf16.mxu1 %v9098_v43 }
 0x378   :  { %2816 = vmatpush1.bf16.msra.mxu0 %v9103_v44  ;;  %2857 = vmatpush1.bf16.msra.mxu1 %v9108_v45 }
 0x379   :  { %2817 = vmatprep.subr.bf16.mxu0 %v9117_v46  ;;  %2858 = vmatprep.subr.bf16.mxu1 %v9132_v20 }
 0x37c   :  { %2818 = vmatpush1.bf16.msra.mxu0 %v9122_v14  ;;  %2859 = vmatpush1.bf16.msra.mxu1 %v9127_v17 }
 0x37d   :  { %2819 = vmatprep.subr.bf16.mxu0 %v9141_v21  ;;  %2860 = vmatprep.subr.bf16.mxu1 %v9146_v27 }
 0x380   :  { %2820 = vmatpush1.bf16.msra.mxu0 %v9151_v28  ;;  %2861 = vmatpush1.bf16.msra.mxu1 %v9156_v24 }
 0x381   :  { %2821 = vmatprep.subr.bf16.mxu0 %v9165_v29  ;;  %2862 = vmatprep.subr.bf16.mxu1 %v9170_v30 }
 0x384   :  { %2822 = vmatpush1.bf16.msra.mxu0 %v9175_v12  ;;  %2863 = vmatpush1.bf16.msra.mxu1 %v9180_v13 }
 0x385   :  { %2823 = vmatprep.subr.bf16.mxu0 %v9189_v32  ;;  %2864 = vmatprep.subr.bf16.mxu1 %v9194_v40 }
 0x388   :  { %2824 = vmatpush1.bf16.msra.mxu0 %v9199_v47  ;;  %2865 = vmatpush1.bf16.msra.mxu1 %v9204_v1 }
 0x389   :  { %2825 = vmatprep.subr.bf16.mxu0 %v9213_v48  ;;  %2866 = vmatprep.subr.bf16.mxu1 %v9218_v49 }
 0x38c   :  { %2826 = vmatpush1.bf16.msra.mxu0 %v9223_v50  ;;  %2867 = vmatpush1.bf16.msra.mxu1 %v9228_v51 }
 0x38d   :  { %2827 = vmatprep.subr.bf16.mxu0 %v9237_v52  ;;  %2868 = vmatprep.subr.bf16.mxu1 %v9242_v53 }
 0x390   :  { %2828 = vmatpush1.bf16.msra.mxu0 %v9247_v54  ;;  %2869 = vmatpush1.bf16.msra.mxu1 %v9252_v55 }
 0x391   :  { %3137 = vmatprep.subr.bf16.mxu0 %v9261_v56  ;;  %3178 = vmatprep.subr.bf16.mxu1 %v9266_v58 }
 0x425   :  { %v2199_v59 = vpop.f32.mrb[24].mxu0  ;;  %v2240_v60 = vpop.f32.mrb[24].mxu1 }
 0x426   :  { %v2201_v63 = vpop.f32.mrb[25].mxu0  ;;  %v2242_v2 = vpop.f32.mrb[25].mxu1 }
 0x427   :  { %v2251_v35 = vcombine.low %v2199_v59, %v2201_v63  ;;  %v2252_v38 = vcombine.low %v2240_v60, %v2242_v2  ;;  %v2203_v39 = vpop.f32.mrb[26].mxu0  ;;  %v2244_v57 = vpop.f32.mrb[26].mxu1  ;;  %v6773_v63 = vld [vmem:[%s10561_s1 + $0x60] sm:$0xff] }
 0x428   :  { %v2204_v31 = vpop.f32.mrb[27].mxu0  ;;  %v2245_v0 = vpop.f32.mrb[27].mxu1 }
 0x429   :  { %v2255_v3 = vadd.f32 %v6735_v62, %v2251_v35  ;;  %v2256_v8 = vadd.f32 %v6736_v4, %v2252_v38  ;;  %v2282_v62 = vld [vmem:[#allocation3] sm:$0xf] }
 0x42b   :  { %v6769_v5 = vmul.f32 -1.442695, %v2255_v3  ;;  %v2264_v6 = vrot.slane %v2255_v3, 4  ;;  %v2274_v9 = vrot.slane %v2256_v8, 4 }
 0x42d   :  { %7842 = vpow2.f32 %v6769_v5  ;;  %v6770_v7 = vmul.f32 -1.442695, %v2264_v6  ;;  %v6771_v10 = vmul.f32 -1.442695, %v2274_v9 }
 0x42f   :  { %7844 = vpow2.f32 %v6770_v7  ;;  %v6774_v7 = vld [vmem:[%s10561_s1 + $0x68] sm:$0xff] }
 0x430   :  { %7846 = vtanh.f32 %v2256_v8 }
 0x431   :  { %7848 = vpow2.f32 %v6771_v10 }
 0x437   :  { %v7843_v11 = vpop.eup %7842 }
 0x438   :  { %v2260_v15 = vadd.f32 1.0, %v7843_v11 }
 0x439   :  { %v7845_v16 = vpop.eup %7844 }
 0x43a   :  { %7850 = vrcp.f32 %v2260_v15  ;;  %v2269_v18 = vadd.f32 1.0, %v7845_v16  ;;  %v7847_v19 = vpop.eup %7846 }
 0x43b   :  { %v7849_v22 = vpop.eup %7848 }
 0x43c   :  { %7852 = vrcp.f32 %v2269_v18  ;;  %v2279_v60 = vadd.f32 1.0, %v7849_v22 }
 0x43e   :  { %7854 = vrcp.f32 %v2279_v60  ;;  %v9288_v60 = vld [vmem:[%s10559_s3] ss:$16 sps:$4 sm:$0xff]  }
 0x444   :  { %v7851_v23 = vpop.eup %7850 }
 0x445   :  { %v2284_v25 = vmul.f32 %v7851_v23, %v7847_v19  ;;  %v2523_v26 = vpop.f32.mrb[28].mxu0  ;;  %v2564_v33 = vpop.f32.mrb[28].mxu1 }
 0x446   :  { %v7853_v59 = vpop.eup %7852  ;;  %v2525_v2 = vpop.f32.mrb[29].mxu0 }
 0x447   :  { %v2566_v35 = vpop.f32.mrb[29].mxu1  ;;  %v2283_v38 = vmul.f32 %v7853_v59, %v2282_v62  ;;  %v2575_v39 = vcombine.low %v2523_v26, %v2525_v2  ;;  %v2527_v31 = vpop.f32.mrb[30].mxu0  ;;  %v9293_v62 = vld [vmem:[%s10559_s3 + $0x8] ss:$16 sps:$4 sm:$0xff]   ;;  %v9298_v2 = vld [vmem:[%s10559_s3 + $0x24] ss:$16 sps:$4 sm:$0xff]  }
 0x448   :  { %v2576_v57 = vcombine.low %v2564_v33, %v2566_v35  ;;  %v2568_v0 = vpop.f32.mrb[30].mxu1  ;;  %v2528_v3 = vpop.f32.mrb[31].mxu0  ;;  %v9303_v35 = vld [vmem:[%s10559_s3 + $0x2c] ss:$16 sps:$4 sm:$0xff]   ;;  %v9315_v31 = vld [vmem:[%s10559_s3 + $0x28] ss:$16 sps:$4 sm:$0xff]  }
 0x449   :  { %v2569_v4 = vpop.f32.mrb[31].mxu1  ;;  %v2285_v5 = vadd.f32 %v2284_v25, %v2283_v38  ;;  %v2579_v6 = vadd.f32 %v6773_v63, %v2575_v39  ;;  %v7855_v16 = vpop.eup %7854  ;;  %v9322_v3 = vld [vmem:[%s10559_s3 + $0x44] ss:$16 sps:$4 sm:$0xff]  }
 0x44a   :  { %v2580_v11 = vadd.f32 %v6774_v7, %v2576_v57  ;;  %v9310_v57 = vld [vmem:[%s10559_s3 + $0x20] ss:$16 sps:$4 sm:$0xff]   ;;  %v9327_v4 = vld [vmem:[%s10559_s3 + $0x4c] ss:$16 sps:$4 sm:$0xff]  }
 0x44b   :  { %7856 = vtanh.f32 %v2285_v5  ;;  %2288 = vst [vmem:[#allocation3] sm:$0xf] %v2285_v5  ;;  %v6807_v8 = vmul.f32 -1.442695, %v2579_v6  ;;  %v2588_v9 = vrot.slane %v2579_v6, 4 }
 0x44c   :  { %v2598_v15 = vrot.slane %v2580_v11, 4 }
 0x44d   :  { %7858 = vpow2.f32 %v6807_v8  ;;  %v6808_v10 = vmul.f32 -1.442695, %v2588_v9  ;;  %v2606_v8 = vld [vmem:[#allocation3 + $0x4] sm:$0xf] }
 0x44e   :  { %v6809_v19 = vmul.f32 -1.442695, %v2598_v15  ;;  %v9348_v15 = vld [vmem:[%s10559_s3 + $0x64] ss:$16 sps:$4 sm:$0xff]  }
 0x44f   :  { %7860 = vpow2.f32 %v6808_v10  ;;  %v9336_v10 = vld [vmem:[%s10559_s3 + $0x40] ss:$16 sps:$4 sm:$0xff]  }
 0x450   :  { %7862 = vtanh.f32 %v2580_v11  ;;  %v9341_v11 = vld [vmem:[%s10559_s3 + $0x48] ss:$16 sps:$4 sm:$0xff]  }
 0x451   :  { %7864 = vpow2.f32 %v6809_v19  ;;  %v9360_v19 = vld [vmem:[%s10559_s3 + $0x60] ss:$16 sps:$4 sm:$0xff]  }
 0x455   :  { %v7857_v18 = vpop.eup %7856 }
 0x456   :  { %v2287_v22 = vmul.f32 %v7857_v18, %v7855_v16  ;;  %v9353_v16 = vld [vmem:[%s10559_s3 + $0x6c] ss:$16 sps:$4 sm:$0xff]  }
 0x457   :  { %v7859_v23 = vpop.eup %7858 }
 0x458   :  { %2289 = vst [vmem:[#allocation2] sm:$0xf] %v2287_v22  ;;  %6772 = vst [vmem:[%s10562_s4 + $0xc] sm:$0xf] %v2287_v22  ;;  %v2584_v25 = vadd.f32 1.0, %v7859_v23 }
 0x459   :  { %v7861_v26 = vpop.eup %7860  ;;  %v9365_v22 = vld [vmem:[%s10559_s3 + $0x68] ss:$16 sps:$4 sm:$0xff]   ;;  %v9372_v23 = vld [vmem:[%s10559_s3 + $0x84] ss:$16 sps:$4 sm:$0xff]  }
 0x45a   :  { %7866 = vrcp.f32 %v2584_v25  ;;  %v2593_v33 = vadd.f32 1.0, %v7861_v26  ;;  %v7863_v38 = vpop.eup %7862  ;;  %v9377_v25 = vld [vmem:[%s10559_s3 + $0x8c] ss:$16 sps:$4 sm:$0xff]   ;;  %v9384_v26 = vld [vmem:[%s10559_s3 + $0x80] ss:$16 sps:$4 sm:$0xff]  }
 0x45b   :  { %v7865_v39 = vpop.eup %7864 }
 0x45c   :  { %7868 = vrcp.f32 %v2593_v33  ;;  %v2603_v7 = vadd.f32 1.0, %v7865_v39  ;;  %v9389_v33 = vld [vmem:[%s10559_s3 + $0x88] ss:$16 sps:$4 sm:$0xff]  }
 0x45d   :  { %v9413_v39 = vld [vmem:[%s10559_s3 + $0xa8] ss:$16 sps:$4 sm:$0xff]  }
 0x45e   :  { %7870 = vrcp.f32 %v2603_v7 }
 0x45f   :  { %v2619_v59 = vld [vmem:[#allocation2] sm:$0xf] }
 0x460   :  { %v2620_v63 = vpack.c.bf16 %v2619_v59, %v2619_v59  ;;  %v9396_v59 = vld [vmem:[%s10559_s3 + $0xa4] ss:$16 sps:$4 sm:$0xff]  }
 0x462   :  { %2846 = vmatmul.mubr.bf16.vlgmr.msra.gmra.mrb[32].mxu0 %v2620_v63  ;;  %2887 = vmatmul.mubr.bf16.vlgmr.msra.gmra.mrb[32].mxu1 %v2620_v63  ;;  %v9401_v63 = vld [vmem:[%s10559_s3 + $0xac] ss:$16 sps:$4 sm:$0xff]  }
 0x463   :  { %3138 = vmatpush1.bf16.msra.mxu0 %v9288_v60  ;;  %3179 = vmatpush1.bf16.msra.mxu1 %v9293_v62 }
 0x464   :  { %v7867_v0 = vpop.eup %7866  ;;  %3139 = vmatprep.subr.bf16.mxu0 %v9298_v2  ;;  %3180 = vmatprep.subr.bf16.mxu1 %v9303_v35 }
 0x465   :  { %v2608_v5 = vmul.f32 %v7867_v0, %v7863_v38  ;;  %3169 = vmatprep.mubr.bf16.mxu0 %v10584_v61  ;;  %3210 = vmatprep.mubr.bf16.mxu1 %v10584_v61  ;;  %v9408_v38 = vld [vmem:[%s10559_s3 + $0xa0] ss:$16 sps:$4 sm:$0xff]  }
 0x466   :  { %v7869_v6 = vpop.eup %7868 }
 0x467   :  { %v2607_v9 = vmul.f32 %v7869_v6, %v2606_v8  ;;  %3140 = vmatpush1.bf16.msra.mxu0 %v9310_v57  ;;  %3181 = vmatpush1.bf16.msra.mxu1 %v9315_v31  ;;  %v9425_v6 = vld [vmem:[%s10559_s3 + $0xcc] ss:$16 sps:$4 sm:$0xff]  }
 0x468   :  { %3141 = vmatprep.subr.bf16.mxu0 %v9322_v3  ;;  %3182 = vmatprep.subr.bf16.mxu1 %v9327_v4  ;;  %v7871_v0 = vpop.eup %7870  ;;  %10594 = vst [vmem:[#allocation4_spill] sm:$0xff] %v9425_v6 }
 0x469   :  { %v2609_v18 = vadd.f32 %v2608_v5, %v2607_v9  ;;  %v9420_v5 = vld [vmem:[%s10559_s3 + $0xc4] ss:$16 sps:$4 sm:$0xff]   ;;  %v9432_v9 = vld [vmem:[%s10559_s3 + $0xc0] ss:$16 sps:$4 sm:$0xff]  }
 0x46a   :  { %10595 = vst [vmem:[#allocation5_spill] sm:$0xff] %v9432_v9 }
 0x46b   :  { %7872 = vtanh.f32 %v2609_v18  ;;  %2612 = vst [vmem:[#allocation3 + $0x4] sm:$0xf] %v2609_v18  ;;  %3142 = vmatpush1.bf16.msra.mxu0 %v9336_v10  ;;  %3183 = vmatpush1.bf16.msra.mxu1 %v9341_v11  ;;  %v9437_v18 = vld [vmem:[%s10559_s3 + $0xc8] ss:$16 sps:$4 sm:$0xff]  }
 0x46c   :  { %3143 = vmatprep.subr.bf16.mxu0 %v9348_v15  ;;  %3184 = vmatprep.subr.bf16.mxu1 %v9353_v16  ;;  %10596 = vst [vmem:[#allocation6_spill] sm:$0xff] %v9437_v18 }
 0x46f   :  { %3144 = vmatpush1.bf16.msra.mxu0 %v9360_v19  ;;  %3185 = vmatpush1.bf16.msra.mxu1 %v9365_v22 }
 0x470   :  { %3145 = vmatprep.subr.bf16.mxu0 %v9372_v23  ;;  %3186 = vmatprep.subr.bf16.mxu1 %v9377_v25 }
 0x473   :  { %3146 = vmatpush1.bf16.msra.mxu0 %v9384_v26  ;;  %3187 = vmatpush1.bf16.msra.mxu1 %v9389_v33 }
 0x474   :  { %3147 = vmatprep.subr.bf16.mxu0 %v9396_v59  ;;  %3188 = vmatprep.subr.bf16.mxu1 %v9401_v63 }
 0x475   :  { %v7873_v7 = vpop.eup %7872 }
 0x476   :  { %v2611_v8 = vmul.f32 %v7873_v7, %v7871_v0  ;;  %v9447_v0 = vld [vmem:[%s10559_s3 + $0xe4] ss:$16 sps:$4 sm:$0xff]   ;;  %v9452_v7 = vld [vmem:[%s10559_s3 + $0xec] ss:$16 sps:$4 sm:$0xff]  }
 0x477   :  { %3148 = vmatpush1.bf16.msra.mxu0 %v9408_v38  ;;  %3189 = vmatpush1.bf16.msra.mxu1 %v9413_v39 }
 0x478   :  { %2613 = vst [vmem:[#allocation2 + $0x4] sm:$0xf] %v2611_v8  ;;  %6810 = vst [vmem:[%s10563_s5 + $0x18] sm:$0xf] %v2611_v8  ;;  %3149 = vmatprep.subr.bf16.mxu0 %v9420_v5  ;;  %3190 = vmatprep.subr.bf16.mxu1 %v9425_v6  ;;  %v9459_v8 = vld [vmem:[%s10559_s3 + $0xe0] ss:$16 sps:$4 sm:$0xff]  }
 0x479   :  { %v9464_v6 = vld [vmem:[%s10559_s3 + $0xe8] ss:$16 sps:$4 sm:$0xff]  }
 0x47b   :  { %3150 = vmatpush1.bf16.msra.mxu0 %v9432_v9  ;;  %3191 = vmatpush1.bf16.msra.mxu1 %v9437_v18 }
 0x47c   :  { %3151 = vmatprep.subr.bf16.mxu0 %v9447_v0  ;;  %3192 = vmatprep.subr.bf16.mxu1 %v9452_v7 }
 0x47f   :  { %3152 = vmatpush1.bf16.msra.mxu0 %v9459_v8  ;;  %3193 = vmatpush1.bf16.msra.mxu1 %v9464_v6  ;;  %v2943_v9 = vld [vmem:[#allocation2 + $0x4] sm:$0xf] }
 0x480   :  { %v2944_v18 = vpack.c.bf16 %v2943_v9, %v2943_v9  ;;  %3461 = vmatprep.subr.bf16.mxu0 %v9069_v34  ;;  %3502 = vmatprep.subr.bf16.mxu1 %v9074_v36 }
 0x482   :  { %3170 = vmatmul.mubr.bf16.vlgmr.msra.gmra.mrb[36].mxu0 %v2944_v18  ;;  %3211 = vmatmul.mubr.bf16.vlgmr.msra.gmra.mrb[36].mxu1 %v2944_v18 }
 0x483   :  { %3462 = vmatpush1.bf16.msra.mxu0 %v9079_v37  ;;  %3503 = vmatpush1.bf16.msra.mxu1 %v9084_v41  ;;  %v6811_v37 = vld [vmem:[%s10560_s0 + $0x40] sm:$0xff] }
 0x484   :  { %3463 = vmatprep.subr.bf16.mxu0 %v9093_v42  ;;  %3504 = vmatprep.subr.bf16.mxu1 %v9098_v43 }
 0x485   :  { %3493 = vmatprep.mubr.bf16.mxu0 %v10584_v61  ;;  %3534 = vmatprep.mubr.bf16.mxu1 %v10584_v61 }
 0x487   :  { %3464 = vmatpush1.bf16.msra.mxu0 %v9103_v44  ;;  %3505 = vmatpush1.bf16.msra.mxu1 %v9108_v45 }
 0x488   :  { %3465 = vmatprep.subr.bf16.mxu0 %v9117_v46  ;;  %3506 = vmatprep.subr.bf16.mxu1 %v9132_v20 }
 0x48b   :  { %3466 = vmatpush1.bf16.msra.mxu0 %v9122_v14  ;;  %3507 = vmatpush1.bf16.msra.mxu1 %v9127_v17 }
 0x48c   :  { %3467 = vmatprep.subr.bf16.mxu0 %v9141_v21  ;;  %3508 = vmatprep.subr.bf16.mxu1 %v9146_v27  ;;  %v6812_v21 = vld [vmem:[%s10560_s0 + $0x48] sm:$0xff] }
 0x48f   :  { %3468 = vmatpush1.bf16.msra.mxu0 %v9151_v28  ;;  %3509 = vmatpush1.bf16.msra.mxu1 %v9156_v24 }
 0x490   :  { %3469 = vmatprep.subr.bf16.mxu0 %v9165_v29  ;;  %3510 = vmatprep.subr.bf16.mxu1 %v9170_v30 }
 0x493   :  { %3470 = vmatpush1.bf16.msra.mxu0 %v9175_v12  ;;  %3511 = vmatpush1.bf16.msra.mxu1 %v9180_v13 }
 0x494   :  { %3471 = vmatprep.subr.bf16.mxu0 %v9189_v32  ;;  %3512 = vmatprep.subr.bf16.mxu1 %v9194_v40 }
 0x497   :  { %3472 = vmatpush1.bf16.msra.mxu0 %v9199_v47  ;;  %3513 = vmatpush1.bf16.msra.mxu1 %v9204_v1 }
 0x498   :  { %3473 = vmatprep.subr.bf16.mxu0 %v9213_v48  ;;  %3514 = vmatprep.subr.bf16.mxu1 %v9218_v49 }
 0x49b   :  { %3474 = vmatpush1.bf16.msra.mxu0 %v9223_v50  ;;  %3515 = vmatpush1.bf16.msra.mxu1 %v9228_v51 }
 0x49c   :  { %3475 = vmatprep.subr.bf16.mxu0 %v9237_v52  ;;  %3516 = vmatprep.subr.bf16.mxu1 %v9242_v53 }
 0x49f   :  { %3476 = vmatpush1.bf16.msra.mxu0 %v9247_v54  ;;  %3517 = vmatpush1.bf16.msra.mxu1 %v9252_v55  ;;  %v2930_v55 = vld [vmem:[#allocation3] sm:$0xf] }
 0x4a0   :  { %3785 = vmatprep.subr.bf16.mxu0 %v9261_v56  ;;  %3826 = vmatprep.subr.bf16.mxu1 %v9266_v58  ;;  %v6849_v56 = vld [vmem:[%s10561_s1 + $0x50] sm:$0xff] }
 0x535   :  { %v2847_v34 = vpop.f32.mrb[32].mxu0  ;;  %v2888_v36 = vpop.f32.mrb[32].mxu1 }
 0x536   :  { %v2849_v41 = vpop.f32.mrb[33].mxu0  ;;  %v2890_v42 = vpop.f32.mrb[33].mxu1 }
 0x537   :  { %v2899_v43 = vcombine.low %v2847_v34, %v2849_v41  ;;  %v2900_v44 = vcombine.low %v2888_v36, %v2890_v42  ;;  %v2851_v45 = vpop.f32.mrb[34].mxu0  ;;  %v2892_v46 = vpop.f32.mrb[34].mxu1 }
 0x538   :  { %v2852_v14 = vpop.f32.mrb[35].mxu0  ;;  %v2893_v17 = vpop.f32.mrb[35].mxu1  ;;  %v6850_v46 = vld [vmem:[%s10561_s1 + $0x58] sm:$0xff] }
 0x539   :  { %v2903_v20 = vadd.f32 %v6811_v37, %v2899_v43  ;;  %v2904_v29 = vadd.f32 %v6812_v21, %v2900_v44 }
 0x53b   :  { %v6845_v27 = vmul.f32 -1.442695, %v2903_v20  ;;  %v2912_v28 = vrot.slane %v2903_v20, 4  ;;  %v2922_v30 = vrot.slane %v2904_v29, 4 }
 0x53d   :  { %7874 = vpow2.f32 %v6845_v27  ;;  %v6846_v24 = vmul.f32 -1.442695, %v2912_v28  ;;  %v6847_v12 = vmul.f32 -1.442695, %v2922_v30 }
 0x53f   :  { %7876 = vpow2.f32 %v6846_v24 }
 0x540   :  { %7878 = vtanh.f32 %v2904_v29 }
 0x541   :  { %7880 = vpow2.f32 %v6847_v12 }
 0x547   :  { %v7875_v13 = vpop.eup %7874 }
 0x548   :  { %v2908_v32 = vadd.f32 1.0, %v7875_v13 }
 0x549   :  { %v7877_v40 = vpop.eup %7876 }
 0x54a   :  { %7882 = vrcp.f32 %v2908_v32  ;;  %v2917_v47 = vadd.f32 1.0, %v7877_v40  ;;  %v7879_v1 = vpop.eup %7878 }
 0x54b   :  { %v7881_v48 = vpop.eup %7880 }
 0x54c   :  { %7884 = vrcp.f32 %v2917_v47  ;;  %v2927_v54 = vadd.f32 1.0, %v7881_v48 }
 0x54e   :  { %7886 = vrcp.f32 %v2927_v54  ;;  %v3254_v54 = vld [vmem:[#allocation3 + $0x4] sm:$0xf] }
 0x554   :  { %v7883_v49 = vpop.eup %7882 }
 0x555   :  { %v2932_v50 = vmul.f32 %v7883_v49, %v7879_v1  ;;  %v3171_v51 = vpop.f32.mrb[36].mxu0  ;;  %v3212_v52 = vpop.f32.mrb[36].mxu1 }
 0x556   :  { %v7885_v53 = vpop.eup %7884  ;;  %v3173_v58 = vpop.f32.mrb[37].mxu0 }
 0x557   :  { %v3214_v9 = vpop.f32.mrb[37].mxu1  ;;  %v2931_v18 = vmul.f32 %v7885_v53, %v2930_v55  ;;  %v3223_v34 = vcombine.low %v3171_v51, %v3173_v58  ;;  %v3175_v37 = vpop.f32.mrb[38].mxu0  ;;  %v9672_v58 = vld [vmem:[%s10558_s2 + $0x88] ss:$16 sps:$4 sm:$0xff]  }
 0x558   :  { %v3224_v36 = vcombine.low %v3212_v52, %v3214_v9  ;;  %v3216_v41 = vpop.f32.mrb[38].mxu1  ;;  %v3176_v42 = vpop.f32.mrb[39].mxu0  ;;  %v9681_v9 = vld [vmem:[%s10558_s2 + $0xa4] ss:$16 sps:$4 sm:$0xff]  }
 0x559   :  { %v3217_v43 = vpop.f32.mrb[39].mxu1  ;;  %v2933_v44 = vadd.f32 %v2932_v50, %v2931_v18  ;;  %v3227_v45 = vadd.f32 %v6849_v56, %v3223_v34  ;;  %v7887_v28 = vpop.eup %7886  ;;  %v9667_v56 = vld [vmem:[%s10558_s2 + $0x80] ss:$16 sps:$4 sm:$0xff]   ;;  %v9686_v18 = vld [vmem:[%s10558_s2 + $0xac] ss:$16 sps:$4 sm:$0xff]  }
 0x55a   :  { %v3228_v21 = vadd.f32 %v6850_v46, %v3224_v36  ;;  %v9691_v34 = vld [vmem:[%s10558_s2 + $0xa0] ss:$16 sps:$4 sm:$0xff]   ;;  %v9696_v36 = vld [vmem:[%s10558_s2 + $0xa8] ss:$16 sps:$4 sm:$0xff]   ;;  %v9705_v37 = vld [vmem:[%s10558_s2 + $0xc4] ss:$16 sps:$4 sm:$0xff]  }
 0x55b   :  { %7888 = vtanh.f32 %v2933_v44  ;;  %2936 = vst [vmem:[#allocation3] sm:$0xf] %v2933_v44  ;;  %v6883_v14 = vmul.f32 -1.442695, %v3227_v45  ;;  %v3236_v17 = vrot.slane %v3227_v45, 4 }
 0x55c   :  { %v3246_v27 = vrot.slane %v3228_v21, 4  ;;  %v9710_v41 = vld [vmem:[%s10558_s2 + $0xcc] ss:$16 sps:$4 sm:$0xff]   ;;  %v9715_v42 = vld [vmem:[%s10558_s2 + $0xc0] ss:$16 sps:$4 sm:$0xff]  }
 0x55d   :  { %7890 = vpow2.f32 %v6883_v14  ;;  %v6884_v20 = vmul.f32 -1.442695, %v3236_v17  ;;  %v9720_v43 = vld [vmem:[%s10558_s2 + $0xc8] ss:$16 sps:$4 sm:$0xff]   ;;  %v9729_v44 = vld [vmem:[%s10558_s2 + $0xe4] ss:$16 sps:$4 sm:$0xff]  }
 0x55e   :  { %v6885_v29 = vmul.f32 -1.442695, %v3246_v27  ;;  %v9734_v45 = vld [vmem:[%s10558_s2 + $0xec] ss:$16 sps:$4 sm:$0xff]   ;;  %v9739_v46 = vld [vmem:[%s10558_s2 + $0xe0] ss:$16 sps:$4 sm:$0xff]  }
 0x55f   :  { %7892 = vpow2.f32 %v6884_v20  ;;  %v9744_v14 = vld [vmem:[%s10558_s2 + $0xe8] ss:$16 sps:$4 sm:$0xff]   ;;  %v9753_v17 = vld [vmem:[%s10559_s3 + $0x4] ss:$16 sps:$4 sm:$0xff]   ;;  %v9758_v20 = vld [vmem:[%s10559_s3 + $0xc] ss:$16 sps:$4 sm:$0xff]  }
 0x560   :  { %7894 = vtanh.f32 %v3228_v21 }
 0x561   :  { %7896 = vpow2.f32 %v6885_v29 }
 0x565   :  { %v7889_v24 = vpop.eup %7888 }
 0x566   :  { %v2935_v30 = vmul.f32 %v7889_v24, %v7887_v28  ;;  %v6887_v28 = vld [vmem:[%s10560_s0 + $0x50] sm:$0xff] }
 0x567   :  { %v7891_v12 = vpop.eup %7890 }
 0x568   :  { %2937 = vst [vmem:[#allocation2] sm:$0xf] %v2935_v30  ;;  %6848 = vst [vmem:[%s10562_s4 + $0x10] sm:$0xf] %v2935_v30  ;;  %v3232_v13 = vadd.f32 1.0, %v7891_v12 }
 0x569   :  { %v7893_v32 = vpop.eup %7892 }
 0x56a   :  { %7898 = vrcp.f32 %v3232_v13  ;;  %v3241_v40 = vadd.f32 1.0, %v7893_v32  ;;  %v7895_v48 = vpop.eup %7894 }
 0x56b   :  { %v7897_v49 = vpop.eup %7896 }
 0x56c   :  { %7900 = vrcp.f32 %v3241_v40  ;;  %v3251_v53 = vadd.f32 1.0, %v7897_v49 }
 0x56e   :  { %7902 = vrcp.f32 %v3251_v53 }
 0x56f   :  { %v3267_v47 = vld [vmem:[#allocation2] sm:$0xf] }
 0x570   :  { %v3268_v1 = vpack.c.bf16 %v3267_v47, %v3267_v47 }
 0x572   :  { %3494 = vmatmul.mubr.bf16.vlgmr.msra.gmra.mrb[40].mxu0 %v3268_v1  ;;  %3535 = vmatmul.mubr.bf16.vlgmr.msra.gmra.mrb[40].mxu1 %v3268_v1 }
 0x573   :  { %3786 = vmatpush1.bf16.msra.mxu0 %v9288_v60  ;;  %3827 = vmatpush1.bf16.msra.mxu1 %v9293_v62 }
 0x574   :  { %v7899_v50 = vpop.eup %7898  ;;  %3787 = vmatprep.subr.bf16.mxu0 %v9298_v2  ;;  %3828 = vmatprep.subr.bf16.mxu1 %v9303_v35 }
 0x575   :  { %v3256_v51 = vmul.f32 %v7899_v50, %v7895_v48  ;;  %3817 = vmatprep.mubr.bf16.mxu0 %v10584_v61  ;;  %3858 = vmatprep.mubr.bf16.mxu1 %v10584_v61  ;;  %v6888_v48 = vld [vmem:[%s10560_s0 + $0x58] sm:$0xff] }
 0x576   :  { %v7901_v52 = vpop.eup %7900 }
 0x577   :  { %v3255_v55 = vmul.f32 %v7901_v52, %v3254_v54  ;;  %3788 = vmatpush1.bf16.msra.mxu0 %v9310_v57  ;;  %3829 = vmatpush1.bf16.msra.mxu1 %v9315_v31  ;;  %v10597_v57 = vld [vmem:[#allocation4_spill] sm:$0xff]  ;;  %v10598_v31 = vld [vmem:[#allocation5_spill] sm:$0xff] }
 0x578   :  { %3789 = vmatprep.subr.bf16.mxu0 %v9322_v3  ;;  %3830 = vmatprep.subr.bf16.mxu1 %v9327_v4  ;;  %v7903_v62 = vpop.eup %7902  ;;  %v10599_v3 = vld [vmem:[#allocation6_spill] sm:$0xff] }
 0x579   :  { %v3257_v60 = vadd.f32 %v3256_v51, %v3255_v55 }
 0x57b   :  { %7904 = vtanh.f32 %v3257_v60  ;;  %3260 = vst [vmem:[#allocation3 + $0x4] sm:$0xf] %v3257_v60  ;;  %3790 = vmatpush1.bf16.msra.mxu0 %v9336_v10  ;;  %3831 = vmatpush1.bf16.msra.mxu1 %v9341_v11  ;;  %v9561_v11 = vld [vmem:[%s10558_s2 + $0x4] ss:$16 sps:$4 sm:$0xff]  }
 0x57c   :  { %3791 = vmatprep.subr.bf16.mxu0 %v9348_v15  ;;  %3832 = vmatprep.subr.bf16.mxu1 %v9353_v16  ;;  %v9566_v15 = vld [vmem:[%s10558_s2 + $0xc] ss:$16 sps:$4 sm:$0xff]   ;;  %v9571_v16 = vld [vmem:[%s10558_s2] ss:$16 sps:$4 sm:$0xff]  }
 0x57f   :  { %3792 = vmatpush1.bf16.msra.mxu0 %v9360_v19  ;;  %3833 = vmatpush1.bf16.msra.mxu1 %v9365_v22  ;;  %v9576_v19 = vld [vmem:[%s10558_s2 + $0x8] ss:$16 sps:$4 sm:$0xff]   ;;  %v9585_v22 = vld [vmem:[%s10558_s2 + $0x24] ss:$16 sps:$4 sm:$0xff]  }
 0x580   :  { %3793 = vmatprep.subr.bf16.mxu0 %v9372_v23  ;;  %3834 = vmatprep.subr.bf16.mxu1 %v9377_v25  ;;  %v9590_v23 = vld [vmem:[%s10558_s2 + $0x2c] ss:$16 sps:$4 sm:$0xff]   ;;  %v9595_v25 = vld [vmem:[%s10558_s2 + $0x20] ss:$16 sps:$4 sm:$0xff]  }
 0x583   :  { %3794 = vmatpush1.bf16.msra.mxu0 %v9384_v26  ;;  %3835 = vmatpush1.bf16.msra.mxu1 %v9389_v33  ;;  %v9600_v26 = vld [vmem:[%s10558_s2 + $0x28] ss:$16 sps:$4 sm:$0xff]   ;;  %v9609_v33 = vld [vmem:[%s10558_s2 + $0x44] ss:$16 sps:$4 sm:$0xff]  }
 0x584   :  { %3795 = vmatprep.subr.bf16.mxu0 %v9396_v59  ;;  %3836 = vmatprep.subr.bf16.mxu1 %v9401_v63  ;;  %v9614_v59 = vld [vmem:[%s10558_s2 + $0x40] ss:$16 sps:$4 sm:$0xff]   ;;  %v9619_v63 = vld [vmem:[%s10558_s2 + $0x48] ss:$16 sps:$4 sm:$0xff]  }
 0x585   :  { %v7905_v2 = vpop.eup %7904 }
 0x586   :  { %v3259_v35 = vmul.f32 %v7905_v2, %v7903_v62 }
 0x587   :  { %3796 = vmatpush1.bf16.msra.mxu0 %v9408_v38  ;;  %3837 = vmatpush1.bf16.msra.mxu1 %v9413_v39  ;;  %v9624_v38 = vld [vmem:[%s10558_s2 + $0x4c] ss:$16 sps:$4 sm:$0xff]   ;;  %v9633_v39 = vld [vmem:[%s10558_s2 + $0x64] ss:$16 sps:$4 sm:$0xff]  }
 0x588   :  { %3261 = vst [vmem:[#allocation2 + $0x4] sm:$0xf] %v3259_v35  ;;  %6886 = vst [vmem:[%s10563_s5 + $0x14] sm:$0xf] %v3259_v35  ;;  %3797 = vmatprep.subr.bf16.mxu0 %v9420_v5  ;;  %3838 = vmatprep.subr.bf16.mxu1 %v10597_v57  ;;  %v9638_v5 = vld [vmem:[%s10558_s2 + $0x6c] ss:$16 sps:$4 sm:$0xff]  }
 0x58b   :  { %3798 = vmatpush1.bf16.msra.mxu0 %v10598_v31  ;;  %3839 = vmatpush1.bf16.msra.mxu1 %v10599_v3 }
 0x58c   :  { %3799 = vmatprep.subr.bf16.mxu0 %v9447_v0  ;;  %3840 = vmatprep.subr.bf16.mxu1 %v9452_v7  ;;  %v9648_v0 = vld [vmem:[%s10558_s2 + $0x68] ss:$16 sps:$4 sm:$0xff]   ;;  %v9657_v7 = vld [vmem:[%s10558_s2 + $0x84] ss:$16 sps:$4 sm:$0xff]  }
 0x58f   :  { %3800 = vmatpush1.bf16.msra.mxu0 %v9459_v8  ;;  %3841 = vmatpush1.bf16.msra.mxu1 %v9464_v6  ;;  %v3591_v4 = vld [vmem:[#allocation2 + $0x4] sm:$0xf]  ;;  %v9643_v6 = vld [vmem:[%s10558_s2 + $0x60] ss:$16 sps:$4 sm:$0xff]   ;;  %v9662_v8 = vld [vmem:[%s10558_s2 + $0x8c] ss:$16 sps:$4 sm:$0xff]  }
 0x590   :  { %v3592_v10 = vpack.c.bf16 %v3591_v4, %v3591_v4  ;;  %4109 = vmatprep.subr.bf16.mxu0 %v9561_v11  ;;  %4150 = vmatprep.subr.bf16.mxu1 %v9566_v15 }
 0x592   :  { %3818 = vmatmul.mubr.bf16.vlgmr.msra.gmra.mrb[44].mxu0 %v3592_v10  ;;  %3859 = vmatmul.mubr.bf16.vlgmr.msra.gmra.mrb[44].mxu1 %v3592_v10 }
 0x593   :  { %4141 = vmatprep.mubr.bf16.mxu0 %v10584_v61  ;;  %4182 = vmatprep.mubr.bf16.mxu1 %v10584_v61 }
 0x594   :  { %4110 = vmatpush1.bf16.msra.mxu0 %v9571_v16  ;;  %4151 = vmatpush1.bf16.msra.mxu1 %v9576_v19 }
 0x595   :  { %4111 = vmatprep.subr.bf16.mxu0 %v9585_v22  ;;  %4152 = vmatprep.subr.bf16.mxu1 %v9590_v23 }
 0x598   :  { %4112 = vmatpush1.bf16.msra.mxu0 %v9595_v25  ;;  %4153 = vmatpush1.bf16.msra.mxu1 %v9600_v26 }
 0x599   :  { %4113 = vmatprep.subr.bf16.mxu0 %v9609_v33  ;;  %4154 = vmatprep.subr.bf16.mxu1 %v9624_v38 }
 0x59c   :  { %4114 = vmatpush1.bf16.msra.mxu0 %v9614_v59  ;;  %4155 = vmatpush1.bf16.msra.mxu1 %v9619_v63 }
 0x59d   :  { %4115 = vmatprep.subr.bf16.mxu0 %v9633_v39  ;;  %4156 = vmatprep.subr.bf16.mxu1 %v9638_v5 }
 0x5a0   :  { %4116 = vmatpush1.bf16.msra.mxu0 %v9643_v6  ;;  %4157 = vmatpush1.bf16.msra.mxu1 %v9648_v0 }
 0x5a1   :  { %4117 = vmatprep.subr.bf16.mxu0 %v9657_v7  ;;  %4158 = vmatprep.subr.bf16.mxu1 %v9662_v8 }
 0x5a4   :  { %4118 = vmatpush1.bf16.msra.mxu0 %v9667_v56  ;;  %4159 = vmatpush1.bf16.msra.mxu1 %v9672_v58 }
 0x5a5   :  { %4119 = vmatprep.subr.bf16.mxu0 %v9681_v9  ;;  %4160 = vmatprep.subr.bf16.mxu1 %v9686_v18 }
 0x5a8   :  { %4120 = vmatpush1.bf16.msra.mxu0 %v9691_v34  ;;  %4161 = vmatpush1.bf16.msra.mxu1 %v9696_v36 }
 0x5a9   :  { %4121 = vmatprep.subr.bf16.mxu0 %v9705_v37  ;;  %4162 = vmatprep.subr.bf16.mxu1 %v9710_v41 }
 0x5ac   :  { %4122 = vmatpush1.bf16.msra.mxu0 %v9715_v42  ;;  %4163 = vmatpush1.bf16.msra.mxu1 %v9720_v43 }
 0x5ad   :  { %4123 = vmatprep.subr.bf16.mxu0 %v9729_v44  ;;  %4164 = vmatprep.subr.bf16.mxu1 %v9734_v45 }
 0x5b0   :  { %4124 = vmatpush1.bf16.msra.mxu0 %v9739_v46  ;;  %4165 = vmatpush1.bf16.msra.mxu1 %v9744_v14 }
 0x5b1   :  { %4433 = vmatprep.subr.bf16.mxu0 %v9753_v17  ;;  %4474 = vmatprep.subr.bf16.mxu1 %v9758_v20 }
 0x645   :  { %v3495_v21 = vpop.f32.mrb[40].mxu0  ;;  %v3536_v27 = vpop.f32.mrb[40].mxu1 }
 0x646   :  { %v3497_v24 = vpop.f32.mrb[41].mxu0  ;;  %v3538_v29 = vpop.f32.mrb[41].mxu1 }
 0x647   :  { %v3547_v30 = vcombine.low %v3495_v21, %v3497_v24  ;;  %v3548_v12 = vcombine.low %v3536_v27, %v3538_v29  ;;  %v3499_v13 = vpop.f32.mrb[42].mxu0  ;;  %v3540_v32 = vpop.f32.mrb[42].mxu1  ;;  %v6925_v24 = vld [vmem:[%s10561_s1 + $0x40] sm:$0xff] }
 0x648   :  { %v3500_v40 = vpop.f32.mrb[43].mxu0  ;;  %v3541_v47 = vpop.f32.mrb[43].mxu1 }
 0x649   :  { %v3551_v1 = vadd.f32 %v6887_v28, %v3547_v30  ;;  %v3552_v52 = vadd.f32 %v6888_v48, %v3548_v12  ;;  %v3578_v28 = vld [vmem:[#allocation3] sm:$0xf] }
 0x64b   :  { %v6921_v49 = vmul.f32 -1.442695, %v3551_v1  ;;  %v3560_v50 = vrot.slane %v3551_v1, 4  ;;  %v3570_v53 = vrot.slane %v3552_v52, 4 }
 0x64d   :  { %7906 = vpow2.f32 %v6921_v49  ;;  %v6922_v51 = vmul.f32 -1.442695, %v3560_v50  ;;  %v6923_v54 = vmul.f32 -1.442695, %v3570_v53 }
 0x64f   :  { %7908 = vpow2.f32 %v6922_v51  ;;  %v6926_v51 = vld [vmem:[%s10561_s1 + $0x48] sm:$0xff] }
 0x650   :  { %7910 = vtanh.f32 %v3552_v52 }
 0x651   :  { %7912 = vpow2.f32 %v6923_v54 }
 0x657   :  { %v7907_v55 = vpop.eup %7906 }
 0x658   :  { %v3556_v60 = vadd.f32 1.0, %v7907_v55 }
 0x659   :  { %v7909_v62 = vpop.eup %7908 }
 0x65a   :  { %7914 = vrcp.f32 %v3556_v60  ;;  %v3565_v2 = vadd.f32 1.0, %v7909_v62  ;;  %v7911_v35 = vpop.eup %7910 }
 0x65b   :  { %v7913_v57 = vpop.eup %7912 }
 0x65c   :  { %7916 = vrcp.f32 %v3565_v2  ;;  %v3575_v27 = vadd.f32 1.0, %v7913_v57 }
 0x65e   :  { %7918 = vrcp.f32 %v3575_v27  ;;  %v9780_v27 = vld [vmem:[%s10559_s3] ss:$16 sps:$4 sm:$0xff]  }
 0x664   :  { %v7915_v31 = vpop.eup %7914 }
 0x665   :  { %v3580_v3 = vmul.f32 %v7915_v31, %v7911_v35  ;;  %v3819_v4 = vpop.f32.mrb[44].mxu0  ;;  %v3860_v10 = vpop.f32.mrb[44].mxu1 }
 0x666   :  { %v7917_v21 = vpop.eup %7916  ;;  %v3821_v29 = vpop.f32.mrb[45].mxu0 }
 0x667   :  { %v3862_v30 = vpop.f32.mrb[45].mxu1  ;;  %v3579_v12 = vmul.f32 %v7917_v21, %v3578_v28  ;;  %v3871_v13 = vcombine.low %v3819_v4, %v3821_v29  ;;  %v3823_v40 = vpop.f32.mrb[46].mxu0  ;;  %v9785_v28 = vld [vmem:[%s10559_s3 + $0x8] ss:$16 sps:$4 sm:$0xff]   ;;  %v9790_v29 = vld [vmem:[%s10559_s3 + $0x24] ss:$16 sps:$4 sm:$0xff]  }
 0x668   :  { %v3872_v32 = vcombine.low %v3860_v10, %v3862_v30  ;;  %v3864_v47 = vpop.f32.mrb[46].mxu1  ;;  %v3824_v1 = vpop.f32.mrb[47].mxu0  ;;  %v9795_v30 = vld [vmem:[%s10559_s3 + $0x2c] ss:$16 sps:$4 sm:$0xff]   ;;  %v9807_v40 = vld [vmem:[%s10559_s3 + $0x28] ss:$16 sps:$4 sm:$0xff]  }
 0x669   :  { %v3865_v48 = vpop.f32.mrb[47].mxu1  ;;  %v3581_v49 = vadd.f32 %v3580_v3, %v3579_v12  ;;  %v3875_v50 = vadd.f32 %v6925_v24, %v3871_v13  ;;  %v7919_v62 = vpop.eup %7918  ;;  %v9814_v1 = vld [vmem:[%s10559_s3 + $0x44] ss:$16 sps:$4 sm:$0xff]  }
 0x66a   :  { %v3876_v55 = vadd.f32 %v6926_v51, %v3872_v32  ;;  %v9802_v32 = vld [vmem:[%s10559_s3 + $0x20] ss:$16 sps:$4 sm:$0xff]   ;;  %v9819_v48 = vld [vmem:[%s10559_s3 + $0x4c] ss:$16 sps:$4 sm:$0xff]  }
 0x66b   :  { %7920 = vtanh.f32 %v3581_v49  ;;  %3584 = vst [vmem:[#allocation3] sm:$0xf] %v3581_v49  ;;  %v6959_v52 = vmul.f32 -1.442695, %v3875_v50  ;;  %v3884_v53 = vrot.slane %v3875_v50, 4 }
 0x66c   :  { %v3894_v60 = vrot.slane %v3876_v55, 4 }
 0x66d   :  { %7922 = vpow2.f32 %v6959_v52  ;;  %v6960_v54 = vmul.f32 -1.442695, %v3884_v53  ;;  %v3902_v52 = vld [vmem:[#allocation3 + $0x4] sm:$0xf] }
 0x66e   :  { %v6961_v35 = vmul.f32 -1.442695, %v3894_v60  ;;  %v9840_v60 = vld [vmem:[%s10559_s3 + $0x64] ss:$16 sps:$4 sm:$0xff]  }
 0x66f   :  { %7924 = vpow2.f32 %v6960_v54  ;;  %v9828_v54 = vld [vmem:[%s10559_s3 + $0x40] ss:$16 sps:$4 sm:$0xff]  }
 0x670   :  { %7926 = vtanh.f32 %v3876_v55  ;;  %v9833_v55 = vld [vmem:[%s10559_s3 + $0x48] ss:$16 sps:$4 sm:$0xff]  }
 0x671   :  { %7928 = vpow2.f32 %v6961_v35  ;;  %v9852_v35 = vld [vmem:[%s10559_s3 + $0x60] ss:$16 sps:$4 sm:$0xff]  }
 0x675   :  { %v7921_v2 = vpop.eup %7920 }
 0x676   :  { %v3583_v57 = vmul.f32 %v7921_v2, %v7919_v62  ;;  %v9845_v62 = vld [vmem:[%s10559_s3 + $0x6c] ss:$16 sps:$4 sm:$0xff]  }
 0x677   :  { %v7923_v31 = vpop.eup %7922 }
 0x678   :  { %6924 = vst [vmem:[%s10562_s4 + $0x14] sm:$0xf] %v3583_v57  ;;  %3585 = vst [vmem:[#allocation2] sm:$0xf] %v3583_v57  ;;  %v3880_v3 = vadd.f32 1.0, %v7923_v31 }
 0x679   :  { %v7925_v4 = vpop.eup %7924  ;;  %v9857_v57 = vld [vmem:[%s10559_s3 + $0x68] ss:$16 sps:$4 sm:$0xff]   ;;  %v9864_v31 = vld [vmem:[%s10559_s3 + $0x84] ss:$16 sps:$4 sm:$0xff]  }
 0x67a   :  { %7930 = vrcp.f32 %v3880_v3  ;;  %v3889_v10 = vadd.f32 1.0, %v7925_v4  ;;  %v7927_v12 = vpop.eup %7926  ;;  %v9869_v3 = vld [vmem:[%s10559_s3 + $0x8c] ss:$16 sps:$4 sm:$0xff]   ;;  %v9876_v4 = vld [vmem:[%s10559_s3 + $0x80] ss:$16 sps:$4 sm:$0xff]  }
 0x67b   :  { %v7929_v13 = vpop.eup %7928 }
 0x67c   :  { %7932 = vrcp.f32 %v3889_v10  ;;  %v3899_v51 = vadd.f32 1.0, %v7929_v13  ;;  %v9881_v10 = vld [vmem:[%s10559_s3 + $0x88] ss:$16 sps:$4 sm:$0xff]  }
 0x67d   :  { %v9905_v13 = vld [vmem:[%s10559_s3 + $0xa8] ss:$16 sps:$4 sm:$0xff]  }
 0x67e   :  { %7934 = vrcp.f32 %v3899_v51 }
 0x67f   :  { %v3915_v21 = vld [vmem:[#allocation2] sm:$0xf] }
 0x680   :  { %v3916_v24 = vpack.c.bf16 %v3915_v21, %v3915_v21  ;;  %v9888_v21 = vld [vmem:[%s10559_s3 + $0xa4] ss:$16 sps:$4 sm:$0xff]  }
 0x682   :  { %4142 = vmatmul.mubr.bf16.vlgmr.msra.gmra.mrb[48].mxu0 %v3916_v24  ;;  %4183 = vmatmul.mubr.bf16.vlgmr.msra.gmra.mrb[48].mxu1 %v3916_v24  ;;  %v9893_v24 = vld [vmem:[%s10559_s3 + $0xac] ss:$16 sps:$4 sm:$0xff]  }
 0x683   :  { %4434 = vmatpush1.bf16.msra.mxu0 %v9780_v27  ;;  %4475 = vmatpush1.bf16.msra.mxu1 %v9785_v28 }
 0x684   :  { %v7931_v47 = vpop.eup %7930  ;;  %4435 = vmatprep.subr.bf16.mxu0 %v9790_v29  ;;  %4476 = vmatprep.subr.bf16.mxu1 %v9795_v30 }
 0x685   :  { %v3904_v49 = vmul.f32 %v7931_v47, %v7927_v12  ;;  %4465 = vmatprep.mubr.bf16.mxu0 %v10584_v61  ;;  %4506 = vmatprep.mubr.bf16.mxu1 %v10584_v61  ;;  %v9900_v12 = vld [vmem:[%s10559_s3 + $0xa0] ss:$16 sps:$4 sm:$0xff]  }
 0x686   :  { %v7933_v50 = vpop.eup %7932 }
 0x687   :  { %v3903_v53 = vmul.f32 %v7933_v50, %v3902_v52  ;;  %4436 = vmatpush1.bf16.msra.mxu0 %v9802_v32  ;;  %4477 = vmatpush1.bf16.msra.mxu1 %v9807_v40  ;;  %v9917_v50 = vld [vmem:[%s10559_s3 + $0xcc] ss:$16 sps:$4 sm:$0xff]  }
 0x688   :  { %4437 = vmatprep.subr.bf16.mxu0 %v9814_v1  ;;  %4478 = vmatprep.subr.bf16.mxu1 %v9819_v48  ;;  %v7935_v47 = vpop.eup %7934  ;;  %10600 = vst [vmem:[#allocation4_spill] sm:$0xff] %v9917_v50 }
 0x689   :  { %v3905_v2 = vadd.f32 %v3904_v49, %v3903_v53  ;;  %v9912_v49 = vld [vmem:[%s10559_s3 + $0xc4] ss:$16 sps:$4 sm:$0xff]   ;;  %v9924_v53 = vld [vmem:[%s10559_s3 + $0xc0] ss:$16 sps:$4 sm:$0xff]  }
 0x68a   :  { %10601 = vst [vmem:[#allocation5_spill] sm:$0xff] %v9924_v53 }
 0x68b   :  { %7936 = vtanh.f32 %v3905_v2  ;;  %3908 = vst [vmem:[#allocation3 + $0x4] sm:$0xf] %v3905_v2  ;;  %4438 = vmatpush1.bf16.msra.mxu0 %v9828_v54  ;;  %4479 = vmatpush1.bf16.msra.mxu1 %v9833_v55  ;;  %v9929_v2 = vld [vmem:[%s10559_s3 + $0xc8] ss:$16 sps:$4 sm:$0xff]  }
 0x68c   :  { %4439 = vmatprep.subr.bf16.mxu0 %v9840_v60  ;;  %4480 = vmatprep.subr.bf16.mxu1 %v9845_v62  ;;  %10602 = vst [vmem:[#allocation6_spill] sm:$0xff] %v9929_v2 }
 0x68f   :  { %4440 = vmatpush1.bf16.msra.mxu0 %v9852_v35  ;;  %4481 = vmatpush1.bf16.msra.mxu1 %v9857_v57 }
 0x690   :  { %4441 = vmatprep.subr.bf16.mxu0 %v9864_v31  ;;  %4482 = vmatprep.subr.bf16.mxu1 %v9869_v3 }
 0x693   :  { %4442 = vmatpush1.bf16.msra.mxu0 %v9876_v4  ;;  %4483 = vmatpush1.bf16.msra.mxu1 %v9881_v10 }
 0x694   :  { %4443 = vmatprep.subr.bf16.mxu0 %v9888_v21  ;;  %4484 = vmatprep.subr.bf16.mxu1 %v9893_v24 }
 0x695   :  { %v7937_v51 = vpop.eup %7936 }
 0x696   :  { %v3907_v52 = vmul.f32 %v7937_v51, %v7935_v47  ;;  %v9939_v47 = vld [vmem:[%s10559_s3 + $0xe4] ss:$16 sps:$4 sm:$0xff]   ;;  %v9944_v51 = vld [vmem:[%s10559_s3 + $0xec] ss:$16 sps:$4 sm:$0xff]  }
 0x697   :  { %4444 = vmatpush1.bf16.msra.mxu0 %v9900_v12  ;;  %4485 = vmatpush1.bf16.msra.mxu1 %v9905_v13 }
 0x698   :  { %6962 = vst [vmem:[%s10563_s5 + $0x10] sm:$0xf] %v3907_v52  ;;  %3909 = vst [vmem:[#allocation2 + $0x4] sm:$0xf] %v3907_v52  ;;  %4445 = vmatprep.subr.bf16.mxu0 %v9912_v49  ;;  %4486 = vmatprep.subr.bf16.mxu1 %v9917_v50  ;;  %v9951_v52 = vld [vmem:[%s10559_s3 + $0xe0] ss:$16 sps:$4 sm:$0xff]  }
 0x699   :  { %v9956_v50 = vld [vmem:[%s10559_s3 + $0xe8] ss:$16 sps:$4 sm:$0xff]  }
 0x69b   :  { %4446 = vmatpush1.bf16.msra.mxu0 %v9924_v53  ;;  %4487 = vmatpush1.bf16.msra.mxu1 %v9929_v2 }
 0x69c   :  { %4447 = vmatprep.subr.bf16.mxu0 %v9939_v47  ;;  %4488 = vmatprep.subr.bf16.mxu1 %v9944_v51 }
 0x69f   :  { %4448 = vmatpush1.bf16.msra.mxu0 %v9951_v52  ;;  %4489 = vmatpush1.bf16.msra.mxu1 %v9956_v50  ;;  %v4239_v53 = vld [vmem:[#allocation2 + $0x4] sm:$0xf] }
 0x6a0   :  { %v4240_v2 = vpack.c.bf16 %v4239_v53, %v4239_v53  ;;  %4757 = vmatprep.subr.bf16.mxu0 %v9561_v11  ;;  %4798 = vmatprep.subr.bf16.mxu1 %v9566_v15 }
 0x6a2   :  { %4466 = vmatmul.mubr.bf16.vlgmr.msra.gmra.mrb[52].mxu0 %v4240_v2  ;;  %4507 = vmatmul.mubr.bf16.vlgmr.msra.gmra.mrb[52].mxu1 %v4240_v2 }
 0x6a3   :  { %4758 = vmatpush1.bf16.msra.mxu0 %v9571_v16  ;;  %4799 = vmatpush1.bf16.msra.mxu1 %v9576_v19  ;;  %v6963_v16 = vld [vmem:[%s10560_s0 + $0x60] sm:$0xff] }
 0x6a4   :  { %4759 = vmatprep.subr.bf16.mxu0 %v9585_v22  ;;  %4800 = vmatprep.subr.bf16.mxu1 %v9590_v23 }
 0x6a5   :  { %4789 = vmatprep.mubr.bf16.mxu0 %v10584_v61  ;;  %4830 = vmatprep.mubr.bf16.mxu1 %v10584_v61 }
 0x6a7   :  { %4760 = vmatpush1.bf16.msra.mxu0 %v9595_v25  ;;  %4801 = vmatpush1.bf16.msra.mxu1 %v9600_v26 }
 0x6a8   :  { %4761 = vmatprep.subr.bf16.mxu0 %v9609_v33  ;;  %4802 = vmatprep.subr.bf16.mxu1 %v9624_v38 }
 0x6ab   :  { %4762 = vmatpush1.bf16.msra.mxu0 %v9614_v59  ;;  %4803 = vmatpush1.bf16.msra.mxu1 %v9619_v63 }
 0x6ac   :  { %4763 = vmatprep.subr.bf16.mxu0 %v9633_v39  ;;  %4804 = vmatprep.subr.bf16.mxu1 %v9638_v5  ;;  %v6964_v39 = vld [vmem:[%s10560_s0 + $0x68] sm:$0xff] }
 0x6af   :  { %4764 = vmatpush1.bf16.msra.mxu0 %v9643_v6  ;;  %4805 = vmatpush1.bf16.msra.mxu1 %v9648_v0 }
 0x6b0   :  { %4765 = vmatprep.subr.bf16.mxu0 %v9657_v7  ;;  %4806 = vmatprep.subr.bf16.mxu1 %v9662_v8 }
 0x6b3   :  { %4766 = vmatpush1.bf16.msra.mxu0 %v9667_v56  ;;  %4807 = vmatpush1.bf16.msra.mxu1 %v9672_v58 }
 0x6b4   :  { %4767 = vmatprep.subr.bf16.mxu0 %v9681_v9  ;;  %4808 = vmatprep.subr.bf16.mxu1 %v9686_v18 }
 0x6b7   :  { %4768 = vmatpush1.bf16.msra.mxu0 %v9691_v34  ;;  %4809 = vmatpush1.bf16.msra.mxu1 %v9696_v36 }
 0x6b8   :  { %4769 = vmatprep.subr.bf16.mxu0 %v9705_v37  ;;  %4810 = vmatprep.subr.bf16.mxu1 %v9710_v41 }
 0x6bb   :  { %4770 = vmatpush1.bf16.msra.mxu0 %v9715_v42  ;;  %4811 = vmatpush1.bf16.msra.mxu1 %v9720_v43 }
 0x6bc   :  { %4771 = vmatprep.subr.bf16.mxu0 %v9729_v44  ;;  %4812 = vmatprep.subr.bf16.mxu1 %v9734_v45 }
 0x6bf   :  { %4772 = vmatpush1.bf16.msra.mxu0 %v9739_v46  ;;  %4813 = vmatpush1.bf16.msra.mxu1 %v9744_v14  ;;  %v4226_v14 = vld [vmem:[#allocation3] sm:$0xf] }
 0x6c0   :  { %5081 = vmatprep.subr.bf16.mxu0 %v9753_v17  ;;  %5122 = vmatprep.subr.bf16.mxu1 %v9758_v20  ;;  %v7001_v17 = vld [vmem:[%s10561_s1 + $0x30] sm:$0xff] }
 0x755   :  { %v4143_v11 = vpop.f32.mrb[48].mxu0  ;;  %v4184_v15 = vpop.f32.mrb[48].mxu1 }
 0x756   :  { %v4145_v19 = vpop.f32.mrb[49].mxu0  ;;  %v4186_v22 = vpop.f32.mrb[49].mxu1 }
 0x757   :  { %v4195_v23 = vcombine.low %v4143_v11, %v4145_v19  ;;  %v4196_v25 = vcombine.low %v4184_v15, %v4186_v22  ;;  %v4147_v26 = vpop.f32.mrb[50].mxu0  ;;  %v4188_v33 = vpop.f32.mrb[50].mxu1 }
 0x758   :  { %v4148_v59 = vpop.f32.mrb[51].mxu0  ;;  %v4189_v63 = vpop.f32.mrb[51].mxu1  ;;  %v7002_v33 = vld [vmem:[%s10561_s1 + $0x38] sm:$0xff] }
 0x759   :  { %v4199_v38 = vadd.f32 %v6963_v16, %v4195_v23  ;;  %v4200_v7 = vadd.f32 %v6964_v39, %v4196_v25 }
 0x75b   :  { %v6997_v5 = vmul.f32 -1.442695, %v4199_v38  ;;  %v4208_v6 = vrot.slane %v4199_v38, 4  ;;  %v4218_v8 = vrot.slane %v4200_v7, 4 }
 0x75d   :  { %7938 = vpow2.f32 %v6997_v5  ;;  %v6998_v0 = vmul.f32 -1.442695, %v4208_v6  ;;  %v6999_v56 = vmul.f32 -1.442695, %v4218_v8 }
 0x75f   :  { %7940 = vpow2.f32 %v6998_v0 }
 0x760   :  { %7942 = vtanh.f32 %v4200_v7 }
 0x761   :  { %7944 = vpow2.f32 %v6999_v56 }
 0x767   :  { %v7939_v58 = vpop.eup %7938 }
 0x768   :  { %v4204_v9 = vadd.f32 1.0, %v7939_v58 }
 0x769   :  { %v7941_v18 = vpop.eup %7940 }
 0x76a   :  { %7946 = vrcp.f32 %v4204_v9  ;;  %v4213_v34 = vadd.f32 1.0, %v7941_v18  ;;  %v7943_v36 = vpop.eup %7942 }
 0x76b   :  { %v7945_v37 = vpop.eup %7944 }
 0x76c   :  { %7948 = vrcp.f32 %v4213_v34  ;;  %v4223_v46 = vadd.f32 1.0, %v7945_v37 }
 0x76e   :  { %7950 = vrcp.f32 %v4223_v46  ;;  %v4550_v46 = vld [vmem:[#allocation3 + $0x4] sm:$0xf] }
 0x774   :  { %v7947_v41 = vpop.eup %7946 }
 0x775   :  { %v4228_v42 = vmul.f32 %v7947_v41, %v7943_v36  ;;  %v4467_v43 = vpop.f32.mrb[52].mxu0  ;;  %v4508_v44 = vpop.f32.mrb[52].mxu1 }
 0x776   :  { %v7949_v45 = vpop.eup %7948  ;;  %v4469_v20 = vpop.f32.mrb[53].mxu0 }
 0x777   :  { %v4510_v53 = vpop.f32.mrb[53].mxu1  ;;  %v4227_v2 = vmul.f32 %v7949_v45, %v4226_v14  ;;  %v4519_v11 = vcombine.low %v4467_v43, %v4469_v20  ;;  %v4471_v16 = vpop.f32.mrb[54].mxu0  ;;  %v10164_v20 = vld [vmem:[%s10558_s2 + $0x88] ss:$16 sps:$4 sm:$0xff]  }
 0x778   :  { %v4520_v15 = vcombine.low %v4508_v44, %v4510_v53  ;;  %v4512_v19 = vpop.f32.mrb[54].mxu1  ;;  %v4472_v22 = vpop.f32.mrb[55].mxu0  ;;  %v10173_v53 = vld [vmem:[%s10558_s2 + $0xa4] ss:$16 sps:$4 sm:$0xff]  }
 0x779   :  { %v4513_v23 = vpop.f32.mrb[55].mxu1  ;;  %v4229_v25 = vadd.f32 %v4228_v42, %v4227_v2  ;;  %v4523_v26 = vadd.f32 %v7001_v17, %v4519_v11  ;;  %v7951_v6 = vpop.eup %7950  ;;  %v10159_v17 = vld [vmem:[%s10558_s2 + $0x80] ss:$16 sps:$4 sm:$0xff]   ;;  %v10178_v2 = vld [vmem:[%s10558_s2 + $0xac] ss:$16 sps:$4 sm:$0xff]  }
 0x77a   :  { %v4524_v39 = vadd.f32 %v7002_v33, %v4520_v15  ;;  %v10183_v11 = vld [vmem:[%s10558_s2 + $0xa0] ss:$16 sps:$4 sm:$0xff]   ;;  %v10188_v15 = vld [vmem:[%s10558_s2 + $0xa8] ss:$16 sps:$4 sm:$0xff]   ;;  %v10197_v16 = vld [vmem:[%s10558_s2 + $0xc4] ss:$16 sps:$4 sm:$0xff]  }
 0x77b   :  { %7952 = vtanh.f32 %v4229_v25  ;;  %4232 = vst [vmem:[#allocation3] sm:$0xf] %v4229_v25  ;;  %v7035_v59 = vmul.f32 -1.442695, %v4523_v26  ;;  %v4532_v63 = vrot.slane %v4523_v26, 4 }
 0x77c   :  { %v4542_v5 = vrot.slane %v4524_v39, 4  ;;  %v10202_v19 = vld [vmem:[%s10558_s2 + $0xcc] ss:$16 sps:$4 sm:$0xff]   ;;  %v10207_v22 = vld [vmem:[%s10558_s2 + $0xc0] ss:$16 sps:$4 sm:$0xff]  }
 0x77d   :  { %7954 = vpow2.f32 %v7035_v59  ;;  %v7036_v38 = vmul.f32 -1.442695, %v4532_v63  ;;  %v10212_v23 = vld [vmem:[%s10558_s2 + $0xc8] ss:$16 sps:$4 sm:$0xff]   ;;  %v10221_v25 = vld [vmem:[%s10558_s2 + $0xe4] ss:$16 sps:$4 sm:$0xff]  }
 0x77e   :  { %v7037_v7 = vmul.f32 -1.442695, %v4542_v5  ;;  %v10226_v26 = vld [vmem:[%s10558_s2 + $0xec] ss:$16 sps:$4 sm:$0xff]   ;;  %v10231_v33 = vld [vmem:[%s10558_s2 + $0xe0] ss:$16 sps:$4 sm:$0xff]  }
 0x77f   :  { %7956 = vpow2.f32 %v7036_v38  ;;  %v10236_v59 = vld [vmem:[%s10558_s2 + $0xe8] ss:$16 sps:$4 sm:$0xff]   ;;  %v10245_v63 = vld [vmem:[%s10559_s3 + $0x4] ss:$16 sps:$4 sm:$0xff]   ;;  %v10250_v38 = vld [vmem:[%s10559_s3 + $0xc] ss:$16 sps:$4 sm:$0xff]  }
 0x780   :  { %7958 = vtanh.f32 %v4524_v39 }
 0x781   :  { %7960 = vpow2.f32 %v7037_v7 }
 0x785   :  { %v7953_v0 = vpop.eup %7952 }
 0x786   :  { %v4231_v8 = vmul.f32 %v7953_v0, %v7951_v6  ;;  %v7039_v6 = vld [vmem:[%s10560_s0 + $0x70] sm:$0xff] }
 0x787   :  { %v7955_v56 = vpop.eup %7954 }
 0x788   :  { %7000 = vst [vmem:[%s10562_s4 + $0x18] sm:$0xf] %v4231_v8  ;;  %4233 = vst [vmem:[#allocation2] sm:$0xf] %v4231_v8  ;;  %v4528_v58 = vadd.f32 1.0, %v7955_v56 }
 0x789   :  { %v7957_v9 = vpop.eup %7956 }
 0x78a   :  { %7962 = vrcp.f32 %v4528_v58  ;;  %v4537_v18 = vadd.f32 1.0, %v7957_v9  ;;  %v7959_v37 = vpop.eup %7958 }
 0x78b   :  { %v7961_v41 = vpop.eup %7960 }
 0x78c   :  { %7964 = vrcp.f32 %v4537_v18  ;;  %v4547_v45 = vadd.f32 1.0, %v7961_v41 }
 0x78e   :  { %7966 = vrcp.f32 %v4547_v45 }
 0x78f   :  { %v4563_v34 = vld [vmem:[#allocation2] sm:$0xf] }
 0x790   :  { %v4564_v36 = vpack.c.bf16 %v4563_v34, %v4563_v34 }
 0x792   :  { %4790 = vmatmul.mubr.bf16.vlgmr.msra.gmra.mrb[56].mxu0 %v4564_v36  ;;  %4831 = vmatmul.mubr.bf16.vlgmr.msra.gmra.mrb[56].mxu1 %v4564_v36 }
 0x793   :  { %5082 = vmatpush1.bf16.msra.mxu0 %v9780_v27  ;;  %5123 = vmatpush1.bf16.msra.mxu1 %v9785_v28 }
 0x794   :  { %v7963_v42 = vpop.eup %7962  ;;  %5083 = vmatprep.subr.bf16.mxu0 %v9790_v29  ;;  %5124 = vmatprep.subr.bf16.mxu1 %v9795_v30 }
 0x795   :  { %v4552_v43 = vmul.f32 %v7963_v42, %v7959_v37  ;;  %5113 = vmatprep.mubr.bf16.mxu0 %v10584_v61  ;;  %5154 = vmatprep.mubr.bf16.mxu1 %v10584_v61  ;;  %v7040_v37 = vld [vmem:[%s10560_s0 + $0x78] sm:$0xff] }
 0x796   :  { %v7965_v44 = vpop.eup %7964 }
 0x797   :  { %v4551_v14 = vmul.f32 %v7965_v44, %v4550_v46  ;;  %5084 = vmatpush1.bf16.msra.mxu0 %v9802_v32  ;;  %5125 = vmatpush1.bf16.msra.mxu1 %v9807_v40  ;;  %v10603_v32 = vld [vmem:[#allocation4_spill] sm:$0xff]  ;;  %v10604_v40 = vld [vmem:[#allocation5_spill] sm:$0xff] }
 0x798   :  { %5085 = vmatprep.subr.bf16.mxu0 %v9814_v1  ;;  %5126 = vmatprep.subr.bf16.mxu1 %v9819_v48  ;;  %v7967_v28 = vpop.eup %7966  ;;  %v10605_v1 = vld [vmem:[#allocation6_spill] sm:$0xff] }
 0x799   :  { %v4553_v27 = vadd.f32 %v4552_v43, %v4551_v14 }
 0x79b   :  { %7968 = vtanh.f32 %v4553_v27  ;;  %4556 = vst [vmem:[#allocation3 + $0x4] sm:$0xf] %v4553_v27  ;;  %5086 = vmatpush1.bf16.msra.mxu0 %v9828_v54  ;;  %5127 = vmatpush1.bf16.msra.mxu1 %v9833_v55  ;;  %v10053_v55 = vld [vmem:[%s10558_s2 + $0x4] ss:$16 sps:$4 sm:$0xff]  }
 0x79c   :  { %5087 = vmatprep.subr.bf16.mxu0 %v9840_v60  ;;  %5128 = vmatprep.subr.bf16.mxu1 %v9845_v62  ;;  %v10058_v60 = vld [vmem:[%s10558_s2 + $0xc] ss:$16 sps:$4 sm:$0xff]   ;;  %v10063_v62 = vld [vmem:[%s10558_s2] ss:$16 sps:$4 sm:$0xff]  }
 0x79f   :  { %5088 = vmatpush1.bf16.msra.mxu0 %v9852_v35  ;;  %5129 = vmatpush1.bf16.msra.mxu1 %v9857_v57  ;;  %v10068_v35 = vld [vmem:[%s10558_s2 + $0x8] ss:$16 sps:$4 sm:$0xff]   ;;  %v10077_v57 = vld [vmem:[%s10558_s2 + $0x24] ss:$16 sps:$4 sm:$0xff]  }
 0x7a0   :  { %5089 = vmatprep.subr.bf16.mxu0 %v9864_v31  ;;  %5130 = vmatprep.subr.bf16.mxu1 %v9869_v3  ;;  %v10082_v31 = vld [vmem:[%s10558_s2 + $0x2c] ss:$16 sps:$4 sm:$0xff]   ;;  %v10087_v3 = vld [vmem:[%s10558_s2 + $0x20] ss:$16 sps:$4 sm:$0xff]  }
 0x7a3   :  { %5090 = vmatpush1.bf16.msra.mxu0 %v9876_v4  ;;  %5131 = vmatpush1.bf16.msra.mxu1 %v9881_v10  ;;  %v10092_v4 = vld [vmem:[%s10558_s2 + $0x28] ss:$16 sps:$4 sm:$0xff]   ;;  %v10101_v10 = vld [vmem:[%s10558_s2 + $0x44] ss:$16 sps:$4 sm:$0xff]  }
 0x7a4   :  { %5091 = vmatprep.subr.bf16.mxu0 %v9888_v21  ;;  %5132 = vmatprep.subr.bf16.mxu1 %v9893_v24  ;;  %v10106_v21 = vld [vmem:[%s10558_s2 + $0x40] ss:$16 sps:$4 sm:$0xff]   ;;  %v10111_v24 = vld [vmem:[%s10558_s2 + $0x48] ss:$16 sps:$4 sm:$0xff]  }
 0x7a5   :  { %v7969_v29 = vpop.eup %7968 }
 0x7a6   :  { %v4555_v30 = vmul.f32 %v7969_v29, %v7967_v28 }
 0x7a7   :  { %5092 = vmatpush1.bf16.msra.mxu0 %v9900_v12  ;;  %5133 = vmatpush1.bf16.msra.mxu1 %v9905_v13  ;;  %v10116_v12 = vld [vmem:[%s10558_s2 + $0x4c] ss:$16 sps:$4 sm:$0xff]   ;;  %v10125_v13 = vld [vmem:[%s10558_s2 + $0x64] ss:$16 sps:$4 sm:$0xff]  }
 0x7a8   :  { %7038 = vst [vmem:[%s10563_s5 + $0xc] sm:$0xf] %v4555_v30  ;;  %4557 = vst [vmem:[#allocation2 + $0x4] sm:$0xf] %v4555_v30  ;;  %5093 = vmatprep.subr.bf16.mxu0 %v9912_v49  ;;  %5134 = vmatprep.subr.bf16.mxu1 %v10603_v32  ;;  %v10130_v49 = vld [vmem:[%s10558_s2 + $0x6c] ss:$16 sps:$4 sm:$0xff]  }
 0x7ab   :  { %5094 = vmatpush1.bf16.msra.mxu0 %v10604_v40  ;;  %5135 = vmatpush1.bf16.msra.mxu1 %v10605_v1 }
 0x7ac   :  { %5095 = vmatprep.subr.bf16.mxu0 %v9939_v47  ;;  %5136 = vmatprep.subr.bf16.mxu1 %v9944_v51  ;;  %v10140_v47 = vld [vmem:[%s10558_s2 + $0x68] ss:$16 sps:$4 sm:$0xff]   ;;  %v10149_v51 = vld [vmem:[%s10558_s2 + $0x84] ss:$16 sps:$4 sm:$0xff]  }
 0x7af   :  { %5096 = vmatpush1.bf16.msra.mxu0 %v9951_v52  ;;  %5137 = vmatpush1.bf16.msra.mxu1 %v9956_v50  ;;  %v4887_v48 = vld [vmem:[#allocation2 + $0x4] sm:$0xf]  ;;  %v10135_v50 = vld [vmem:[%s10558_s2 + $0x60] ss:$16 sps:$4 sm:$0xff]   ;;  %v10154_v52 = vld [vmem:[%s10558_s2 + $0x8c] ss:$16 sps:$4 sm:$0xff]  }
 0x7b0   :  { %v4888_v54 = vpack.c.bf16 %v4887_v48, %v4887_v48  ;;  %5405 = vmatprep.subr.bf16.mxu0 %v10053_v55  ;;  %5446 = vmatprep.subr.bf16.mxu1 %v10058_v60 }
 0x7b2   :  { %5114 = vmatmul.mubr.bf16.vlgmr.msra.gmra.mrb[60].mxu0 %v4888_v54  ;;  %5155 = vmatmul.mubr.bf16.vlgmr.msra.gmra.mrb[60].mxu1 %v4888_v54 }
 0x7b3   :  { %5437 = vmatprep.mubr.bf16.mxu0 %v10584_v61  ;;  %5478 = vmatprep.mubr.bf16.mxu1 %v10584_v61 }
 0x7b4   :  { %5406 = vmatpush1.bf16.msra.mxu0 %v10063_v62  ;;  %5447 = vmatpush1.bf16.msra.mxu1 %v10068_v35 }
 0x7b5   :  { %5407 = vmatprep.subr.bf16.mxu0 %v10077_v57  ;;  %5448 = vmatprep.subr.bf16.mxu1 %v10082_v31 }
 0x7b8   :  { %5408 = vmatpush1.bf16.msra.mxu0 %v10087_v3  ;;  %5449 = vmatpush1.bf16.msra.mxu1 %v10092_v4 }
 0x7b9   :  { %5409 = vmatprep.subr.bf16.mxu0 %v10101_v10  ;;  %5450 = vmatprep.subr.bf16.mxu1 %v10116_v12 }
 0x7bc   :  { %5410 = vmatpush1.bf16.msra.mxu0 %v10106_v21  ;;  %5451 = vmatpush1.bf16.msra.mxu1 %v10111_v24 }
 0x7bd   :  { %5411 = vmatprep.subr.bf16.mxu0 %v10125_v13  ;;  %5452 = vmatprep.subr.bf16.mxu1 %v10130_v49 }
 0x7c0   :  { %5412 = vmatpush1.bf16.msra.mxu0 %v10135_v50  ;;  %5453 = vmatpush1.bf16.msra.mxu1 %v10140_v47 }
 0x7c1   :  { %5413 = vmatprep.subr.bf16.mxu0 %v10149_v51  ;;  %5454 = vmatprep.subr.bf16.mxu1 %v10154_v52 }
 0x7c4   :  { %5414 = vmatpush1.bf16.msra.mxu0 %v10159_v17  ;;  %5455 = vmatpush1.bf16.msra.mxu1 %v10164_v20 }
 0x7c5   :  { %5415 = vmatprep.subr.bf16.mxu0 %v10173_v53  ;;  %5456 = vmatprep.subr.bf16.mxu1 %v10178_v2 }
 0x7c8   :  { %5416 = vmatpush1.bf16.msra.mxu0 %v10183_v11  ;;  %5457 = vmatpush1.bf16.msra.mxu1 %v10188_v15 }
 0x7c9   :  { %5417 = vmatprep.subr.bf16.mxu0 %v10197_v16  ;;  %5458 = vmatprep.subr.bf16.mxu1 %v10202_v19 }
 0x7cc   :  { %5418 = vmatpush1.bf16.msra.mxu0 %v10207_v22  ;;  %5459 = vmatpush1.bf16.msra.mxu1 %v10212_v23 }
 0x7cd   :  { %5419 = vmatprep.subr.bf16.mxu0 %v10221_v25  ;;  %5460 = vmatprep.subr.bf16.mxu1 %v10226_v26 }
 0x7d0   :  { %5420 = vmatpush1.bf16.msra.mxu0 %v10231_v33  ;;  %5461 = vmatpush1.bf16.msra.mxu1 %v10236_v59 }
 0x7d1   :  { %5729 = vmatprep.subr.bf16.mxu0 %v10245_v63  ;;  %5770 = vmatprep.subr.bf16.mxu1 %v10250_v38 }
 0x865   :  { %v4791_v39 = vpop.f32.mrb[56].mxu0  ;;  %v4832_v5 = vpop.f32.mrb[56].mxu1 }
 0x866   :  { %v4793_v0 = vpop.f32.mrb[57].mxu0  ;;  %v4834_v7 = vpop.f32.mrb[57].mxu1 }
 0x867   :  { %v4843_v8 = vcombine.low %v4791_v39, %v4793_v0  ;;  %v4844_v56 = vcombine.low %v4832_v5, %v4834_v7  ;;  %v4795_v58 = vpop.f32.mrb[58].mxu0  ;;  %v4836_v9 = vpop.f32.mrb[58].mxu1  ;;  %v7077_v0 = vld [vmem:[%s10561_s1 + $0x20] sm:$0xff] }
 0x868   :  { %v4796_v18 = vpop.f32.mrb[59].mxu0  ;;  %v4837_v34 = vpop.f32.mrb[59].mxu1 }
 0x869   :  { %v4847_v36 = vadd.f32 %v7039_v6, %v4843_v8  ;;  %v4848_v44 = vadd.f32 %v7040_v37, %v4844_v56  ;;  %v4874_v6 = vld [vmem:[#allocation3] sm:$0xf] }
 0x86b   :  { %v7073_v41 = vmul.f32 -1.442695, %v4847_v36  ;;  %v4856_v42 = vrot.slane %v4847_v36, 4  ;;  %v4866_v45 = vrot.slane %v4848_v44, 4 }
 0x86d   :  { %7970 = vpow2.f32 %v7073_v41  ;;  %v7074_v43 = vmul.f32 -1.442695, %v4856_v42  ;;  %v7075_v46 = vmul.f32 -1.442695, %v4866_v45 }
 0x86f   :  { %7972 = vpow2.f32 %v7074_v43  ;;  %v7078_v43 = vld [vmem:[%s10561_s1 + $0x28] sm:$0xff] }
 0x870   :  { %7974 = vtanh.f32 %v4848_v44 }
 0x871   :  { %7976 = vpow2.f32 %v7075_v46 }
 0x877   :  { %v7971_v14 = vpop.eup %7970 }
 0x878   :  { %v4852_v27 = vadd.f32 1.0, %v7971_v14 }
 0x879   :  { %v7973_v28 = vpop.eup %7972 }
 0x87a   :  { %7978 = vrcp.f32 %v4852_v27  ;;  %v4861_v29 = vadd.f32 1.0, %v7973_v28  ;;  %v7975_v30 = vpop.eup %7974 }
 0x87b   :  { %v7977_v32 = vpop.eup %7976 }
 0x87c   :  { %7980 = vrcp.f32 %v4861_v29  ;;  %v4871_v5 = vadd.f32 1.0, %v7977_v32 }
 0x87e   :  { %7982 = vrcp.f32 %v4871_v5  ;;  %v10272_v5 = vld [vmem:[%s10559_s3] ss:$16 sps:$4 sm:$0xff]  }
 0x884   :  { %v7979_v40 = vpop.eup %7978 }
 0x885   :  { %v4876_v1 = vmul.f32 %v7979_v40, %v7975_v30  ;;  %v5115_v48 = vpop.f32.mrb[60].mxu0  ;;  %v5156_v54 = vpop.f32.mrb[60].mxu1 }
 0x886   :  { %v7981_v39 = vpop.eup %7980  ;;  %v5117_v7 = vpop.f32.mrb[61].mxu0 }
 0x887   :  { %v5158_v8 = vpop.f32.mrb[61].mxu1  ;;  %v4875_v56 = vmul.f32 %v7981_v39, %v4874_v6  ;;  %v5167_v58 = vcombine.low %v5115_v48, %v5117_v7  ;;  %v5119_v18 = vpop.f32.mrb[62].mxu0  ;;  %v10277_v6 = vld [vmem:[%s10559_s3 + $0x8] ss:$16 sps:$4 sm:$0xff]   ;;  %v10282_v7 = vld [vmem:[%s10559_s3 + $0x24] ss:$16 sps:$4 sm:$0xff]  }
 0x888   :  { %v5168_v9 = vcombine.low %v5156_v54, %v5158_v8  ;;  %v5160_v34 = vpop.f32.mrb[62].mxu1  ;;  %v5120_v36 = vpop.f32.mrb[63].mxu0  ;;  %v10287_v8 = vld [vmem:[%s10559_s3 + $0x2c] ss:$16 sps:$4 sm:$0xff]   ;;  %v10299_v18 = vld [vmem:[%s10559_s3 + $0x28] ss:$16 sps:$4 sm:$0xff]  }
 0x889   :  { %v5161_v37 = vpop.f32.mrb[63].mxu1  ;;  %v4877_v41 = vadd.f32 %v4876_v1, %v4875_v56  ;;  %v5171_v42 = vadd.f32 %v7077_v0, %v5167_v58  ;;  %v7983_v28 = vpop.eup %7982  ;;  %v10306_v36 = vld [vmem:[%s10559_s3 + $0x44] ss:$16 sps:$4 sm:$0xff]  }
 0x88a   :  { %v5172_v14 = vadd.f32 %v7078_v43, %v5168_v9  ;;  %v10294_v9 = vld [vmem:[%s10559_s3 + $0x20] ss:$16 sps:$4 sm:$0xff]   ;;  %v10311_v37 = vld [vmem:[%s10559_s3 + $0x4c] ss:$16 sps:$4 sm:$0xff]  }
 0x88b   :  { %7984 = vtanh.f32 %v4877_v41  ;;  %4880 = vst [vmem:[#allocation3] sm:$0xf] %v4877_v41  ;;  %v7111_v44 = vmul.f32 -1.442695, %v5171_v42  ;;  %v5180_v45 = vrot.slane %v5171_v42, 4 }
 0x88c   :  { %v5190_v27 = vrot.slane %v5172_v14, 4 }
 0x88d   :  { %7986 = vpow2.f32 %v7111_v44  ;;  %v7112_v46 = vmul.f32 -1.442695, %v5180_v45  ;;  %v5198_v44 = vld [vmem:[#allocation3 + $0x4] sm:$0xf] }
 0x88e   :  { %v7113_v30 = vmul.f32 -1.442695, %v5190_v27  ;;  %v10332_v27 = vld [vmem:[%s10559_s3 + $0x64] ss:$16 sps:$4 sm:$0xff]  }
 0x88f   :  { %7988 = vpow2.f32 %v7112_v46  ;;  %v10320_v46 = vld [vmem:[%s10559_s3 + $0x40] ss:$16 sps:$4 sm:$0xff]  }
 0x890   :  { %7990 = vtanh.f32 %v5172_v14  ;;  %v10325_v14 = vld [vmem:[%s10559_s3 + $0x48] ss:$16 sps:$4 sm:$0xff]  }
 0x891   :  { %7992 = vpow2.f32 %v7113_v30  ;;  %v10344_v30 = vld [vmem:[%s10559_s3 + $0x60] ss:$16 sps:$4 sm:$0xff]  }
 0x895   :  { %v7985_v29 = vpop.eup %7984 }
 0x896   :  { %v4879_v32 = vmul.f32 %v7985_v29, %v7983_v28  ;;  %v10337_v28 = vld [vmem:[%s10559_s3 + $0x6c] ss:$16 sps:$4 sm:$0xff]  }
 0x897   :  { %v7987_v40 = vpop.eup %7986 }
 0x898   :  { %7076 = vst [vmem:[%s10562_s4 + $0x1c] sm:$0xf] %v4879_v32  ;;  %4881 = vst [vmem:[#allocation2] sm:$0xf] %v4879_v32  ;;  %v5176_v1 = vadd.f32 1.0, %v7987_v40 }
 0x899   :  { %v7989_v48 = vpop.eup %7988  ;;  %v10349_v32 = vld [vmem:[%s10559_s3 + $0x68] ss:$16 sps:$4 sm:$0xff]   ;;  %v10356_v40 = vld [vmem:[%s10559_s3 + $0x84] ss:$16 sps:$4 sm:$0xff]  }
 0x89a   :  { %7994 = vrcp.f32 %v5176_v1  ;;  %v5185_v54 = vadd.f32 1.0, %v7989_v48  ;;  %v7991_v56 = vpop.eup %7990  ;;  %v10361_v1 = vld [vmem:[%s10559_s3 + $0x8c] ss:$16 sps:$4 sm:$0xff]   ;;  %v10368_v48 = vld [vmem:[%s10559_s3 + $0x80] ss:$16 sps:$4 sm:$0xff]  }
 0x89b   :  { %v7993_v58 = vpop.eup %7992 }
 0x89c   :  { %7996 = vrcp.f32 %v5185_v54  ;;  %v5195_v43 = vadd.f32 1.0, %v7993_v58  ;;  %v10373_v54 = vld [vmem:[%s10559_s3 + $0x88] ss:$16 sps:$4 sm:$0xff]  }
 0x89d   :  { %v10397_v58 = vld [vmem:[%s10559_s3 + $0xa8] ss:$16 sps:$4 sm:$0xff]  }
 0x89e   :  { %7998 = vrcp.f32 %v5195_v43 }
 0x89f   :  { %v5211_v39 = vld [vmem:[#allocation2] sm:$0xf] }
 0x8a0   :  { %v5212_v0 = vpack.c.bf16 %v5211_v39, %v5211_v39  ;;  %v10380_v39 = vld [vmem:[%s10559_s3 + $0xa4] ss:$16 sps:$4 sm:$0xff]  }
 0x8a2   :  { %5438 = vmatmul.mubr.bf16.vlgmr.msra.gmra.mrb[64].mxu0 %v5212_v0  ;;  %5479 = vmatmul.mubr.bf16.vlgmr.msra.gmra.mrb[64].mxu1 %v5212_v0  ;;  %v10385_v0 = vld [vmem:[%s10559_s3 + $0xac] ss:$16 sps:$4 sm:$0xff]  }
 0x8a3   :  { %5730 = vmatpush1.bf16.msra.mxu0 %v10272_v5  ;;  %5771 = vmatpush1.bf16.msra.mxu1 %v10277_v6 }
 0x8a4   :  { %v7995_v34 = vpop.eup %7994  ;;  %5731 = vmatprep.subr.bf16.mxu0 %v10282_v7  ;;  %5772 = vmatprep.subr.bf16.mxu1 %v10287_v8 }
 0x8a5   :  { %v5200_v41 = vmul.f32 %v7995_v34, %v7991_v56  ;;  %5761 = vmatprep.mubr.bf16.mxu0 %v10584_v61  ;;  %5802 = vmatprep.mubr.bf16.mxu1 %v10584_v61  ;;  %v10392_v56 = vld [vmem:[%s10559_s3 + $0xa0] ss:$16 sps:$4 sm:$0xff]  }
 0x8a6   :  { %v7997_v42 = vpop.eup %7996 }
 0x8a7   :  { %v5199_v45 = vmul.f32 %v7997_v42, %v5198_v44  ;;  %5732 = vmatpush1.bf16.msra.mxu0 %v10294_v9  ;;  %5773 = vmatpush1.bf16.msra.mxu1 %v10299_v18  ;;  %v10409_v42 = vld [vmem:[%s10559_s3 + $0xcc] ss:$16 sps:$4 sm:$0xff]  }
 0x8a8   :  { %5733 = vmatprep.subr.bf16.mxu0 %v10306_v36  ;;  %5774 = vmatprep.subr.bf16.mxu1 %v10311_v37  ;;  %v7999_v34 = vpop.eup %7998  ;;  %10606 = vst [vmem:[#allocation4_spill] sm:$0xff] %v10409_v42 }
 0x8a9   :  { %v5201_v29 = vadd.f32 %v5200_v41, %v5199_v45  ;;  %v10404_v41 = vld [vmem:[%s10559_s3 + $0xc4] ss:$16 sps:$4 sm:$0xff]   ;;  %v10416_v45 = vld [vmem:[%s10559_s3 + $0xc0] ss:$16 sps:$4 sm:$0xff]  }
 0x8aa   :  { %10607 = vst [vmem:[#allocation5_spill] sm:$0xff] %v10416_v45 }
 0x8ab   :  { %8000 = vtanh.f32 %v5201_v29  ;;  %5204 = vst [vmem:[#allocation3 + $0x4] sm:$0xf] %v5201_v29  ;;  %5734 = vmatpush1.bf16.msra.mxu0 %v10320_v46  ;;  %5775 = vmatpush1.bf16.msra.mxu1 %v10325_v14  ;;  %v10421_v29 = vld [vmem:[%s10559_s3 + $0xc8] ss:$16 sps:$4 sm:$0xff]  }
 0x8ac   :  { %5735 = vmatprep.subr.bf16.mxu0 %v10332_v27  ;;  %5776 = vmatprep.subr.bf16.mxu1 %v10337_v28  ;;  %10608 = vst [vmem:[#allocation6_spill] sm:$0xff] %v10421_v29 }
 0x8af   :  { %5736 = vmatpush1.bf16.msra.mxu0 %v10344_v30  ;;  %5777 = vmatpush1.bf16.msra.mxu1 %v10349_v32 }
 0x8b0   :  { %5737 = vmatprep.subr.bf16.mxu0 %v10356_v40  ;;  %5778 = vmatprep.subr.bf16.mxu1 %v10361_v1 }
 0x8b3   :  { %5738 = vmatpush1.bf16.msra.mxu0 %v10368_v48  ;;  %5779 = vmatpush1.bf16.msra.mxu1 %v10373_v54 }
 0x8b4   :  { %5739 = vmatprep.subr.bf16.mxu0 %v10380_v39  ;;  %5780 = vmatprep.subr.bf16.mxu1 %v10385_v0 }
 0x8b5   :  { %v8001_v43 = vpop.eup %8000 }
 0x8b6   :  { %v5203_v44 = vmul.f32 %v8001_v43, %v7999_v34  ;;  %v10431_v34 = vld [vmem:[%s10559_s3 + $0xe4] ss:$16 sps:$4 sm:$0xff]   ;;  %v10436_v43 = vld [vmem:[%s10559_s3 + $0xec] ss:$16 sps:$4 sm:$0xff]  }
 0x8b7   :  { %5740 = vmatpush1.bf16.msra.mxu0 %v10392_v56  ;;  %5781 = vmatpush1.bf16.msra.mxu1 %v10397_v58 }
 0x8b8   :  { %7114 = vst [vmem:[%s10563_s5 + $0x8] sm:$0xf] %v5203_v44  ;;  %5205 = vst [vmem:[#allocation2 + $0x4] sm:$0xf] %v5203_v44  ;;  %5741 = vmatprep.subr.bf16.mxu0 %v10404_v41  ;;  %5782 = vmatprep.subr.bf16.mxu1 %v10409_v42  ;;  %v10443_v44 = vld [vmem:[%s10559_s3 + $0xe0] ss:$16 sps:$4 sm:$0xff]  }
 0x8b9   :  { %v10448_v42 = vld [vmem:[%s10559_s3 + $0xe8] ss:$16 sps:$4 sm:$0xff]  }
 0x8bb   :  { %5742 = vmatpush1.bf16.msra.mxu0 %v10416_v45  ;;  %5783 = vmatpush1.bf16.msra.mxu1 %v10421_v29 }
 0x8bc   :  { %5743 = vmatprep.subr.bf16.mxu0 %v10431_v34  ;;  %5784 = vmatprep.subr.bf16.mxu1 %v10436_v43 }
 0x8bf   :  { %5744 = vmatpush1.bf16.msra.mxu0 %v10443_v44  ;;  %5785 = vmatpush1.bf16.msra.mxu1 %v10448_v42  ;;  %v5535_v45 = vld [vmem:[#allocation2 + $0x4] sm:$0xf] }
 0x8c0   :  { %v5536_v29 = vpack.c.bf16 %v5535_v45, %v5535_v45  ;;  %6053 = vmatprep.subr.bf16.mxu0 %v10053_v55  ;;  %6094 = vmatprep.subr.bf16.mxu1 %v10058_v60 }
 0x8c2   :  { %5762 = vmatmul.mubr.bf16.vlgmr.msra.gmra.mrb[68].mxu0 %v5536_v29  ;;  %5803 = vmatmul.mubr.bf16.vlgmr.msra.gmra.mrb[68].mxu1 %v5536_v29 }
 0x8c3   :  { %6054 = vmatpush1.bf16.msra.mxu0 %v10063_v62  ;;  %6095 = vmatpush1.bf16.msra.mxu1 %v10068_v35  ;;  %v7115_v62 = vld [vmem:[%s10560_s0 + $0x80] sm:$0xff] }
 0x8c4   :  { %6055 = vmatprep.subr.bf16.mxu0 %v10077_v57  ;;  %6096 = vmatprep.subr.bf16.mxu1 %v10082_v31 }
 0x8c5   :  { %6085 = vmatprep.mubr.bf16.mxu0 %v10584_v61  ;;  %6126 = vmatprep.mubr.bf16.mxu1 %v10584_v61 }
 0x8c7   :  { %6056 = vmatpush1.bf16.msra.mxu0 %v10087_v3  ;;  %6097 = vmatpush1.bf16.msra.mxu1 %v10092_v4 }
 0x8c8   :  { %6057 = vmatprep.subr.bf16.mxu0 %v10101_v10  ;;  %6098 = vmatprep.subr.bf16.mxu1 %v10116_v12 }
 0x8cb   :  { %6058 = vmatpush1.bf16.msra.mxu0 %v10106_v21  ;;  %6099 = vmatpush1.bf16.msra.mxu1 %v10111_v24 }
 0x8cc   :  { %6059 = vmatprep.subr.bf16.mxu0 %v10125_v13  ;;  %6100 = vmatprep.subr.bf16.mxu1 %v10130_v49  ;;  %v7116_v13 = vld [vmem:[%s10560_s0 + $0x88] sm:$0xff] }
 0x8cf   :  { %6060 = vmatpush1.bf16.msra.mxu0 %v10135_v50  ;;  %6101 = vmatpush1.bf16.msra.mxu1 %v10140_v47 }
 0x8d0   :  { %6061 = vmatprep.subr.bf16.mxu0 %v10149_v51  ;;  %6102 = vmatprep.subr.bf16.mxu1 %v10154_v52 }
 0x8d3   :  { %6062 = vmatpush1.bf16.msra.mxu0 %v10159_v17  ;;  %6103 = vmatpush1.bf16.msra.mxu1 %v10164_v20 }
 0x8d4   :  { %6063 = vmatprep.subr.bf16.mxu0 %v10173_v53  ;;  %6104 = vmatprep.subr.bf16.mxu1 %v10178_v2 }
 0x8d7   :  { %6064 = vmatpush1.bf16.msra.mxu0 %v10183_v11  ;;  %6105 = vmatpush1.bf16.msra.mxu1 %v10188_v15 }
 0x8d8   :  { %6065 = vmatprep.subr.bf16.mxu0 %v10197_v16  ;;  %6106 = vmatprep.subr.bf16.mxu1 %v10202_v19 }
 0x8db   :  { %6066 = vmatpush1.bf16.msra.mxu0 %v10207_v22  ;;  %6107 = vmatpush1.bf16.msra.mxu1 %v10212_v23 }
 0x8dc   :  { %6067 = vmatprep.subr.bf16.mxu0 %v10221_v25  ;;  %6108 = vmatprep.subr.bf16.mxu1 %v10226_v26 }
 0x8df   :  { %6068 = vmatpush1.bf16.msra.mxu0 %v10231_v33  ;;  %6109 = vmatpush1.bf16.msra.mxu1 %v10236_v59  ;;  %v5522_v59 = vld [vmem:[#allocation3] sm:$0xf] }
 0x8e0   :  { %6376 = vmatprep.subr.bf16.mxu0 %v10245_v63  ;;  %6417 = vmatprep.subr.bf16.mxu1 %v10250_v38  ;;  %v7153_v63 = vld [vmem:[%s10561_s1 + $0x10] sm:$0xff] }
 0x975   :  { %v5439_v55 = vpop.f32.mrb[64].mxu0  ;;  %v5480_v60 = vpop.f32.mrb[64].mxu1 }
 0x976   :  { %v5441_v35 = vpop.f32.mrb[65].mxu0  ;;  %v5482_v57 = vpop.f32.mrb[65].mxu1 }
 0x977   :  { %v5491_v31 = vcombine.low %v5439_v55, %v5441_v35  ;;  %v5492_v3 = vcombine.low %v5480_v60, %v5482_v57  ;;  %v5443_v4 = vpop.f32.mrb[66].mxu0  ;;  %v5484_v10 = vpop.f32.mrb[66].mxu1 }
 0x978   :  { %v5444_v21 = vpop.f32.mrb[67].mxu0  ;;  %v5485_v24 = vpop.f32.mrb[67].mxu1  ;;  %v7154_v10 = vld [vmem:[%s10561_s1 + $0x18] sm:$0xff] }
 0x979   :  { %v5495_v12 = vadd.f32 %v7115_v62, %v5491_v31  ;;  %v5496_v51 = vadd.f32 %v7116_v13, %v5492_v3 }
 0x97b   :  { %v7149_v49 = vmul.f32 -1.442695, %v5495_v12  ;;  %v5504_v50 = vrot.slane %v5495_v12, 4  ;;  %v5514_v52 = vrot.slane %v5496_v51, 4 }
 0x97d   :  { %8002 = vpow2.f32 %v7149_v49  ;;  %v7150_v47 = vmul.f32 -1.442695, %v5504_v50  ;;  %v7151_v17 = vmul.f32 -1.442695, %v5514_v52 }
 0x97f   :  { %8004 = vpow2.f32 %v7150_v47 }
 0x980   :  { %8006 = vtanh.f32 %v5496_v51 }
 0x981   :  { %8008 = vpow2.f32 %v7151_v17 }
 0x987   :  { %v8003_v20 = vpop.eup %8002 }
 0x988   :  { %v5500_v53 = vadd.f32 1.0, %v8003_v20 }
 0x989   :  { %v8005_v2 = vpop.eup %8004 }
 0x98a   :  { %8010 = vrcp.f32 %v5500_v53  ;;  %v5509_v11 = vadd.f32 1.0, %v8005_v2  ;;  %v8007_v15 = vpop.eup %8006 }
 0x98b   :  { %v8009_v16 = vpop.eup %8008 }
 0x98c   :  { %8012 = vrcp.f32 %v5509_v11  ;;  %v5519_v33 = vadd.f32 1.0, %v8009_v16 }
 0x98e   :  { %8014 = vrcp.f32 %v5519_v33  ;;  %v5846_v33 = vld [vmem:[#allocation3 + $0x4] sm:$0xf] }
 0x994   :  { %v8011_v19 = vpop.eup %8010 }
 0x995   :  { %v5524_v22 = vmul.f32 %v8011_v19, %v8007_v15  ;;  %v5763_v23 = vpop.f32.mrb[68].mxu0  ;;  %v5804_v25 = vpop.f32.mrb[68].mxu1 }
 0x996   :  { %v8013_v26 = vpop.eup %8012  ;;  %v5765_v38 = vpop.f32.mrb[69].mxu0 }
 0x997   :  { %v5806_v45 = vpop.f32.mrb[69].mxu1  ;;  %v5523_v29 = vmul.f32 %v8013_v26, %v5522_v59  ;;  %v5815_v55 = vcombine.low %v5763_v23, %v5765_v38  ;;  %v5767_v62 = vpop.f32.mrb[70].mxu0 }
 0x998   :  { %v5816_v60 = vcombine.low %v5804_v25, %v5806_v45  ;;  %v5808_v35 = vpop.f32.mrb[70].mxu1  ;;  %v5768_v57 = vpop.f32.mrb[71].mxu0 }
 0x999   :  { %v5809_v31 = vpop.f32.mrb[71].mxu1  ;;  %v5525_v3 = vadd.f32 %v5524_v22, %v5523_v29  ;;  %v5819_v4 = vadd.f32 %v7153_v63, %v5815_v55  ;;  %v8015_v50 = vpop.eup %8014 }
 0x99a   :  { %v5820_v13 = vadd.f32 %v7154_v10, %v5816_v60 }
 0x99b   :  { %8016 = vtanh.f32 %v5525_v3  ;;  %5528 = vst [vmem:[#allocation3] sm:$0xf] %v5525_v3  ;;  %v7187_v21 = vmul.f32 -1.442695, %v5819_v4  ;;  %v5828_v24 = vrot.slane %v5819_v4, 4 }
 0x99c   :  { %v5838_v49 = vrot.slane %v5820_v13, 4 }
 0x99d   :  { %8018 = vpow2.f32 %v7187_v21  ;;  %v7188_v12 = vmul.f32 -1.442695, %v5828_v24  ;;  %v6180_v21 = vld [vmem:[%s10561_s1] sm:$0xff] }
 0x99e   :  { %v7189_v51 = vmul.f32 -1.442695, %v5838_v49 }
 0x99f   :  { %8020 = vpow2.f32 %v7188_v12 }
 0x9a0   :  { %8022 = vtanh.f32 %v5820_v13 }
 0x9a1   :  { %8024 = vpow2.f32 %v7189_v51 }
 0x9a2   :  { %v6170_v10 = vld [vmem:[#allocation3] sm:$0xf] }
 0x9a5   :  { %v8017_v47 = vpop.eup %8016 }
 0x9a6   :  { %v5527_v52 = vmul.f32 %v8017_v47, %v8015_v50 }
 0x9a7   :  { %v8019_v17 = vpop.eup %8018 }
 0x9a8   :  { %7152 = vst [vmem:[%s10562_s4 + $0x20] sm:$0xf] %v5527_v52  ;;  %5529 = vst [vmem:[#allocation2] sm:$0xf] %v5527_v52  ;;  %v5824_v20 = vadd.f32 1.0, %v8019_v17 }
 0x9a9   :  { %v8021_v53 = vpop.eup %8020 }
 0x9aa   :  { %8026 = vrcp.f32 %v5824_v20  ;;  %v5833_v2 = vadd.f32 1.0, %v8021_v53  ;;  %v8023_v16 = vpop.eup %8022 }
 0x9ab   :  { %v8025_v19 = vpop.eup %8024 }
 0x9ac   :  { %8028 = vrcp.f32 %v5833_v2  ;;  %v5843_v26 = vadd.f32 1.0, %v8025_v19  ;;  %v6181_v2 = vld [vmem:[%s10561_s1 + $0x8] sm:$0xff] }
 0x9ae   :  { %8030 = vrcp.f32 %v5843_v26 }
 0x9af   :  { %v5859_v11 = vld [vmem:[#allocation2] sm:$0xf] }
 0x9b0   :  { %v5860_v15 = vpack.c.bf16 %v5859_v11, %v5859_v11 }
 0x9b2   :  { %6086 = vmatmul.mubr.bf16.vlgmr.msra.gmra.mrb[72].mxu0 %v5860_v15  ;;  %6127 = vmatmul.mubr.bf16.vlgmr.msra.gmra.mrb[72].mxu1 %v5860_v15 }
 0x9b3   :  { %6377 = vmatpush1.bf16.msra.mxu0 %v10272_v5  ;;  %6418 = vmatpush1.bf16.msra.mxu1 %v10277_v6 }
 0x9b4   :  { %v8027_v22 = vpop.eup %8026  ;;  %6378 = vmatprep.subr.bf16.mxu0 %v10282_v7  ;;  %6419 = vmatprep.subr.bf16.mxu1 %v10287_v8  ;;  %v10609_v8 = vld [vmem:[#allocation4_spill] sm:$0xff] }
 0x9b5   :  { %v5848_v23 = vmul.f32 %v8027_v22, %v8023_v16  ;;  %6408 = vmatprep.mubr.bf16.mxu0 %v10584_v61  ;;  %6449 = vmatprep.mubr.bf16.mxu1 %v10584_v61 }
 0x9b6   :  { %v8029_v25 = vpop.eup %8028 }
 0x9b7   :  { %v5847_v59 = vmul.f32 %v8029_v25, %v5846_v33  ;;  %6379 = vmatpush1.bf16.msra.mxu0 %v10294_v9  ;;  %6420 = vmatpush1.bf16.msra.mxu1 %v10299_v18  ;;  %v10610_v9 = vld [vmem:[#allocation5_spill] sm:$0xff]  ;;  %v10611_v18 = vld [vmem:[#allocation6_spill] sm:$0xff] }
 0x9b8   :  { %6380 = vmatprep.subr.bf16.mxu0 %v10306_v36  ;;  %6421 = vmatprep.subr.bf16.mxu1 %v10311_v37  ;;  %v8031_v61 = vpop.eup %8030 }
 0x9b9   :  { %v5849_v5 = vadd.f32 %v5848_v23, %v5847_v59 }
 0x9bb   :  { %8032 = vtanh.f32 %v5849_v5  ;;  %5852 = vst [vmem:[#allocation3 + $0x4] sm:$0xf] %v5849_v5  ;;  %6381 = vmatpush1.bf16.msra.mxu0 %v10320_v46  ;;  %6422 = vmatpush1.bf16.msra.mxu1 %v10325_v14 }
 0x9bc   :  { %6382 = vmatprep.subr.bf16.mxu0 %v10332_v27  ;;  %6423 = vmatprep.subr.bf16.mxu1 %v10337_v28  ;;  %v7191_v27 = vld [vmem:[%s10560_s0 + $0x90] sm:$0xff] }
 0x9bf   :  { %6383 = vmatpush1.bf16.msra.mxu0 %v10344_v30  ;;  %6424 = vmatpush1.bf16.msra.mxu1 %v10349_v32 }
 0x9c0   :  { %6384 = vmatprep.subr.bf16.mxu0 %v10356_v40  ;;  %6425 = vmatprep.subr.bf16.mxu1 %v10361_v1 }
 0x9c3   :  { %6385 = vmatpush1.bf16.msra.mxu0 %v10368_v48  ;;  %6426 = vmatpush1.bf16.msra.mxu1 %v10373_v54 }
 0x9c4   :  { %6386 = vmatprep.subr.bf16.mxu0 %v10380_v39  ;;  %6427 = vmatprep.subr.bf16.mxu1 %v10385_v0 }
 0x9c5   :  { %v8033_v6 = vpop.eup %8032 }
 0x9c6   :  { %v5851_v7 = vmul.f32 %v8033_v6, %v8031_v61 }
 0x9c7   :  { %6387 = vmatpush1.bf16.msra.mxu0 %v10392_v56  ;;  %6428 = vmatpush1.bf16.msra.mxu1 %v10397_v58  ;;  %v7192_v56 = vld [vmem:[%s10560_s0 + $0x98] sm:$0xff] }
 0x9c8   :  { %7190 = vst [vmem:[%s10563_s5 + $0x4] sm:$0xf] %v5851_v7  ;;  %5853 = vst [vmem:[#allocation2 + $0x4] sm:$0xf] %v5851_v7  ;;  %6388 = vmatprep.subr.bf16.mxu0 %v10404_v41  ;;  %6429 = vmatprep.subr.bf16.mxu1 %v10609_v8 }
 0x9cb   :  { %6389 = vmatpush1.bf16.msra.mxu0 %v10610_v9  ;;  %6430 = vmatpush1.bf16.msra.mxu1 %v10611_v18 }
 0x9cc   :  { %6390 = vmatprep.subr.bf16.mxu0 %v10431_v34  ;;  %6431 = vmatprep.subr.bf16.mxu1 %v10436_v43 }
 0x9cf   :  { %6391 = vmatpush1.bf16.msra.mxu0 %v10443_v44  ;;  %6432 = vmatpush1.bf16.msra.mxu1 %v10448_v42  ;;  %v6182_v36 = vld [vmem:[#allocation2 + $0x4] sm:$0xf] }
 0x9d0   :  { %v6183_v37 = vpack.c.bf16 %v6182_v36, %v6182_v36 }
 0x9d2   :  { %6409 = vmatmul.mubr.bf16.vlgmr.msra.gmra.mrb[76].mxu0 %v6183_v37  ;;  %6450 = vmatmul.mubr.bf16.vlgmr.msra.gmra.mrb[76].mxu1 %v6183_v37 }
 0xa85   :  { %v6087_v46 = vpop.f32.mrb[72].mxu0  ;;  %v6128_v14 = vpop.f32.mrb[72].mxu1 }
 0xa86   :  { %v6089_v28 = vpop.f32.mrb[73].mxu0  ;;  %v6130_v30 = vpop.f32.mrb[73].mxu1 }
 0xa87   :  { %v6139_v32 = vcombine.low %v6087_v46, %v6089_v28  ;;  %v6140_v40 = vcombine.low %v6128_v14, %v6130_v30  ;;  %v6091_v1 = vpop.f32.mrb[74].mxu0  ;;  %v6132_v48 = vpop.f32.mrb[74].mxu1  ;;  %v6493_v46 = vld [vmem:[#allocation3 + $0x4] sm:$0xf] }
 0xa88   :  { %v6092_v54 = vpop.f32.mrb[75].mxu0  ;;  %v6133_v39 = vpop.f32.mrb[75].mxu1 }
 0xa89   :  { %v6143_v0 = vadd.f32 %v7191_v27, %v6139_v32  ;;  %v6144_v34 = vadd.f32 %v7192_v56, %v6140_v40 }
 0xa8b   :  { %v7225_v58 = vmul.f32 -1.442695, %v6143_v0  ;;  %v6152_v41 = vrot.slane %v6143_v0, 4  ;;  %v6162_v43 = vrot.slane %v6144_v34, 4 }
 0xa8d   :  { %8034 = vpow2.f32 %v7225_v58  ;;  %v7226_v42 = vmul.f32 -1.442695, %v6152_v41  ;;  %v7227_v44 = vmul.f32 -1.442695, %v6162_v43 }
 0xa8f   :  { %8036 = vpow2.f32 %v7226_v42 }
 0xa90   :  { %8038 = vtanh.f32 %v6144_v34 }
 0xa91   :  { %8040 = vpow2.f32 %v7227_v44 }
 0xa97   :  { %v8035_v63 = vpop.eup %8034 }
 0xa98   :  { %v6148_v38 = vadd.f32 1.0, %v8035_v63 }
 0xa99   :  { %v8037_v45 = vpop.eup %8036 }
 0xa9a   :  { %8042 = vrcp.f32 %v6148_v38  ;;  %v6157_v29 = vadd.f32 1.0, %v8037_v45  ;;  %v8039_v55 = vpop.eup %8038 }
 0xa9b   :  { %v8041_v60 = vpop.eup %8040 }
 0xa9c   :  { %8044 = vrcp.f32 %v6157_v29  ;;  %v6167_v4 = vadd.f32 1.0, %v8041_v60 }
 0xa9e   :  { %8046 = vrcp.f32 %v6167_v4 }
 0xaa4   :  { %v8043_v62 = vpop.eup %8042 }
 0xaa5   :  { %v6172_v35 = vmul.f32 %v8043_v62, %v8039_v55  ;;  %v6410_v57 = vpop.f32.mrb[76].mxu0  ;;  %v6451_v31 = vpop.f32.mrb[76].mxu1 }
 0xaa6   :  { %v8045_v3 = vpop.eup %8044  ;;  %v6412_v24 = vpop.f32.mrb[77].mxu0 }
 0xaa7   :  { %v6453_v12 = vpop.f32.mrb[77].mxu1  ;;  %v6171_v13 = vmul.f32 %v8045_v3, %v6170_v10  ;;  %v6462_v49 = vcombine.low %v6410_v57, %v6412_v24  ;;  %v6414_v47 = vpop.f32.mrb[78].mxu0 }
 0xaa8   :  { %v6463_v50 = vcombine.low %v6451_v31, %v6453_v12  ;;  %v6455_v51 = vpop.f32.mrb[78].mxu1  ;;  %v6415_v52 = vpop.f32.mrb[79].mxu0 }
 0xaa9   :  { %v6456_v17 = vpop.f32.mrb[79].mxu1  ;;  %v6173_v20 = vadd.f32 %v6172_v35, %v6171_v13  ;;  %v6466_v53 = vadd.f32 %v6462_v49, %v6180_v21  ;;  %v8047_v23 = vpop.eup %8046 }
 0xaaa   :  { %v6467_v19 = vadd.f32 %v6463_v50, %v6181_v2 }
 0xaab   :  { %8048 = vtanh.f32 %v6173_v20  ;;  %6176 = vst [vmem:[#allocation3] sm:$0xf] %v6173_v20  ;;  %v7261_v11 = vmul.f32 -1.442695, %v6466_v53  ;;  %v6475_v15 = vrot.slane %v6466_v53, 4 }
 0xaac   :  { %v6485_v22 = vrot.slane %v6467_v19, 4 }
 0xaad   :  { %8050 = vpow2.f32 %v7261_v11  ;;  %v7262_v16 = vmul.f32 -1.442695, %v6475_v15 }
 0xaae   :  { %v7263_v26 = vmul.f32 -1.442695, %v6485_v22 }
 0xaaf   :  { %8052 = vpow2.f32 %v7262_v16 }
 0xab0   :  { %8054 = vtanh.f32 %v6467_v19 }
 0xab1   :  { %8056 = vpow2.f32 %v7263_v26 }
 0xab5   :  { %v8049_v25 = vpop.eup %8048 }
 0xab6   :  { %v6175_v33 = vmul.f32 %v8049_v25, %v8047_v23 }
 0xab7   :  { %v8051_v59 = vpop.eup %8050 }
 0xab8   :  { %6177 = vst [vmem:[#allocation2] sm:$0xf] %v6175_v33  ;;  %7228 = vst [vmem:[%s10562_s4 + $0x24] sm:$0xf] %v6175_v33  ;;  %v6471_v5 = vadd.f32 1.0, %v8051_v59 }
 0xab9   :  { %v8053_v61 = vpop.eup %8052 }
 0xaba   :  { %8058 = vrcp.f32 %v6471_v5  ;;  %v6480_v6 = vadd.f32 1.0, %v8053_v61  ;;  %v8055_v7 = vpop.eup %8054 }
 0xabb   :  { %v8057_v8 = vpop.eup %8056 }
 0xabc   :  { %8060 = vrcp.f32 %v6480_v6  ;;  %v6490_v37 = vadd.f32 1.0, %v8057_v8 }
 0xabe   :  { %8062 = vrcp.f32 %v6490_v37 }
 0xac4   :  { %v8059_v9 = vpop.eup %8058 }
 0xac5   :  { %v6495_v18 = vmul.f32 %v8059_v9, %v8055_v7 }
 0xac6   :  { %v8061_v36 = vpop.eup %8060 }
 0xac7   :  { %v6494_v14 = vmul.f32 %v8061_v36, %v6493_v46 }
 0xac8   :  { %v8063_v28 = vpop.eup %8062 }
 0xac9   :  { %v6496_v27 = vadd.f32 %v6495_v18, %v6494_v14 }
 0xacb   :  { %8064 = vtanh.f32 %v6496_v27  ;;  %6499 = vst [vmem:[#allocation3 + $0x4] sm:$0xf] %v6496_v27 }
 0xad5   :  { %v8065_v30 = vpop.eup %8064 }
 0xad6   :  { %v6498_v32 = vmul.f32 %v8065_v30, %v8063_v28 }
 0xad8   :  { %6500 = vst [vmem:[#allocation2 + $0x4] sm:$0xf] %v6498_v32  ;;  %6501 = vst [vmem:[%s10563_s5] sm:$0xf] %v6498_v32 }

</bundles_post_ra>
